<compile_context>
chip_gen: v6e
topology: v6e:2x2x1
jax: 0.10.0
libtpu: 0.0.40
codegen_flags: <defaults>
</compile_context>

<pallas_src>
import functools
import math

import jax
import jax.numpy as jnp
from jax.experimental import pallas as pl
from jax.experimental.pallas import tpu as pltpu


def _relational_memory_kernel(
    # ---- inputs -------------------------------------------------------------
    x_ref,        # (U, TB, Din_pad)  input slice for this (batch tile, time block)
    mem0_ref,     # (TB, D_pad)       initial memory for this batch tile
    p1w_ref, p1b_ref,                 # proj1
    wq_ref, bq_ref,                   # attention query linear
    wkv_ref,                          # [wk | wv]  (D_pad, 2*D_pad), biases cancel
    wv_ref, bv_ref,                   # attention value linear (for the input slot)
    wo_ref, bo_ref,                   # attention output linear
    m1w_ref, m1b_ref,                 # mlp linear 1
    m2w_ref, m2b_ref,                 # mlp linear 2
    wu_ref, gb_ref,                   # fused [[Wi,Wf],[Ui,Uf]] and (W_b + U_b)
    hmask_s_ref,                      # (D_pad, H) column->head one-hot * 1/sqrt(d_k)
    hmask_t_ref,                      # (H, D_pad)
    # ---- outputs ------------------------------------------------------------
    out_ref,      # (U, TB, D_pad)
    # ---- scratch ------------------------------------------------------------
    mem_scratch,  # (TB, D_pad) f32, persists across the time axis
    *, n_steps, d_pad,
):
    f32 = jnp.float32

    @pl.when(pl.program_id(1) == 0)
    def _():
        mem_scratch[...] = mem0_ref[...].astype(f32)

    # Weights stay in their storage dtype (bf16 by default); load once per
    # grid step, outside the unrolled time loop.
    p1w = p1w_ref[...]
    wq = wq_ref[...]
    wkv = wkv_ref[...]
    wv = wv_ref[...]
    wo = wo_ref[...]
    m1w = m1w_ref[...]
    m2w = m2w_ref[...]
    wu = wu_ref[...]
    hmask_s = hmask_s_ref[...]
    hmask_t = hmask_t_ref[...]
    p1b = p1b_ref[...].astype(f32)
    bq = bq_ref[...].astype(f32)
    bv = bv_ref[...].astype(f32)
    bo = bo_ref[...].astype(f32)
    m1b = m1b_ref[...].astype(f32)
    m2b = m2b_ref[...].astype(f32)
    gb = gb_ref[...].astype(f32)

    wdt = p1w.dtype

    def mm(a, b):
        # MXU matmul: LHS cast to the weight dtype, accumulate in f32.
        return jnp.dot(a.astype(wdt), b, preferred_element_type=f32)

    def sigmoid(x):
        # tanh form: routed to the EUP, no f32 divide on the VALU.
        return 0.5 * (jnp.tanh(0.5 * x) + 1.0)

    def step(u, mem):
        x = x_ref[u].astype(f32)                         # (TB, Din_pad)

        # ---- proj1 ----------------------------------------------------------
        inp = mm(x, p1w) + p1b                           # (TB, D_pad)

        # ---- attention: q = memory, k/v over {memory, input} slots ----------
        # Bias cancellation: k_mem - k_in = (mem - inp) @ wk  (same for v).
        q = mm(mem, wq) + bq
        kvd = mm(mem - inp, wkv)                         # (TB, 2*D_pad)
        kd = kvd[:, :d_pad]
        vd = kvd[:, d_pad:]
        v_in = mm(inp, wv) + bv
        # 2-way softmax over {memory, input} == sigmoid of the score diff;
        # 1/sqrt(d_k) is folded into hmask_s.
        p_mem = sigmoid(mm(q * kd, hmask_s))             # (TB, H)
        ctx = v_in + mm(p_mem, hmask_t) * vd             # p*v_mem + (1-p)*v_in
        nm = mem + mm(ctx, wo) + bo

        # ---- residual MLP ----------------------------------------------------
        h = jnp.maximum(mm(nm, m1w) + m1b, 0.0)
        h = jnp.maximum(mm(h, m2w) + m2b, 0.0)
        nm = nm + h

        # ---- fused W/U gating ------------------------------------------------
        gin = jnp.concatenate([inp, jnp.tanh(mem)], axis=-1)   # (TB, 2*D_pad)
        gates = mm(gin, wu) + gb                                # (TB, 2*D_pad)
        nxt = (sigmoid(gates[:, :d_pad]) * jnp.tanh(nm)
               + sigmoid(gates[:, d_pad:]) * mem)

        out_ref[u] = nxt.astype(out_ref.dtype)
        return nxt

    mem = mem_scratch[...]
    mem = jax.lax.fori_loop(0, n_steps, step, mem, unroll=True)
    mem_scratch[...] = mem


def relational_memory_forward(inputs, memory0, params, *, num_heads,
                              batch_tile=None, time_block=None,
                              compute_dtype=jnp.bfloat16, interpret=False):
    """inputs: (B, T, input_dim), memory0: (B, d_model) -> (B, T, d_model)."""
    B, T, Din = inputs.shape
    D = memory0.shape[-1]
    assert D % num_heads == 0
    d_k = D // num_heads
    scale = 1.0 / math.sqrt(d_k)
    out_dtype = inputs.dtype
    f32 = jnp.float32
    cdt = compute_dtype

    def rup(a, m):
        return (a + m - 1) // m * m

    # ---- lane padding: D / Din to multiples of 128 (dense stores + full MXU)
    Dp = rup(D, 128)
    Dinp = rup(Din, 128)

    # ---- batch tiling: pad to a multiple of 8; aim for >= 2 tiles so the
    # "parallel" batch axis can shard across v7x's two TensorCores.
    B8 = rup(B, 8)
    if batch_tile is None:
        batch_tile = min(256, rup(-(-B8 // 2), 8)) if B8 >= 16 else B8
    batch_tile = max(8, rup(min(batch_tile, B8), 8))
    B_pad = rup(B8, batch_tile)
    n_btiles = B_pad // batch_tile

    # ---- time blocking: U consecutive steps per grid step, unrolled in-kernel.
    if time_block is None:
        U = 1
        for cand in range(2, min(T, 8) + 1):
            if T % cand == 0:
                U = cand
    else:
        U = max(1, min(time_block, T))
    T_pad = rup(T, U)
    n_tblocks = T_pad // U

    # ---- (T, B, Din) layout so each per-step tile is a dense (batch, feature)
    # sublane x lane slab.  (Consumers that accept time-major output could skip
    # the inverse transpose below.)
    x_t = jnp.transpose(inputs, (1, 0, 2))
    x_t = jnp.pad(x_t, ((0, T_pad - T), (0, B_pad - B), (0, Dinp - Din)))
    mem0 = jnp.pad(memory0, ((0, B_pad - B), (0, Dp - D))).astype(f32)

    # ---- weight prep: zero-pad, cast to compute dtype, fuse ------------------
    def pad_w(w, r, c):
        return jnp.pad(w, ((0, r - w.shape[0]), (0, c - w.shape[1]))).astype(cdt)

    def pad_b(b, c):
        return jnp.pad(b, (0, c - b.shape[0])).reshape(1, -1).astype(f32)

    p1w = pad_w(params["p1w"], Dinp, Dp)
    wq = pad_w(params["wq"], Dp, Dp)
    wk = pad_w(params["wk"], Dp, Dp)
    wv = pad_w(params["wv"], Dp, Dp)
    wkv = jnp.concatenate([wk, wv], axis=1)                     # (Dp, 2Dp)
    wo = pad_w(params["wo"], Dp, Dp)
    m1w = pad_w(params["m1w"], Dp, Dp)
    m2w = pad_w(params["m2w"], Dp, Dp)

    W_w, W_b = params["W_w"], params["W_b"]
    U_w, U_b = params["U_w"], params["U_b"]
    wi, wf = pad_w(W_w[:, :D], Dp, Dp), pad_w(W_w[:, D:], Dp, Dp)
    ui, uf = pad_w(U_w[:, :D], Dp, Dp), pad_w(U_w[:, D:], Dp, Dp)
    wu = jnp.concatenate([jnp.concatenate([wi, wf], axis=1),
                          jnp.concatenate([ui, uf], axis=1)], axis=0)  # (2Dp, 2Dp)
    gb = jnp.concatenate([pad_b(W_b[:D] + U_b[:D], Dp),
                          pad_b(W_b[D:] + U_b[D:], Dp)], axis=1)       # (1, 2Dp)

    p1b = pad_b(params["p1b"], Dp)
    bq = pad_b(params["bq"], Dp)
    bv = pad_b(params["bv"], Dp)
    bo = pad_b(params["bo"], Dp)
    m1b = pad_b(params["m1b"], Dp)
    m2b = pad_b(params["m2b"], Dp)

    # Head bookkeeping: column -> head one-hot with the 1/sqrt(d_k) scale
    # folded in, so per-head reductions/broadcasts are lane-dense matmuls.
    col_head = jnp.arange(D, dtype=jnp.int32) // d_k
    hmask = (col_head[:, None] == jnp.arange(num_heads, dtype=jnp.int32)[None, :]
             ).astype(f32)
    hmask_s = jnp.pad(hmask * scale, ((0, Dp - D), (0, 0))).astype(cdt)   # (Dp, H)
    hmask_t = jnp.pad(hmask.T, ((0, 0), (0, Dp - D))).astype(cdt)         # (H, Dp)

    operands = [
        x_t, mem0,
        p1w, p1b, wq, bq, wkv, wv, bv, wo, bo,
        m1w, m1b, m2w, m2b, wu, gb, hmask_s, hmask_t,
    ]

    def resident(a):  # all resident operands are 2-D, DMA'd once per call
        return pl.BlockSpec(a.shape, lambda b, t: (0, 0))

    in_specs = [
        pl.BlockSpec((U, batch_tile, Dinp), lambda b, t: (t, b, 0)),  # x block
        pl.BlockSpec((batch_tile, Dp), lambda b, t: (b, 0)),          # initial memory
    ] + [resident(a) for a in operands[2:]]

    out_spec = pl.BlockSpec((U, batch_tile, Dp), lambda b, t: (t, b, 0))

    # ---- VMEM budget: resident weights + double-buffered IO blocks + scratch.
    resident_bytes = sum(int(a.size) * a.dtype.itemsize for a in operands[2:])
    io_bytes = 2 * (U * batch_tile * Dinp * x_t.dtype.itemsize
                    + batch_tile * Dp * mem0.dtype.itemsize
                    + U * batch_tile * Dp * jnp.dtype(out_dtype).itemsize)
    scratch_bytes = batch_tile * Dp * 4
    vmem_limit = resident_bytes + io_bytes + scratch_bytes + 8 * 1024 * 1024
    vmem_limit = max(16 * 1024 * 1024, min(64 * 1024 * 1024, vmem_limit))

    kernel = functools.partial(_relational_memory_kernel, n_steps=U, d_pad=Dp)

    out_t = pl.pallas_call(
        kernel,
        out_shape=jax.ShapeDtypeStruct((T_pad, B_pad, Dp), out_dtype),
        grid_spec=pltpu.PrefetchScalarGridSpec(
            num_scalar_prefetch=0,
            grid=(n_btiles, n_tblocks),          # time axis last = innermost
            in_specs=in_specs,
            out_specs=out_spec,
            scratch_shapes=[pltpu.VMEM((batch_tile, Dp), jnp.float32)],
        ),
        compiler_params=pltpu.CompilerParams(
            dimension_semantics=("parallel", "arbitrary"),
            vmem_limit_bytes=int(vmem_limit),
        ),
        interpret=interpret,
    )(*operands)

    return jnp.transpose(out_t, (1, 0, 2))[:B, :T, :D]


def relational_memory_reference(inputs, memory0, params, *, num_heads):
    """Pure-JAX reference matching the PyTorch RelationalMemory.forward (eval)."""
    P = jax.lax.Precision.HIGHEST
    B, T, _ = inputs.shape
    D = memory0.shape[-1]
    d_k = D // num_heads

    def linear(x, w, b):
        return jnp.dot(x, w, precision=P) + b

    mem = memory0
    outs = []
    for t in range(T):
        x = inputs[:, t, :]
        inp = linear(x, params["p1w"], params["p1b"])                      # (B, D)
        q = linear(mem, params["wq"], params["bq"]).reshape(B, num_heads, d_k)
        k = jnp.stack([linear(mem, params["wk"], params["bk"]),
                       linear(inp, params["wk"], params["bk"])], axis=1)   # (B, 2, D)
        v = jnp.stack([linear(mem, params["wv"], params["bv"]),
                       linear(inp, params["wv"], params["bv"])], axis=1)
        kh = k.reshape(B, 2, num_heads, d_k).transpose(0, 2, 1, 3)         # (B, H, 2, dk)
        vh = v.reshape(B, 2, num_heads, d_k).transpose(0, 2, 1, 3)
        scores = jnp.einsum("bhd,bhnd->bhn", q, kh, precision=P) / math.sqrt(d_k)
        p = jax.nn.softmax(scores, axis=-1)                                # (B, H, 2)
        ctx = jnp.einsum("bhn,bhnd->bhd", p, vh, precision=P).reshape(B, D)
        attn_out = linear(ctx, params["wo"], params["bo"])
        nm = mem + attn_out
        h1 = jax.nn.relu(linear(nm, params["m1w"], params["m1b"]))
        h2 = jax.nn.relu(linear(h1, params["m2w"], params["m2b"]))
        nm = nm + h2
        gates = (linear(inp, params["W_w"], params["W_b"])
                 + linear(jnp.tanh(mem), params["U_w"], params["U_b"]))
        ig = jax.nn.sigmoid(gates[:, :D])
        fg = jax.nn.sigmoid(gates[:, D:])
        mem = ig * jnp.tanh(nm) + fg * mem
        outs.append(mem)
    return jnp.stack(outs, axis=1)


if __name__ == "__main__":
    B, T, Din, D, H = 2, 8, 48, 32, 4

    key = jax.random.PRNGKey(0)
    keys = jax.random.split(key, 20)

    def w(k, shape, s=0.1):
        return jax.random.normal(k, shape, dtype=jnp.float32) * s

    params = dict(
        p1w=w(keys[0], (Din, D)), p1b=w(keys[1], (D,)),
        wq=w(keys[2], (D, D)),    bq=w(keys[3], (D,)),
        wk=w(keys[4], (D, D)),    bk=w(keys[5], (D,)),
        wv=w(keys[6], (D, D)),    bv=w(keys[7], (D,)),
        wo=w(keys[8], (D, D)),    bo=w(keys[9], (D,)),
        m1w=w(keys[10], (D, D)),  m1b=w(keys[11], (D,)),
        m2w=w(keys[12], (D, D)),  m2b=w(keys[13], (D,)),
        W_w=w(keys[14], (D, 2 * D)), W_b=w(keys[15], (2 * D,)),
        U_w=w(keys[16], (D, 2 * D)), U_b=w(keys[17], (2 * D,)),
    )
    inputs = jax.random.normal(keys[18], (B, T, Din), dtype=jnp.float32)
    memory0 = jax.random.normal(keys[19], (B, D), dtype=jnp.float32) * 0.5

    ref = relational_memory_reference(inputs, memory0, params, num_heads=H)

    # f32 compute path: tight validation of the fused/padded algebra.
    out_f32 = relational_memory_forward(inputs, memory0, params, num_heads=H,
                                        compute_dtype=jnp.float32)
    out_f32 = jax.block_until_ready(out_f32)
    assert out_f32.shape == (B, T, D), f"bad output shape {out_f32.shape}"
    diff_f32 = float(jnp.max(jnp.abs(out_f32 - ref)))
    assert jnp.allclose(out_f32, ref, atol=2e-3, rtol=2e-3), (
        f"f32 mismatch vs reference, max abs diff = {diff_f32}")

    # bf16 weight path (default, MXU fast path): loose validation.
    out_bf16 = relational_memory_forward(inputs, memory0, params, num_heads=H)
    out_bf16 = jax.block_until_ready(out_bf16)
    diff_bf16 = float(jnp.max(jnp.abs(out_bf16 - ref)))
    assert jnp.allclose(out_bf16, ref, atol=1e-1, rtol=1e-1), (
        f"bf16 mismatch vs reference, max abs diff = {diff_bf16}")

    print("KERNEL_OK")
</pallas_src>

<mosaic_0001>
module attributes {stable_mosaic.version = 11 : i64} {
  func.func @_relational_memory_kernel(%arg0: i32, %arg1: i32, %arg2: memref<8x8x128xf32, #tpu.memory_space<vmem>>, %arg3: memref<8x128xf32, #tpu.memory_space<vmem>>, %arg4: memref<128x128xf32, #tpu.memory_space<vmem>>, %arg5: memref<1x128xf32, #tpu.memory_space<vmem>>, %arg6: memref<128x128xf32, #tpu.memory_space<vmem>>, %arg7: memref<1x128xf32, #tpu.memory_space<vmem>>, %arg8: memref<128x256xf32, #tpu.memory_space<vmem>>, %arg9: memref<128x128xf32, #tpu.memory_space<vmem>>, %arg10: memref<1x128xf32, #tpu.memory_space<vmem>>, %arg11: memref<128x128xf32, #tpu.memory_space<vmem>>, %arg12: memref<1x128xf32, #tpu.memory_space<vmem>>, %arg13: memref<128x128xf32, #tpu.memory_space<vmem>>, %arg14: memref<1x128xf32, #tpu.memory_space<vmem>>, %arg15: memref<128x128xf32, #tpu.memory_space<vmem>>, %arg16: memref<1x128xf32, #tpu.memory_space<vmem>>, %arg17: memref<256x256xf32, #tpu.memory_space<vmem>>, %arg18: memref<1x256xf32, #tpu.memory_space<vmem>>, %arg19: memref<128x4xf32, #tpu.memory_space<vmem>>, %arg20: memref<4x128xf32, #tpu.memory_space<vmem>>, %arg21: memref<8x8x128xf32, #tpu.memory_space<vmem>>, %arg22: memref<8x128xf32, #tpu.memory_space<vmem>>) attributes {dimension_semantics = [#tpu.dimension_semantics<parallel>, #tpu.dimension_semantics<arbitrary>], iteration_bounds = array<i64: 1, 1>, scalar_prefetch = 0 : i64, scratch_operands = 1 : i64, tpu.core_type = #tpu.core_type<tc>, window_params = [{transform_indices = @transform_0, window_bounds = array<i64: 8, 8, 128>}, {transform_indices = @transform_1, window_bounds = array<i64: 8, 128>}, {pipeline_mode = #tpu.pipeline_mode<synchronous>, transform_indices = @transform_2, window_bounds = array<i64: 128, 128>}, {pipeline_mode = #tpu.pipeline_mode<synchronous>, transform_indices = @transform_3, window_bounds = array<i64: 1, 128>}, {pipeline_mode = #tpu.pipeline_mode<synchronous>, transform_indices = @transform_4, window_bounds = array<i64: 128, 128>}, {pipeline_mode = #tpu.pipeline_mode<synchronous>, transform_indices = @transform_5, window_bounds = array<i64: 1, 128>}, {pipeline_mode = #tpu.pipeline_mode<synchronous>, transform_indices = @transform_6, window_bounds = array<i64: 128, 256>}, {pipeline_mode = #tpu.pipeline_mode<synchronous>, transform_indices = @transform_7, window_bounds = array<i64: 128, 128>}, {pipeline_mode = #tpu.pipeline_mode<synchronous>, transform_indices = @transform_8, window_bounds = array<i64: 1, 128>}, {pipeline_mode = #tpu.pipeline_mode<synchronous>, transform_indices = @transform_9, window_bounds = array<i64: 128, 128>}, {pipeline_mode = #tpu.pipeline_mode<synchronous>, transform_indices = @transform_10, window_bounds = array<i64: 1, 128>}, {pipeline_mode = #tpu.pipeline_mode<synchronous>, transform_indices = @transform_11, window_bounds = array<i64: 128, 128>}, {pipeline_mode = #tpu.pipeline_mode<synchronous>, transform_indices = @transform_12, window_bounds = array<i64: 1, 128>}, {pipeline_mode = #tpu.pipeline_mode<synchronous>, transform_indices = @transform_13, window_bounds = array<i64: 128, 128>}, {pipeline_mode = #tpu.pipeline_mode<synchronous>, transform_indices = @transform_14, window_bounds = array<i64: 1, 128>}, {pipeline_mode = #tpu.pipeline_mode<synchronous>, transform_indices = @transform_15, window_bounds = array<i64: 256, 256>}, {pipeline_mode = #tpu.pipeline_mode<synchronous>, transform_indices = @transform_16, window_bounds = array<i64: 1, 256>}, {pipeline_mode = #tpu.pipeline_mode<synchronous>, transform_indices = @transform_17, window_bounds = array<i64: 128, 4>}, {pipeline_mode = #tpu.pipeline_mode<synchronous>, transform_indices = @transform_18, window_bounds = array<i64: 4, 128>}, {transform_indices = @transform_19, window_bounds = array<i64: 8, 8, 128>}]} {
    %c0_i32 = arith.constant 0 : i32
    %0 = arith.cmpi eq, %arg1, %c0_i32 : i32
    %1 = arith.extui %0 : i1 to i32
    %c0_i32_0 = arith.constant 0 : i32
    %2 = arith.cmpi ne, %1, %c0_i32_0 : i32
    scf.if %2 {
      %c0_238 = arith.constant 0 : index
      %c0_239 = arith.constant 0 : index
      %598 = vector.load %arg3[%c0_238, %c0_239] : memref<8x128xf32, #tpu.memory_space<vmem>>, vector<8x128xf32>
      %c0_240 = arith.constant 0 : index
      %c0_241 = arith.constant 0 : index
      %599 = vector.load %arg22[%c0_240, %c0_241] : memref<8x128xf32, #tpu.memory_space<vmem>>, vector<8x128xf32>
      tpu.vector_store %arg22[%c0_240, %c0_241], %598 {strides = array<i32>} : memref<8x128xf32, #tpu.memory_space<vmem>>, vector<8x128xf32>,
    } else {
    }
    %c0 = arith.constant 0 : index
    %c0_1 = arith.constant 0 : index
    %3 = vector.load %arg4[%c0, %c0_1] : memref<128x128xf32, #tpu.memory_space<vmem>>, vector<128x128xf32>
    %c0_2 = arith.constant 0 : index
    %c0_3 = arith.constant 0 : index
    %4 = vector.load %arg6[%c0_2, %c0_3] : memref<128x128xf32, #tpu.memory_space<vmem>>, vector<128x128xf32>
    %c0_4 = arith.constant 0 : index
    %c0_5 = arith.constant 0 : index
    %5 = vector.load %arg8[%c0_4, %c0_5] : memref<128x256xf32, #tpu.memory_space<vmem>>, vector<128x256xf32>
    %c0_6 = arith.constant 0 : index
    %c0_7 = arith.constant 0 : index
    %6 = vector.load %arg9[%c0_6, %c0_7] : memref<128x128xf32, #tpu.memory_space<vmem>>, vector<128x128xf32>
    %c0_8 = arith.constant 0 : index
    %c0_9 = arith.constant 0 : index
    %7 = vector.load %arg11[%c0_8, %c0_9] : memref<128x128xf32, #tpu.memory_space<vmem>>, vector<128x128xf32>
    %c0_10 = arith.constant 0 : index
    %c0_11 = arith.constant 0 : index
    %8 = vector.load %arg13[%c0_10, %c0_11] : memref<128x128xf32, #tpu.memory_space<vmem>>, vector<128x128xf32>
    %c0_12 = arith.constant 0 : index
    %c0_13 = arith.constant 0 : index
    %9 = vector.load %arg15[%c0_12, %c0_13] : memref<128x128xf32, #tpu.memory_space<vmem>>, vector<128x128xf32>
    %c0_14 = arith.constant 0 : index
    %c0_15 = arith.constant 0 : index
    %10 = vector.load %arg17[%c0_14, %c0_15] : memref<256x256xf32, #tpu.memory_space<vmem>>, vector<256x256xf32>
    %c0_16 = arith.constant 0 : index
    %c0_17 = arith.constant 0 : index
    %11 = vector.load %arg19[%c0_16, %c0_17] : memref<128x4xf32, #tpu.memory_space<vmem>>, vector<128x4xf32>
    %c0_18 = arith.constant 0 : index
    %c0_19 = arith.constant 0 : index
    %12 = vector.load %arg20[%c0_18, %c0_19] : memref<4x128xf32, #tpu.memory_space<vmem>>, vector<4x128xf32>
    %c0_20 = arith.constant 0 : index
    %c0_21 = arith.constant 0 : index
    %13 = vector.load %arg5[%c0_20, %c0_21] : memref<1x128xf32, #tpu.memory_space<vmem>>, vector<1x128xf32>
    %c0_22 = arith.constant 0 : index
    %c0_23 = arith.constant 0 : index
    %14 = vector.load %arg7[%c0_22, %c0_23] : memref<1x128xf32, #tpu.memory_space<vmem>>, vector<1x128xf32>
    %c0_24 = arith.constant 0 : index
    %c0_25 = arith.constant 0 : index
    %15 = vector.load %arg10[%c0_24, %c0_25] : memref<1x128xf32, #tpu.memory_space<vmem>>, vector<1x128xf32>
    %c0_26 = arith.constant 0 : index
    %c0_27 = arith.constant 0 : index
    %16 = vector.load %arg12[%c0_26, %c0_27] : memref<1x128xf32, #tpu.memory_space<vmem>>, vector<1x128xf32>
    %c0_28 = arith.constant 0 : index
    %c0_29 = arith.constant 0 : index
    %17 = vector.load %arg14[%c0_28, %c0_29] : memref<1x128xf32, #tpu.memory_space<vmem>>, vector<1x128xf32>
    %c0_30 = arith.constant 0 : index
    %c0_31 = arith.constant 0 : index
    %18 = vector.load %arg16[%c0_30, %c0_31] : memref<1x128xf32, #tpu.memory_space<vmem>>, vector<1x128xf32>
    %c0_32 = arith.constant 0 : index
    %c0_33 = arith.constant 0 : index
    %19 = vector.load %arg18[%c0_32, %c0_33] : memref<1x256xf32, #tpu.memory_space<vmem>>, vector<1x256xf32>
    %c0_34 = arith.constant 0 : index
    %c0_35 = arith.constant 0 : index
    %20 = vector.load %arg22[%c0_34, %c0_35] : memref<8x128xf32, #tpu.memory_space<vmem>>, vector<8x128xf32>
    %c0_i32_36 = arith.constant 0 : i32
    %21 = arith.index_cast %c0_i32_36 : i32 to index
    %c0_37 = arith.constant 0 : index
    %c0_38 = arith.constant 0 : index
    %22 = vector.load %arg2[%21, %c0_37, %c0_38] : memref<8x8x128xf32, #tpu.memory_space<vmem>>, vector<1x8x128xf32>
    %23 = vector.shape_cast %22 : vector<1x8x128xf32> to vector<8x128xf32>
    %cst = arith.constant dense<0.000000e+00> : vector<8x128xf32>
    %24 = tpu.matmul %23, %3, %cst {dimension_numbers = #tpu.dot_dimension_numbers<[1], [0], [0], [1], [0, 0, 1, 1], [], []>} : vector<8x128xf32>, vector<128x128xf32>, vector<8x128xf32> -> vector<8x128xf32>
    %25 = vector.broadcast %13 : vector<1x128xf32> to vector<8x128xf32>
    %26 = arith.addf %24, %25 : vector<8x128xf32>
    %cst_39 = arith.constant dense<0.000000e+00> : vector<8x128xf32>
    %27 = tpu.matmul %20, %4, %cst_39 {dimension_numbers = #tpu.dot_dimension_numbers<[1], [0], [0], [1], [0, 0, 1, 1], [], []>} : vector<8x128xf32>, vector<128x128xf32>, vector<8x128xf32> -> vector<8x128xf32>
    %28 = vector.broadcast %14 : vector<1x128xf32> to vector<8x128xf32>
    %29 = arith.addf %27, %28 : vector<8x128xf32>
    %30 = arith.subf %20, %26 : vector<8x128xf32>
    %cst_40 = arith.constant dense<0.000000e+00> : vector<8x256xf32>
    %31 = tpu.matmul %30, %5, %cst_40 {dimension_numbers = #tpu.dot_dimension_numbers<[1], [0], [0], [1], [0, 0, 1, 1], [], []>} : vector<8x128xf32>, vector<128x256xf32>, vector<8x256xf32> -> vector<8x256xf32>
    %32 = vector.extract_strided_slice %31 {offsets = [0, 0], sizes = [8, 128], strides = [1, 1]} : vector<8x256xf32> to vector<8x128xf32>
    %33 = vector.extract_strided_slice %31 {offsets = [0, 128], sizes = [8, 128], strides = [1, 1]} : vector<8x256xf32> to vector<8x128xf32>
    %cst_41 = arith.constant dense<0.000000e+00> : vector<8x128xf32>
    %34 = tpu.matmul %26, %6, %cst_41 {dimension_numbers = #tpu.dot_dimension_numbers<[1], [0], [0], [1], [0, 0, 1, 1], [], []>} : vector<8x128xf32>, vector<128x128xf32>, vector<8x128xf32> -> vector<8x128xf32>
    %35 = vector.broadcast %15 : vector<1x128xf32> to vector<8x128xf32>
    %36 = arith.addf %34, %35 : vector<8x128xf32>
    %37 = arith.mulf %29, %32 : vector<8x128xf32>
    %cst_42 = arith.constant dense<0.000000e+00> : vector<8x4xf32>
    %38 = tpu.matmul %37, %11, %cst_42 {dimension_numbers = #tpu.dot_dimension_numbers<[1], [0], [0], [1], [0, 0, 1, 1], [], []>} : vector<8x128xf32>, vector<128x4xf32>, vector<8x4xf32> -> vector<8x4xf32>
    %cst_43 = arith.constant 5.000000e-01 : f32
    %39 = vector.broadcast %cst_43 : f32 to vector<8x4xf32>
    %40 = arith.mulf %39, %38 : vector<8x4xf32>
    %41 = math.tanh %40 : vector<8x4xf32>
    %cst_44 = arith.constant 1.000000e+00 : f32
    %42 = vector.broadcast %cst_44 : f32 to vector<8x4xf32>
    %43 = arith.addf %41, %42 : vector<8x4xf32>
    %cst_45 = arith.constant 5.000000e-01 : f32
    %44 = vector.broadcast %cst_45 : f32 to vector<8x4xf32>
    %45 = arith.mulf %44, %43 : vector<8x4xf32>
    %cst_46 = arith.constant dense<0.000000e+00> : vector<8x128xf32>
    %46 = tpu.matmul %45, %12, %cst_46 {dimension_numbers = #tpu.dot_dimension_numbers<[1], [0], [0], [1], [0, 0, 1, 1], [], []>} : vector<8x4xf32>, vector<4x128xf32>, vector<8x128xf32> -> vector<8x128xf32>
    %47 = arith.mulf %46, %33 : vector<8x128xf32>
    %48 = arith.addf %36, %47 : vector<8x128xf32>
    %cst_47 = arith.constant dense<0.000000e+00> : vector<8x128xf32>
    %49 = tpu.matmul %48, %7, %cst_47 {dimension_numbers = #tpu.dot_dimension_numbers<[1], [0], [0], [1], [0, 0, 1, 1], [], []>} : vector<8x128xf32>, vector<128x128xf32>, vector<8x128xf32> -> vector<8x128xf32>
    %50 = arith.addf %20, %49 : vector<8x128xf32>
    %51 = vector.broadcast %16 : vector<1x128xf32> to vector<8x128xf32>
    %52 = arith.addf %50, %51 : vector<8x128xf32>
    %cst_48 = arith.constant dense<0.000000e+00> : vector<8x128xf32>
    %53 = tpu.matmul %52, %8, %cst_48 {dimension_numbers = #tpu.dot_dimension_numbers<[1], [0], [0], [1], [0, 0, 1, 1], [], []>} : vector<8x128xf32>, vector<128x128xf32>, vector<8x128xf32> -> vector<8x128xf32>
    %54 = vector.broadcast %17 : vector<1x128xf32> to vector<8x128xf32>
    %55 = arith.addf %53, %54 : vector<8x128xf32>
    %cst_49 = arith.constant 0.000000e+00 : f32
    %56 = vector.broadcast %cst_49 : f32 to vector<8x128xf32>
    %57 = arith.maximumf %55, %56 : vector<8x128xf32>
    %cst_50 = arith.constant dense<0.000000e+00> : vector<8x128xf32>
    %58 = tpu.matmul %57, %9, %cst_50 {dimension_numbers = #tpu.dot_dimension_numbers<[1], [0], [0], [1], [0, 0, 1, 1], [], []>} : vector<8x128xf32>, vector<128x128xf32>, vector<8x128xf32> -> vector<8x128xf32>
    %59 = vector.broadcast %18 : vector<1x128xf32> to vector<8x128xf32>
    %60 = arith.addf %58, %59 : vector<8x128xf32>
    %cst_51 = arith.constant 0.000000e+00 : f32
    %61 = vector.broadcast %cst_51 : f32 to vector<8x128xf32>
    %62 = arith.maximumf %60, %61 : vector<8x128xf32>
    %63 = arith.addf %52, %62 : vector<8x128xf32>
    %64 = math.tanh %20 : vector<8x128xf32>
    %65 = tpu.concatenate %26, %64 in 1 : vector<8x128xf32>, vector<8x128xf32> -> vector<8x256xf32>
    %cst_52 = arith.constant dense<0.000000e+00> : vector<8x256xf32>
    %66 = tpu.matmul %65, %10, %cst_52 {dimension_numbers = #tpu.dot_dimension_numbers<[1], [0], [0], [1], [0, 0, 1, 1], [], []>} : vector<8x256xf32>, vector<256x256xf32>, vector<8x256xf32> -> vector<8x256xf32>
    %67 = vector.broadcast %19 : vector<1x256xf32> to vector<8x256xf32>
    %68 = arith.addf %66, %67 : vector<8x256xf32>
    %69 = vector.extract_strided_slice %68 {offsets = [0, 0], sizes = [8, 128], strides = [1, 1]} : vector<8x256xf32> to vector<8x128xf32>
    %cst_53 = arith.constant 5.000000e-01 : f32
    %70 = vector.broadcast %cst_53 : f32 to vector<8x128xf32>
    %71 = arith.mulf %70, %69 : vector<8x128xf32>
    %72 = math.tanh %71 : vector<8x128xf32>
    %cst_54 = arith.constant 1.000000e+00 : f32
    %73 = vector.broadcast %cst_54 : f32 to vector<8x128xf32>
    %74 = arith.addf %72, %73 : vector<8x128xf32>
    %cst_55 = arith.constant 5.000000e-01 : f32
    %75 = vector.broadcast %cst_55 : f32 to vector<8x128xf32>
    %76 = arith.mulf %75, %74 : vector<8x128xf32>
    %77 = math.tanh %63 : vector<8x128xf32>
    %78 = arith.mulf %76, %77 : vector<8x128xf32>
    %79 = vector.extract_strided_slice %68 {offsets = [0, 128], sizes = [8, 128], strides = [1, 1]} : vector<8x256xf32> to vector<8x128xf32>
    %cst_56 = arith.constant 5.000000e-01 : f32
    %80 = vector.broadcast %cst_56 : f32 to vector<8x128xf32>
    %81 = arith.mulf %80, %79 : vector<8x128xf32>
    %82 = math.tanh %81 : vector<8x128xf32>
    %cst_57 = arith.constant 1.000000e+00 : f32
    %83 = vector.broadcast %cst_57 : f32 to vector<8x128xf32>
    %84 = arith.addf %82, %83 : vector<8x128xf32>
    %cst_58 = arith.constant 5.000000e-01 : f32
    %85 = vector.broadcast %cst_58 : f32 to vector<8x128xf32>
    %86 = arith.mulf %85, %84 : vector<8x128xf32>
    %87 = arith.mulf %86, %20 : vector<8x128xf32>
    %88 = arith.addf %78, %87 : vector<8x128xf32>
    %89 = arith.index_cast %c0_i32_36 : i32 to index
    %c0_59 = arith.constant 0 : index
    %c0_60 = arith.constant 0 : index
    %90 = vector.load %arg21[%89, %c0_59, %c0_60] : memref<8x8x128xf32, #tpu.memory_space<vmem>>, vector<1x8x128xf32>
    %91 = vector.shape_cast %90 : vector<1x8x128xf32> to vector<8x128xf32>
    %92 = vector.shape_cast %88 : vector<8x128xf32> to vector<1x8x128xf32>
    tpu.vector_store %arg21[%89, %c0_59, %c0_60], %92 {strides = array<i32>} : memref<8x8x128xf32, #tpu.memory_space<vmem>>, vector<1x8x128xf32>,
    %c1_i32 = arith.constant 1 : i32
    %93 = arith.index_cast %c1_i32 : i32 to index
    %c0_61 = arith.constant 0 : index
    %c0_62 = arith.constant 0 : index
    %94 = vector.load %arg2[%93, %c0_61, %c0_62] : memref<8x8x128xf32, #tpu.memory_space<vmem>>, vector<1x8x128xf32>
    %95 = vector.shape_cast %94 : vector<1x8x128xf32> to vector<8x128xf32>
    %cst_63 = arith.constant dense<0.000000e+00> : vector<8x128xf32>
    %96 = tpu.matmul %95, %3, %cst_63 {dimension_numbers = #tpu.dot_dimension_numbers<[1], [0], [0], [1], [0, 0, 1, 1], [], []>} : vector<8x128xf32>, vector<128x128xf32>, vector<8x128xf32> -> vector<8x128xf32>
    %97 = vector.broadcast %13 : vector<1x128xf32> to vector<8x128xf32>
    %98 = arith.addf %96, %97 : vector<8x128xf32>
    %cst_64 = arith.constant dense<0.000000e+00> : vector<8x128xf32>
    %99 = tpu.matmul %88, %4, %cst_64 {dimension_numbers = #tpu.dot_dimension_numbers<[1], [0], [0], [1], [0, 0, 1, 1], [], []>} : vector<8x128xf32>, vector<128x128xf32>, vector<8x128xf32> -> vector<8x128xf32>
    %100 = vector.broadcast %14 : vector<1x128xf32> to vector<8x128xf32>
    %101 = arith.addf %99, %100 : vector<8x128xf32>
    %102 = arith.subf %88, %98 : vector<8x128xf32>
    %cst_65 = arith.constant dense<0.000000e+00> : vector<8x256xf32>
    %103 = tpu.matmul %102, %5, %cst_65 {dimension_numbers = #tpu.dot_dimension_numbers<[1], [0], [0], [1], [0, 0, 1, 1], [], []>} : vector<8x128xf32>, vector<128x256xf32>, vector<8x256xf32> -> vector<8x256xf32>
    %104 = vector.extract_strided_slice %103 {offsets = [0, 0], sizes = [8, 128], strides = [1, 1]} : vector<8x256xf32> to vector<8x128xf32>
    %105 = vector.extract_strided_slice %103 {offsets = [0, 128], sizes = [8, 128], strides = [1, 1]} : vector<8x256xf32> to vector<8x128xf32>
    %cst_66 = arith.constant dense<0.000000e+00> : vector<8x128xf32>
    %106 = tpu.matmul %98, %6, %cst_66 {dimension_numbers = #tpu.dot_dimension_numbers<[1], [0], [0], [1], [0, 0, 1, 1], [], []>} : vector<8x128xf32>, vector<128x128xf32>, vector<8x128xf32> -> vector<8x128xf32>
    %107 = vector.broadcast %15 : vector<1x128xf32> to vector<8x128xf32>
    %108 = arith.addf %106, %107 : vector<8x128xf32>
    %109 = arith.mulf %101, %104 : vector<8x128xf32>
    %cst_67 = arith.constant dense<0.000000e+00> : vector<8x4xf32>
    %110 = tpu.matmul %109, %11, %cst_67 {dimension_numbers = #tpu.dot_dimension_numbers<[1], [0], [0], [1], [0, 0, 1, 1], [], []>} : vector<8x128xf32>, vector<128x4xf32>, vector<8x4xf32> -> vector<8x4xf32>
    %cst_68 = arith.constant 5.000000e-01 : f32
    %111 = vector.broadcast %cst_68 : f32 to vector<8x4xf32>
    %112 = arith.mulf %111, %110 : vector<8x4xf32>
    %113 = math.tanh %112 : vector<8x4xf32>
    %cst_69 = arith.constant 1.000000e+00 : f32
    %114 = vector.broadcast %cst_69 : f32 to vector<8x4xf32>
    %115 = arith.addf %113, %114 : vector<8x4xf32>
    %cst_70 = arith.constant 5.000000e-01 : f32
    %116 = vector.broadcast %cst_70 : f32 to vector<8x4xf32>
    %117 = arith.mulf %116, %115 : vector<8x4xf32>
    %cst_71 = arith.constant dense<0.000000e+00> : vector<8x128xf32>
    %118 = tpu.matmul %117, %12, %cst_71 {dimension_numbers = #tpu.dot_dimension_numbers<[1], [0], [0], [1], [0, 0, 1, 1], [], []>} : vector<8x4xf32>, vector<4x128xf32>, vector<8x128xf32> -> vector<8x128xf32>
    %119 = arith.mulf %118, %105 : vector<8x128xf32>
    %120 = arith.addf %108, %119 : vector<8x128xf32>
    %cst_72 = arith.constant dense<0.000000e+00> : vector<8x128xf32>
    %121 = tpu.matmul %120, %7, %cst_72 {dimension_numbers = #tpu.dot_dimension_numbers<[1], [0], [0], [1], [0, 0, 1, 1], [], []>} : vector<8x128xf32>, vector<128x128xf32>, vector<8x128xf32> -> vector<8x128xf32>
    %122 = arith.addf %88, %121 : vector<8x128xf32>
    %123 = vector.broadcast %16 : vector<1x128xf32> to vector<8x128xf32>
    %124 = arith.addf %122, %123 : vector<8x128xf32>
    %cst_73 = arith.constant dense<0.000000e+00> : vector<8x128xf32>
    %125 = tpu.matmul %124, %8, %cst_73 {dimension_numbers = #tpu.dot_dimension_numbers<[1], [0], [0], [1], [0, 0, 1, 1], [], []>} : vector<8x128xf32>, vector<128x128xf32>, vector<8x128xf32> -> vector<8x128xf32>
    %126 = vector.broadcast %17 : vector<1x128xf32> to vector<8x128xf32>
    %127 = arith.addf %125, %126 : vector<8x128xf32>
    %cst_74 = arith.constant 0.000000e+00 : f32
    %128 = vector.broadcast %cst_74 : f32 to vector<8x128xf32>
    %129 = arith.maximumf %127, %128 : vector<8x128xf32>
    %cst_75 = arith.constant dense<0.000000e+00> : vector<8x128xf32>
    %130 = tpu.matmul %129, %9, %cst_75 {dimension_numbers = #tpu.dot_dimension_numbers<[1], [0], [0], [1], [0, 0, 1, 1], [], []>} : vector<8x128xf32>, vector<128x128xf32>, vector<8x128xf32> -> vector<8x128xf32>
    %131 = vector.broadcast %18 : vector<1x128xf32> to vector<8x128xf32>
    %132 = arith.addf %130, %131 : vector<8x128xf32>
    %cst_76 = arith.constant 0.000000e+00 : f32
    %133 = vector.broadcast %cst_76 : f32 to vector<8x128xf32>
    %134 = arith.maximumf %132, %133 : vector<8x128xf32>
    %135 = arith.addf %124, %134 : vector<8x128xf32>
    %136 = math.tanh %88 : vector<8x128xf32>
    %137 = tpu.concatenate %98, %136 in 1 : vector<8x128xf32>, vector<8x128xf32> -> vector<8x256xf32>
    %cst_77 = arith.constant dense<0.000000e+00> : vector<8x256xf32>
    %138 = tpu.matmul %137, %10, %cst_77 {dimension_numbers = #tpu.dot_dimension_numbers<[1], [0], [0], [1], [0, 0, 1, 1], [], []>} : vector<8x256xf32>, vector<256x256xf32>, vector<8x256xf32> -> vector<8x256xf32>
    %139 = vector.broadcast %19 : vector<1x256xf32> to vector<8x256xf32>
    %140 = arith.addf %138, %139 : vector<8x256xf32>
    %141 = vector.extract_strided_slice %140 {offsets = [0, 0], sizes = [8, 128], strides = [1, 1]} : vector<8x256xf32> to vector<8x128xf32>
    %cst_78 = arith.constant 5.000000e-01 : f32
    %142 = vector.broadcast %cst_78 : f32 to vector<8x128xf32>
    %143 = arith.mulf %142, %141 : vector<8x128xf32>
    %144 = math.tanh %143 : vector<8x128xf32>
    %cst_79 = arith.constant 1.000000e+00 : f32
    %145 = vector.broadcast %cst_79 : f32 to vector<8x128xf32>
    %146 = arith.addf %144, %145 : vector<8x128xf32>
    %cst_80 = arith.constant 5.000000e-01 : f32
    %147 = vector.broadcast %cst_80 : f32 to vector<8x128xf32>
    %148 = arith.mulf %147, %146 : vector<8x128xf32>
    %149 = math.tanh %135 : vector<8x128xf32>
    %150 = arith.mulf %148, %149 : vector<8x128xf32>
    %151 = vector.extract_strided_slice %140 {offsets = [0, 128], sizes = [8, 128], strides = [1, 1]} : vector<8x256xf32> to vector<8x128xf32>
    %cst_81 = arith.constant 5.000000e-01 : f32
    %152 = vector.broadcast %cst_81 : f32 to vector<8x128xf32>
    %153 = arith.mulf %152, %151 : vector<8x128xf32>
    %154 = math.tanh %153 : vector<8x128xf32>
    %cst_82 = arith.constant 1.000000e+00 : f32
    %155 = vector.broadcast %cst_82 : f32 to vector<8x128xf32>
    %156 = arith.addf %154, %155 : vector<8x128xf32>
    %cst_83 = arith.constant 5.000000e-01 : f32
    %157 = vector.broadcast %cst_83 : f32 to vector<8x128xf32>
    %158 = arith.mulf %157, %156 : vector<8x128xf32>
    %159 = arith.mulf %158, %88 : vector<8x128xf32>
    %160 = arith.addf %150, %159 : vector<8x128xf32>
    %161 = arith.index_cast %c1_i32 : i32 to index
    %c0_84 = arith.constant 0 : index
    %c0_85 = arith.constant 0 : index
    %162 = vector.load %arg21[%161, %c0_84, %c0_85] : memref<8x8x128xf32, #tpu.memory_space<vmem>>, vector<1x8x128xf32>
    %163 = vector.shape_cast %162 : vector<1x8x128xf32> to vector<8x128xf32>
    %164 = vector.shape_cast %160 : vector<8x128xf32> to vector<1x8x128xf32>
    tpu.vector_store %arg21[%161, %c0_84, %c0_85], %164 {strides = array<i32>} : memref<8x8x128xf32, #tpu.memory_space<vmem>>, vector<1x8x128xf32>,
    %c2_i32 = arith.constant 2 : i32
    %165 = arith.index_cast %c2_i32 : i32 to index
    %c0_86 = arith.constant 0 : index
    %c0_87 = arith.constant 0 : index
    %166 = vector.load %arg2[%165, %c0_86, %c0_87] : memref<8x8x128xf32, #tpu.memory_space<vmem>>, vector<1x8x128xf32>
    %167 = vector.shape_cast %166 : vector<1x8x128xf32> to vector<8x128xf32>
    %cst_88 = arith.constant dense<0.000000e+00> : vector<8x128xf32>
    %168 = tpu.matmul %167, %3, %cst_88 {dimension_numbers = #tpu.dot_dimension_numbers<[1], [0], [0], [1], [0, 0, 1, 1], [], []>} : vector<8x128xf32>, vector<128x128xf32>, vector<8x128xf32> -> vector<8x128xf32>
    %169 = vector.broadcast %13 : vector<1x128xf32> to vector<8x128xf32>
    %170 = arith.addf %168, %169 : vector<8x128xf32>
    %cst_89 = arith.constant dense<0.000000e+00> : vector<8x128xf32>
    %171 = tpu.matmul %160, %4, %cst_89 {dimension_numbers = #tpu.dot_dimension_numbers<[1], [0], [0], [1], [0, 0, 1, 1], [], []>} : vector<8x128xf32>, vector<128x128xf32>, vector<8x128xf32> -> vector<8x128xf32>
    %172 = vector.broadcast %14 : vector<1x128xf32> to vector<8x128xf32>
    %173 = arith.addf %171, %172 : vector<8x128xf32>
    %174 = arith.subf %160, %170 : vector<8x128xf32>
    %cst_90 = arith.constant dense<0.000000e+00> : vector<8x256xf32>
    %175 = tpu.matmul %174, %5, %cst_90 {dimension_numbers = #tpu.dot_dimension_numbers<[1], [0], [0], [1], [0, 0, 1, 1], [], []>} : vector<8x128xf32>, vector<128x256xf32>, vector<8x256xf32> -> vector<8x256xf32>
    %176 = vector.extract_strided_slice %175 {offsets = [0, 0], sizes = [8, 128], strides = [1, 1]} : vector<8x256xf32> to vector<8x128xf32>
    %177 = vector.extract_strided_slice %175 {offsets = [0, 128], sizes = [8, 128], strides = [1, 1]} : vector<8x256xf32> to vector<8x128xf32>
    %cst_91 = arith.constant dense<0.000000e+00> : vector<8x128xf32>
    %178 = tpu.matmul %170, %6, %cst_91 {dimension_numbers = #tpu.dot_dimension_numbers<[1], [0], [0], [1], [0, 0, 1, 1], [], []>} : vector<8x128xf32>, vector<128x128xf32>, vector<8x128xf32> -> vector<8x128xf32>
    %179 = vector.broadcast %15 : vector<1x128xf32> to vector<8x128xf32>
    %180 = arith.addf %178, %179 : vector<8x128xf32>
    %181 = arith.mulf %173, %176 : vector<8x128xf32>
    %cst_92 = arith.constant dense<0.000000e+00> : vector<8x4xf32>
    %182 = tpu.matmul %181, %11, %cst_92 {dimension_numbers = #tpu.dot_dimension_numbers<[1], [0], [0], [1], [0, 0, 1, 1], [], []>} : vector<8x128xf32>, vector<128x4xf32>, vector<8x4xf32> -> vector<8x4xf32>
    %cst_93 = arith.constant 5.000000e-01 : f32
    %183 = vector.broadcast %cst_93 : f32 to vector<8x4xf32>
    %184 = arith.mulf %183, %182 : vector<8x4xf32>
    %185 = math.tanh %184 : vector<8x4xf32>
    %cst_94 = arith.constant 1.000000e+00 : f32
    %186 = vector.broadcast %cst_94 : f32 to vector<8x4xf32>
    %187 = arith.addf %185, %186 : vector<8x4xf32>
    %cst_95 = arith.constant 5.000000e-01 : f32
    %188 = vector.broadcast %cst_95 : f32 to vector<8x4xf32>
    %189 = arith.mulf %188, %187 : vector<8x4xf32>
    %cst_96 = arith.constant dense<0.000000e+00> : vector<8x128xf32>
    %190 = tpu.matmul %189, %12, %cst_96 {dimension_numbers = #tpu.dot_dimension_numbers<[1], [0], [0], [1], [0, 0, 1, 1], [], []>} : vector<8x4xf32>, vector<4x128xf32>, vector<8x128xf32> -> vector<8x128xf32>
    %191 = arith.mulf %190, %177 : vector<8x128xf32>
    %192 = arith.addf %180, %191 : vector<8x128xf32>
    %cst_97 = arith.constant dense<0.000000e+00> : vector<8x128xf32>
    %193 = tpu.matmul %192, %7, %cst_97 {dimension_numbers = #tpu.dot_dimension_numbers<[1], [0], [0], [1], [0, 0, 1, 1], [], []>} : vector<8x128xf32>, vector<128x128xf32>, vector<8x128xf32> -> vector<8x128xf32>
    %194 = arith.addf %160, %193 : vector<8x128xf32>
    %195 = vector.broadcast %16 : vector<1x128xf32> to vector<8x128xf32>
    %196 = arith.addf %194, %195 : vector<8x128xf32>
    %cst_98 = arith.constant dense<0.000000e+00> : vector<8x128xf32>
    %197 = tpu.matmul %196, %8, %cst_98 {dimension_numbers = #tpu.dot_dimension_numbers<[1], [0], [0], [1], [0, 0, 1, 1], [], []>} : vector<8x128xf32>, vector<128x128xf32>, vector<8x128xf32> -> vector<8x128xf32>
    %198 = vector.broadcast %17 : vector<1x128xf32> to vector<8x128xf32>
    %199 = arith.addf %197, %198 : vector<8x128xf32>
    %cst_99 = arith.constant 0.000000e+00 : f32
    %200 = vector.broadcast %cst_99 : f32 to vector<8x128xf32>
    %201 = arith.maximumf %199, %200 : vector<8x128xf32>
    %cst_100 = arith.constant dense<0.000000e+00> : vector<8x128xf32>
    %202 = tpu.matmul %201, %9, %cst_100 {dimension_numbers = #tpu.dot_dimension_numbers<[1], [0], [0], [1], [0, 0, 1, 1], [], []>} : vector<8x128xf32>, vector<128x128xf32>, vector<8x128xf32> -> vector<8x128xf32>
    %203 = vector.broadcast %18 : vector<1x128xf32> to vector<8x128xf32>
    %204 = arith.addf %202, %203 : vector<8x128xf32>
    %cst_101 = arith.constant 0.000000e+00 : f32
    %205 = vector.broadcast %cst_101 : f32 to vector<8x128xf32>
    %206 = arith.maximumf %204, %205 : vector<8x128xf32>
    %207 = arith.addf %196, %206 : vector<8x128xf32>
    %208 = math.tanh %160 : vector<8x128xf32>
    %209 = tpu.concatenate %170, %208 in 1 : vector<8x128xf32>, vector<8x128xf32> -> vector<8x256xf32>
    %cst_102 = arith.constant dense<0.000000e+00> : vector<8x256xf32>
    %210 = tpu.matmul %209, %10, %cst_102 {dimension_numbers = #tpu.dot_dimension_numbers<[1], [0], [0], [1], [0, 0, 1, 1], [], []>} : vector<8x256xf32>, vector<256x256xf32>, vector<8x256xf32> -> vector<8x256xf32>
    %211 = vector.broadcast %19 : vector<1x256xf32> to vector<8x256xf32>
    %212 = arith.addf %210, %211 : vector<8x256xf32>
    %213 = vector.extract_strided_slice %212 {offsets = [0, 0], sizes = [8, 128], strides = [1, 1]} : vector<8x256xf32> to vector<8x128xf32>
    %cst_103 = arith.constant 5.000000e-01 : f32
    %214 = vector.broadcast %cst_103 : f32 to vector<8x128xf32>
    %215 = arith.mulf %214, %213 : vector<8x128xf32>
    %216 = math.tanh %215 : vector<8x128xf32>
    %cst_104 = arith.constant 1.000000e+00 : f32
    %217 = vector.broadcast %cst_104 : f32 to vector<8x128xf32>
    %218 = arith.addf %216, %217 : vector<8x128xf32>
    %cst_105 = arith.constant 5.000000e-01 : f32
    %219 = vector.broadcast %cst_105 : f32 to vector<8x128xf32>
    %220 = arith.mulf %219, %218 : vector<8x128xf32>
    %221 = math.tanh %207 : vector<8x128xf32>
    %222 = arith.mulf %220, %221 : vector<8x128xf32>
    %223 = vector.extract_strided_slice %212 {offsets = [0, 128], sizes = [8, 128], strides = [1, 1]} : vector<8x256xf32> to vector<8x128xf32>
    %cst_106 = arith.constant 5.000000e-01 : f32
    %224 = vector.broadcast %cst_106 : f32 to vector<8x128xf32>
    %225 = arith.mulf %224, %223 : vector<8x128xf32>
    %226 = math.tanh %225 : vector<8x128xf32>
    %cst_107 = arith.constant 1.000000e+00 : f32
    %227 = vector.broadcast %cst_107 : f32 to vector<8x128xf32>
    %228 = arith.addf %226, %227 : vector<8x128xf32>
    %cst_108 = arith.constant 5.000000e-01 : f32
    %229 = vector.broadcast %cst_108 : f32 to vector<8x128xf32>
    %230 = arith.mulf %229, %228 : vector<8x128xf32>
    %231 = arith.mulf %230, %160 : vector<8x128xf32>
    %232 = arith.addf %222, %231 : vector<8x128xf32>
    %233 = arith.index_cast %c2_i32 : i32 to index
    %c0_109 = arith.constant 0 : index
    %c0_110 = arith.constant 0 : index
    %234 = vector.load %arg21[%233, %c0_109, %c0_110] : memref<8x8x128xf32, #tpu.memory_space<vmem>>, vector<1x8x128xf32>
    %235 = vector.shape_cast %234 : vector<1x8x128xf32> to vector<8x128xf32>
    %236 = vector.shape_cast %232 : vector<8x128xf32> to vector<1x8x128xf32>
    tpu.vector_store %arg21[%233, %c0_109, %c0_110], %236 {strides = array<i32>} : memref<8x8x128xf32, #tpu.memory_space<vmem>>, vector<1x8x128xf32>,
    %c3_i32 = arith.constant 3 : i32
    %237 = arith.index_cast %c3_i32 : i32 to index
    %c0_111 = arith.constant 0 : index
    %c0_112 = arith.constant 0 : index
    %238 = vector.load %arg2[%237, %c0_111, %c0_112] : memref<8x8x128xf32, #tpu.memory_space<vmem>>, vector<1x8x128xf32>
    %239 = vector.shape_cast %238 : vector<1x8x128xf32> to vector<8x128xf32>
    %cst_113 = arith.constant dense<0.000000e+00> : vector<8x128xf32>
    %240 = tpu.matmul %239, %3, %cst_113 {dimension_numbers = #tpu.dot_dimension_numbers<[1], [0], [0], [1], [0, 0, 1, 1], [], []>} : vector<8x128xf32>, vector<128x128xf32>, vector<8x128xf32> -> vector<8x128xf32>
    %241 = vector.broadcast %13 : vector<1x128xf32> to vector<8x128xf32>
    %242 = arith.addf %240, %241 : vector<8x128xf32>
    %cst_114 = arith.constant dense<0.000000e+00> : vector<8x128xf32>
    %243 = tpu.matmul %232, %4, %cst_114 {dimension_numbers = #tpu.dot_dimension_numbers<[1], [0], [0], [1], [0, 0, 1, 1], [], []>} : vector<8x128xf32>, vector<128x128xf32>, vector<8x128xf32> -> vector<8x128xf32>
    %244 = vector.broadcast %14 : vector<1x128xf32> to vector<8x128xf32>
    %245 = arith.addf %243, %244 : vector<8x128xf32>
    %246 = arith.subf %232, %242 : vector<8x128xf32>
    %cst_115 = arith.constant dense<0.000000e+00> : vector<8x256xf32>
    %247 = tpu.matmul %246, %5, %cst_115 {dimension_numbers = #tpu.dot_dimension_numbers<[1], [0], [0], [1], [0, 0, 1, 1], [], []>} : vector<8x128xf32>, vector<128x256xf32>, vector<8x256xf32> -> vector<8x256xf32>
    %248 = vector.extract_strided_slice %247 {offsets = [0, 0], sizes = [8, 128], strides = [1, 1]} : vector<8x256xf32> to vector<8x128xf32>
    %249 = vector.extract_strided_slice %247 {offsets = [0, 128], sizes = [8, 128], strides = [1, 1]} : vector<8x256xf32> to vector<8x128xf32>
    %cst_116 = arith.constant dense<0.000000e+00> : vector<8x128xf32>
    %250 = tpu.matmul %242, %6, %cst_116 {dimension_numbers = #tpu.dot_dimension_numbers<[1], [0], [0], [1], [0, 0, 1, 1], [], []>} : vector<8x128xf32>, vector<128x128xf32>, vector<8x128xf32> -> vector<8x128xf32>
    %251 = vector.broadcast %15 : vector<1x128xf32> to vector<8x128xf32>
    %252 = arith.addf %250, %251 : vector<8x128xf32>
    %253 = arith.mulf %245, %248 : vector<8x128xf32>
    %cst_117 = arith.constant dense<0.000000e+00> : vector<8x4xf32>
    %254 = tpu.matmul %253, %11, %cst_117 {dimension_numbers = #tpu.dot_dimension_numbers<[1], [0], [0], [1], [0, 0, 1, 1], [], []>} : vector<8x128xf32>, vector<128x4xf32>, vector<8x4xf32> -> vector<8x4xf32>
    %cst_118 = arith.constant 5.000000e-01 : f32
    %255 = vector.broadcast %cst_118 : f32 to vector<8x4xf32>
    %256 = arith.mulf %255, %254 : vector<8x4xf32>
    %257 = math.tanh %256 : vector<8x4xf32>
    %cst_119 = arith.constant 1.000000e+00 : f32
    %258 = vector.broadcast %cst_119 : f32 to vector<8x4xf32>
    %259 = arith.addf %257, %258 : vector<8x4xf32>
    %cst_120 = arith.constant 5.000000e-01 : f32
    %260 = vector.broadcast %cst_120 : f32 to vector<8x4xf32>
    %261 = arith.mulf %260, %259 : vector<8x4xf32>
    %cst_121 = arith.constant dense<0.000000e+00> : vector<8x128xf32>
    %262 = tpu.matmul %261, %12, %cst_121 {dimension_numbers = #tpu.dot_dimension_numbers<[1], [0], [0], [1], [0, 0, 1, 1], [], []>} : vector<8x4xf32>, vector<4x128xf32>, vector<8x128xf32> -> vector<8x128xf32>
    %263 = arith.mulf %262, %249 : vector<8x128xf32>
    %264 = arith.addf %252, %263 : vector<8x128xf32>
    %cst_122 = arith.constant dense<0.000000e+00> : vector<8x128xf32>
    %265 = tpu.matmul %264, %7, %cst_122 {dimension_numbers = #tpu.dot_dimension_numbers<[1], [0], [0], [1], [0, 0, 1, 1], [], []>} : vector<8x128xf32>, vector<128x128xf32>, vector<8x128xf32> -> vector<8x128xf32>
    %266 = arith.addf %232, %265 : vector<8x128xf32>
    %267 = vector.broadcast %16 : vector<1x128xf32> to vector<8x128xf32>
    %268 = arith.addf %266, %267 : vector<8x128xf32>
    %cst_123 = arith.constant dense<0.000000e+00> : vector<8x128xf32>
    %269 = tpu.matmul %268, %8, %cst_123 {dimension_numbers = #tpu.dot_dimension_numbers<[1], [0], [0], [1], [0, 0, 1, 1], [], []>} : vector<8x128xf32>, vector<128x128xf32>, vector<8x128xf32> -> vector<8x128xf32>
    %270 = vector.broadcast %17 : vector<1x128xf32> to vector<8x128xf32>
    %271 = arith.addf %269, %270 : vector<8x128xf32>
    %cst_124 = arith.constant 0.000000e+00 : f32
    %272 = vector.broadcast %cst_124 : f32 to vector<8x128xf32>
    %273 = arith.maximumf %271, %272 : vector<8x128xf32>
    %cst_125 = arith.constant dense<0.000000e+00> : vector<8x128xf32>
    %274 = tpu.matmul %273, %9, %cst_125 {dimension_numbers = #tpu.dot_dimension_numbers<[1], [0], [0], [1], [0, 0, 1, 1], [], []>} : vector<8x128xf32>, vector<128x128xf32>, vector<8x128xf32> -> vector<8x128xf32>
    %275 = vector.broadcast %18 : vector<1x128xf32> to vector<8x128xf32>
    %276 = arith.addf %274, %275 : vector<8x128xf32>
    %cst_126 = arith.constant 0.000000e+00 : f32
    %277 = vector.broadcast %cst_126 : f32 to vector<8x128xf32>
    %278 = arith.maximumf %276, %277 : vector<8x128xf32>
    %279 = arith.addf %268, %278 : vector<8x128xf32>
    %280 = math.tanh %232 : vector<8x128xf32>
    %281 = tpu.concatenate %242, %280 in 1 : vector<8x128xf32>, vector<8x128xf32> -> vector<8x256xf32>
    %cst_127 = arith.constant dense<0.000000e+00> : vector<8x256xf32>
    %282 = tpu.matmul %281, %10, %cst_127 {dimension_numbers = #tpu.dot_dimension_numbers<[1], [0], [0], [1], [0, 0, 1, 1], [], []>} : vector<8x256xf32>, vector<256x256xf32>, vector<8x256xf32> -> vector<8x256xf32>
    %283 = vector.broadcast %19 : vector<1x256xf32> to vector<8x256xf32>
    %284 = arith.addf %282, %283 : vector<8x256xf32>
    %285 = vector.extract_strided_slice %284 {offsets = [0, 0], sizes = [8, 128], strides = [1, 1]} : vector<8x256xf32> to vector<8x128xf32>
    %cst_128 = arith.constant 5.000000e-01 : f32
    %286 = vector.broadcast %cst_128 : f32 to vector<8x128xf32>
    %287 = arith.mulf %286, %285 : vector<8x128xf32>
    %288 = math.tanh %287 : vector<8x128xf32>
    %cst_129 = arith.constant 1.000000e+00 : f32
    %289 = vector.broadcast %cst_129 : f32 to vector<8x128xf32>
    %290 = arith.addf %288, %289 : vector<8x128xf32>
    %cst_130 = arith.constant 5.000000e-01 : f32
    %291 = vector.broadcast %cst_130 : f32 to vector<8x128xf32>
    %292 = arith.mulf %291, %290 : vector<8x128xf32>
    %293 = math.tanh %279 : vector<8x128xf32>
    %294 = arith.mulf %292, %293 : vector<8x128xf32>
    %295 = vector.extract_strided_slice %284 {offsets = [0, 128], sizes = [8, 128], strides = [1, 1]} : vector<8x256xf32> to vector<8x128xf32>
    %cst_131 = arith.constant 5.000000e-01 : f32
    %296 = vector.broadcast %cst_131 : f32 to vector<8x128xf32>
    %297 = arith.mulf %296, %295 : vector<8x128xf32>
    %298 = math.tanh %297 : vector<8x128xf32>
    %cst_132 = arith.constant 1.000000e+00 : f32
    %299 = vector.broadcast %cst_132 : f32 to vector<8x128xf32>
    %300 = arith.addf %298, %299 : vector<8x128xf32>
    %cst_133 = arith.constant 5.000000e-01 : f32
    %301 = vector.broadcast %cst_133 : f32 to vector<8x128xf32>
    %302 = arith.mulf %301, %300 : vector<8x128xf32>
    %303 = arith.mulf %302, %232 : vector<8x128xf32>
    %304 = arith.addf %294, %303 : vector<8x128xf32>
    %305 = arith.index_cast %c3_i32 : i32 to index
    %c0_134 = arith.constant 0 : index
    %c0_135 = arith.constant 0 : index
    %306 = vector.load %arg21[%305, %c0_134, %c0_135] : memref<8x8x128xf32, #tpu.memory_space<vmem>>, vector<1x8x128xf32>
    %307 = vector.shape_cast %306 : vector<1x8x128xf32> to vector<8x128xf32>
    %308 = vector.shape_cast %304 : vector<8x128xf32> to vector<1x8x128xf32>
    tpu.vector_store %arg21[%305, %c0_134, %c0_135], %308 {strides = array<i32>} : memref<8x8x128xf32, #tpu.memory_space<vmem>>, vector<1x8x128xf32>,
    %c4_i32 = arith.constant 4 : i32
    %309 = arith.index_cast %c4_i32 : i32 to index
    %c0_136 = arith.constant 0 : index
    %c0_137 = arith.constant 0 : index
    %310 = vector.load %arg2[%309, %c0_136, %c0_137] : memref<8x8x128xf32, #tpu.memory_space<vmem>>, vector<1x8x128xf32>
    %311 = vector.shape_cast %310 : vector<1x8x128xf32> to vector<8x128xf32>
    %cst_138 = arith.constant dense<0.000000e+00> : vector<8x128xf32>
    %312 = tpu.matmul %311, %3, %cst_138 {dimension_numbers = #tpu.dot_dimension_numbers<[1], [0], [0], [1], [0, 0, 1, 1], [], []>} : vector<8x128xf32>, vector<128x128xf32>, vector<8x128xf32> -> vector<8x128xf32>
    %313 = vector.broadcast %13 : vector<1x128xf32> to vector<8x128xf32>
    %314 = arith.addf %312, %313 : vector<8x128xf32>
    %cst_139 = arith.constant dense<0.000000e+00> : vector<8x128xf32>
    %315 = tpu.matmul %304, %4, %cst_139 {dimension_numbers = #tpu.dot_dimension_numbers<[1], [0], [0], [1], [0, 0, 1, 1], [], []>} : vector<8x128xf32>, vector<128x128xf32>, vector<8x128xf32> -> vector<8x128xf32>
    %316 = vector.broadcast %14 : vector<1x128xf32> to vector<8x128xf32>
    %317 = arith.addf %315, %316 : vector<8x128xf32>
    %318 = arith.subf %304, %314 : vector<8x128xf32>
    %cst_140 = arith.constant dense<0.000000e+00> : vector<8x256xf32>
    %319 = tpu.matmul %318, %5, %cst_140 {dimension_numbers = #tpu.dot_dimension_numbers<[1], [0], [0], [1], [0, 0, 1, 1], [], []>} : vector<8x128xf32>, vector<128x256xf32>, vector<8x256xf32> -> vector<8x256xf32>
    %320 = vector.extract_strided_slice %319 {offsets = [0, 0], sizes = [8, 128], strides = [1, 1]} : vector<8x256xf32> to vector<8x128xf32>
    %321 = vector.extract_strided_slice %319 {offsets = [0, 128], sizes = [8, 128], strides = [1, 1]} : vector<8x256xf32> to vector<8x128xf32>
    %cst_141 = arith.constant dense<0.000000e+00> : vector<8x128xf32>
    %322 = tpu.matmul %314, %6, %cst_141 {dimension_numbers = #tpu.dot_dimension_numbers<[1], [0], [0], [1], [0, 0, 1, 1], [], []>} : vector<8x128xf32>, vector<128x128xf32>, vector<8x128xf32> -> vector<8x128xf32>
    %323 = vector.broadcast %15 : vector<1x128xf32> to vector<8x128xf32>
    %324 = arith.addf %322, %323 : vector<8x128xf32>
    %325 = arith.mulf %317, %320 : vector<8x128xf32>
    %cst_142 = arith.constant dense<0.000000e+00> : vector<8x4xf32>
    %326 = tpu.matmul %325, %11, %cst_142 {dimension_numbers = #tpu.dot_dimension_numbers<[1], [0], [0], [1], [0, 0, 1, 1], [], []>} : vector<8x128xf32>, vector<128x4xf32>, vector<8x4xf32> -> vector<8x4xf32>
    %cst_143 = arith.constant 5.000000e-01 : f32
    %327 = vector.broadcast %cst_143 : f32 to vector<8x4xf32>
    %328 = arith.mulf %327, %326 : vector<8x4xf32>
    %329 = math.tanh %328 : vector<8x4xf32>
    %cst_144 = arith.constant 1.000000e+00 : f32
    %330 = vector.broadcast %cst_144 : f32 to vector<8x4xf32>
    %331 = arith.addf %329, %330 : vector<8x4xf32>
    %cst_145 = arith.constant 5.000000e-01 : f32
    %332 = vector.broadcast %cst_145 : f32 to vector<8x4xf32>
    %333 = arith.mulf %332, %331 : vector<8x4xf32>
    %cst_146 = arith.constant dense<0.000000e+00> : vector<8x128xf32>
    %334 = tpu.matmul %333, %12, %cst_146 {dimension_numbers = #tpu.dot_dimension_numbers<[1], [0], [0], [1], [0, 0, 1, 1], [], []>} : vector<8x4xf32>, vector<4x128xf32>, vector<8x128xf32> -> vector<8x128xf32>
    %335 = arith.mulf %334, %321 : vector<8x128xf32>
    %336 = arith.addf %324, %335 : vector<8x128xf32>
    %cst_147 = arith.constant dense<0.000000e+00> : vector<8x128xf32>
    %337 = tpu.matmul %336, %7, %cst_147 {dimension_numbers = #tpu.dot_dimension_numbers<[1], [0], [0], [1], [0, 0, 1, 1], [], []>} : vector<8x128xf32>, vector<128x128xf32>, vector<8x128xf32> -> vector<8x128xf32>
    %338 = arith.addf %304, %337 : vector<8x128xf32>
    %339 = vector.broadcast %16 : vector<1x128xf32> to vector<8x128xf32>
    %340 = arith.addf %338, %339 : vector<8x128xf32>
    %cst_148 = arith.constant dense<0.000000e+00> : vector<8x128xf32>
    %341 = tpu.matmul %340, %8, %cst_148 {dimension_numbers = #tpu.dot_dimension_numbers<[1], [0], [0], [1], [0, 0, 1, 1], [], []>} : vector<8x128xf32>, vector<128x128xf32>, vector<8x128xf32> -> vector<8x128xf32>
    %342 = vector.broadcast %17 : vector<1x128xf32> to vector<8x128xf32>
    %343 = arith.addf %341, %342 : vector<8x128xf32>
    %cst_149 = arith.constant 0.000000e+00 : f32
    %344 = vector.broadcast %cst_149 : f32 to vector<8x128xf32>
    %345 = arith.maximumf %343, %344 : vector<8x128xf32>
    %cst_150 = arith.constant dense<0.000000e+00> : vector<8x128xf32>
    %346 = tpu.matmul %345, %9, %cst_150 {dimension_numbers = #tpu.dot_dimension_numbers<[1], [0], [0], [1], [0, 0, 1, 1], [], []>} : vector<8x128xf32>, vector<128x128xf32>, vector<8x128xf32> -> vector<8x128xf32>
    %347 = vector.broadcast %18 : vector<1x128xf32> to vector<8x128xf32>
    %348 = arith.addf %346, %347 : vector<8x128xf32>
    %cst_151 = arith.constant 0.000000e+00 : f32
    %349 = vector.broadcast %cst_151 : f32 to vector<8x128xf32>
    %350 = arith.maximumf %348, %349 : vector<8x128xf32>
    %351 = arith.addf %340, %350 : vector<8x128xf32>
    %352 = math.tanh %304 : vector<8x128xf32>
    %353 = tpu.concatenate %314, %352 in 1 : vector<8x128xf32>, vector<8x128xf32> -> vector<8x256xf32>
    %cst_152 = arith.constant dense<0.000000e+00> : vector<8x256xf32>
    %354 = tpu.matmul %353, %10, %cst_152 {dimension_numbers = #tpu.dot_dimension_numbers<[1], [0], [0], [1], [0, 0, 1, 1], [], []>} : vector<8x256xf32>, vector<256x256xf32>, vector<8x256xf32> -> vector<8x256xf32>
    %355 = vector.broadcast %19 : vector<1x256xf32> to vector<8x256xf32>
    %356 = arith.addf %354, %355 : vector<8x256xf32>
    %357 = vector.extract_strided_slice %356 {offsets = [0, 0], sizes = [8, 128], strides = [1, 1]} : vector<8x256xf32> to vector<8x128xf32>
    %cst_153 = arith.constant 5.000000e-01 : f32
    %358 = vector.broadcast %cst_153 : f32 to vector<8x128xf32>
    %359 = arith.mulf %358, %357 : vector<8x128xf32>
    %360 = math.tanh %359 : vector<8x128xf32>
    %cst_154 = arith.constant 1.000000e+00 : f32
    %361 = vector.broadcast %cst_154 : f32 to vector<8x128xf32>
    %362 = arith.addf %360, %361 : vector<8x128xf32>
    %cst_155 = arith.constant 5.000000e-01 : f32
    %363 = vector.broadcast %cst_155 : f32 to vector<8x128xf32>
    %364 = arith.mulf %363, %362 : vector<8x128xf32>
    %365 = math.tanh %351 : vector<8x128xf32>
    %366 = arith.mulf %364, %365 : vector<8x128xf32>
    %367 = vector.extract_strided_slice %356 {offsets = [0, 128], sizes = [8, 128], strides = [1, 1]} : vector<8x256xf32> to vector<8x128xf32>
    %cst_156 = arith.constant 5.000000e-01 : f32
    %368 = vector.broadcast %cst_156 : f32 to vector<8x128xf32>
    %369 = arith.mulf %368, %367 : vector<8x128xf32>
    %370 = math.tanh %369 : vector<8x128xf32>
    %cst_157 = arith.constant 1.000000e+00 : f32
    %371 = vector.broadcast %cst_157 : f32 to vector<8x128xf32>
    %372 = arith.addf %370, %371 : vector<8x128xf32>
    %cst_158 = arith.constant 5.000000e-01 : f32
    %373 = vector.broadcast %cst_158 : f32 to vector<8x128xf32>
    %374 = arith.mulf %373, %372 : vector<8x128xf32>
    %375 = arith.mulf %374, %304 : vector<8x128xf32>
    %376 = arith.addf %366, %375 : vector<8x128xf32>
    %377 = arith.index_cast %c4_i32 : i32 to index
    %c0_159 = arith.constant 0 : index
    %c0_160 = arith.constant 0 : index
    %378 = vector.load %arg21[%377, %c0_159, %c0_160] : memref<8x8x128xf32, #tpu.memory_space<vmem>>, vector<1x8x128xf32>
    %379 = vector.shape_cast %378 : vector<1x8x128xf32> to vector<8x128xf32>
    %380 = vector.shape_cast %376 : vector<8x128xf32> to vector<1x8x128xf32>
    tpu.vector_store %arg21[%377, %c0_159, %c0_160], %380 {strides = array<i32>} : memref<8x8x128xf32, #tpu.memory_space<vmem>>, vector<1x8x128xf32>,
    %c5_i32 = arith.constant 5 : i32
    %381 = arith.index_cast %c5_i32 : i32 to index
    %c0_161 = arith.constant 0 : index
    %c0_162 = arith.constant 0 : index
    %382 = vector.load %arg2[%381, %c0_161, %c0_162] : memref<8x8x128xf32, #tpu.memory_space<vmem>>, vector<1x8x128xf32>
    %383 = vector.shape_cast %382 : vector<1x8x128xf32> to vector<8x128xf32>
    %cst_163 = arith.constant dense<0.000000e+00> : vector<8x128xf32>
    %384 = tpu.matmul %383, %3, %cst_163 {dimension_numbers = #tpu.dot_dimension_numbers<[1], [0], [0], [1], [0, 0, 1, 1], [], []>} : vector<8x128xf32>, vector<128x128xf32>, vector<8x128xf32> -> vector<8x128xf32>
    %385 = vector.broadcast %13 : vector<1x128xf32> to vector<8x128xf32>
    %386 = arith.addf %384, %385 : vector<8x128xf32>
    %cst_164 = arith.constant dense<0.000000e+00> : vector<8x128xf32>
    %387 = tpu.matmul %376, %4, %cst_164 {dimension_numbers = #tpu.dot_dimension_numbers<[1], [0], [0], [1], [0, 0, 1, 1], [], []>} : vector<8x128xf32>, vector<128x128xf32>, vector<8x128xf32> -> vector<8x128xf32>
    %388 = vector.broadcast %14 : vector<1x128xf32> to vector<8x128xf32>
    %389 = arith.addf %387, %388 : vector<8x128xf32>
    %390 = arith.subf %376, %386 : vector<8x128xf32>
    %cst_165 = arith.constant dense<0.000000e+00> : vector<8x256xf32>
    %391 = tpu.matmul %390, %5, %cst_165 {dimension_numbers = #tpu.dot_dimension_numbers<[1], [0], [0], [1], [0, 0, 1, 1], [], []>} : vector<8x128xf32>, vector<128x256xf32>, vector<8x256xf32> -> vector<8x256xf32>
    %392 = vector.extract_strided_slice %391 {offsets = [0, 0], sizes = [8, 128], strides = [1, 1]} : vector<8x256xf32> to vector<8x128xf32>
    %393 = vector.extract_strided_slice %391 {offsets = [0, 128], sizes = [8, 128], strides = [1, 1]} : vector<8x256xf32> to vector<8x128xf32>
    %cst_166 = arith.constant dense<0.000000e+00> : vector<8x128xf32>
    %394 = tpu.matmul %386, %6, %cst_166 {dimension_numbers = #tpu.dot_dimension_numbers<[1], [0], [0], [1], [0, 0, 1, 1], [], []>} : vector<8x128xf32>, vector<128x128xf32>, vector<8x128xf32> -> vector<8x128xf32>
    %395 = vector.broadcast %15 : vector<1x128xf32> to vector<8x128xf32>
    %396 = arith.addf %394, %395 : vector<8x128xf32>
    %397 = arith.mulf %389, %392 : vector<8x128xf32>
    %cst_167 = arith.constant dense<0.000000e+00> : vector<8x4xf32>
    %398 = tpu.matmul %397, %11, %cst_167 {dimension_numbers = #tpu.dot_dimension_numbers<[1], [0], [0], [1], [0, 0, 1, 1], [], []>} : vector<8x128xf32>, vector<128x4xf32>, vector<8x4xf32> -> vector<8x4xf32>
    %cst_168 = arith.constant 5.000000e-01 : f32
    %399 = vector.broadcast %cst_168 : f32 to vector<8x4xf32>
    %400 = arith.mulf %399, %398 : vector<8x4xf32>
    %401 = math.tanh %400 : vector<8x4xf32>
    %cst_169 = arith.constant 1.000000e+00 : f32
    %402 = vector.broadcast %cst_169 : f32 to vector<8x4xf32>
    %403 = arith.addf %401, %402 : vector<8x4xf32>
    %cst_170 = arith.constant 5.000000e-01 : f32
    %404 = vector.broadcast %cst_170 : f32 to vector<8x4xf32>
    %405 = arith.mulf %404, %403 : vector<8x4xf32>
    %cst_171 = arith.constant dense<0.000000e+00> : vector<8x128xf32>
    %406 = tpu.matmul %405, %12, %cst_171 {dimension_numbers = #tpu.dot_dimension_numbers<[1], [0], [0], [1], [0, 0, 1, 1], [], []>} : vector<8x4xf32>, vector<4x128xf32>, vector<8x128xf32> -> vector<8x128xf32>
    %407 = arith.mulf %406, %393 : vector<8x128xf32>
    %408 = arith.addf %396, %407 : vector<8x128xf32>
    %cst_172 = arith.constant dense<0.000000e+00> : vector<8x128xf32>
    %409 = tpu.matmul %408, %7, %cst_172 {dimension_numbers = #tpu.dot_dimension_numbers<[1], [0], [0], [1], [0, 0, 1, 1], [], []>} : vector<8x128xf32>, vector<128x128xf32>, vector<8x128xf32> -> vector<8x128xf32>
    %410 = arith.addf %376, %409 : vector<8x128xf32>
    %411 = vector.broadcast %16 : vector<1x128xf32> to vector<8x128xf32>
    %412 = arith.addf %410, %411 : vector<8x128xf32>
    %cst_173 = arith.constant dense<0.000000e+00> : vector<8x128xf32>
    %413 = tpu.matmul %412, %8, %cst_173 {dimension_numbers = #tpu.dot_dimension_numbers<[1], [0], [0], [1], [0, 0, 1, 1], [], []>} : vector<8x128xf32>, vector<128x128xf32>, vector<8x128xf32> -> vector<8x128xf32>
    %414 = vector.broadcast %17 : vector<1x128xf32> to vector<8x128xf32>
    %415 = arith.addf %413, %414 : vector<8x128xf32>
    %cst_174 = arith.constant 0.000000e+00 : f32
    %416 = vector.broadcast %cst_174 : f32 to vector<8x128xf32>
    %417 = arith.maximumf %415, %416 : vector<8x128xf32>
    %cst_175 = arith.constant dense<0.000000e+00> : vector<8x128xf32>
    %418 = tpu.matmul %417, %9, %cst_175 {dimension_numbers = #tpu.dot_dimension_numbers<[1], [0], [0], [1], [0, 0, 1, 1], [], []>} : vector<8x128xf32>, vector<128x128xf32>, vector<8x128xf32> -> vector<8x128xf32>
    %419 = vector.broadcast %18 : vector<1x128xf32> to vector<8x128xf32>
    %420 = arith.addf %418, %419 : vector<8x128xf32>
    %cst_176 = arith.constant 0.000000e+00 : f32
    %421 = vector.broadcast %cst_176 : f32 to vector<8x128xf32>
    %422 = arith.maximumf %420, %421 : vector<8x128xf32>
    %423 = arith.addf %412, %422 : vector<8x128xf32>
    %424 = math.tanh %376 : vector<8x128xf32>
    %425 = tpu.concatenate %386, %424 in 1 : vector<8x128xf32>, vector<8x128xf32> -> vector<8x256xf32>
    %cst_177 = arith.constant dense<0.000000e+00> : vector<8x256xf32>
    %426 = tpu.matmul %425, %10, %cst_177 {dimension_numbers = #tpu.dot_dimension_numbers<[1], [0], [0], [1], [0, 0, 1, 1], [], []>} : vector<8x256xf32>, vector<256x256xf32>, vector<8x256xf32> -> vector<8x256xf32>
    %427 = vector.broadcast %19 : vector<1x256xf32> to vector<8x256xf32>
    %428 = arith.addf %426, %427 : vector<8x256xf32>
    %429 = vector.extract_strided_slice %428 {offsets = [0, 0], sizes = [8, 128], strides = [1, 1]} : vector<8x256xf32> to vector<8x128xf32>
    %cst_178 = arith.constant 5.000000e-01 : f32
    %430 = vector.broadcast %cst_178 : f32 to vector<8x128xf32>
    %431 = arith.mulf %430, %429 : vector<8x128xf32>
    %432 = math.tanh %431 : vector<8x128xf32>
    %cst_179 = arith.constant 1.000000e+00 : f32
    %433 = vector.broadcast %cst_179 : f32 to vector<8x128xf32>
    %434 = arith.addf %432, %433 : vector<8x128xf32>
    %cst_180 = arith.constant 5.000000e-01 : f32
    %435 = vector.broadcast %cst_180 : f32 to vector<8x128xf32>
    %436 = arith.mulf %435, %434 : vector<8x128xf32>
    %437 = math.tanh %423 : vector<8x128xf32>
    %438 = arith.mulf %436, %437 : vector<8x128xf32>
    %439 = vector.extract_strided_slice %428 {offsets = [0, 128], sizes = [8, 128], strides = [1, 1]} : vector<8x256xf32> to vector<8x128xf32>
    %cst_181 = arith.constant 5.000000e-01 : f32
    %440 = vector.broadcast %cst_181 : f32 to vector<8x128xf32>
    %441 = arith.mulf %440, %439 : vector<8x128xf32>
    %442 = math.tanh %441 : vector<8x128xf32>
    %cst_182 = arith.constant 1.000000e+00 : f32
    %443 = vector.broadcast %cst_182 : f32 to vector<8x128xf32>
    %444 = arith.addf %442, %443 : vector<8x128xf32>
    %cst_183 = arith.constant 5.000000e-01 : f32
    %445 = vector.broadcast %cst_183 : f32 to vector<8x128xf32>
    %446 = arith.mulf %445, %444 : vector<8x128xf32>
    %447 = arith.mulf %446, %376 : vector<8x128xf32>
    %448 = arith.addf %438, %447 : vector<8x128xf32>
    %449 = arith.index_cast %c5_i32 : i32 to index
    %c0_184 = arith.constant 0 : index
    %c0_185 = arith.constant 0 : index
    %450 = vector.load %arg21[%449, %c0_184, %c0_185] : memref<8x8x128xf32, #tpu.memory_space<vmem>>, vector<1x8x128xf32>
    %451 = vector.shape_cast %450 : vector<1x8x128xf32> to vector<8x128xf32>
    %452 = vector.shape_cast %448 : vector<8x128xf32> to vector<1x8x128xf32>
    tpu.vector_store %arg21[%449, %c0_184, %c0_185], %452 {strides = array<i32>} : memref<8x8x128xf32, #tpu.memory_space<vmem>>, vector<1x8x128xf32>,
    %c6_i32 = arith.constant 6 : i32
    %453 = arith.index_cast %c6_i32 : i32 to index
    %c0_186 = arith.constant 0 : index
    %c0_187 = arith.constant 0 : index
    %454 = vector.load %arg2[%453, %c0_186, %c0_187] : memref<8x8x128xf32, #tpu.memory_space<vmem>>, vector<1x8x128xf32>
    %455 = vector.shape_cast %454 : vector<1x8x128xf32> to vector<8x128xf32>
    %cst_188 = arith.constant dense<0.000000e+00> : vector<8x128xf32>
    %456 = tpu.matmul %455, %3, %cst_188 {dimension_numbers = #tpu.dot_dimension_numbers<[1], [0], [0], [1], [0, 0, 1, 1], [], []>} : vector<8x128xf32>, vector<128x128xf32>, vector<8x128xf32> -> vector<8x128xf32>
    %457 = vector.broadcast %13 : vector<1x128xf32> to vector<8x128xf32>
    %458 = arith.addf %456, %457 : vector<8x128xf32>
    %cst_189 = arith.constant dense<0.000000e+00> : vector<8x128xf32>
    %459 = tpu.matmul %448, %4, %cst_189 {dimension_numbers = #tpu.dot_dimension_numbers<[1], [0], [0], [1], [0, 0, 1, 1], [], []>} : vector<8x128xf32>, vector<128x128xf32>, vector<8x128xf32> -> vector<8x128xf32>
    %460 = vector.broadcast %14 : vector<1x128xf32> to vector<8x128xf32>
    %461 = arith.addf %459, %460 : vector<8x128xf32>
    %462 = arith.subf %448, %458 : vector<8x128xf32>
    %cst_190 = arith.constant dense<0.000000e+00> : vector<8x256xf32>
    %463 = tpu.matmul %462, %5, %cst_190 {dimension_numbers = #tpu.dot_dimension_numbers<[1], [0], [0], [1], [0, 0, 1, 1], [], []>} : vector<8x128xf32>, vector<128x256xf32>, vector<8x256xf32> -> vector<8x256xf32>
    %464 = vector.extract_strided_slice %463 {offsets = [0, 0], sizes = [8, 128], strides = [1, 1]} : vector<8x256xf32> to vector<8x128xf32>
    %465 = vector.extract_strided_slice %463 {offsets = [0, 128], sizes = [8, 128], strides = [1, 1]} : vector<8x256xf32> to vector<8x128xf32>
    %cst_191 = arith.constant dense<0.000000e+00> : vector<8x128xf32>
    %466 = tpu.matmul %458, %6, %cst_191 {dimension_numbers = #tpu.dot_dimension_numbers<[1], [0], [0], [1], [0, 0, 1, 1], [], []>} : vector<8x128xf32>, vector<128x128xf32>, vector<8x128xf32> -> vector<8x128xf32>
    %467 = vector.broadcast %15 : vector<1x128xf32> to vector<8x128xf32>
    %468 = arith.addf %466, %467 : vector<8x128xf32>
    %469 = arith.mulf %461, %464 : vector<8x128xf32>
    %cst_192 = arith.constant dense<0.000000e+00> : vector<8x4xf32>
    %470 = tpu.matmul %469, %11, %cst_192 {dimension_numbers = #tpu.dot_dimension_numbers<[1], [0], [0], [1], [0, 0, 1, 1], [], []>} : vector<8x128xf32>, vector<128x4xf32>, vector<8x4xf32> -> vector<8x4xf32>
    %cst_193 = arith.constant 5.000000e-01 : f32
    %471 = vector.broadcast %cst_193 : f32 to vector<8x4xf32>
    %472 = arith.mulf %471, %470 : vector<8x4xf32>
    %473 = math.tanh %472 : vector<8x4xf32>
    %cst_194 = arith.constant 1.000000e+00 : f32
    %474 = vector.broadcast %cst_194 : f32 to vector<8x4xf32>
    %475 = arith.addf %473, %474 : vector<8x4xf32>
    %cst_195 = arith.constant 5.000000e-01 : f32
    %476 = vector.broadcast %cst_195 : f32 to vector<8x4xf32>
    %477 = arith.mulf %476, %475 : vector<8x4xf32>
    %cst_196 = arith.constant dense<0.000000e+00> : vector<8x128xf32>
    %478 = tpu.matmul %477, %12, %cst_196 {dimension_numbers = #tpu.dot_dimension_numbers<[1], [0], [0], [1], [0, 0, 1, 1], [], []>} : vector<8x4xf32>, vector<4x128xf32>, vector<8x128xf32> -> vector<8x128xf32>
    %479 = arith.mulf %478, %465 : vector<8x128xf32>
    %480 = arith.addf %468, %479 : vector<8x128xf32>
    %cst_197 = arith.constant dense<0.000000e+00> : vector<8x128xf32>
    %481 = tpu.matmul %480, %7, %cst_197 {dimension_numbers = #tpu.dot_dimension_numbers<[1], [0], [0], [1], [0, 0, 1, 1], [], []>} : vector<8x128xf32>, vector<128x128xf32>, vector<8x128xf32> -> vector<8x128xf32>
    %482 = arith.addf %448, %481 : vector<8x128xf32>
    %483 = vector.broadcast %16 : vector<1x128xf32> to vector<8x128xf32>
    %484 = arith.addf %482, %483 : vector<8x128xf32>
    %cst_198 = arith.constant dense<0.000000e+00> : vector<8x128xf32>
    %485 = tpu.matmul %484, %8, %cst_198 {dimension_numbers = #tpu.dot_dimension_numbers<[1], [0], [0], [1], [0, 0, 1, 1], [], []>} : vector<8x128xf32>, vector<128x128xf32>, vector<8x128xf32> -> vector<8x128xf32>
    %486 = vector.broadcast %17 : vector<1x128xf32> to vector<8x128xf32>
    %487 = arith.addf %485, %486 : vector<8x128xf32>
    %cst_199 = arith.constant 0.000000e+00 : f32
    %488 = vector.broadcast %cst_199 : f32 to vector<8x128xf32>
    %489 = arith.maximumf %487, %488 : vector<8x128xf32>
    %cst_200 = arith.constant dense<0.000000e+00> : vector<8x128xf32>
    %490 = tpu.matmul %489, %9, %cst_200 {dimension_numbers = #tpu.dot_dimension_numbers<[1], [0], [0], [1], [0, 0, 1, 1], [], []>} : vector<8x128xf32>, vector<128x128xf32>, vector<8x128xf32> -> vector<8x128xf32>
    %491 = vector.broadcast %18 : vector<1x128xf32> to vector<8x128xf32>
    %492 = arith.addf %490, %491 : vector<8x128xf32>
    %cst_201 = arith.constant 0.000000e+00 : f32
    %493 = vector.broadcast %cst_201 : f32 to vector<8x128xf32>
    %494 = arith.maximumf %492, %493 : vector<8x128xf32>
    %495 = arith.addf %484, %494 : vector<8x128xf32>
    %496 = math.tanh %448 : vector<8x128xf32>
    %497 = tpu.concatenate %458, %496 in 1 : vector<8x128xf32>, vector<8x128xf32> -> vector<8x256xf32>
    %cst_202 = arith.constant dense<0.000000e+00> : vector<8x256xf32>
    %498 = tpu.matmul %497, %10, %cst_202 {dimension_numbers = #tpu.dot_dimension_numbers<[1], [0], [0], [1], [0, 0, 1, 1], [], []>} : vector<8x256xf32>, vector<256x256xf32>, vector<8x256xf32> -> vector<8x256xf32>
    %499 = vector.broadcast %19 : vector<1x256xf32> to vector<8x256xf32>
    %500 = arith.addf %498, %499 : vector<8x256xf32>
    %501 = vector.extract_strided_slice %500 {offsets = [0, 0], sizes = [8, 128], strides = [1, 1]} : vector<8x256xf32> to vector<8x128xf32>
    %cst_203 = arith.constant 5.000000e-01 : f32
    %502 = vector.broadcast %cst_203 : f32 to vector<8x128xf32>
    %503 = arith.mulf %502, %501 : vector<8x128xf32>
    %504 = math.tanh %503 : vector<8x128xf32>
    %cst_204 = arith.constant 1.000000e+00 : f32
    %505 = vector.broadcast %cst_204 : f32 to vector<8x128xf32>
    %506 = arith.addf %504, %505 : vector<8x128xf32>
    %cst_205 = arith.constant 5.000000e-01 : f32
    %507 = vector.broadcast %cst_205 : f32 to vector<8x128xf32>
    %508 = arith.mulf %507, %506 : vector<8x128xf32>
    %509 = math.tanh %495 : vector<8x128xf32>
    %510 = arith.mulf %508, %509 : vector<8x128xf32>
    %511 = vector.extract_strided_slice %500 {offsets = [0, 128], sizes = [8, 128], strides = [1, 1]} : vector<8x256xf32> to vector<8x128xf32>
    %cst_206 = arith.constant 5.000000e-01 : f32
    %512 = vector.broadcast %cst_206 : f32 to vector<8x128xf32>
    %513 = arith.mulf %512, %511 : vector<8x128xf32>
    %514 = math.tanh %513 : vector<8x128xf32>
    %cst_207 = arith.constant 1.000000e+00 : f32
    %515 = vector.broadcast %cst_207 : f32 to vector<8x128xf32>
    %516 = arith.addf %514, %515 : vector<8x128xf32>
    %cst_208 = arith.constant 5.000000e-01 : f32
    %517 = vector.broadcast %cst_208 : f32 to vector<8x128xf32>
    %518 = arith.mulf %517, %516 : vector<8x128xf32>
    %519 = arith.mulf %518, %448 : vector<8x128xf32>
    %520 = arith.addf %510, %519 : vector<8x128xf32>
    %521 = arith.index_cast %c6_i32 : i32 to index
    %c0_209 = arith.constant 0 : index
    %c0_210 = arith.constant 0 : index
    %522 = vector.load %arg21[%521, %c0_209, %c0_210] : memref<8x8x128xf32, #tpu.memory_space<vmem>>, vector<1x8x128xf32>
    %523 = vector.shape_cast %522 : vector<1x8x128xf32> to vector<8x128xf32>
    %524 = vector.shape_cast %520 : vector<8x128xf32> to vector<1x8x128xf32>
    tpu.vector_store %arg21[%521, %c0_209, %c0_210], %524 {strides = array<i32>} : memref<8x8x128xf32, #tpu.memory_space<vmem>>, vector<1x8x128xf32>,
    %c7_i32 = arith.constant 7 : i32
    %525 = arith.index_cast %c7_i32 : i32 to index
    %c0_211 = arith.constant 0 : index
    %c0_212 = arith.constant 0 : index
    %526 = vector.load %arg2[%525, %c0_211, %c0_212] : memref<8x8x128xf32, #tpu.memory_space<vmem>>, vector<1x8x128xf32>
    %527 = vector.shape_cast %526 : vector<1x8x128xf32> to vector<8x128xf32>
    %cst_213 = arith.constant dense<0.000000e+00> : vector<8x128xf32>
    %528 = tpu.matmul %527, %3, %cst_213 {dimension_numbers = #tpu.dot_dimension_numbers<[1], [0], [0], [1], [0, 0, 1, 1], [], []>} : vector<8x128xf32>, vector<128x128xf32>, vector<8x128xf32> -> vector<8x128xf32>
    %529 = vector.broadcast %13 : vector<1x128xf32> to vector<8x128xf32>
    %530 = arith.addf %528, %529 : vector<8x128xf32>
    %cst_214 = arith.constant dense<0.000000e+00> : vector<8x128xf32>
    %531 = tpu.matmul %520, %4, %cst_214 {dimension_numbers = #tpu.dot_dimension_numbers<[1], [0], [0], [1], [0, 0, 1, 1], [], []>} : vector<8x128xf32>, vector<128x128xf32>, vector<8x128xf32> -> vector<8x128xf32>
    %532 = vector.broadcast %14 : vector<1x128xf32> to vector<8x128xf32>
    %533 = arith.addf %531, %532 : vector<8x128xf32>
    %534 = arith.subf %520, %530 : vector<8x128xf32>
    %cst_215 = arith.constant dense<0.000000e+00> : vector<8x256xf32>
    %535 = tpu.matmul %534, %5, %cst_215 {dimension_numbers = #tpu.dot_dimension_numbers<[1], [0], [0], [1], [0, 0, 1, 1], [], []>} : vector<8x128xf32>, vector<128x256xf32>, vector<8x256xf32> -> vector<8x256xf32>
    %536 = vector.extract_strided_slice %535 {offsets = [0, 0], sizes = [8, 128], strides = [1, 1]} : vector<8x256xf32> to vector<8x128xf32>
    %537 = vector.extract_strided_slice %535 {offsets = [0, 128], sizes = [8, 128], strides = [1, 1]} : vector<8x256xf32> to vector<8x128xf32>
    %cst_216 = arith.constant dense<0.000000e+00> : vector<8x128xf32>
    %538 = tpu.matmul %530, %6, %cst_216 {dimension_numbers = #tpu.dot_dimension_numbers<[1], [0], [0], [1], [0, 0, 1, 1], [], []>} : vector<8x128xf32>, vector<128x128xf32>, vector<8x128xf32> -> vector<8x128xf32>
    %539 = vector.broadcast %15 : vector<1x128xf32> to vector<8x128xf32>
    %540 = arith.addf %538, %539 : vector<8x128xf32>
    %541 = arith.mulf %533, %536 : vector<8x128xf32>
    %cst_217 = arith.constant dense<0.000000e+00> : vector<8x4xf32>
    %542 = tpu.matmul %541, %11, %cst_217 {dimension_numbers = #tpu.dot_dimension_numbers<[1], [0], [0], [1], [0, 0, 1, 1], [], []>} : vector<8x128xf32>, vector<128x4xf32>, vector<8x4xf32> -> vector<8x4xf32>
    %cst_218 = arith.constant 5.000000e-01 : f32
    %543 = vector.broadcast %cst_218 : f32 to vector<8x4xf32>
    %544 = arith.mulf %543, %542 : vector<8x4xf32>
    %545 = math.tanh %544 : vector<8x4xf32>
    %cst_219 = arith.constant 1.000000e+00 : f32
    %546 = vector.broadcast %cst_219 : f32 to vector<8x4xf32>
    %547 = arith.addf %545, %546 : vector<8x4xf32>
    %cst_220 = arith.constant 5.000000e-01 : f32
    %548 = vector.broadcast %cst_220 : f32 to vector<8x4xf32>
    %549 = arith.mulf %548, %547 : vector<8x4xf32>
    %cst_221 = arith.constant dense<0.000000e+00> : vector<8x128xf32>
    %550 = tpu.matmul %549, %12, %cst_221 {dimension_numbers = #tpu.dot_dimension_numbers<[1], [0], [0], [1], [0, 0, 1, 1], [], []>} : vector<8x4xf32>, vector<4x128xf32>, vector<8x128xf32> -> vector<8x128xf32>
    %551 = arith.mulf %550, %537 : vector<8x128xf32>
    %552 = arith.addf %540, %551 : vector<8x128xf32>
    %cst_222 = arith.constant dense<0.000000e+00> : vector<8x128xf32>
    %553 = tpu.matmul %552, %7, %cst_222 {dimension_numbers = #tpu.dot_dimension_numbers<[1], [0], [0], [1], [0, 0, 1, 1], [], []>} : vector<8x128xf32>, vector<128x128xf32>, vector<8x128xf32> -> vector<8x128xf32>
    %554 = arith.addf %520, %553 : vector<8x128xf32>
    %555 = vector.broadcast %16 : vector<1x128xf32> to vector<8x128xf32>
    %556 = arith.addf %554, %555 : vector<8x128xf32>
    %cst_223 = arith.constant dense<0.000000e+00> : vector<8x128xf32>
    %557 = tpu.matmul %556, %8, %cst_223 {dimension_numbers = #tpu.dot_dimension_numbers<[1], [0], [0], [1], [0, 0, 1, 1], [], []>} : vector<8x128xf32>, vector<128x128xf32>, vector<8x128xf32> -> vector<8x128xf32>
    %558 = vector.broadcast %17 : vector<1x128xf32> to vector<8x128xf32>
    %559 = arith.addf %557, %558 : vector<8x128xf32>
    %cst_224 = arith.constant 0.000000e+00 : f32
    %560 = vector.broadcast %cst_224 : f32 to vector<8x128xf32>
    %561 = arith.maximumf %559, %560 : vector<8x128xf32>
    %cst_225 = arith.constant dense<0.000000e+00> : vector<8x128xf32>
    %562 = tpu.matmul %561, %9, %cst_225 {dimension_numbers = #tpu.dot_dimension_numbers<[1], [0], [0], [1], [0, 0, 1, 1], [], []>} : vector<8x128xf32>, vector<128x128xf32>, vector<8x128xf32> -> vector<8x128xf32>
    %563 = vector.broadcast %18 : vector<1x128xf32> to vector<8x128xf32>
    %564 = arith.addf %562, %563 : vector<8x128xf32>
    %cst_226 = arith.constant 0.000000e+00 : f32
    %565 = vector.broadcast %cst_226 : f32 to vector<8x128xf32>
    %566 = arith.maximumf %564, %565 : vector<8x128xf32>
    %567 = arith.addf %556, %566 : vector<8x128xf32>
    %568 = math.tanh %520 : vector<8x128xf32>
    %569 = tpu.concatenate %530, %568 in 1 : vector<8x128xf32>, vector<8x128xf32> -> vector<8x256xf32>
    %cst_227 = arith.constant dense<0.000000e+00> : vector<8x256xf32>
    %570 = tpu.matmul %569, %10, %cst_227 {dimension_numbers = #tpu.dot_dimension_numbers<[1], [0], [0], [1], [0, 0, 1, 1], [], []>} : vector<8x256xf32>, vector<256x256xf32>, vector<8x256xf32> -> vector<8x256xf32>
    %571 = vector.broadcast %19 : vector<1x256xf32> to vector<8x256xf32>
    %572 = arith.addf %570, %571 : vector<8x256xf32>
    %573 = vector.extract_strided_slice %572 {offsets = [0, 0], sizes = [8, 128], strides = [1, 1]} : vector<8x256xf32> to vector<8x128xf32>
    %cst_228 = arith.constant 5.000000e-01 : f32
    %574 = vector.broadcast %cst_228 : f32 to vector<8x128xf32>
    %575 = arith.mulf %574, %573 : vector<8x128xf32>
    %576 = math.tanh %575 : vector<8x128xf32>
    %cst_229 = arith.constant 1.000000e+00 : f32
    %577 = vector.broadcast %cst_229 : f32 to vector<8x128xf32>
    %578 = arith.addf %576, %577 : vector<8x128xf32>
    %cst_230 = arith.constant 5.000000e-01 : f32
    %579 = vector.broadcast %cst_230 : f32 to vector<8x128xf32>
    %580 = arith.mulf %579, %578 : vector<8x128xf32>
    %581 = math.tanh %567 : vector<8x128xf32>
    %582 = arith.mulf %580, %581 : vector<8x128xf32>
    %583 = vector.extract_strided_slice %572 {offsets = [0, 128], sizes = [8, 128], strides = [1, 1]} : vector<8x256xf32> to vector<8x128xf32>
    %cst_231 = arith.constant 5.000000e-01 : f32
    %584 = vector.broadcast %cst_231 : f32 to vector<8x128xf32>
    %585 = arith.mulf %584, %583 : vector<8x128xf32>
    %586 = math.tanh %585 : vector<8x128xf32>
    %cst_232 = arith.constant 1.000000e+00 : f32
    %587 = vector.broadcast %cst_232 : f32 to vector<8x128xf32>
    %588 = arith.addf %586, %587 : vector<8x128xf32>
    %cst_233 = arith.constant 5.000000e-01 : f32
    %589 = vector.broadcast %cst_233 : f32 to vector<8x128xf32>
    %590 = arith.mulf %589, %588 : vector<8x128xf32>
    %591 = arith.mulf %590, %520 : vector<8x128xf32>
    %592 = arith.addf %582, %591 : vector<8x128xf32>
    %593 = arith.index_cast %c7_i32 : i32 to index
    %c0_234 = arith.constant 0 : index
    %c0_235 = arith.constant 0 : index
    %594 = vector.load %arg21[%593, %c0_234, %c0_235] : memref<8x8x128xf32, #tpu.memory_space<vmem>>, vector<1x8x128xf32>
    %595 = vector.shape_cast %594 : vector<1x8x128xf32> to vector<8x128xf32>
    %596 = vector.shape_cast %592 : vector<8x128xf32> to vector<1x8x128xf32>
    tpu.vector_store %arg21[%593, %c0_234, %c0_235], %596 {strides = array<i32>} : memref<8x8x128xf32, #tpu.memory_space<vmem>>, vector<1x8x128xf32>,
    %c8_i32 = arith.constant 8 : i32
    %c0_236 = arith.constant 0 : index
    %c0_237 = arith.constant 0 : index
    %597 = vector.load %arg22[%c0_236, %c0_237] : memref<8x128xf32, #tpu.memory_space<vmem>>, vector<8x128xf32>
    tpu.vector_store %arg22[%c0_236, %c0_237], %592 {strides = array<i32>} : memref<8x128xf32, #tpu.memory_space<vmem>>, vector<8x128xf32>,
    return
  }
  func.func @transform_0(%arg0: i32, %arg1: i32) -> (i32, i32, i32) {
    %c0_i32 = arith.constant 0 : i32
    %c0_i32_0 = arith.constant 0 : i32
    return %arg1, %arg0, %c0_i32 : i32, i32, i32
  }
  func.func @transform_1(%arg0: i32, %arg1: i32) -> (i32, i32) {
    %c0_i32 = arith.constant 0 : i32
    %c0_i32_0 = arith.constant 0 : i32
    return %arg0, %c0_i32 : i32, i32
  }
  func.func @transform_2(%arg0: i32, %arg1: i32) -> (i32, i32) {
    %c0_i32 = arith.constant 0 : i32
    %c0_i32_0 = arith.constant 0 : i32
    %c0_i32_1 = arith.constant 0 : i32
    return %c0_i32, %c0_i32_0 : i32, i32
  }
  func.func @transform_3(%arg0: i32, %arg1: i32) -> (i32, i32) {
    %c0_i32 = arith.constant 0 : i32
    %c0_i32_0 = arith.constant 0 : i32
    %c0_i32_1 = arith.constant 0 : i32
    return %c0_i32, %c0_i32_0 : i32, i32
  }
  func.func @transform_4(%arg0: i32, %arg1: i32) -> (i32, i32) {
    %c0_i32 = arith.constant 0 : i32
    %c0_i32_0 = arith.constant 0 : i32
    %c0_i32_1 = arith.constant 0 : i32
    return %c0_i32, %c0_i32_0 : i32, i32
  }
  func.func @transform_5(%arg0: i32, %arg1: i32) -> (i32, i32) {
    %c0_i32 = arith.constant 0 : i32
    %c0_i32_0 = arith.constant 0 : i32
    %c0_i32_1 = arith.constant 0 : i32
    return %c0_i32, %c0_i32_0 : i32, i32
  }
  func.func @transform_6(%arg0: i32, %arg1: i32) -> (i32, i32) {
    %c0_i32 = arith.constant 0 : i32
    %c0_i32_0 = arith.constant 0 : i32
    %c0_i32_1 = arith.constant 0 : i32
    return %c0_i32, %c0_i32_0 : i32, i32
  }
  func.func @transform_7(%arg0: i32, %arg1: i32) -> (i32, i32) {
    %c0_i32 = arith.constant 0 : i32
    %c0_i32_0 = arith.constant 0 : i32
    %c0_i32_1 = arith.constant 0 : i32
    return %c0_i32, %c0_i32_0 : i32, i32
  }
  func.func @transform_8(%arg0: i32, %arg1: i32) -> (i32, i32) {
    %c0_i32 = arith.constant 0 : i32
    %c0_i32_0 = arith.constant 0 : i32
    %c0_i32_1 = arith.constant 0 : i32
    return %c0_i32, %c0_i32_0 : i32, i32
  }
  func.func @transform_9(%arg0: i32, %arg1: i32) -> (i32, i32) {
    %c0_i32 = arith.constant 0 : i32
    %c0_i32_0 = arith.constant 0 : i32
    %c0_i32_1 = arith.constant 0 : i32
    return %c0_i32, %c0_i32_0 : i32, i32
  }
  func.func @transform_10(%arg0: i32, %arg1: i32) -> (i32, i32) {
    %c0_i32 = arith.constant 0 : i32
    %c0_i32_0 = arith.constant 0 : i32
    %c0_i32_1 = arith.constant 0 : i32
    return %c0_i32, %c0_i32_0 : i32, i32
  }
  func.func @transform_11(%arg0: i32, %arg1: i32) -> (i32, i32) {
    %c0_i32 = arith.constant 0 : i32
    %c0_i32_0 = arith.constant 0 : i32
    %c0_i32_1 = arith.constant 0 : i32
    return %c0_i32, %c0_i32_0 : i32, i32
  }
  func.func @transform_12(%arg0: i32, %arg1: i32) -> (i32, i32) {
    %c0_i32 = arith.constant 0 : i32
    %c0_i32_0 = arith.constant 0 : i32
    %c0_i32_1 = arith.constant 0 : i32
    return %c0_i32, %c0_i32_0 : i32, i32
  }
  func.func @transform_13(%arg0: i32, %arg1: i32) -> (i32, i32) {
    %c0_i32 = arith.constant 0 : i32
    %c0_i32_0 = arith.constant 0 : i32
    %c0_i32_1 = arith.constant 0 : i32
    return %c0_i32, %c0_i32_0 : i32, i32
  }
  func.func @transform_14(%arg0: i32, %arg1: i32) -> (i32, i32) {
    %c0_i32 = arith.constant 0 : i32
    %c0_i32_0 = arith.constant 0 : i32
    %c0_i32_1 = arith.constant 0 : i32
    return %c0_i32, %c0_i32_0 : i32, i32
  }
  func.func @transform_15(%arg0: i32, %arg1: i32) -> (i32, i32) {
    %c0_i32 = arith.constant 0 : i32
    %c0_i32_0 = arith.constant 0 : i32
    %c0_i32_1 = arith.constant 0 : i32
    return %c0_i32, %c0_i32_0 : i32, i32
  }
  func.func @transform_16(%arg0: i32, %arg1: i32) -> (i32, i32) {
    %c0_i32 = arith.constant 0 : i32
    %c0_i32_0 = arith.constant 0 : i32
    %c0_i32_1 = arith.constant 0 : i32
    return %c0_i32, %c0_i32_0 : i32, i32
  }
  func.func @transform_17(%arg0: i32, %arg1: i32) -> (i32, i32) {
    %c0_i32 = arith.constant 0 : i32
    %c0_i32_0 = arith.constant 0 : i32
    %c0_i32_1 = arith.constant 0 : i32
    return %c0_i32, %c0_i32_0 : i32, i32
  }
  func.func @transform_18(%arg0: i32, %arg1: i32) -> (i32, i32) {
    %c0_i32 = arith.constant 0 : i32
    %c0_i32_0 = arith.constant 0 : i32
    %c0_i32_1 = arith.constant 0 : i32
    return %c0_i32, %c0_i32_0 : i32, i32
  }
  func.func @transform_19(%arg0: i32, %arg1: i32) -> (i32, i32, i32) {
    %c0_i32 = arith.constant 0 : i32
    %c0_i32_0 = arith.constant 0 : i32
    return %arg1, %arg0, %c0_i32 : i32, i32, i32
  }
}

</mosaic_0001>

<bundles_post_ra>
// kernel: tpu_custom_call.1
= control target key start
LH: loop header
LB: loop body
LE: loop exit
PB: predicated region body
PF: predicated region fallthrough
CT: control target
= control target key end

     0   :  { %s15515_s0 = inlined_call_operand.hbm [shape: f32[8,8,128], index: 0, kind: input, shape index: {}]   ;;  %s15516_s1 = inlined_call_operand.hbm [shape: f32[8,128], index: 1, kind: input, shape index: {}]   ;;  %s15517_s2 = inlined_call_operand.vmem [shape: f32[128,128], index: 2, kind: input, shape index: {}]   ;;  %s15518_s3 = inlined_call_operand.vmem [shape: f32[1,128], index: 3, kind: input, shape index: {}]   ;;  %s15519_s4 = inlined_call_operand.hbm [shape: f32[128,128], index: 4, kind: input, shape index: {}]   ;;  %s15520_s5 = inlined_call_operand.vmem [shape: f32[1,128], index: 5, kind: input, shape index: {}]   ;;  %s15521_s6 = inlined_call_operand.hbm [shape: f32[128,256], index: 6, kind: input, shape index: {}]   ;;  %s15522_s7 = inlined_call_operand.hbm [shape: f32[128,128], index: 7, kind: input, shape index: {}]   ;;  %s15523_s8 = inlined_call_operand.vmem [shape: f32[1,128], index: 8, kind: input, shape index: {}]   ;;  %s15524_s9 = inlined_call_operand.hbm [shape: f32[128,128], index: 9, kind: input, shape index: {}]   ;;  %s15525_s10 = inlined_call_operand.vmem [shape: f32[1,128], index: 10, kind: input, shape index: {}]   ;;  %s15526_s11 = inlined_call_operand.hbm [shape: f32[128,128], index: 11, kind: input, shape index: {}]   ;;  %s15527_s12 = inlined_call_operand.vmem [shape: f32[1,128], index: 12, kind: input, shape index: {}]   ;;  %s15528_s13 = inlined_call_operand.hbm [shape: f32[128,128], index: 13, kind: input, shape index: {}]   ;;  %s15529_s14 = inlined_call_operand.vmem [shape: f32[1,128], index: 14, kind: input, shape index: {}]   ;;  %s15530_s15 = inlined_call_operand.hbm [shape: f32[256,256], index: 15, kind: input, shape index: {}]   ;;  %s15531_s16 = inlined_call_operand.vmem [shape: f32[1,256], index: 16, kind: input, shape index: {}]   ;;  %s15532_s17 = inlined_call_operand.vmem [shape: f32[128,4], index: 17, kind: input, shape index: {}]   ;;  %s15533_s18 = inlined_call_operand.vmem [shape: f32[4,128], index: 18, kind: input, shape index: {}]   ;;  %s15534_s19 = inlined_call_operand.hbm [shape: f32[8,8,128], index: 19, kind: output, shape index: {}]  }
   0x1   :  { %16016 = sst [smem:[#allocation154_spill]] %s15515_s0 }
   0x2   :  { %16017 = sst [smem:[#allocation155_spill]] %s15516_s1 }
   0x3   :  { %16018 = sst [smem:[#allocation156_spill]] %s15517_s2 }
   0x4   :  { %16019 = sst [smem:[#allocation157_spill]] %s15518_s3 }
   0x5   :  { %24 = vsyncpa [#allocation4], 0 }
   0x6   :  { %25 = vsyncpa [#allocation7], 0 }
   0x7   :  { %26 = vsyncpa [#allocation10], 0 }
   0x8   :  { %27 = vsyncpa [#allocation13], 0 }
   0x9   :  { %28 = vsyncpa [#allocation16], 0 }
   0xa   :  { %29 = vsyncpa [#allocation5], 0  ;;  %s10369_s0 = smov [#allocation6]   ;;  %s10370_s20 = smov [#allocation9]  }
   0xb   :  { %s48_s30 = sshll.u32 %s10369_s0, 4  ;;  %s75_s21 = sshll.u32 %s10370_s20, 4  ;;  %s49_s30 = int_to_ptr.vmem [resolvable:$true] %s48_s30  ;;  %s76_s21 = int_to_ptr.vmem [resolvable:$true] %s75_s21 }
   0xc   :  { %s10165_s1 = scalar_lea.vmem %s49_s30, 128  ;;  %p10170_p1 = scmp.lt.s32.totalorder %s49_s30, %s49_s30 }
   0xd   :  { %p10166_p0 = scmp.ne.s32.totalorder %s49_s30, %s10165_s1  ;;  %p10171_p2 = scmp.lt.s32.totalorder %s10165_s1, %s10165_s1 }
   0xf   :  { %p10172_p3 = por %p10171_p2, %p10170_p1 }
  0x11   :  { %p10173_p4 = pnand %p10172_p3, %p10166_p0 }
  0x13   :  { %10176 = shalt.err (!%p10173_p4)
}
  0x14   :  { %s16020_s23 = sld [smem:[#allocation155_spill]]  ;;  %s10185_s24 = scalar_lea.vmem %s76_s21, 4096 }
  0x15   :  { %p10186_p5 = scmp.ne.s32.totalorder %s76_s21, %s10185_s24  ;;  %p10190_p6 = scmp.lt.s32.totalorder %s76_s21, %s76_s21 }
  0x16   :  { %p10191_p7 = scmp.lt.s32.totalorder %s10185_s24, %s10185_s24 }
  0x18   :  { %p10192_p8 = por %p10191_p7, %p10190_p6 }
  0x1a   :  { %51 = dma.hbm_to_vmem [thread:$0]  %s16020_s23, 128, %s49_s30, [#allocation7]  }
  0x1b   :  { %p10193_p9 = pnand %p10192_p8, %p10186_p5 }
  0x1d   :  { %10196 = shalt.err (!%p10193_p9)
}
  0x1e   :  { %s10371_s25 = smov 256   ;;  %s10372_s3 = smov 16  }
  0x1f   :  { %81 = dma.hbm_to_vmem [thread:$0]  %s15521_s6, 4096, %s76_s21, [#allocation10], %s10371_s25, %s10371_s25, %s10372_s3  }
  0x20   :  { %s10373_s28 = smov [#allocation12]   ;;  %s10374_s0 = smov [#allocation15]  }
  0x21   :  { %s101_s29 = sshll.u32 %s10373_s28, 4  ;;  %s129_s30 = sshll.u32 %s10374_s0, 4  ;;  %s102_s29 = int_to_ptr.vmem [resolvable:$true] %s101_s29  ;;  %s130_s30 = int_to_ptr.vmem [resolvable:$true] %s129_s30 }
  0x22   :  { %s10205_s20 = scalar_lea.vmem %s102_s29, 2048  ;;  %p10210_p11 = scmp.lt.s32.totalorder %s102_s29, %s102_s29 }
  0x23   :  { %p10206_p10 = scmp.ne.s32.totalorder %s102_s29, %s10205_s20  ;;  %p10211_p12 = scmp.lt.s32.totalorder %s10205_s20, %s10205_s20 }
  0x25   :  { %p10212_p13 = por %p10211_p12, %p10210_p11 }
  0x27   :  { %p10213_p0 = pnand %p10212_p13, %p10206_p10 }
  0x29   :  { %10216 = shalt.err (!%p10213_p0)
}
  0x2a   :  { %s10375_s1 = smov 128   ;;  %s10376_s22 = smov 8  }
  0x2b   :  { %107 = dma.hbm_to_vmem [thread:$0]  %s15524_s9, 2048, %s102_s29, [#allocation13], %s10375_s1, %s10375_s1, %s10376_s22  }
  0x2c   :  { %s10225_s21 = scalar_lea.vmem %s130_s30, 2048  ;;  %p10230_p2 = scmp.lt.s32.totalorder %s130_s30, %s130_s30 }
  0x2d   :  { %p10226_p1 = scmp.ne.s32.totalorder %s130_s30, %s10225_s21  ;;  %p10231_p3 = scmp.lt.s32.totalorder %s10225_s21, %s10225_s21 }
  0x2f   :  { %p10232_p4 = por %p10231_p3, %p10230_p2 }
  0x31   :  { %p10233_p5 = pnand %p10232_p4, %p10226_p1 }
  0x33   :  { %10236 = shalt.err (!%p10233_p5)
}
  0x34   :  { %135 = dma.hbm_to_vmem [thread:$0]  %s15528_s13, 2048, %s130_s30, [#allocation16], %s10375_s1, %s10375_s1, %s10376_s22  }
  0x35   :  { %s10377_s26 = smov [#allocation3]   ;;  %s10378_s28 = smov [#allocation8]  }
  0x36   :  { %s35_s27 = sshll.u32 %s10377_s26, 4  ;;  %s61_s0 = sshll.u32 %s10378_s28, 4  ;;  %s36_s27 = int_to_ptr.vmem [resolvable:$true] %s35_s27  ;;  %s62_s0 = int_to_ptr.vmem [resolvable:$true] %s61_s0 }
  0x37   :  { %s10245_s9 = scalar_lea.vmem %s36_s27, 1024  ;;  %p10250_p7 = scmp.lt.s32.totalorder %s36_s27, %s36_s27 }
  0x38   :  { %p10246_p6 = scmp.ne.s32.totalorder %s36_s27, %s10245_s9  ;;  %p10251_p8 = scmp.lt.s32.totalorder %s10245_s9, %s10245_s9 }
  0x3a   :  { %p10252_p9 = por %p10251_p8, %p10250_p7 }
  0x3c   :  { %p10253_p10 = pnand %p10252_p9, %p10246_p6 }
  0x3e   :  { %10256 = shalt.err (!%p10253_p10)
}
  0x3f   :  { %s16021_s2 = sld [smem:[#allocation154_spill]]  ;;  %s10265_s13 = scalar_lea.vmem %s62_s0, 2048 }
  0x40   :  { %p10266_p11 = scmp.ne.s32.totalorder %s62_s0, %s10265_s13  ;;  %p10270_p12 = scmp.lt.s32.totalorder %s62_s0, %s62_s0 }
  0x41   :  { %p10271_p13 = scmp.lt.s32.totalorder %s10265_s13, %s10265_s13 }
  0x43   :  { %p10272_p0 = por %p10271_p13, %p10270_p12 }
  0x45   :  { %41 = dma.hbm_to_vmem [thread:$0]  %s16021_s2, 1024, %s36_s27, [#allocation4], %s10375_s1, %s10375_s1, %s10376_s22  }
  0x46   :  { %p10273_p1 = pnand %p10272_p0, %p10266_p11 }
  0x48   :  { %10276 = shalt.err (!%p10273_p1)
}
  0x49   :  { %67 = dma.hbm_to_vmem [thread:$0]  %s15519_s4, 2048, %s62_s0, [#allocation7], %s10375_s1, %s10375_s1, %s10376_s22  }
  0x4a   :  { %s10379_s21 = smov [#allocation11]   ;;  %s10380_s24 = smov [#allocation14]  }
  0x4b   :  { %s87_s23 = sshll.u32 %s10379_s21, 4  ;;  %s115_s26 = sshll.u32 %s10380_s24, 4  ;;  %s88_s23 = int_to_ptr.vmem [resolvable:$true] %s87_s23  ;;  %s116_s26 = int_to_ptr.vmem [resolvable:$true] %s115_s26 }
  0x4c   :  { %s10285_s27 = scalar_lea.vmem %s88_s23, 2048  ;;  %p10290_p3 = scmp.lt.s32.totalorder %s88_s23, %s88_s23 }
  0x4d   :  { %p10286_p2 = scmp.ne.s32.totalorder %s88_s23, %s10285_s27  ;;  %p10291_p4 = scmp.lt.s32.totalorder %s10285_s27, %s10285_s27 }
  0x4f   :  { %p10292_p5 = por %p10291_p4, %p10290_p3 }
  0x51   :  { %p10293_p6 = pnand %p10292_p5, %p10286_p2 }
  0x53   :  { %10296 = shalt.err (!%p10293_p6)
}
  0x54   :  { %93 = dma.hbm_to_vmem [thread:$0]  %s15522_s7, 2048, %s88_s23, [#allocation10], %s10375_s1, %s10375_s1, %s10376_s22  }
  0x55   :  { %s10305_s4 = scalar_lea.vmem %s116_s26, 2048  ;;  %p10310_p8 = scmp.lt.s32.totalorder %s116_s26, %s116_s26 }
  0x56   :  { %p10306_p7 = scmp.ne.s32.totalorder %s116_s26, %s10305_s4  ;;  %p10311_p9 = scmp.lt.s32.totalorder %s10305_s4, %s10305_s4 }
  0x58   :  { %p10312_p10 = por %p10311_p9, %p10310_p8 }
  0x5a   :  { %p10313_p11 = pnand %p10312_p10, %p10306_p7 }
  0x5c   :  { %10316 = shalt.err (!%p10313_p11)
}
  0x5d   :  { %121 = dma.hbm_to_vmem [thread:$0]  %s15526_s11, 2048, %s116_s26, [#allocation13], %s10375_s1, %s10375_s1, %s10376_s22  }
  0x5e   :  { %s10381_s20 = smov [#allocation17]  }
  0x5f   :  { %s143_s2 = sshll.u32 %s10381_s20, 4  ;;  %s144_s2 = int_to_ptr.vmem [resolvable:$true] %s143_s2 }
  0x60   :  { %s10325_s13 = scalar_lea.vmem %s144_s2, 8192  ;;  %p10330_p13 = scmp.lt.s32.totalorder %s144_s2, %s144_s2 }
  0x61   :  { %p10326_p12 = scmp.ne.s32.totalorder %s144_s2, %s10325_s13  ;;  %p10331_p0 = scmp.lt.s32.totalorder %s10325_s13, %s10325_s13 }
  0x63   :  { %p10332_p1 = por %p10331_p0, %p10330_p13 }
  0x65   :  { %p10333_p2 = pnand %p10332_p1, %p10326_p12 }
  0x67   :  { %10336 = shalt.err (!%p10333_p2)
}
  0x68   :  { %149 = dma.hbm_to_vmem [thread:$0]  %s15530_s15, 8192, %s144_s2, [#allocation16], %s10371_s25, %s10371_s25, %s10372_s3  }
  0x69   :  { %10357 = dma.done.wait [#allocation4], 1024  }
  0x6a   :  { %10358 = vsyncadd [#allocation4], 4294966272 }
  0x6b   :  { %10359 = dma.done.wait [#allocation7], 2176  }
  0x6c   :  { %10360 = vsyncadd [#allocation7], 4294965120 }
  0x6d   :  { %10361 = dma.done.wait [#allocation10], 6144  }
  0x6e   :  { %10362 = vsyncadd [#allocation10], 4294961152 }
  0x6f   :  { %10363 = dma.done.wait [#allocation13], 4096  }
  0x70   :  { %10364 = vsyncadd [#allocation13], 4294963200 }
  0x71   :  { %10365 = dma.done.wait [#allocation16], 10240  }
  0x72   :  { %10366 = vsyncadd [#allocation16], 4294957056  ;;  %v15564_v0 = vmov 0.0   ;;  %vm10383_vm0 = vmmov 0   ;;  %s16022_s25 = sld [smem:[#allocation156_spill]]  ;;  %v220_v5 = vld [vmem:[#allocation8 + $0x78] sm:$0xff] }
  0x73   :  { %7348 = vmatprep.subr.mxu0 %v15564_v0  ;;  %7380 = vmatprep.mubr.msk.f32.mxu0 %vm10383_vm0, %v15564_v0  ;;  %v219_v7 = vld [vmem:[#allocation8 + $0x70] sm:$0xff]  ;;  %v218_v8 = vld [vmem:[#allocation8 + $0x68] sm:$0xff]  ;;  %v217_v10 = vld [vmem:[#allocation8 + $0x60] sm:$0xff]  ;;  %s16023_s2 = sld [smem:[#allocation157_spill]]  ;;  %vm786_vm1 = vcmask 1043456   ;;  %vm782_vm2 = vcmask 31744  }
  0x74   :  { %7383 = vmatprep.subr.mxu1 %v15564_v0  ;;  %7415 = vmatprep.mubr.msk.f32.mxu1 %vm10383_vm0, %v15564_v0  ;;  %v216_v12 = vld [vmem:[#allocation8 + $0x58] sm:$0xff]  ;;  %v215_v14 = vld [vmem:[#allocation8 + $0x50] sm:$0xff]  ;;  %v214_v16 = vld [vmem:[#allocation8 + $0x48] sm:$0xff] }
  0x75   :  { %7384 = vmatpush3.msra.mxu1 %v220_v5  ;;  %v213_v18 = vld [vmem:[#allocation8 + $0x40] sm:$0xff]  ;;  %v212_v20 = vld [vmem:[#allocation8 + $0x38] sm:$0xff]  ;;  %v211_v22 = vld [vmem:[#allocation8 + $0x30] sm:$0xff] }
  0x76   :  { %7385 = vmatprep.subr.mxu1 %v15564_v0  ;;  %v210_v24 = vld [vmem:[#allocation8 + $0x28] sm:$0xff]  ;;  %v209_v26 = vld [vmem:[#allocation8 + $0x20] sm:$0xff]  ;;  %v208_v28 = vld [vmem:[#allocation8 + $0x18] sm:$0xff] }
  0x77   :  { %7386 = vmatpush3.msra.mxu1 %v219_v7  ;;  %v406_v30 = vld [vmem:[#allocation3] sm:$0xff]  ;;  %v207_v31 = vld [vmem:[#allocation8 + $0x10] sm:$0xff]  ;;  %v206_v33 = vld [vmem:[#allocation8 + $0x8] sm:$0xff] }
  0x78   :  { %v204_v1 = vld [vmem:[%s16022_s25 + $0x78] sm:$0xff]  ;;  %v203_v2 = vld [vmem:[%s16022_s25 + $0x70] sm:$0xff]  ;;  %v202_v3 = vld [vmem:[%s16022_s25 + $0x68] sm:$0xff]  ;;  %7387 = vmatprep.subr.mxu1 %v15564_v0 }
  0x79   :  { %7349 = vmatpush3.msra.mxu0 %v204_v1  ;;  %v201_v4 = vld [vmem:[%s16022_s25 + $0x60] sm:$0xff]  ;;  %v200_v6 = vld [vmem:[%s16022_s25 + $0x58] sm:$0xff]  ;;  %v199_v9 = vld [vmem:[%s16022_s25 + $0x50] sm:$0xff]  ;;  %7388 = vmatpush3.msra.mxu1 %v218_v8 }
  0x7a   :  { %7350 = vmatprep.subr.mxu0 %v15564_v0  ;;  %v198_v11 = vld [vmem:[%s16022_s25 + $0x48] sm:$0xff]  ;;  %7389 = vmatprep.subr.mxu1 %v15564_v0  ;;  %v197_v13 = vld [vmem:[%s16022_s25 + $0x40] sm:$0xff]  ;;  %v196_v15 = vld [vmem:[%s16022_s25 + $0x38] sm:$0xff] }
  0x7b   :  { %7351 = vmatpush3.msra.mxu0 %v203_v2  ;;  %7390 = vmatpush3.msra.mxu1 %v217_v10  ;;  %v195_v17 = vld [vmem:[%s16022_s25 + $0x30] sm:$0xff]  ;;  %v194_v19 = vld [vmem:[%s16022_s25 + $0x28] sm:$0xff]  ;;  %v193_v21 = vld [vmem:[%s16022_s25 + $0x20] sm:$0xff] }
  0x7c   :  { %7352 = vmatprep.subr.mxu0 %v15564_v0  ;;  %7391 = vmatprep.subr.mxu1 %v15564_v0  ;;  %v192_v23 = vld [vmem:[%s16022_s25 + $0x18] sm:$0xff]  ;;  %v191_v25 = vld [vmem:[%s16022_s25 + $0x10] sm:$0xff]  ;;  %v190_v27 = vld [vmem:[%s16022_s25 + $0x8] sm:$0xff] }
  0x7d   :  { %7353 = vmatpush3.msra.mxu0 %v202_v3  ;;  %7392 = vmatpush3.msra.mxu1 %v216_v12  ;;  %v189_v29 = vld [vmem:[%s16022_s25] sm:$0xff]  ;;  %v10620_v34 = vld [vmem:[#allocation9 + $0xf0] sm:$0xff]  ;;  %v10622_v35 = vld [vmem:[#allocation9 + $0xe8] sm:$0xff] }
  0x7e   :  { %7354 = vmatprep.subr.mxu0 %v15564_v0  ;;  %7393 = vmatprep.subr.mxu1 %v15564_v0  ;;  %v10617_v32 = vld [vmem:[#allocation9 + $0xf8] sm:$0xff]  ;;  %v205_v36 = vld [vmem:[#allocation8] sm:$0xff]  ;;  %v10636_v41 = vld [vmem:[#allocation9 + $0xd0] sm:$0xff] }
  0x7f   :  { %7355 = vmatpush3.msra.mxu0 %v201_v4  ;;  %7394 = vmatpush3.msra.mxu1 %v215_v14  ;;  %v10626_v37 = vld [vmem:[#allocation9 + $0xe0] sm:$0xff]  ;;  %v10628_v38 = vld [vmem:[#allocation6] sm:$0xff]  ;;  %v267_v42 = vld [vmem:[#allocation11 + $0x70] sm:$0xff] }
  0x80   :  { %7356 = vmatprep.subr.mxu0 %v15564_v0  ;;  %7395 = vmatprep.subr.mxu1 %v15564_v0  ;;  %v268_v39 = vld [vmem:[#allocation11 + $0x78] sm:$0xff]  ;;  %v10640_v43 = vld [vmem:[#allocation9 + $0xc8] sm:$0xff]  ;;  %v10643_v44 = vld [vmem:[#allocation9 + $0xc0] sm:$0xff] }
  0x81   :  { %7357 = vmatpush3.msra.mxu0 %v200_v6  ;;  %7396 = vmatpush3.msra.mxu1 %v214_v16  ;;  %v10633_v40 = vld [vmem:[#allocation9 + $0xd8] sm:$0xff]  ;;  %v266_v45 = vld [vmem:[#allocation11 + $0x68] sm:$0xff]  ;;  %v10650_v47 = vld [vmem:[#allocation9 + $0xb0] sm:$0xff] }
  0x82   :  { %7358 = vmatprep.subr.mxu0 %v15564_v0  ;;  %7397 = vmatprep.subr.mxu1 %v15564_v0  ;;  %v10647_v46 = vld [vmem:[#allocation9 + $0xb8] sm:$0xff]  ;;  %v265_v48 = vld [vmem:[#allocation11 + $0x60] sm:$0xff]  ;;  %v10654_v49 = vld [vmem:[#allocation9 + $0xa8] sm:$0xff] }
  0x83   :  { %7359 = vmatpush3.msra.mxu0 %v199_v9  ;;  %7398 = vmatpush3.msra.mxu1 %v213_v18  ;;  %v10657_v50 = vld [vmem:[#allocation9 + $0xa0] sm:$0xff]  ;;  %v264_v51 = vld [vmem:[#allocation11 + $0x58] sm:$0xff]  ;;  %v10664_v53 = vld [vmem:[#allocation9 + $0x90] sm:$0xff] }
  0x84   :  { %7360 = vmatprep.subr.mxu0 %v15564_v0  ;;  %7399 = vmatprep.subr.mxu1 %v15564_v0  ;;  %v10661_v52 = vld [vmem:[#allocation9 + $0x98] sm:$0xff]  ;;  %v263_v54 = vld [vmem:[#allocation11 + $0x50] sm:$0xff]  ;;  %v10668_v55 = vld [vmem:[#allocation9 + $0x88] sm:$0xff] }
  0x85   :  { %7361 = vmatpush3.msra.mxu0 %v198_v11  ;;  %7400 = vmatpush3.msra.mxu1 %v212_v20  ;;  %v10671_v56 = vld [vmem:[#allocation9 + $0x80] sm:$0xff]  ;;  %v262_v57 = vld [vmem:[#allocation11 + $0x48] sm:$0xff]  ;;  %v10675_v58 = vld [vmem:[#allocation9 + $0x78] sm:$0xff] }
  0x86   :  { %7362 = vmatprep.subr.mxu0 %v15564_v0  ;;  %7401 = vmatprep.subr.mxu1 %v15564_v0  ;;  %v10678_v59 = vld [vmem:[#allocation9 + $0x70] sm:$0xff]  ;;  %v261_v60 = vld [vmem:[#allocation11 + $0x40] sm:$0xff]  ;;  %v10682_v61 = vld [vmem:[#allocation9 + $0x68] sm:$0xff] }
  0x87   :  { %7363 = vmatpush3.msra.mxu0 %v197_v13  ;;  %7402 = vmatpush3.msra.mxu1 %v211_v22  ;;  %v10685_v62 = vld [vmem:[#allocation9 + $0x60] sm:$0xff]  ;;  %v260_v63 = vld [vmem:[#allocation11 + $0x38] sm:$0xff]  ;;  %v10692_v2 = vld [vmem:[#allocation9 + $0x50] sm:$0xff] }
  0x88   :  { %7364 = vmatprep.subr.mxu0 %v15564_v0  ;;  %7403 = vmatprep.subr.mxu1 %v15564_v0  ;;  %v10689_v1 = vld [vmem:[#allocation9 + $0x58] sm:$0xff]  ;;  %v259_v3 = vld [vmem:[#allocation11 + $0x30] sm:$0xff]  ;;  %v10696_v4 = vld [vmem:[#allocation9 + $0x48] sm:$0xff] }
  0x89   :  { %7365 = vmatpush3.msra.mxu0 %v196_v15  ;;  %7404 = vmatpush3.msra.mxu1 %v210_v24  ;;  %v10699_v5 = vld [vmem:[#allocation9 + $0x40] sm:$0xff]  ;;  %v258_v6 = vld [vmem:[#allocation11 + $0x28] sm:$0xff]  ;;  %v10703_v7 = vld [vmem:[#allocation9 + $0x38] sm:$0xff] }
  0x8a   :  { %7366 = vmatprep.subr.mxu0 %v15564_v0  ;;  %7405 = vmatprep.subr.mxu1 %v15564_v0  ;;  %v10706_v8 = vld [vmem:[#allocation9 + $0x30] sm:$0xff]  ;;  %v257_v9 = vld [vmem:[#allocation11 + $0x20] sm:$0xff]  ;;  %v10710_v10 = vld [vmem:[#allocation9 + $0x28] sm:$0xff] }
  0x8b   :  { %7367 = vmatpush3.msra.mxu0 %v195_v17  ;;  %7406 = vmatpush3.msra.mxu1 %v209_v26  ;;  %v256_v11 = vld [vmem:[#allocation11 + $0x18] sm:$0xff]  ;;  %v255_v12 = vld [vmem:[#allocation11 + $0x10] sm:$0xff]  ;;  %v10722_v13 = vld [vmem:[#allocation9 + $0x20] sm:$0xff] }
  0x8c   :  { %7368 = vmatprep.subr.mxu0 %v15564_v0  ;;  %7407 = vmatprep.subr.mxu1 %v15564_v0  ;;  %v254_v14 = vld [vmem:[#allocation11 + $0x8] sm:$0xff]  ;;  %v10725_v15 = vld [vmem:[#allocation9 + $0x18] sm:$0xff]  ;;  %v10729_v16 = vld [vmem:[#allocation9 + $0x10] sm:$0xff] }
  0x8d   :  { %7369 = vmatpush3.msra.mxu0 %v194_v19  ;;  %7408 = vmatpush3.msra.mxu1 %v208_v28  ;;  %v253_v17 = vld [vmem:[#allocation11] sm:$0xff]  ;;  %v10732_v18 = vld [vmem:[#allocation9 + $0x8] sm:$0xff]  ;;  %v6358_v20 = vld [vmem:[%s16023_s2] ss:$0 sm:$0xff] }
  0x8e   :  { %7370 = vmatprep.subr.mxu0 %v15564_v0  ;;  %7409 = vmatprep.subr.mxu1 %v15564_v0  ;;  %v10735_v19 = vld [vmem:[#allocation9] sm:$0xff]  ;;  %v395_v26 = vld [vmem:[%s15532_s17 + $0x70] sm:$0xff] }
  0x8f   :  { %7371 = vmatpush3.msra.mxu0 %v193_v21  ;;  %7410 = vmatpush3.msra.mxu1 %v207_v31  ;;  %v394_v28 = vld [vmem:[%s15532_s17 + $0x68] sm:$0xff]  ;;  %v392_v31 = vld [vmem:[%s15532_s17 + $0x58] sm:$0xff] }
  0x90   :  { %7372 = vmatprep.subr.mxu0 %v15564_v0  ;;  %7411 = vmatprep.subr.mxu1 %v15564_v0 }
  0x91   :  { %7373 = vmatpush3.msra.mxu0 %v192_v23  ;;  %7412 = vmatpush3.msra.mxu1 %v206_v33  ;;  %v391_v33 = vld [vmem:[%s15532_s17 + $0x50] sm:$0xff] }
  0x92   :  { %7374 = vmatprep.subr.mxu0 %v15564_v0  ;;  %7413 = vmatprep.subr.mxu1 %v15564_v0 }
  0x93   :  { %7375 = vmatpush3.msra.mxu0 %v191_v25  ;;  %7414 = vmatpush3.msra.mxu1 %v205_v36  ;;  %v396_v25 = vld [vmem:[%s15532_s17 + $0x78] sm:$0xff]  ;;  %v390_v36 = vld [vmem:[%s15532_s17 + $0x48] sm:$0xff] }
  0x94   :  { %7376 = vmatprep.subr.mxu0 %v15564_v0  ;;  %7418 = vmatprep.subr.mxu1 %v15564_v0 }
  0x95   :  { %7377 = vmatpush3.msra.mxu0 %v190_v27  ;;  %7416 = vmatmul.mubr.f32.vlgmr.msra.gmra.mxu1 %v10628_v38 }
  0x96   :  { %7378 = vmatprep.subr.mxu0 %v15564_v0  ;;  %7419 = vmatpush3.msra.mxu1 %v268_v39  ;;  %v389_v39 = vld [vmem:[%s15532_s17 + $0x40] sm:$0xff] }
  0x97   :  { %7379 = vmatpush3.msra.mxu0 %v189_v29  ;;  %7420 = vmatprep.subr.mxu1 %v15564_v0 }
  0x98   :  { %7381 = vmatmul.mubr.f32.vlgmr.msra.gmra.mxu0 %v406_v30  ;;  %560 = vmatprep.subr.mxu0 %v10617_v32  ;;  %v393_v30 = vld [vmem:[%s15532_s17 + $0x60] sm:$0xff] }
  0x99   :  { %561 = vmatpush1.msra.mxu0 %v10620_v34  ;;  %7421 = vmatpush3.msra.mxu1 %v267_v42  ;;  %v388_v42 = vld [vmem:[%s15532_s17 + $0x38] sm:$0xff] }
  0x9a   :  { %562 = vmatprep.subr.mxu0 %v10622_v35  ;;  %7422 = vmatprep.subr.mxu1 %v15564_v0 }
  0x9b   :  { %563 = vmatpush1.msra.mxu0 %v10626_v37  ;;  %7423 = vmatpush3.msra.mxu1 %v266_v45  ;;  %v387_v45 = vld [vmem:[%s15532_s17 + $0x30] sm:$0xff] }
  0x9c   :  { %564 = vmatprep.subr.mxu0 %v10633_v40  ;;  %7424 = vmatprep.subr.mxu1 %v15564_v0 }
  0x9d   :  { %565 = vmatpush1.msra.mxu0 %v10636_v41  ;;  %7425 = vmatpush3.msra.mxu1 %v265_v48  ;;  %v386_v48 = vld [vmem:[%s15532_s17 + $0x28] sm:$0xff] }
  0x9e   :  { %566 = vmatprep.subr.mxu0 %v10640_v43  ;;  %7426 = vmatprep.subr.mxu1 %v15564_v0 }
  0x9f   :  { %567 = vmatpush1.msra.mxu0 %v10643_v44  ;;  %7427 = vmatpush3.msra.mxu1 %v264_v51  ;;  %v385_v51 = vld [vmem:[%s15532_s17 + $0x20] sm:$0xff] }
  0xa0   :  { %568 = vmatprep.subr.mxu0 %v10647_v46  ;;  %7428 = vmatprep.subr.mxu1 %v15564_v0 }
  0xa1   :  { %569 = vmatpush1.msra.mxu0 %v10650_v47  ;;  %7429 = vmatpush3.msra.mxu1 %v263_v54  ;;  %v384_v54 = vld [vmem:[%s15532_s17 + $0x18] sm:$0xff] }
  0xa2   :  { %570 = vmatprep.subr.mxu0 %v10654_v49  ;;  %7430 = vmatprep.subr.mxu1 %v15564_v0 }
  0xa3   :  { %571 = vmatpush1.msra.mxu0 %v10657_v50  ;;  %7431 = vmatpush3.msra.mxu1 %v262_v57  ;;  %v383_v57 = vld [vmem:[%s15532_s17 + $0x10] sm:$0xff] }
  0xa4   :  { %572 = vmatprep.subr.mxu0 %v10661_v52  ;;  %7432 = vmatprep.subr.mxu1 %v15564_v0 }
  0xa5   :  { %573 = vmatpush1.msra.mxu0 %v10664_v53  ;;  %7433 = vmatpush3.msra.mxu1 %v261_v60  ;;  %v382_v60 = vld [vmem:[%s15532_s17 + $0x8] sm:$0xff] }
  0xa6   :  { %574 = vmatprep.subr.mxu0 %v10668_v55  ;;  %7434 = vmatprep.subr.mxu1 %v15564_v0 }
  0xa7   :  { %575 = vmatpush1.msra.mxu0 %v10671_v56  ;;  %7435 = vmatpush3.msra.mxu1 %v260_v63  ;;  %v381_v63 = vld [vmem:[%s15532_s17] sm:$0xff] }
  0xa8   :  { %576 = vmatprep.subr.mxu0 %v10675_v58  ;;  %7436 = vmatprep.subr.mxu1 %v15564_v0 }
  0xa9   :  { %577 = vmatpush1.msra.mxu0 %v10678_v59  ;;  %7437 = vmatpush3.msra.mxu1 %v259_v3  ;;  %v6359_v3 = vld [vmem:[%s15520_s5] ss:$0 sm:$0xff] }
  0xaa   :  { %578 = vmatprep.subr.mxu0 %v10682_v61  ;;  %7438 = vmatprep.subr.mxu1 %v15564_v0 }
  0xab   :  { %579 = vmatpush1.msra.mxu0 %v10685_v62  ;;  %7439 = vmatpush3.msra.mxu1 %v258_v6 }
  0xac   :  { %580 = vmatprep.subr.mxu0 %v10689_v1  ;;  %7440 = vmatprep.subr.mxu1 %v15564_v0 }
  0xad   :  { %581 = vmatpush1.msra.mxu0 %v10692_v2  ;;  %7441 = vmatpush3.msra.mxu1 %v257_v9 }
  0xae   :  { %582 = vmatprep.subr.mxu0 %v10696_v4  ;;  %7442 = vmatprep.subr.mxu1 %v15564_v0 }
  0xaf   :  { %583 = vmatpush1.msra.mxu0 %v10699_v5  ;;  %7450 = vmatprep.mubr.msk.f32.mxu1 %vm10383_vm0, %v15564_v0 }
  0xb0   :  { %584 = vmatprep.subr.mxu0 %v10703_v7  ;;  %7443 = vmatpush3.msra.mxu1 %v256_v11 }
  0xb1   :  { %585 = vmatpush1.msra.mxu0 %v10706_v8  ;;  %624 = vmatprep.mubr.f32.mxu0 %v15564_v0 }
  0xb2   :  { %586 = vmatprep.subr.mxu0 %v10710_v10  ;;  %7444 = vmatprep.subr.mxu1 %v15564_v0 }
  0xb3   :  { %7445 = vmatpush3.msra.mxu1 %v255_v12  ;;  %587 = vmatpush1.msra.mxu0 %v10722_v13 }
  0xb4   :  { %7446 = vmatprep.subr.mxu1 %v15564_v0  ;;  %588 = vmatprep.subr.mxu0 %v10725_v15 }
  0xb5   :  { %7447 = vmatpush3.msra.mxu1 %v254_v14  ;;  %589 = vmatpush1.msra.mxu0 %v10729_v16 }
  0xb6   :  { %7448 = vmatprep.subr.mxu1 %v15564_v0  ;;  %590 = vmatprep.subr.mxu0 %v10732_v18 }
  0xb7   :  { %7449 = vmatpush3.msra.mxu1 %v253_v17  ;;  %591 = vmatpush1.msra.mxu0 %v10735_v19  ;;  %v397_v17 = vld [vmem:[%s15533_s18] sm:$0xf] }
  0xb8   :  { %7493 = vmatprep.subr.mxu1 %v15564_v0  ;;  %7453 = vmatprep.subr.mxu0 %v15564_v0 }
 0x155   :  { %v555_v27 = vpop.f32.mrf.mxu1 }
 0x156   :  { %v556_v6 = vadd.f32 %v6359_v3, %v555_v27  ;;  %v10850_v27 = vld [vmem:[#allocation12 + $0x48] sm:$0xff]  ;;  %v10893_v3 = vld [vmem:[#allocation12] sm:$0xff] }
 0x157   :  { %v7417_v29 = vpop.f32.mrf.mxu1 }
 0x158   :  { %v479_v21 = vpop.f32.mrf.mxu0  ;;  %v10858_v29 = vld [vmem:[#allocation12 + $0x38] sm:$0xff] }
 0x159   :  { %v10743_v22 = vadd.f32 %v6358_v20, %v479_v21  ;;  %v10827_v20 = vld [vmem:[#allocation12 + $0x78] sm:$0xff]  ;;  %v10829_v21 = vld [vmem:[#allocation12 + $0x70] sm:$0xff] }
 0x15a   :  { %v7382_v23 = vpop.f32.mrf.mxu0 }
 0x15b   :  { %v559_v24 = vsub.f32 %v10628_v38, %v10743_v22  ;;  %7451 = vmatmul.mubr.f32.vlgmr.msra.gmra.mxu1 %v10743_v22  ;;  %v10834_v23 = vld [vmem:[#allocation12 + $0x68] sm:$0xff] }
 0x15c   :  { %7525 = vmatprep.mubr.msk.f32.mxu1 %vm10383_vm0, %v15564_v0  ;;  %7494 = vmatpush3.msra.mxu1 %v10827_v20 }
 0x15d   :  { %625 = vmatmul.mubr.f32.vlgmr.msra.gmra.mxu0 %v559_v24  ;;  %7495 = vmatprep.subr.mxu1 %v15564_v0  ;;  %v10838_v24 = vld [vmem:[#allocation12 + $0x60] sm:$0xff] }
 0x15e   :  { %7454 = vmatpush3.msra.mxu0 %v396_v25  ;;  %7485 = vmatprep.mubr.msk.f32.mxu0 %vm10383_vm0, %v15564_v0  ;;  %v10842_v25 = vld [vmem:[#allocation12 + $0x58] sm:$0xff] }
 0x15f   :  { %7455 = vmatprep.subr.mxu0 %v15564_v0  ;;  %7496 = vmatpush3.msra.mxu1 %v10829_v21 }
 0x160   :  { %7456 = vmatpush3.msra.mxu0 %v395_v26  ;;  %7497 = vmatprep.subr.mxu1 %v15564_v0  ;;  %v10846_v26 = vld [vmem:[#allocation12 + $0x50] sm:$0xff] }
 0x161   :  { %7457 = vmatprep.subr.mxu0 %v15564_v0  ;;  %7498 = vmatpush3.msra.mxu1 %v10834_v23 }
 0x162   :  { %7458 = vmatpush3.msra.mxu0 %v394_v28  ;;  %7499 = vmatprep.subr.mxu1 %v15564_v0  ;;  %v10854_v28 = vld [vmem:[#allocation12 + $0x40] sm:$0xff] }
 0x163   :  { %7459 = vmatprep.subr.mxu0 %v15564_v0  ;;  %7500 = vmatpush3.msra.mxu1 %v10838_v24 }
 0x164   :  { %7460 = vmatpush3.msra.mxu0 %v393_v30  ;;  %7501 = vmatprep.subr.mxu1 %v15564_v0  ;;  %v10862_v30 = vld [vmem:[#allocation12 + $0x30] sm:$0xff] }
 0x165   :  { %7461 = vmatprep.subr.mxu0 %v15564_v0  ;;  %7502 = vmatpush3.msra.mxu1 %v10842_v25 }
 0x166   :  { %7462 = vmatpush3.msra.mxu0 %v392_v31  ;;  %7503 = vmatprep.subr.mxu1 %v15564_v0  ;;  %v10866_v31 = vld [vmem:[#allocation12 + $0x28] sm:$0xff] }
 0x167   :  { %7463 = vmatprep.subr.mxu0 %v15564_v0  ;;  %7504 = vmatpush3.msra.mxu1 %v10846_v26 }
 0x168   :  { %7464 = vmatpush3.msra.mxu0 %v391_v33  ;;  %7505 = vmatprep.subr.mxu1 %v15564_v0  ;;  %v10870_v33 = vld [vmem:[#allocation12 + $0x20] sm:$0xff] }
 0x169   :  { %7465 = vmatprep.subr.mxu0 %v15564_v0  ;;  %7506 = vmatpush3.msra.mxu1 %v10850_v27 }
 0x16a   :  { %7466 = vmatpush3.msra.mxu0 %v390_v36  ;;  %7507 = vmatprep.subr.mxu1 %v15564_v0  ;;  %v10874_v36 = vld [vmem:[#allocation12 + $0x18] sm:$0xff] }
 0x16b   :  { %7467 = vmatprep.subr.mxu0 %v15564_v0  ;;  %7508 = vmatpush3.msra.mxu1 %v10854_v28 }
 0x16c   :  { %7468 = vmatpush3.msra.mxu0 %v389_v39  ;;  %7509 = vmatprep.subr.mxu1 %v15564_v0 }
 0x16d   :  { %7469 = vmatprep.subr.mxu0 %v15564_v0  ;;  %7510 = vmatpush3.msra.mxu1 %v10858_v29 }
 0x16e   :  { %7470 = vmatpush3.msra.mxu0 %v388_v42  ;;  %7511 = vmatprep.subr.mxu1 %v15564_v0 }
 0x16f   :  { %7471 = vmatprep.subr.mxu0 %v15564_v0  ;;  %7512 = vmatpush3.msra.mxu1 %v10862_v30 }
 0x170   :  { %7472 = vmatpush3.msra.mxu0 %v387_v45  ;;  %7513 = vmatprep.subr.mxu1 %v15564_v0 }
 0x171   :  { %7473 = vmatprep.subr.mxu0 %v15564_v0  ;;  %7514 = vmatpush3.msra.mxu1 %v10866_v31 }
 0x172   :  { %7474 = vmatpush3.msra.mxu0 %v386_v48  ;;  %7515 = vmatprep.subr.mxu1 %v15564_v0 }
 0x173   :  { %7475 = vmatprep.subr.mxu0 %v15564_v0  ;;  %7516 = vmatpush3.msra.mxu1 %v10870_v33 }
 0x174   :  { %7476 = vmatpush3.msra.mxu0 %v385_v51  ;;  %7517 = vmatprep.subr.mxu1 %v15564_v0 }
 0x175   :  { %7477 = vmatprep.subr.mxu0 %v15564_v0  ;;  %7518 = vmatpush3.msra.mxu1 %v10874_v36 }
 0x176   :  { %7478 = vmatpush3.msra.mxu0 %v384_v54  ;;  %7519 = vmatprep.subr.mxu1 %v15564_v0 }
 0x177   :  { %7479 = vmatprep.subr.mxu0 %v15564_v0 }
 0x178   :  { %7480 = vmatpush3.msra.mxu0 %v383_v57 }
 0x179   :  { %7481 = vmatprep.subr.mxu0 %v15564_v0 }
 0x17a   :  { %7482 = vmatpush3.msra.mxu0 %v382_v60  ;;  %v10885_v60 = vld [vmem:[#allocation12 + $0x10] sm:$0xff] }
 0x17b   :  { %7483 = vmatprep.subr.mxu0 %v15564_v0  ;;  %7520 = vmatpush3.msra.mxu1 %v10885_v60 }
 0x17c   :  { %7484 = vmatpush3.msra.mxu0 %v381_v63  ;;  %7521 = vmatprep.subr.mxu1 %v15564_v0  ;;  %v10889_v63 = vld [vmem:[#allocation12 + $0x8] sm:$0xff] }
 0x17d   :  { %7488 = vmatprep.subr.mxu0 %v15564_v0  ;;  %7522 = vmatpush3.msra.mxu1 %v10889_v63 }
 0x17e   :  { %7523 = vmatprep.subr.mxu1 %v15564_v0 }
 0x17f   :  { %7524 = vmatpush3.msra.mxu1 %v10893_v3 }
 0x180   :  { %7563 = vmatprep.subr.mxu1 %v15564_v0 }
 0x21b   :  { %v10819_v9 = vpop.f32.mrf.mxu1 }
 0x21d   :  { %v626_v11 = vpop.f32.mrf.mxu0  ;;  %v7452_v12 = vpop.f32.mrf.mxu1 }
 0x21e   :  { %v707_v14 = vmul.f32 %v626_v11, %v556_v6  ;;  %v10896_v6 = vld [vmem:[#allocation14 + $0x78] sm:$0xff]  ;;  %v10898_v11 = vld [vmem:[#allocation14 + $0x70] sm:$0xff]  ;;  %v10903_v12 = vld [vmem:[#allocation14 + $0x68] sm:$0xff] }
 0x21f   :  { %v10880_v39 = vpop.f32.mrf.mxu0  ;;  %16024 = vst [vmem:[#allocation25_spill] sm:$0xff] %v10903_v12 }
 0x220   :  { %7486 = vmatmul.mubr.f32.vlgmr.msra.gmra.mxu0 %v707_v14  ;;  %v10907_v14 = vld [vmem:[#allocation14 + $0x60] sm:$0xff] }
 0x221   :  { %7490 = vmatprep.mubr.msk.f32.mxu0 %vm10383_vm0, %v15564_v0  ;;  %7489 = vmatpush3.msk.msra.mxu0 %vm786_vm1, %v397_v17  ;;  %16025 = vst [vmem:[#allocation26_spill] sm:$0xff] %v10907_v14  ;;  %v10911_v17 = vld [vmem:[#allocation14 + $0x58] sm:$0xff] }
 0x222   :  { %7528 = vmatprep.subr.mxu0 %v15564_v0  ;;  %16026 = vst [vmem:[#allocation27_spill] sm:$0xff] %v10911_v17 }
 0x2e0   :  { %v774_v42 = vpop.f32.mrf.mxu0 }
 0x2e1   :  { %v778_v45 = vmul.f32 0.5, %v774_v42  ;;  %v10915_v42 = vld [vmem:[#allocation14 + $0x50] sm:$0xff] }
 0x2e2   :  { %v7487_v48 = vpop.f32.mrf.mxu0  ;;  %16027 = vst [vmem:[#allocation28_spill] sm:$0xff] %v10915_v42 }
 0x2e3   :  { %9364 = vtanh.f32 %v778_v45  ;;  %v10919_v45 = vld [vmem:[#allocation14 + $0x48] sm:$0xff]  ;;  %v10923_v48 = vld [vmem:[#allocation14 + $0x40] sm:$0xff] }
 0x2e4   :  { %16028 = vst [vmem:[#allocation29_spill] sm:$0xff] %v10919_v45  ;;  %16029 = vst [vmem:[#allocation30_spill] sm:$0xff] %v10923_v48  ;;  %9366 = vtanh.f32 %v10628_v38 }
 0x2f0   :  { %v9365_v51 = vpop.eup %9364 }
 0x2f1   :  { %v780_v54 = vadd.f32 1.0, %v9365_v51  ;;  %v10927_v51 = vld [vmem:[#allocation14 + $0x38] sm:$0xff] }
 0x2f2   :  { %16030 = vst [vmem:[#allocation31_spill] sm:$0xff] %v10927_v51 }
 0x2f3   :  { %v781_v57 = vmul.f32 0.5, %v780_v54  ;;  %v10931_v54 = vld [vmem:[#allocation14 + $0x30] sm:$0xff] }
 0x2f4   :  { %16031 = vst [vmem:[#allocation32_spill] sm:$0xff] %v10931_v54 }
 0x2f5   :  { %7491 = vmatmul.mubr.msk.f32.vlgmr.msra.gmra.mxu0 %vm782_vm2, %v781_v57  ;;  %v10935_v57 = vld [vmem:[#allocation14 + $0x28] sm:$0xff] }
 0x2f6   :  { %7560 = vmatprep.mubr.msk.f32.mxu0 %vm10383_vm0, %v15564_v0  ;;  %7529 = vmatpush3.msra.mxu0 %v10896_v6  ;;  %16032 = vst [vmem:[#allocation33_spill] sm:$0xff] %v10935_v57 }
 0x2f7   :  { %7530 = vmatprep.subr.mxu0 %v15564_v0 }
 0x2f8   :  { %7531 = vmatpush3.msra.mxu0 %v10898_v11 }
 0x2f9   :  { %7532 = vmatprep.subr.mxu0 %v15564_v0 }
 0x2fa   :  { %7533 = vmatpush3.msra.mxu0 %v10903_v12  ;;  %v10970_v12 = vld [vmem:[#allocation17 + $0xf8] sm:$0xff] }
 0x2fb   :  { %7534 = vmatprep.subr.mxu0 %v15564_v0  ;;  %16037 = vst [vmem:[#allocation38_spill] sm:$0xff] %v10970_v12 }
 0x2fc   :  { %7535 = vmatpush3.msra.mxu0 %v10907_v14 }
 0x2fd   :  { %7536 = vmatprep.subr.mxu0 %v15564_v0 }
 0x2fe   :  { %7537 = vmatpush3.msra.mxu0 %v10911_v17 }
 0x2ff   :  { %7538 = vmatprep.subr.mxu0 %v15564_v0 }
 0x300   :  { %7539 = vmatpush3.msra.mxu0 %v10915_v42 }
 0x301   :  { %7540 = vmatprep.subr.mxu0 %v15564_v0 }
 0x302   :  { %7541 = vmatpush3.msra.mxu0 %v10919_v45  ;;  %v10939_v45 = vld [vmem:[#allocation14 + $0x20] sm:$0xff] }
 0x303   :  { %7542 = vmatprep.subr.mxu0 %v15564_v0  ;;  %16033 = vst [vmem:[#allocation34_spill] sm:$0xff] %v10939_v45 }
 0x304   :  { %7543 = vmatpush3.msra.mxu0 %v10923_v48  ;;  %v10943_v48 = vld [vmem:[#allocation14 + $0x18] sm:$0xff] }
 0x305   :  { %7544 = vmatprep.subr.mxu0 %v15564_v0  ;;  %16034 = vst [vmem:[#allocation35_spill] sm:$0xff] %v10943_v48 }
 0x306   :  { %7545 = vmatpush3.msra.mxu0 %v10927_v51  ;;  %v10947_v51 = vld [vmem:[#allocation14 + $0x10] sm:$0xff] }
 0x307   :  { %7546 = vmatprep.subr.mxu0 %v15564_v0  ;;  %16035 = vst [vmem:[#allocation36_spill] sm:$0xff] %v10947_v51 }
 0x308   :  { %7547 = vmatpush3.msra.mxu0 %v10931_v54 }
 0x309   :  { %7548 = vmatprep.subr.mxu0 %v15564_v0 }
 0x30a   :  { %7549 = vmatpush3.msra.mxu0 %v10935_v57  ;;  %v10956_v57 = vld [vmem:[%s15523_s8] ss:$0 sm:$0xff] }
 0x30b   :  { %7550 = vmatprep.subr.mxu0 %v15564_v0  ;;  %16036 = vst [vmem:[#allocation37_spill] sm:$0xff] %v10956_v57 }
 0x30c   :  { %7551 = vmatpush3.msra.mxu0 %v10939_v45  ;;  %v704_v45 = vadd.f32 %v10956_v57, %v10819_v9  ;;  %v10973_v9 = vld [vmem:[#allocation15 + $0x78] sm:$0xff]  ;;  %v11039_v57 = vld [vmem:[#allocation17 + $0xf0] sm:$0xff] }
 0x30d   :  { %7552 = vmatprep.subr.mxu0 %v15564_v0  ;;  %16038 = vst [vmem:[#allocation39_spill] sm:$0xff] %v10973_v9  ;;  %16052 = vst [vmem:[#allocation53_spill] sm:$0xff] %v11039_v57 }
 0x30e   :  { %7553 = vmatpush3.msra.mxu0 %v10943_v48  ;;  %v10967_v48 = vld [vmem:[#allocation14] sm:$0xff] }
 0x30f   :  { %7554 = vmatprep.subr.mxu0 %v15564_v0 }
 0x310   :  { %7555 = vmatpush3.msra.mxu0 %v10947_v51  ;;  %v10963_v51 = vld [vmem:[#allocation14 + $0x8] sm:$0xff] }
 0x311   :  { %7556 = vmatprep.subr.mxu0 %v15564_v0 }
 0x312   :  { %7557 = vmatpush3.msra.mxu0 %v10963_v51 }
 0x313   :  { %7558 = vmatprep.subr.mxu0 %v15564_v0 }
 0x314   :  { %7559 = vmatpush3.msra.mxu0 %v10967_v48 }
 0x315   :  { %1107 = vmatprep.subr.mxu0 %v10970_v12  ;;  %v11047_v12 = vld [vmem:[#allocation17 + $0xd8] sm:$0xff] }
 0x316   :  { %16054 = vst [vmem:[#allocation55_spill] sm:$0xff] %v11047_v12 }
 0x3b5   :  { %v856_v54 = vpop.f32.mrf.mxu0 }
 0x3b6   :  { %v860_v42 = vmul.f32 %v856_v54, %v10880_v39  ;;  %v10975_v39 = vld [vmem:[#allocation15 + $0x70] sm:$0xff]  ;;  %v10995_v54 = vld [vmem:[#allocation15 + $0x48] sm:$0xff] }
 0x3b7   :  { %v7492_v17 = vpop.f32.mrf.mxu0  ;;  %16039 = vst [vmem:[#allocation40_spill] sm:$0xff] %v10975_v39  ;;  %16044 = vst [vmem:[#allocation45_spill] sm:$0xff] %v10995_v54 }
 0x3b8   :  { %v861_v14 = vadd.f32 %v860_v42, %v704_v45  ;;  %v10983_v17 = vld [vmem:[#allocation15 + $0x60] sm:$0xff]  ;;  %v10987_v42 = vld [vmem:[#allocation15 + $0x58] sm:$0xff]  ;;  %v10991_v45 = vld [vmem:[#allocation15 + $0x50] sm:$0xff] }
 0x3b9   :  { %16041 = vst [vmem:[#allocation42_spill] sm:$0xff] %v10983_v17  ;;  %16042 = vst [vmem:[#allocation43_spill] sm:$0xff] %v10987_v42 }
 0x3ba   :  { %7526 = vmatmul.mubr.f32.vlgmr.msra.gmra.mxu1 %v861_v14  ;;  %v10979_v14 = vld [vmem:[#allocation15 + $0x68] sm:$0xff]  ;;  %16043 = vst [vmem:[#allocation44_spill] sm:$0xff] %v10991_v45 }
 0x3bb   :  { %7595 = vmatprep.mubr.msk.f32.mxu1 %vm10383_vm0, %v15564_v0  ;;  %7564 = vmatpush3.msra.mxu1 %v10973_v9  ;;  %16040 = vst [vmem:[#allocation41_spill] sm:$0xff] %v10979_v14  ;;  %v9367_v9 = vpop.eup %9366 }
 0x3bc   :  { %7565 = vmatprep.subr.mxu1 %v15564_v0 }
 0x3bd   :  { %7566 = vmatpush3.msra.mxu1 %v10975_v39 }
 0x3be   :  { %7567 = vmatprep.subr.mxu1 %v15564_v0 }
 0x3bf   :  { %7568 = vmatpush3.msra.mxu1 %v10979_v14  ;;  %v10999_v14 = vld [vmem:[#allocation15 + $0x40] sm:$0xff] }
 0x3c0   :  { %7569 = vmatprep.subr.mxu1 %v15564_v0  ;;  %16045 = vst [vmem:[#allocation46_spill] sm:$0xff] %v10999_v14 }
 0x3c1   :  { %7570 = vmatpush3.msra.mxu1 %v10983_v17  ;;  %v11003_v17 = vld [vmem:[#allocation15 + $0x38] sm:$0xff] }
 0x3c2   :  { %7571 = vmatprep.subr.mxu1 %v15564_v0  ;;  %16046 = vst [vmem:[#allocation47_spill] sm:$0xff] %v11003_v17 }
 0x3c3   :  { %7572 = vmatpush3.msra.mxu1 %v10987_v42  ;;  %v11007_v42 = vld [vmem:[#allocation15 + $0x30] sm:$0xff] }
 0x3c4   :  { %7573 = vmatprep.subr.mxu1 %v15564_v0  ;;  %16047 = vst [vmem:[#allocation48_spill] sm:$0xff] %v11007_v42 }
 0x3c5   :  { %7574 = vmatpush3.msra.mxu1 %v10991_v45  ;;  %v11011_v45 = vld [vmem:[#allocation15 + $0x28] sm:$0xff] }
 0x3c6   :  { %7575 = vmatprep.subr.mxu1 %v15564_v0  ;;  %16048 = vst [vmem:[#allocation49_spill] sm:$0xff] %v11011_v45 }
 0x3c7   :  { %7576 = vmatpush3.msra.mxu1 %v10995_v54  ;;  %v11015_v54 = vld [vmem:[#allocation15 + $0x20] sm:$0xff] }
 0x3c8   :  { %7577 = vmatprep.subr.mxu1 %v15564_v0  ;;  %16049 = vst [vmem:[#allocation50_spill] sm:$0xff] %v11015_v54 }
 0x3c9   :  { %7578 = vmatpush3.msra.mxu1 %v10999_v14  ;;  %v11019_v14 = vld [vmem:[#allocation15 + $0x18] sm:$0xff] }
 0x3ca   :  { %7579 = vmatprep.subr.mxu1 %v15564_v0  ;;  %16050 = vst [vmem:[#allocation51_spill] sm:$0xff] %v11019_v14 }
 0x3cb   :  { %7580 = vmatpush3.msra.mxu1 %v11003_v17  ;;  %v11023_v17 = vld [vmem:[#allocation15 + $0x10] sm:$0xff] }
 0x3cc   :  { %7581 = vmatprep.subr.mxu1 %v15564_v0  ;;  %16051 = vst [vmem:[#allocation52_spill] sm:$0xff] %v11023_v17 }
 0x3cd   :  { %7582 = vmatpush3.msra.mxu1 %v11007_v42 }
 0x3ce   :  { %7583 = vmatprep.subr.mxu1 %v15564_v0 }
 0x3cf   :  { %7584 = vmatpush3.msra.mxu1 %v11011_v45  ;;  %v11033_v45 = vld [vmem:[%s15525_s10] ss:$0 sm:$0xff] }
 0x3d0   :  { %7585 = vmatprep.subr.mxu1 %v15564_v0 }
 0x3d1   :  { %7586 = vmatpush3.msra.mxu1 %v11015_v54 }
 0x3d2   :  { %7587 = vmatprep.subr.mxu1 %v15564_v0 }
 0x3d3   :  { %7588 = vmatpush3.msra.mxu1 %v11019_v14 }
 0x3d4   :  { %7589 = vmatprep.subr.mxu1 %v15564_v0 }
 0x3d5   :  { %7590 = vmatpush3.msra.mxu1 %v11023_v17  ;;  %v11041_v17 = vld [vmem:[#allocation17 + $0xe8] sm:$0xff] }
 0x3d6   :  { %7591 = vmatprep.subr.mxu1 %v15564_v0  ;;  %v11044_v0 = vld [vmem:[#allocation17 + $0xe0] sm:$0xff] }
 0x3d7   :  { %16053 = vst [vmem:[#allocation54_spill] sm:$0xff] %v11044_v0 }
 0x47a   :  { %v928_v54 = vpop.f32.mrf.mxu1 }
 0x47b   :  { %v932_v42 = vadd.f32 %v928_v54, %v10628_v38  ;;  %v11050_v38 = vld [vmem:[#allocation17 + $0xd0] sm:$0xff]  ;;  %v11059_v54 = vld [vmem:[#allocation17 + $0xb8] sm:$0xff] }
 0x47c   :  { %v7527_v39 = vpop.f32.mrf.mxu1  ;;  %16055 = vst [vmem:[#allocation56_spill] sm:$0xff] %v11050_v38  ;;  %16058 = vst [vmem:[#allocation59_spill] sm:$0xff] %v11059_v54 }
 0x47d   :  { %v11037_v14 = vadd.f32 %v11033_v45, %v932_v42  ;;  %v11053_v39 = vld [vmem:[#allocation17 + $0xc8] sm:$0xff]  ;;  %v11056_v42 = vld [vmem:[#allocation17 + $0xc0] sm:$0xff] }
 0x47e   :  { %16056 = vst [vmem:[#allocation57_spill] sm:$0xff] %v11053_v39  ;;  %16057 = vst [vmem:[#allocation58_spill] sm:$0xff] %v11056_v42 }
 0x47f   :  { %7561 = vmatmul.mubr.f32.vlgmr.msra.gmra.mxu0 %v11037_v14 }
 0x480   :  { %1108 = vmatpush1.msra.mxu0 %v11039_v57  ;;  %1171 = vmatprep.mubr.f32.mxu0 %v9367_v9  ;;  %v11062_v57 = vld [vmem:[#allocation17 + $0xb0] sm:$0xff]  ;;  %v11065_v9 = vld [vmem:[#allocation17 + $0xa8] sm:$0xff] }
 0x481   :  { %1109 = vmatprep.subr.mxu0 %v11041_v17  ;;  %16059 = vst [vmem:[#allocation60_spill] sm:$0xff] %v11062_v57  ;;  %16060 = vst [vmem:[#allocation61_spill] sm:$0xff] %v11065_v9 }
 0x482   :  { %1110 = vmatpush1.msra.mxu0 %v11044_v0  ;;  %v11068_v0 = vld [vmem:[#allocation17 + $0xa0] sm:$0xff] }
 0x483   :  { %1111 = vmatprep.subr.mxu0 %v11047_v12  ;;  %16061 = vst [vmem:[#allocation62_spill] sm:$0xff] %v11068_v0  ;;  %v11071_v12 = vld [vmem:[#allocation17 + $0x98] sm:$0xff] }
 0x484   :  { %1112 = vmatpush1.msra.mxu0 %v11050_v38  ;;  %16062 = vst [vmem:[#allocation63_spill] sm:$0xff] %v11071_v12  ;;  %v11074_v38 = vld [vmem:[#allocation17 + $0x90] sm:$0xff] }
 0x485   :  { %1113 = vmatprep.subr.mxu0 %v11053_v39  ;;  %16063 = vst [vmem:[#allocation64_spill] sm:$0xff] %v11074_v38  ;;  %v11077_v39 = vld [vmem:[#allocation17 + $0x88] sm:$0xff] }
 0x486   :  { %1114 = vmatpush1.msra.mxu0 %v11056_v42  ;;  %16064 = vst [vmem:[#allocation65_spill] sm:$0xff] %v11077_v39  ;;  %v11080_v42 = vld [vmem:[#allocation17 + $0x80] sm:$0xff] }
 0x487   :  { %1115 = vmatprep.subr.mxu0 %v11059_v54  ;;  %16065 = vst [vmem:[#allocation66_spill] sm:$0xff] %v11080_v42  ;;  %v11083_v54 = vld [vmem:[#allocation17 + $0x78] sm:$0xff] }
 0x488   :  { %1116 = vmatpush1.msra.mxu0 %v11062_v57  ;;  %16066 = vst [vmem:[#allocation67_spill] sm:$0xff] %v11083_v54  ;;  %v11086_v57 = vld [vmem:[#allocation17 + $0x70] sm:$0xff] }
 0x489   :  { %1117 = vmatprep.subr.mxu0 %v11065_v9  ;;  %16067 = vst [vmem:[#allocation68_spill] sm:$0xff] %v11086_v57  ;;  %v11089_v9 = vld [vmem:[#allocation17 + $0x68] sm:$0xff] }
 0x48a   :  { %1118 = vmatpush1.msra.mxu0 %v11068_v0  ;;  %16068 = vst [vmem:[#allocation69_spill] sm:$0xff] %v11089_v9  ;;  %v11092_v0 = vld [vmem:[#allocation17 + $0x60] sm:$0xff] }
 0x48b   :  { %1119 = vmatprep.subr.mxu0 %v11071_v12  ;;  %16069 = vst [vmem:[#allocation70_spill] sm:$0xff] %v11092_v0  ;;  %v11095_v12 = vld [vmem:[#allocation17 + $0x58] sm:$0xff] }
 0x48c   :  { %1120 = vmatpush1.msra.mxu0 %v11074_v38  ;;  %16070 = vst [vmem:[#allocation71_spill] sm:$0xff] %v11095_v12  ;;  %v11098_v38 = vld [vmem:[#allocation17 + $0x50] sm:$0xff] }
 0x48d   :  { %1121 = vmatprep.subr.mxu0 %v11077_v39  ;;  %16071 = vst [vmem:[#allocation72_spill] sm:$0xff] %v11098_v38  ;;  %v11101_v39 = vld [vmem:[#allocation17 + $0x48] sm:$0xff] }
 0x48e   :  { %1122 = vmatpush1.msra.mxu0 %v11080_v42  ;;  %16072 = vst [vmem:[#allocation73_spill] sm:$0xff] %v11101_v39  ;;  %v11104_v42 = vld [vmem:[#allocation17 + $0x40] sm:$0xff] }
 0x48f   :  { %1123 = vmatprep.subr.mxu0 %v11083_v54  ;;  %16073 = vst [vmem:[#allocation74_spill] sm:$0xff] %v11104_v42  ;;  %v11107_v54 = vld [vmem:[#allocation17 + $0x38] sm:$0xff] }
 0x490   :  { %1124 = vmatpush1.msra.mxu0 %v11086_v57  ;;  %16074 = vst [vmem:[#allocation75_spill] sm:$0xff] %v11107_v54  ;;  %v11110_v57 = vld [vmem:[#allocation17 + $0x30] sm:$0xff] }
 0x491   :  { %1125 = vmatprep.subr.mxu0 %v11089_v9  ;;  %16075 = vst [vmem:[#allocation76_spill] sm:$0xff] %v11110_v57  ;;  %v11113_v9 = vld [vmem:[#allocation17 + $0x28] sm:$0xff] }
 0x492   :  { %1126 = vmatpush1.msra.mxu0 %v11092_v0  ;;  %16076 = vst [vmem:[#allocation77_spill] sm:$0xff] %v11113_v9  ;;  %v11116_v0 = vld [vmem:[#allocation17 + $0x20] sm:$0xff] }
 0x493   :  { %1127 = vmatprep.subr.mxu0 %v11095_v12  ;;  %16077 = vst [vmem:[#allocation78_spill] sm:$0xff] %v11116_v0  ;;  %v11119_v12 = vld [vmem:[#allocation17 + $0x18] sm:$0xff] }
 0x494   :  { %1128 = vmatpush1.msra.mxu0 %v11098_v38  ;;  %16078 = vst [vmem:[#allocation79_spill] sm:$0xff] %v11119_v12  ;;  %v11122_v38 = vld [vmem:[#allocation17 + $0x10] sm:$0xff] }
 0x495   :  { %1129 = vmatprep.subr.mxu0 %v11101_v39  ;;  %16079 = vst [vmem:[#allocation80_spill] sm:$0xff] %v11122_v38  ;;  %v11125_v39 = vld [vmem:[#allocation17 + $0x8] sm:$0xff] }
 0x496   :  { %1130 = vmatpush1.msra.mxu0 %v11104_v42  ;;  %16080 = vst [vmem:[#allocation81_spill] sm:$0xff] %v11125_v39  ;;  %v11128_v42 = vld [vmem:[#allocation17] sm:$0xff] }
 0x497   :  { %1131 = vmatprep.subr.mxu0 %v11107_v54  ;;  %16081 = vst [vmem:[#allocation82_spill] sm:$0xff] %v11128_v42  ;;  %v11131_v54 = vld [vmem:[#allocation17 + $0x1f8] sm:$0xff] }
 0x498   :  { %1132 = vmatpush1.msra.mxu0 %v11110_v57  ;;  %16082 = vst [vmem:[#allocation83_spill] sm:$0xff] %v11131_v54  ;;  %v11134_v57 = vld [vmem:[#allocation17 + $0x1f0] sm:$0xff] }
 0x499   :  { %1133 = vmatprep.subr.mxu0 %v11113_v9  ;;  %16083 = vst [vmem:[#allocation84_spill] sm:$0xff] %v11134_v57  ;;  %v11137_v9 = vld [vmem:[#allocation17 + $0x1e8] sm:$0xff] }
 0x49a   :  { %1134 = vmatpush1.msra.mxu0 %v11116_v0  ;;  %16084 = vst [vmem:[#allocation85_spill] sm:$0xff] %v11137_v9  ;;  %v11140_v0 = vld [vmem:[#allocation17 + $0x1e0] sm:$0xff] }
 0x49b   :  { %1135 = vmatprep.subr.mxu0 %v11119_v12  ;;  %16085 = vst [vmem:[#allocation86_spill] sm:$0xff] %v11140_v0  ;;  %v11143_v12 = vld [vmem:[#allocation17 + $0x1d8] sm:$0xff] }
 0x49c   :  { %1136 = vmatpush1.msra.mxu0 %v11122_v38  ;;  %16086 = vst [vmem:[#allocation87_spill] sm:$0xff] %v11143_v12  ;;  %v11146_v38 = vld [vmem:[#allocation17 + $0x1d0] sm:$0xff] }
 0x49d   :  { %1137 = vmatprep.subr.mxu0 %v11125_v39  ;;  %16087 = vst [vmem:[#allocation88_spill] sm:$0xff] %v11146_v38  ;;  %v11149_v39 = vld [vmem:[#allocation17 + $0x1c8] sm:$0xff] }
 0x49e   :  { %1138 = vmatpush1.msra.mxu0 %v11128_v42  ;;  %16088 = vst [vmem:[#allocation89_spill] sm:$0xff] %v11149_v39  ;;  %v11152_v42 = vld [vmem:[#allocation17 + $0x1c0] sm:$0xff] }
 0x49f   :  { %1139 = vmatprep.subr.mxu0 %v11131_v54  ;;  %16089 = vst [vmem:[#allocation90_spill] sm:$0xff] %v11152_v42  ;;  %v11155_v54 = vld [vmem:[#allocation17 + $0x1b8] sm:$0xff] }
 0x4a0   :  { %1140 = vmatpush2.msra.mxu0 %v11134_v57  ;;  %16090 = vst [vmem:[#allocation91_spill] sm:$0xff] %v11155_v54  ;;  %v11158_v57 = vld [vmem:[#allocation17 + $0x1b0] sm:$0xff] }
 0x4a1   :  { %1141 = vmatprep.subr.mxu0 %v11137_v9  ;;  %16091 = vst [vmem:[#allocation92_spill] sm:$0xff] %v11158_v57  ;;  %v11161_v9 = vld [vmem:[#allocation17 + $0x1a8] sm:$0xff] }
 0x4a2   :  { %1142 = vmatpush2.msra.mxu0 %v11140_v0  ;;  %16092 = vst [vmem:[#allocation93_spill] sm:$0xff] %v11161_v9  ;;  %v11164_v0 = vld [vmem:[#allocation17 + $0x1a0] sm:$0xff] }
 0x4a3   :  { %1143 = vmatprep.subr.mxu0 %v11143_v12  ;;  %16093 = vst [vmem:[#allocation94_spill] sm:$0xff] %v11164_v0  ;;  %v11167_v12 = vld [vmem:[#allocation17 + $0x198] sm:$0xff] }
 0x4a4   :  { %1144 = vmatpush2.msra.mxu0 %v11146_v38  ;;  %16094 = vst [vmem:[#allocation95_spill] sm:$0xff] %v11167_v12  ;;  %v11170_v38 = vld [vmem:[#allocation17 + $0x190] sm:$0xff] }
 0x4a5   :  { %1145 = vmatprep.subr.mxu0 %v11149_v39  ;;  %16095 = vst [vmem:[#allocation96_spill] sm:$0xff] %v11170_v38  ;;  %v11173_v39 = vld [vmem:[#allocation17 + $0x188] sm:$0xff] }
 0x4a6   :  { %1146 = vmatpush2.msra.mxu0 %v11152_v42  ;;  %16096 = vst [vmem:[#allocation97_spill] sm:$0xff] %v11173_v39  ;;  %v11176_v42 = vld [vmem:[#allocation17 + $0x180] sm:$0xff] }
 0x4a7   :  { %1147 = vmatprep.subr.mxu0 %v11155_v54  ;;  %16097 = vst [vmem:[#allocation98_spill] sm:$0xff] %v11176_v42  ;;  %v11179_v54 = vld [vmem:[#allocation17 + $0x178] sm:$0xff] }
 0x4a8   :  { %1148 = vmatpush2.msra.mxu0 %v11158_v57  ;;  %16098 = vst [vmem:[#allocation99_spill] sm:$0xff] %v11179_v54  ;;  %v11182_v57 = vld [vmem:[#allocation17 + $0x170] sm:$0xff] }
 0x4a9   :  { %1149 = vmatprep.subr.mxu0 %v11161_v9  ;;  %16099 = vst [vmem:[#allocation100_spill] sm:$0xff] %v11182_v57  ;;  %v11185_v9 = vld [vmem:[#allocation17 + $0x168] sm:$0xff] }
 0x4aa   :  { %1150 = vmatpush2.msra.mxu0 %v11164_v0  ;;  %16100 = vst [vmem:[#allocation101_spill] sm:$0xff] %v11185_v9  ;;  %v11188_v0 = vld [vmem:[#allocation17 + $0x160] sm:$0xff] }
 0x4ab   :  { %1151 = vmatprep.subr.mxu0 %v11167_v12  ;;  %16101 = vst [vmem:[#allocation102_spill] sm:$0xff] %v11188_v0  ;;  %v11191_v12 = vld [vmem:[#allocation17 + $0x158] sm:$0xff] }
 0x4ac   :  { %1152 = vmatpush2.msra.mxu0 %v11170_v38  ;;  %16102 = vst [vmem:[#allocation103_spill] sm:$0xff] %v11191_v12  ;;  %v11194_v38 = vld [vmem:[#allocation17 + $0x150] sm:$0xff] }
 0x4ad   :  { %1153 = vmatprep.subr.mxu0 %v11173_v39  ;;  %16103 = vst [vmem:[#allocation104_spill] sm:$0xff] %v11194_v38  ;;  %v11197_v39 = vld [vmem:[#allocation17 + $0x148] sm:$0xff] }
 0x4ae   :  { %1154 = vmatpush2.msra.mxu0 %v11176_v42  ;;  %16104 = vst [vmem:[#allocation105_spill] sm:$0xff] %v11197_v39  ;;  %v11200_v42 = vld [vmem:[#allocation17 + $0x140] sm:$0xff] }
 0x4af   :  { %1155 = vmatprep.subr.mxu0 %v11179_v54  ;;  %16105 = vst [vmem:[#allocation106_spill] sm:$0xff] %v11200_v42  ;;  %v11203_v54 = vld [vmem:[#allocation17 + $0x138] sm:$0xff] }
 0x4b0   :  { %1156 = vmatpush2.msra.mxu0 %v11182_v57  ;;  %v11206_v57 = vld [vmem:[#allocation17 + $0x130] sm:$0xff] }
 0x4b1   :  { %1157 = vmatprep.subr.mxu0 %v11185_v9  ;;  %v11209_v9 = vld [vmem:[#allocation17 + $0x128] sm:$0xff] }
 0x4b2   :  { %1158 = vmatpush2.msra.mxu0 %v11188_v0  ;;  %16106 = vst [vmem:[#allocation107_spill] sm:$0xff] %v11209_v9  ;;  %v11212_v0 = vld [vmem:[#allocation17 + $0x120] sm:$0xff] }
 0x4b3   :  { %1159 = vmatprep.subr.mxu0 %v11191_v12  ;;  %16107 = vst [vmem:[#allocation108_spill] sm:$0xff] %v11212_v0  ;;  %v11215_v12 = vld [vmem:[#allocation17 + $0x118] sm:$0xff] }
 0x4b4   :  { %1160 = vmatpush2.msra.mxu0 %v11194_v38  ;;  %v11218_v38 = vld [vmem:[#allocation17 + $0x110] sm:$0xff] }
 0x4b5   :  { %1161 = vmatprep.subr.mxu0 %v11197_v39  ;;  %16108 = vst [vmem:[#allocation109_spill] sm:$0xff] %v11218_v38  ;;  %v11221_v39 = vld [vmem:[#allocation17 + $0x108] sm:$0xff] }
 0x4b6   :  { %1162 = vmatpush2.msra.mxu0 %v11200_v42  ;;  %v11224_v42 = vld [vmem:[#allocation17 + $0x100] sm:$0xff] }
 0x4b7   :  { %1163 = vmatprep.subr.mxu0 %v11203_v54 }
 0x4b8   :  { %1164 = vmatpush2.msra.mxu0 %v11206_v57 }
 0x4b9   :  { %1165 = vmatprep.subr.mxu0 %v11209_v9  ;;  %v11231_v9 = vld [vmem:[#allocation15 + $0x8] sm:$0xff] }
 0x4ba   :  { %1166 = vmatpush2.msra.mxu0 %v11212_v0  ;;  %v16109_v0 = vmov 0.0   ;;  %7592 = vmatpush3.msra.mxu1 %v11231_v9 }
 0x4bb   :  { %1167 = vmatprep.subr.mxu0 %v11215_v12  ;;  %7593 = vmatprep.subr.mxu1 %v16109_v0 }
 0x4bc   :  { %1168 = vmatpush2.msra.mxu0 %v11218_v38  ;;  %v11238_v38 = vld [vmem:[#allocation15] sm:$0xff] }
 0x4bd   :  { %1169 = vmatprep.subr.mxu0 %v11221_v39  ;;  %7594 = vmatpush3.msra.mxu1 %v11238_v38 }
 0x4be   :  { %1170 = vmatpush2.msra.mxu0 %v11224_v42  ;;  %7598 = vmatprep.subr.mxu1 %v16109_v0 }
 0x4bf   :  { %1172 = vmatmul.mubr.f32.vlgmr.msra.gmra.mxu0 %v10743_v22  ;;  %1334 = vmatprep.subr.mxu0 %v10617_v32  ;;  %v11275_v32 = vld [vmem:[%s15527_s12] ss:$0 sm:$0xff]  ;;  %v11434_v22 = vld [vmem:[#allocation8 + $0x28] sm:$0xff] }
 0x4c0   :  { %1335 = vmatpush1.msra.mxu0 %v10620_v34  ;;  %1398 = vmatprep.mubr.f32.mxu0 %v16109_v0  ;;  %16122 = vst [vmem:[#allocation122_spill] sm:$0xff] %v11434_v22 }
 0x4c1   :  { %1336 = vmatprep.subr.mxu0 %v10622_v35 }
 0x4c2   :  { %1337 = vmatpush1.msra.mxu0 %v10626_v37 }
 0x4c3   :  { %1338 = vmatprep.subr.mxu0 %v10633_v40 }
 0x4c4   :  { %1339 = vmatpush1.msra.mxu0 %v10636_v41  ;;  %v11281_v41 = vld [vmem:[%s16022_s25 + $0x78] sm:$0xff] }
 0x4c5   :  { %1340 = vmatprep.subr.mxu0 %v10640_v43  ;;  %v11290_v43 = vld [vmem:[%s16022_s25 + $0x70] sm:$0xff] }
 0x4c6   :  { %1341 = vmatpush1.msra.mxu0 %v10643_v44  ;;  %v11297_v44 = vld [vmem:[%s16022_s25 + $0x68] sm:$0xff] }
 0x4c7   :  { %1342 = vmatprep.subr.mxu0 %v10647_v46  ;;  %v11304_v46 = vld [vmem:[%s16022_s25 + $0x60] sm:$0xff] }
 0x4c8   :  { %1343 = vmatpush1.msra.mxu0 %v10650_v47  ;;  %v11311_v47 = vld [vmem:[%s16022_s25 + $0x58] sm:$0xff] }
 0x4c9   :  { %1344 = vmatprep.subr.mxu0 %v10654_v49  ;;  %v11318_v49 = vld [vmem:[%s16022_s25 + $0x50] sm:$0xff] }
 0x4ca   :  { %1345 = vmatpush1.msra.mxu0 %v10657_v50  ;;  %v11325_v50 = vld [vmem:[%s16022_s25 + $0x48] sm:$0xff] }
 0x4cb   :  { %1346 = vmatprep.subr.mxu0 %v10661_v52  ;;  %v11332_v52 = vld [vmem:[%s16022_s25 + $0x40] sm:$0xff] }
 0x4cc   :  { %1347 = vmatpush1.msra.mxu0 %v10664_v53  ;;  %v11339_v53 = vld [vmem:[%s16022_s25 + $0x38] sm:$0xff] }
 0x4cd   :  { %1348 = vmatprep.subr.mxu0 %v10668_v55  ;;  %v11346_v55 = vld [vmem:[%s16022_s25 + $0x30] sm:$0xff] }
 0x4ce   :  { %1349 = vmatpush1.msra.mxu0 %v10671_v56  ;;  %v11353_v56 = vld [vmem:[%s16022_s25 + $0x28] sm:$0xff] }
 0x4cf   :  { %1350 = vmatprep.subr.mxu0 %v10675_v58  ;;  %v11360_v58 = vld [vmem:[%s16022_s25 + $0x20] sm:$0xff] }
 0x4d0   :  { %1351 = vmatpush1.msra.mxu0 %v10678_v59  ;;  %v11367_v59 = vld [vmem:[%s16022_s25 + $0x18] sm:$0xff] }
 0x4d1   :  { %1352 = vmatprep.subr.mxu0 %v10682_v61  ;;  %v11374_v61 = vld [vmem:[%s16022_s25 + $0x10] sm:$0xff] }
 0x4d2   :  { %1353 = vmatpush1.msra.mxu0 %v10685_v62  ;;  %v11381_v62 = vld [vmem:[%s16022_s25 + $0x8] sm:$0xff] }
 0x4d3   :  { %1354 = vmatprep.subr.mxu0 %v10689_v1  ;;  %16110 = vst [vmem:[#allocation110_spill] sm:$0xff] %v11381_v62  ;;  %v1192_v1 = vld [vmem:[#allocation3 + $0x8] sm:$0xff] }
 0x4d4   :  { %1355 = vmatpush1.msra.mxu0 %v10692_v2  ;;  %v11388_v2 = vld [vmem:[%s16022_s25] sm:$0xff] }
 0x4d5   :  { %1356 = vmatprep.subr.mxu0 %v10696_v4  ;;  %16111 = vst [vmem:[#allocation111_spill] sm:$0xff] %v11388_v2  ;;  %v11392_v4 = vld [vmem:[#allocation8 + $0x78] sm:$0xff] }
 0x4d6   :  { %1357 = vmatpush1.msra.mxu0 %v10699_v5  ;;  %16112 = vst [vmem:[#allocation112_spill] sm:$0xff] %v11392_v4  ;;  %v11398_v5 = vld [vmem:[#allocation8 + $0x70] sm:$0xff] }
 0x4d7   :  { %1358 = vmatprep.subr.mxu0 %v10703_v7  ;;  %16113 = vst [vmem:[#allocation113_spill] sm:$0xff] %v11398_v5  ;;  %v11402_v7 = vld [vmem:[#allocation8 + $0x68] sm:$0xff] }
 0x4d8   :  { %1359 = vmatpush1.msra.mxu0 %v10706_v8  ;;  %16114 = vst [vmem:[#allocation114_spill] sm:$0xff] %v11402_v7  ;;  %v11406_v8 = vld [vmem:[#allocation8 + $0x60] sm:$0xff] }
 0x4d9   :  { %1360 = vmatprep.subr.mxu0 %v10710_v10  ;;  %16115 = vst [vmem:[#allocation115_spill] sm:$0xff] %v11406_v8  ;;  %v11410_v10 = vld [vmem:[#allocation8 + $0x58] sm:$0xff] }
 0x4da   :  { %1361 = vmatpush1.msra.mxu0 %v10722_v13  ;;  %16116 = vst [vmem:[#allocation116_spill] sm:$0xff] %v11410_v10  ;;  %v11414_v13 = vld [vmem:[#allocation8 + $0x50] sm:$0xff] }
 0x4db   :  { %1362 = vmatprep.subr.mxu0 %v10725_v15  ;;  %16117 = vst [vmem:[#allocation117_spill] sm:$0xff] %v11414_v13  ;;  %v11418_v15 = vld [vmem:[#allocation8 + $0x48] sm:$0xff] }
 0x4dc   :  { %1363 = vmatpush1.msra.mxu0 %v10729_v16  ;;  %16118 = vst [vmem:[#allocation118_spill] sm:$0xff] %v11418_v15  ;;  %v11422_v16 = vld [vmem:[#allocation8 + $0x40] sm:$0xff] }
 0x4dd   :  { %1364 = vmatprep.subr.mxu0 %v10732_v18  ;;  %16119 = vst [vmem:[#allocation119_spill] sm:$0xff] %v11422_v16  ;;  %v11426_v18 = vld [vmem:[#allocation8 + $0x38] sm:$0xff] }
 0x4de   :  { %1365 = vmatpush1.msra.mxu0 %v10735_v19  ;;  %16120 = vst [vmem:[#allocation120_spill] sm:$0xff] %v11426_v18  ;;  %v11430_v19 = vld [vmem:[#allocation8 + $0x30] sm:$0xff] }
 0x4df   :  { %7703 = vmatprep.subr.mxu0 %v16109_v0  ;;  %16121 = vst [vmem:[#allocation121_spill] sm:$0xff] %v11430_v19 }
 0x53f   :  { %v1012_v34 = vpop.f32.mrf.mxu0 }
 0x540   :  { %v1013_v35 = vadd.f32 %v11275_v32, %v1012_v34  ;;  %v11438_v34 = vld [vmem:[#allocation8 + $0x20] sm:$0xff] }
 0x541   :  { %v7562_v37 = vpop.f32.mrf.mxu0  ;;  %16123 = vst [vmem:[#allocation123_spill] sm:$0xff] %v11438_v34 }
 0x542   :  { %v1016_v40 = vmax.f32 %v1013_v35, 0.0  ;;  %v11442_v35 = vld [vmem:[#allocation8 + $0x18] sm:$0xff]  ;;  %v11446_v37 = vld [vmem:[#allocation8 + $0x10] sm:$0xff] }
 0x543   :  { %16124 = vst [vmem:[#allocation124_spill] sm:$0xff] %v11442_v35  ;;  %16125 = vst [vmem:[#allocation125_spill] sm:$0xff] %v11446_v37 }
 0x544   :  { %7596 = vmatmul.mubr.f32.vlgmr.msra.gmra.mxu1 %v1016_v40  ;;  %v11450_v40 = vld [vmem:[#allocation8 + $0x8] sm:$0xff] }
 0x545   :  { %7599 = vmatpush3.msra.mxu1 %v11281_v41  ;;  %7630 = vmatprep.mubr.msk.f32.mxu1 %vm10383_vm0, %v16109_v0  ;;  %16126 = vst [vmem:[#allocation126_spill] sm:$0xff] %v11450_v40 }
 0x546   :  { %7600 = vmatprep.subr.mxu1 %v16109_v0 }
 0x547   :  { %7601 = vmatpush3.msra.mxu1 %v11290_v43 }
 0x548   :  { %7602 = vmatprep.subr.mxu1 %v16109_v0 }
 0x549   :  { %7603 = vmatpush3.msra.mxu1 %v11297_v44 }
 0x54a   :  { %7604 = vmatprep.subr.mxu1 %v16109_v0 }
 0x54b   :  { %7605 = vmatpush3.msra.mxu1 %v11304_v46 }
 0x54c   :  { %7606 = vmatprep.subr.mxu1 %v16109_v0 }
 0x54d   :  { %7607 = vmatpush3.msra.mxu1 %v11311_v47 }
 0x54e   :  { %7608 = vmatprep.subr.mxu1 %v16109_v0 }
 0x54f   :  { %7609 = vmatpush3.msra.mxu1 %v11318_v49 }
 0x550   :  { %7610 = vmatprep.subr.mxu1 %v16109_v0 }
 0x551   :  { %7611 = vmatpush3.msra.mxu1 %v11325_v50 }
 0x552   :  { %7612 = vmatprep.subr.mxu1 %v16109_v0 }
 0x553   :  { %7613 = vmatpush3.msra.mxu1 %v11332_v52 }
 0x554   :  { %7614 = vmatprep.subr.mxu1 %v16109_v0 }
 0x555   :  { %7615 = vmatpush3.msra.mxu1 %v11339_v53 }
 0x556   :  { %7616 = vmatprep.subr.mxu1 %v16109_v0 }
 0x557   :  { %7617 = vmatpush3.msra.mxu1 %v11346_v55 }
 0x558   :  { %7618 = vmatprep.subr.mxu1 %v16109_v0 }
 0x559   :  { %7619 = vmatpush3.msra.mxu1 %v11353_v56 }
 0x55a   :  { %7620 = vmatprep.subr.mxu1 %v16109_v0 }
 0x55b   :  { %7621 = vmatpush3.msra.mxu1 %v11360_v58 }
 0x55c   :  { %7622 = vmatprep.subr.mxu1 %v16109_v0 }
 0x55d   :  { %7623 = vmatpush3.msra.mxu1 %v11367_v59 }
 0x55e   :  { %7624 = vmatprep.subr.mxu1 %v16109_v0 }
 0x55f   :  { %7625 = vmatpush3.msra.mxu1 %v11374_v61 }
 0x560   :  { %7626 = vmatprep.subr.mxu1 %v16109_v0 }
 0x561   :  { %7627 = vmatpush3.msra.mxu1 %v11381_v62 }
 0x562   :  { %7628 = vmatprep.subr.mxu1 %v16109_v0 }
 0x563   :  { %7629 = vmatpush3.msra.mxu1 %v11388_v2 }
 0x564   :  { %7631 = vmatmul.mubr.f32.vlgmr.msra.gmra.mxu1 %v1192_v1  ;;  %7633 = vmatprep.subr.mxu1 %v16109_v0  ;;  %v11454_v1 = vld [vmem:[#allocation8] sm:$0xff] }
 0x565   :  { %7634 = vmatpush3.msra.mxu1 %v11392_v4  ;;  %7665 = vmatprep.mubr.msk.f32.mxu1 %vm10383_vm0, %v16109_v0  ;;  %16127 = vst [vmem:[#allocation127_spill] sm:$0xff] %v11454_v1 }
 0x566   :  { %7635 = vmatprep.subr.mxu1 %v16109_v0 }
 0x567   :  { %7636 = vmatpush3.msra.mxu1 %v11398_v5 }
 0x568   :  { %7637 = vmatprep.subr.mxu1 %v16109_v0 }
 0x569   :  { %7638 = vmatpush3.msra.mxu1 %v11402_v7 }
 0x56a   :  { %7639 = vmatprep.subr.mxu1 %v16109_v0 }
 0x56b   :  { %7640 = vmatpush3.msra.mxu1 %v11406_v8 }
 0x56c   :  { %7641 = vmatprep.subr.mxu1 %v16109_v0 }
 0x56d   :  { %7642 = vmatpush3.msra.mxu1 %v11410_v10 }
 0x56e   :  { %7643 = vmatprep.subr.mxu1 %v16109_v0 }
 0x56f   :  { %7644 = vmatpush3.msra.mxu1 %v11414_v13 }
 0x570   :  { %7645 = vmatprep.subr.mxu1 %v16109_v0 }
 0x571   :  { %7646 = vmatpush3.msra.mxu1 %v11418_v15 }
 0x572   :  { %7647 = vmatprep.subr.mxu1 %v16109_v0 }
 0x573   :  { %7648 = vmatpush3.msra.mxu1 %v11422_v16 }
 0x574   :  { %7649 = vmatprep.subr.mxu1 %v16109_v0 }
 0x575   :  { %7650 = vmatpush3.msra.mxu1 %v11426_v18 }
 0x576   :  { %7651 = vmatprep.subr.mxu1 %v16109_v0 }
 0x577   :  { %7652 = vmatpush3.msra.mxu1 %v11430_v19 }
 0x578   :  { %7653 = vmatprep.subr.mxu1 %v16109_v0 }
 0x579   :  { %7654 = vmatpush3.msra.mxu1 %v11434_v22 }
 0x57a   :  { %7655 = vmatprep.subr.mxu1 %v16109_v0 }
 0x57b   :  { %7656 = vmatpush3.msra.mxu1 %v11438_v34 }
 0x57c   :  { %7657 = vmatprep.subr.mxu1 %v16109_v0 }
 0x57d   :  { %7658 = vmatpush3.msra.mxu1 %v11442_v35  ;;  %v1097_v35 = vlaneseq }
 0x57e   :  { %7659 = vmatprep.subr.mxu1 %v16109_v0 }
 0x57f   :  { %7660 = vmatpush3.msra.mxu1 %v11446_v37  ;;  %v1098_v34 = vshrl.u32 %v1097_v35, 7  ;;  %v1173_v19 = vpop.f32.mrf.mxu0  ;;  %v404_v37 = vld [vmem:[%s15531_s16] sm:$0x3] }
 0x580   :  { %7661 = vmatprep.subr.mxu1 %v16109_v0 }
 0x581   :  { %7662 = vmatpush3.msra.mxu1 %v11450_v40  ;;  %v1103_v22 = vsub.s32 1, %v1098_v34  ;;  %v1099_v18 = vsub.s32 0, %v1098_v34  ;;  %v1175_v40 = vpop.f32.mrf.mxu0  ;;  %v11470_v34 = vld [vmem:[%s15529_s14] ss:$0 sm:$0xff] }
 0x582   :  { %7663 = vmatprep.subr.mxu1 %v16109_v0 }
 0x583   :  { %7664 = vmatpush3.msra.mxu1 %v11454_v1  ;;  %v11461_v16 = vrot.slane %v404_v37, %v1103_v22  ;;  %v11463_v15 = vrot.slane %v404_v37, %v1099_v18 }
 0x584   :  { %7668 = vmatprep.subr.mxu1 %v16109_v0 }
 0x585   :  { %16128 = vst [vmem:[#allocation128_spill] sm:$0xff] %v11461_v16  ;;  %16129 = vst [vmem:[#allocation129_spill] sm:$0xff] %v11463_v15  ;;  %v1176_v13 = vadd.f32 %v1175_v40, %v11461_v16  ;;  %v1174_v1 = vadd.f32 %v1173_v19, %v11463_v15  ;;  %v9476_v16 = vld [vmem:[#allocation6] sm:$0xff] }
 0x587   :  { %v1184_v10 = vmul.f32 0.5, %v1176_v13  ;;  %v1178_v8 = vmul.f32 0.5, %v1174_v1 }
 0x589   :  { %9368 = vtanh.f32 %v1184_v10 }
 0x58a   :  { %9370 = vtanh.f32 %v1178_v8  ;;  %v11498_v8 = vld [vmem:[%s16023_s2] ss:$0 sm:$0xff] }
 0x596   :  { %v9369_v37 = vpop.eup %9368 }
 0x597   :  { %v9371_v40 = vpop.eup %9370  ;;  %v1186_v19 = vadd.f32 1.0, %v9369_v37  ;;  %v11514_v37 = vld [vmem:[#allocation11 + $0x48] sm:$0xff] }
 0x598   :  { %v1180_v13 = vadd.f32 1.0, %v9371_v40  ;;  %v11520_v40 = vld [vmem:[%s15532_s17 + $0x78] sm:$0xff] }
 0x599   :  { %v1187_v1 = vmul.f32 0.5, %v1186_v19  ;;  %v11525_v19 = vld [vmem:[#allocation11 + $0x40] sm:$0xff] }
 0x59a   :  { %v1181_v10 = vmul.f32 0.5, %v1180_v13  ;;  %v11531_v13 = vld [vmem:[%s15532_s17 + $0x70] sm:$0xff] }
 0x59b   :  { %v1188_v4 = vmul.f32 %v9476_v16, %v1187_v1  ;;  %v11536_v1 = vld [vmem:[#allocation11 + $0x38] sm:$0xff] }
 0x604   :  { %v1089_v35 = vpop.f32.mrf.mxu1 }
 0x605   :  { %v1090_v22 = vadd.f32 %v11470_v34, %v1089_v35  ;;  %v11504_v35 = vld [vmem:[#allocation11 + $0x58] sm:$0xff] }
 0x606   :  { %v7597_v7 = vpop.f32.mrf.mxu1 }
 0x607   :  { %v1093_v5 = vmax.f32 %v1090_v22, 0.0  ;;  %v11478_v7 = vld [vmem:[#allocation11 + $0x78] sm:$0xff] }
 0x609   :  { %v1094_v18 = vadd.f32 %v1093_v5, %v11037_v14  ;;  %v11484_v14 = vld [vmem:[#allocation11 + $0x70] sm:$0xff]  ;;  %v11492_v5 = vld [vmem:[#allocation11 + $0x60] sm:$0xff] }
 0x60b   :  { %9372 = vtanh.f32 %v1094_v18  ;;  %v11510_v18 = vld [vmem:[#allocation11 + $0x50] sm:$0xff] }
 0x618   :  { %v9373_v15 = vpop.eup %9372 }
 0x619   :  { %v1183_v2 = vmul.f32 %v9373_v15, %v1181_v10  ;;  %v11542_v10 = vld [vmem:[%s15532_s17 + $0x68] sm:$0xff] }
 0x61a   :  { %16130 = vst [vmem:[#allocation130_spill] sm:$0xff] %v11542_v10 }
 0x61b   :  { %v11474_v62 = vadd.f32 %v1188_v4, %v1183_v2  ;;  %v11488_v2 = vld [vmem:[#allocation11 + $0x68] sm:$0xff] }
 0x61d   :  { %7666 = vmatmul.mubr.f32.vlgmr.msra.gmra.mxu1 %v11474_v62  ;;  %1190 = vst [vmem:[#allocation18] sm:$0xff] %v11474_v62 }
 0x61e   :  { %7669 = vmatpush3.msra.mxu1 %v11478_v7  ;;  %7700 = vmatprep.mubr.msk.f32.mxu1 %vm10383_vm0, %v16109_v0 }
 0x61f   :  { %7670 = vmatprep.subr.mxu1 %v16109_v0 }
 0x620   :  { %7671 = vmatpush3.msra.mxu1 %v11484_v14 }
 0x621   :  { %7672 = vmatprep.subr.mxu1 %v16109_v0 }
 0x622   :  { %7673 = vmatpush3.msra.mxu1 %v11488_v2 }
 0x623   :  { %7674 = vmatprep.subr.mxu1 %v16109_v0 }
 0x624   :  { %v1259_v4 = vpop.f32.mrf.mxu1  ;;  %7675 = vmatpush3.msra.mxu1 %v11492_v5 }
 0x625   :  { %v11501_v15 = vadd.f32 %v11498_v8, %v1259_v4  ;;  %7676 = vmatprep.subr.mxu1 %v16109_v0  ;;  %v11547_v4 = vld [vmem:[#allocation11 + $0x30] sm:$0xff] }
 0x626   :  { %v7632_v16 = vpop.f32.mrf.mxu1  ;;  %7677 = vmatpush3.msra.mxu1 %v11504_v35  ;;  %16131 = vst [vmem:[#allocation131_spill] sm:$0xff] %v11547_v4 }
 0x627   :  { %v1333_v22 = vsub.f32 %v11474_v62, %v11501_v15  ;;  %7678 = vmatprep.subr.mxu1 %v16109_v0  ;;  %v11553_v16 = vld [vmem:[%s15532_s17 + $0x60] sm:$0xff] }
 0x628   :  { %7679 = vmatpush3.msra.mxu1 %v11510_v18  ;;  %16132 = vst [vmem:[#allocation132_spill] sm:$0xff] %v11553_v16 }
 0x629   :  { %1399 = vmatmul.mubr.f32.vlgmr.msra.gmra.mxu0 %v1333_v22  ;;  %7680 = vmatprep.subr.mxu1 %v16109_v0  ;;  %v11558_v22 = vld [vmem:[#allocation11 + $0x28] sm:$0xff] }
 0x62a   :  { %7681 = vmatpush3.msra.mxu1 %v11514_v37  ;;  %7704 = vmatpush3.msra.mxu0 %v11520_v40  ;;  %16133 = vst [vmem:[#allocation133_spill] sm:$0xff] %v11558_v22 }
 0x62b   :  { %7682 = vmatprep.subr.mxu1 %v16109_v0  ;;  %7705 = vmatprep.subr.mxu0 %v16109_v0 }
 0x62c   :  { %7683 = vmatpush3.msra.mxu1 %v11525_v19  ;;  %7706 = vmatpush3.msra.mxu0 %v11531_v13 }
 0x62d   :  { %7684 = vmatprep.subr.mxu1 %v16109_v0  ;;  %7707 = vmatprep.subr.mxu0 %v16109_v0 }
 0x62e   :  { %7685 = vmatpush3.msra.mxu1 %v11536_v1  ;;  %7708 = vmatpush3.msra.mxu0 %v11542_v10  ;;  %v11564_v10 = vld [vmem:[%s15532_s17 + $0x58] sm:$0xff] }
 0x62f   :  { %7686 = vmatprep.subr.mxu1 %v16109_v0  ;;  %7709 = vmatprep.subr.mxu0 %v16109_v0  ;;  %16134 = vst [vmem:[#allocation134_spill] sm:$0xff] %v11564_v10 }
 0x630   :  { %7687 = vmatpush3.msra.mxu1 %v11547_v4  ;;  %7710 = vmatpush3.msra.mxu0 %v11553_v16  ;;  %v11569_v16 = vld [vmem:[#allocation11 + $0x20] sm:$0xff]  ;;  %v11575_v4 = vld [vmem:[%s15532_s17 + $0x50] sm:$0xff] }
 0x631   :  { %7688 = vmatprep.subr.mxu1 %v16109_v0  ;;  %7711 = vmatprep.subr.mxu0 %v16109_v0  ;;  %16135 = vst [vmem:[#allocation135_spill] sm:$0xff] %v11569_v16  ;;  %16136 = vst [vmem:[#allocation136_spill] sm:$0xff] %v11575_v4 }
 0x632   :  { %7689 = vmatpush3.msra.mxu1 %v11558_v22  ;;  %7712 = vmatpush3.msra.mxu0 %v11564_v10  ;;  %v11580_v10 = vld [vmem:[#allocation11 + $0x18] sm:$0xff]  ;;  %v11586_v22 = vld [vmem:[%s15532_s17 + $0x48] sm:$0xff] }
 0x633   :  { %7690 = vmatprep.subr.mxu1 %v16109_v0  ;;  %7713 = vmatprep.subr.mxu0 %v16109_v0  ;;  %16137 = vst [vmem:[#allocation137_spill] sm:$0xff] %v11580_v10  ;;  %16138 = vst [vmem:[#allocation138_spill] sm:$0xff] %v11586_v22 }
 0x634   :  { %7691 = vmatpush3.msra.mxu1 %v11569_v16  ;;  %7714 = vmatpush3.msra.mxu0 %v11575_v4  ;;  %v11591_v4 = vld [vmem:[#allocation11 + $0x10] sm:$0xff]  ;;  %v11597_v16 = vld [vmem:[%s15532_s17 + $0x40] sm:$0xff] }
 0x635   :  { %7692 = vmatprep.subr.mxu1 %v16109_v0  ;;  %7715 = vmatprep.subr.mxu0 %v16109_v0  ;;  %16139 = vst [vmem:[#allocation139_spill] sm:$0xff] %v11591_v4  ;;  %16140 = vst [vmem:[#allocation140_spill] sm:$0xff] %v11597_v16 }
 0x636   :  { %7693 = vmatpush3.msra.mxu1 %v11580_v10  ;;  %7716 = vmatpush3.msra.mxu0 %v11586_v22  ;;  %v11602_v22 = vld [vmem:[#allocation11 + $0x8] sm:$0xff]  ;;  %v11608_v10 = vld [vmem:[%s15532_s17 + $0x38] sm:$0xff] }
 0x637   :  { %7694 = vmatprep.subr.mxu1 %v16109_v0  ;;  %7717 = vmatprep.subr.mxu0 %v16109_v0  ;;  %16141 = vst [vmem:[#allocation141_spill] sm:$0xff] %v11608_v10 }
 0x638   :  { %7695 = vmatpush3.msra.mxu1 %v11591_v4  ;;  %7718 = vmatpush3.msra.mxu0 %v11597_v16  ;;  %v11613_v16 = vld [vmem:[#allocation11] sm:$0xff]  ;;  %v11619_v4 = vld [vmem:[%s15532_s17 + $0x30] sm:$0xff] }
 0x639   :  { %7696 = vmatprep.subr.mxu1 %v16109_v0  ;;  %7719 = vmatprep.subr.mxu0 %v16109_v0  ;;  %16142 = vst [vmem:[#allocation142_spill] sm:$0xff] %v11619_v4 }
 0x63a   :  { %7697 = vmatpush3.msra.mxu1 %v11602_v22  ;;  %7720 = vmatpush3.msra.mxu0 %v11608_v10  ;;  %v11627_v10 = vld [vmem:[%s15532_s17 + $0x28] sm:$0xff] }
 0x63b   :  { %7698 = vmatprep.subr.mxu1 %v16109_v0  ;;  %7721 = vmatprep.subr.mxu0 %v16109_v0  ;;  %16143 = vst [vmem:[#allocation143_spill] sm:$0xff] %v11627_v10 }
 0x63c   :  { %7699 = vmatpush3.msra.mxu1 %v11613_v16  ;;  %7722 = vmatpush3.msra.mxu0 %v11619_v4  ;;  %v11637_v4 = vld [vmem:[%s15532_s17 + $0x20] sm:$0xff] }
 0x63d   :  { %7701 = vmatmul.mubr.f32.vlgmr.msra.gmra.mxu1 %v11501_v15  ;;  %7723 = vmatprep.subr.mxu0 %v16109_v0 }
 0x63e   :  { %7724 = vmatpush3.msra.mxu0 %v11627_v10  ;;  %7735 = vmatprep.mubr.msk.f32.mxu0 %vm10383_vm0, %v16109_v0  ;;  %v11646_v10 = vld [vmem:[%s15532_s17 + $0x18] sm:$0xff] }
 0x63f   :  { %7725 = vmatprep.subr.mxu0 %v16109_v0  ;;  %7743 = vmatprep.subr.mxu1 %v16109_v0 }
 0x640   :  { %7726 = vmatpush3.msra.mxu0 %v11637_v4  ;;  %7744 = vmatpush3.msra.mxu1 %v10827_v20  ;;  %v11655_v20 = vld [vmem:[%s15532_s17 + $0x10] sm:$0xff] }
 0x641   :  { %7727 = vmatprep.subr.mxu0 %v16109_v0  ;;  %7745 = vmatprep.subr.mxu1 %v16109_v0 }
 0x642   :  { %7728 = vmatpush3.msra.mxu0 %v11646_v10  ;;  %7746 = vmatpush3.msra.mxu1 %v10829_v21  ;;  %v11664_v21 = vld [vmem:[%s15532_s17 + $0x8] sm:$0xff] }
 0x643   :  { %7729 = vmatprep.subr.mxu0 %v16109_v0  ;;  %7747 = vmatprep.subr.mxu1 %v16109_v0 }
 0x644   :  { %7730 = vmatpush3.msra.mxu0 %v11655_v20  ;;  %7748 = vmatpush3.msra.mxu1 %v10834_v23  ;;  %v11673_v23 = vld [vmem:[%s15532_s17] sm:$0xff] }
 0x645   :  { %7731 = vmatprep.subr.mxu0 %v16109_v0  ;;  %7749 = vmatprep.subr.mxu1 %v16109_v0 }
 0x646   :  { %7732 = vmatpush3.msra.mxu0 %v11664_v21  ;;  %7750 = vmatpush3.msra.mxu1 %v10838_v24 }
 0x647   :  { %7733 = vmatprep.subr.mxu0 %v16109_v0  ;;  %7751 = vmatprep.subr.mxu1 %v16109_v0 }
 0x648   :  { %7734 = vmatpush3.msra.mxu0 %v11673_v23  ;;  %7752 = vmatpush3.msra.mxu1 %v10842_v25 }
 0x649   :  { %7738 = vmatprep.subr.mxu0 %v16109_v0  ;;  %7753 = vmatprep.subr.mxu1 %v16109_v0 }
 0x64a   :  { %7754 = vmatpush3.msra.mxu1 %v10846_v26  ;;  %7775 = vmatprep.mubr.msk.f32.mxu1 %vm10383_vm0, %v16109_v0  ;;  %v11706_v26 = vld [vmem:[%s15520_s5] ss:$0 sm:$0xff] }
 0x64b   :  { %7755 = vmatprep.subr.mxu1 %v16109_v0 }
 0x64c   :  { %7756 = vmatpush3.msra.mxu1 %v10850_v27 }
 0x64d   :  { %7757 = vmatprep.subr.mxu1 %v16109_v0 }
 0x64e   :  { %7758 = vmatpush3.msra.mxu1 %v10854_v28 }
 0x64f   :  { %7759 = vmatprep.subr.mxu1 %v16109_v0 }
 0x650   :  { %7760 = vmatpush3.msra.mxu1 %v10858_v29 }
 0x651   :  { %7761 = vmatprep.subr.mxu1 %v16109_v0 }
 0x652   :  { %7762 = vmatpush3.msra.mxu1 %v10862_v30  ;;  %v11712_v30 = vld [vmem:[%s15533_s18] sm:$0xf] }
 0x653   :  { %7763 = vmatprep.subr.mxu1 %v16109_v0 }
 0x654   :  { %7764 = vmatpush3.msra.mxu1 %v10866_v31 }
 0x655   :  { %7765 = vmatprep.subr.mxu1 %v16109_v0 }
 0x656   :  { %7766 = vmatpush3.msra.mxu1 %v10870_v33 }
 0x657   :  { %7767 = vmatprep.subr.mxu1 %v16109_v0 }
 0x658   :  { %7768 = vmatpush3.msra.mxu1 %v10874_v36 }
 0x659   :  { %7769 = vmatprep.subr.mxu1 %v16109_v0 }
 0x65a   :  { %7770 = vmatpush3.msra.mxu1 %v10885_v60 }
 0x65b   :  { %7771 = vmatprep.subr.mxu1 %v16109_v0 }
 0x65c   :  { %7772 = vmatpush3.msra.mxu1 %v10889_v63 }
 0x65d   :  { %7773 = vmatprep.subr.mxu1 %v16109_v0 }
 0x65e   :  { %7774 = vmatpush3.msra.mxu1 %v10893_v3 }
 0x65f   :  { %7813 = vmatprep.subr.mxu1 %v16109_v0 }
 0x6dd   :  { %v1329_v24 = vpop.f32.mrf.mxu1 }
 0x6de   :  { %v1330_v27 = vadd.f32 %v11706_v26, %v1329_v24 }
 0x6df   :  { %v7667_v25 = vpop.f32.mrf.mxu1 }
 0x6e9   :  { %v1400_v28 = vpop.f32.mrf.mxu0 }
 0x6ea   :  { %v1475_v29 = vmul.f32 %v1400_v28, %v1330_v27  ;;  %v16144_v28 = vld [vmem:[#allocation25_spill] sm:$0xff] }
 0x6eb   :  { %v1402_v36 = vpop.f32.mrf.mxu0 }
 0x6ec   :  { %7736 = vmatmul.mubr.f32.vlgmr.msra.gmra.mxu0 %v1475_v29  ;;  %v16145_v29 = vld [vmem:[#allocation26_spill] sm:$0xff] }
 0x6ed   :  { %7739 = vmatpush3.msk.msra.mxu0 %vm786_vm1, %v11712_v30  ;;  %7740 = vmatprep.mubr.msk.f32.mxu0 %vm10383_vm0, %v16109_v0 }
 0x6ee   :  { %7778 = vmatprep.subr.mxu0 %v16109_v0 }
 0x6fd   :  { %v1471_v31 = vpop.f32.mrf.mxu1 }
 0x6ff   :  { %v7702_v33 = vpop.f32.mrf.mxu1 }
 0x700   :  { %v16146_v33 = vld [vmem:[#allocation27_spill] sm:$0xff] }
 0x7ac   :  { %v1542_v60 = vpop.f32.mrf.mxu0 }
 0x7ad   :  { %v1546_v63 = vmul.f32 0.5, %v1542_v60  ;;  %v16148_v60 = vld [vmem:[#allocation29_spill] sm:$0xff] }
 0x7ae   :  { %v7737_v3 = vpop.f32.mrf.mxu0 }
 0x7af   :  { %9374 = vtanh.f32 %v1546_v63  ;;  %v16150_v63 = vld [vmem:[#allocation31_spill] sm:$0xff]  ;;  %v16151_v3 = vld [vmem:[#allocation32_spill] sm:$0xff] }
 0x7b0   :  { %9376 = vtanh.f32 %v11474_v62 }
 0x7bc   :  { %v9375_v24 = vpop.eup %9374 }
 0x7bd   :  { %v1548_v25 = vadd.f32 1.0, %v9375_v24  ;;  %v16152_v24 = vld [vmem:[#allocation33_spill] sm:$0xff] }
 0x7bf   :  { %v1549_v27 = vmul.f32 0.5, %v1548_v25  ;;  %v16153_v25 = vld [vmem:[#allocation34_spill] sm:$0xff] }
 0x7c1   :  { %7741 = vmatmul.mubr.msk.f32.vlgmr.msra.gmra.mxu0 %vm782_vm2, %v1549_v27  ;;  %v16154_v27 = vld [vmem:[#allocation35_spill] sm:$0xff] }
 0x7c2   :  { %7779 = vmatpush3.msra.mxu0 %v10896_v6  ;;  %7810 = vmatprep.mubr.msk.f32.mxu0 %vm10383_vm0, %v16109_v0  ;;  %v16147_v6 = vld [vmem:[#allocation28_spill] sm:$0xff] }
 0x7c3   :  { %7780 = vmatprep.subr.mxu0 %v16109_v0 }
 0x7c4   :  { %7781 = vmatpush3.msra.mxu0 %v10898_v11  ;;  %v16149_v11 = vld [vmem:[#allocation30_spill] sm:$0xff] }
 0x7c5   :  { %7782 = vmatprep.subr.mxu0 %v16109_v0 }
 0x7c6   :  { %7783 = vmatpush3.msra.mxu0 %v16144_v28  ;;  %v16155_v28 = vld [vmem:[#allocation36_spill] sm:$0xff] }
 0x7c7   :  { %7784 = vmatprep.subr.mxu0 %v16109_v0 }
 0x7c8   :  { %7785 = vmatpush3.msra.mxu0 %v16145_v29  ;;  %v16156_v29 = vld [vmem:[#allocation38_spill] sm:$0xff] }
 0x7c9   :  { %7786 = vmatprep.subr.mxu0 %v16109_v0 }
 0x7ca   :  { %7787 = vmatpush3.msra.mxu0 %v16146_v33 }
 0x7cb   :  { %7788 = vmatprep.subr.mxu0 %v16109_v0 }
 0x7cc   :  { %7789 = vmatpush3.msra.mxu0 %v16147_v6  ;;  %v16157_v6 = vld [vmem:[#allocation37_spill] sm:$0xff] }
 0x7cd   :  { %7790 = vmatprep.subr.mxu0 %v16109_v0 }
 0x7ce   :  { %7791 = vmatpush3.msra.mxu0 %v16148_v60  ;;  %v1472_v60 = vadd.f32 %v16157_v6, %v1471_v31  ;;  %v16161_v31 = vld [vmem:[#allocation42_spill] sm:$0xff]  ;;  %v16168_v6 = vld [vmem:[#allocation49_spill] sm:$0xff] }
 0x7cf   :  { %7792 = vmatprep.subr.mxu0 %v16109_v0 }
 0x7d0   :  { %7793 = vmatpush3.msra.mxu0 %v16149_v11 }
 0x7d1   :  { %7794 = vmatprep.subr.mxu0 %v16109_v0 }
 0x7d2   :  { %7795 = vmatpush3.msra.mxu0 %v16150_v63 }
 0x7d3   :  { %7796 = vmatprep.subr.mxu0 %v16109_v0 }
 0x7d4   :  { %7797 = vmatpush3.msra.mxu0 %v16151_v3 }
 0x7d5   :  { %7798 = vmatprep.subr.mxu0 %v16109_v0 }
 0x7d6   :  { %7799 = vmatpush3.msra.mxu0 %v16152_v24  ;;  %v16158_v24 = vld [vmem:[#allocation39_spill] sm:$0xff] }
 0x7d7   :  { %7800 = vmatprep.subr.mxu0 %v16109_v0 }
 0x7d8   :  { %7801 = vmatpush3.msra.mxu0 %v16153_v25  ;;  %v16163_v25 = vld [vmem:[#allocation44_spill] sm:$0xff] }
 0x7d9   :  { %7802 = vmatprep.subr.mxu0 %v16109_v0 }
 0x7da   :  { %7803 = vmatpush3.msra.mxu0 %v16154_v27  ;;  %v16164_v27 = vld [vmem:[#allocation45_spill] sm:$0xff] }
 0x7db   :  { %7804 = vmatprep.subr.mxu0 %v16109_v0 }
 0x7dc   :  { %7805 = vmatpush3.msra.mxu0 %v16155_v28  ;;  %v16165_v28 = vld [vmem:[#allocation46_spill] sm:$0xff] }
 0x7dd   :  { %7806 = vmatprep.subr.mxu0 %v16109_v0 }
 0x7de   :  { %7807 = vmatpush3.msra.mxu0 %v10963_v51  ;;  %v16159_v51 = vld [vmem:[#allocation40_spill] sm:$0xff] }
 0x7df   :  { %7808 = vmatprep.subr.mxu0 %v16109_v0 }
 0x7e0   :  { %7809 = vmatpush3.msra.mxu0 %v10967_v48  ;;  %v16160_v48 = vld [vmem:[#allocation41_spill] sm:$0xff] }
 0x7e1   :  { %1841 = vmatprep.subr.mxu0 %v16156_v29  ;;  %v16166_v29 = vld [vmem:[#allocation47_spill] sm:$0xff] }
 0x881   :  { %v1619_v33 = vpop.f32.mrf.mxu0 }
 0x882   :  { %v1623_v11 = vmul.f32 %v1619_v33, %v1402_v36  ;;  %v16162_v36 = vld [vmem:[#allocation43_spill] sm:$0xff]  ;;  %v16167_v33 = vld [vmem:[#allocation48_spill] sm:$0xff] }
 0x883   :  { %v7742_v63 = vpop.f32.mrf.mxu0 }
 0x884   :  { %v1624_v3 = vadd.f32 %v1623_v11, %v1472_v60  ;;  %v16169_v60 = vld [vmem:[#allocation50_spill] sm:$0xff]  ;;  %v16170_v11 = vld [vmem:[#allocation51_spill] sm:$0xff]  ;;  %v16171_v63 = vld [vmem:[#allocation52_spill] sm:$0xff] }
 0x886   :  { %7776 = vmatmul.mubr.f32.vlgmr.msra.gmra.mxu1 %v1624_v3 }
 0x887   :  { %7814 = vmatpush3.msra.mxu1 %v16158_v24  ;;  %7845 = vmatprep.mubr.msk.f32.mxu1 %vm10383_vm0, %v16109_v0 }
 0x888   :  { %7815 = vmatprep.subr.mxu1 %v16109_v0 }
 0x889   :  { %7816 = vmatpush3.msra.mxu1 %v16159_v51 }
 0x88a   :  { %7817 = vmatprep.subr.mxu1 %v16109_v0 }
 0x88b   :  { %7818 = vmatpush3.msra.mxu1 %v16160_v48 }
 0x88c   :  { %7819 = vmatprep.subr.mxu1 %v16109_v0 }
 0x88d   :  { %7820 = vmatpush3.msra.mxu1 %v16161_v31  ;;  %v9377_v31 = vpop.eup %9376 }
 0x88e   :  { %7821 = vmatprep.subr.mxu1 %v16109_v0 }
 0x88f   :  { %7822 = vmatpush3.msra.mxu1 %v16162_v36  ;;  %v16172_v36 = vld [vmem:[#allocation53_spill] sm:$0xff] }
 0x890   :  { %7823 = vmatprep.subr.mxu1 %v16109_v0 }
 0x891   :  { %7824 = vmatpush3.msra.mxu1 %v16163_v25  ;;  %v16175_v25 = vld [vmem:[#allocation56_spill] sm:$0xff] }
 0x892   :  { %7825 = vmatprep.subr.mxu1 %v16109_v0 }
 0x893   :  { %7826 = vmatpush3.msra.mxu1 %v16164_v27  ;;  %v16176_v27 = vld [vmem:[#allocation57_spill] sm:$0xff] }
 0x894   :  { %7827 = vmatprep.subr.mxu1 %v16109_v0 }
 0x895   :  { %7828 = vmatpush3.msra.mxu1 %v16165_v28  ;;  %v16177_v28 = vld [vmem:[#allocation58_spill] sm:$0xff] }
 0x896   :  { %7829 = vmatprep.subr.mxu1 %v16109_v0 }
 0x897   :  { %7830 = vmatpush3.msra.mxu1 %v16166_v29  ;;  %v16179_v29 = vld [vmem:[#allocation60_spill] sm:$0xff] }
 0x898   :  { %7831 = vmatprep.subr.mxu1 %v16109_v0 }
 0x899   :  { %7832 = vmatpush3.msra.mxu1 %v16167_v33  ;;  %v16180_v33 = vld [vmem:[#allocation61_spill] sm:$0xff] }
 0x89a   :  { %7833 = vmatprep.subr.mxu1 %v16109_v0 }
 0x89b   :  { %7834 = vmatpush3.msra.mxu1 %v16168_v6  ;;  %v16181_v6 = vld [vmem:[#allocation62_spill] sm:$0xff] }
 0x89c   :  { %7835 = vmatprep.subr.mxu1 %v16109_v0 }
 0x89d   :  { %7836 = vmatpush3.msra.mxu1 %v16169_v60  ;;  %v16182_v60 = vld [vmem:[#allocation63_spill] sm:$0xff] }
 0x89e   :  { %7837 = vmatprep.subr.mxu1 %v16109_v0 }
 0x89f   :  { %7838 = vmatpush3.msra.mxu1 %v16170_v11  ;;  %v16184_v11 = vld [vmem:[#allocation65_spill] sm:$0xff] }
 0x8a0   :  { %7839 = vmatprep.subr.mxu1 %v16109_v0 }
 0x8a1   :  { %7840 = vmatpush3.msra.mxu1 %v16171_v63  ;;  %v16185_v63 = vld [vmem:[#allocation66_spill] sm:$0xff] }
 0x8a2   :  { %7841 = vmatprep.subr.mxu1 %v16109_v0 }
 0x8a3   :  { %7842 = vmatpush3.msra.mxu1 %v11231_v9  ;;  %v16174_v9 = vld [vmem:[#allocation55_spill] sm:$0xff] }
 0x8a4   :  { %7843 = vmatprep.subr.mxu1 %v16109_v0 }
 0x8a5   :  { %7844 = vmatpush3.msra.mxu1 %v11238_v38  ;;  %v16173_v38 = vld [vmem:[#allocation54_spill] sm:$0xff] }
 0x8a6   :  { %7848 = vmatprep.subr.mxu1 %v16109_v0 }
 0x946   :  { %v1691_v3 = vpop.f32.mrf.mxu1 }
 0x947   :  { %v1695_v24 = vadd.f32 %v1691_v3, %v11474_v62  ;;  %v16186_v3 = vld [vmem:[#allocation67_spill] sm:$0xff] }
 0x948   :  { %v7777_v51 = vpop.f32.mrf.mxu1 }
 0x949   :  { %v11792_v48 = vadd.f32 %v11033_v45, %v1695_v24  ;;  %v16178_v45 = vld [vmem:[#allocation59_spill] sm:$0xff]  ;;  %v16187_v24 = vld [vmem:[#allocation68_spill] sm:$0xff]  ;;  %v16188_v51 = vld [vmem:[#allocation69_spill] sm:$0xff] }
 0x94b   :  { %7811 = vmatmul.mubr.f32.vlgmr.msra.gmra.mxu0 %v11792_v48 }
 0x94c   :  { %1842 = vmatpush1.msra.mxu0 %v16172_v36  ;;  %1905 = vmatprep.mubr.f32.mxu0 %v9377_v31  ;;  %v16189_v31 = vld [vmem:[#allocation70_spill] sm:$0xff]  ;;  %v16190_v36 = vld [vmem:[#allocation71_spill] sm:$0xff] }
 0x94d   :  { %1843 = vmatprep.subr.mxu0 %v11041_v17  ;;  %v16183_v17 = vld [vmem:[#allocation64_spill] sm:$0xff] }
 0x94e   :  { %1844 = vmatpush1.msra.mxu0 %v16173_v38  ;;  %v16191_v38 = vld [vmem:[#allocation72_spill] sm:$0xff] }
 0x94f   :  { %1845 = vmatprep.subr.mxu0 %v16174_v9  ;;  %v16192_v9 = vld [vmem:[#allocation73_spill] sm:$0xff] }
 0x950   :  { %1846 = vmatpush1.msra.mxu0 %v16175_v25  ;;  %v16193_v25 = vld [vmem:[#allocation74_spill] sm:$0xff] }
 0x951   :  { %1847 = vmatprep.subr.mxu0 %v16176_v27  ;;  %v16194_v27 = vld [vmem:[#allocation75_spill] sm:$0xff] }
 0x952   :  { %1848 = vmatpush1.msra.mxu0 %v16177_v28  ;;  %v16195_v28 = vld [vmem:[#allocation76_spill] sm:$0xff] }
 0x953   :  { %1849 = vmatprep.subr.mxu0 %v16178_v45  ;;  %v16196_v45 = vld [vmem:[#allocation77_spill] sm:$0xff] }
 0x954   :  { %1850 = vmatpush1.msra.mxu0 %v16179_v29  ;;  %v16197_v29 = vld [vmem:[#allocation78_spill] sm:$0xff] }
 0x955   :  { %1851 = vmatprep.subr.mxu0 %v16180_v33  ;;  %v16198_v33 = vld [vmem:[#allocation79_spill] sm:$0xff] }
 0x956   :  { %1852 = vmatpush1.msra.mxu0 %v16181_v6  ;;  %v16199_v6 = vld [vmem:[#allocation80_spill] sm:$0xff] }
 0x957   :  { %1853 = vmatprep.subr.mxu0 %v16182_v60  ;;  %v16200_v60 = vld [vmem:[#allocation81_spill] sm:$0xff] }
 0x958   :  { %1854 = vmatpush1.msra.mxu0 %v16183_v17  ;;  %v16201_v17 = vld [vmem:[#allocation82_spill] sm:$0xff] }
 0x959   :  { %1855 = vmatprep.subr.mxu0 %v16184_v11  ;;  %v16202_v11 = vld [vmem:[#allocation83_spill] sm:$0xff] }
 0x95a   :  { %1856 = vmatpush1.msra.mxu0 %v16185_v63  ;;  %v16203_v63 = vld [vmem:[#allocation84_spill] sm:$0xff] }
 0x95b   :  { %1857 = vmatprep.subr.mxu0 %v16186_v3  ;;  %v16204_v3 = vld [vmem:[#allocation85_spill] sm:$0xff] }
 0x95c   :  { %1858 = vmatpush1.msra.mxu0 %v16187_v24  ;;  %v16205_v24 = vld [vmem:[#allocation86_spill] sm:$0xff] }
 0x95d   :  { %1859 = vmatprep.subr.mxu0 %v16188_v51  ;;  %v16206_v51 = vld [vmem:[#allocation87_spill] sm:$0xff] }
 0x95e   :  { %1860 = vmatpush1.msra.mxu0 %v16189_v31  ;;  %v16207_v31 = vld [vmem:[#allocation88_spill] sm:$0xff] }
 0x95f   :  { %1861 = vmatprep.subr.mxu0 %v16190_v36  ;;  %v16208_v36 = vld [vmem:[#allocation89_spill] sm:$0xff] }
 0x960   :  { %1862 = vmatpush1.msra.mxu0 %v16191_v38  ;;  %v16209_v38 = vld [vmem:[#allocation90_spill] sm:$0xff] }
 0x961   :  { %1863 = vmatprep.subr.mxu0 %v16192_v9  ;;  %v16210_v9 = vld [vmem:[#allocation91_spill] sm:$0xff] }
 0x962   :  { %1864 = vmatpush1.msra.mxu0 %v16193_v25  ;;  %v16211_v25 = vld [vmem:[#allocation92_spill] sm:$0xff] }
 0x963   :  { %1865 = vmatprep.subr.mxu0 %v16194_v27  ;;  %v16212_v27 = vld [vmem:[#allocation93_spill] sm:$0xff] }
 0x964   :  { %1866 = vmatpush1.msra.mxu0 %v16195_v28  ;;  %v16213_v28 = vld [vmem:[#allocation94_spill] sm:$0xff] }
 0x965   :  { %1867 = vmatprep.subr.mxu0 %v16196_v45  ;;  %v16214_v45 = vld [vmem:[#allocation95_spill] sm:$0xff] }
 0x966   :  { %1868 = vmatpush1.msra.mxu0 %v16197_v29  ;;  %v16215_v29 = vld [vmem:[#allocation96_spill] sm:$0xff] }
 0x967   :  { %1869 = vmatprep.subr.mxu0 %v16198_v33  ;;  %v16216_v33 = vld [vmem:[#allocation97_spill] sm:$0xff] }
 0x968   :  { %1870 = vmatpush1.msra.mxu0 %v16199_v6  ;;  %v16217_v6 = vld [vmem:[#allocation98_spill] sm:$0xff] }
 0x969   :  { %1871 = vmatprep.subr.mxu0 %v16200_v60  ;;  %v16218_v60 = vld [vmem:[#allocation99_spill] sm:$0xff] }
 0x96a   :  { %1872 = vmatpush1.msra.mxu0 %v16201_v17  ;;  %v16219_v17 = vld [vmem:[#allocation100_spill] sm:$0xff] }
 0x96b   :  { %1873 = vmatprep.subr.mxu0 %v16202_v11  ;;  %v16220_v11 = vld [vmem:[#allocation101_spill] sm:$0xff] }
 0x96c   :  { %1874 = vmatpush2.msra.mxu0 %v16203_v63  ;;  %v16221_v63 = vld [vmem:[#allocation102_spill] sm:$0xff] }
 0x96d   :  { %1875 = vmatprep.subr.mxu0 %v16204_v3  ;;  %v16222_v3 = vld [vmem:[#allocation103_spill] sm:$0xff] }
 0x96e   :  { %1876 = vmatpush2.msra.mxu0 %v16205_v24  ;;  %v16223_v24 = vld [vmem:[#allocation104_spill] sm:$0xff] }
 0x96f   :  { %1877 = vmatprep.subr.mxu0 %v16206_v51  ;;  %v16224_v51 = vld [vmem:[#allocation105_spill] sm:$0xff] }
 0x970   :  { %1878 = vmatpush2.msra.mxu0 %v16207_v31  ;;  %v16225_v31 = vld [vmem:[#allocation106_spill] sm:$0xff] }
 0x971   :  { %1879 = vmatprep.subr.mxu0 %v16208_v36  ;;  %v16226_v36 = vld [vmem:[#allocation107_spill] sm:$0xff] }
 0x972   :  { %1880 = vmatpush2.msra.mxu0 %v16209_v38  ;;  %v16227_v38 = vld [vmem:[#allocation108_spill] sm:$0xff] }
 0x973   :  { %1881 = vmatprep.subr.mxu0 %v16210_v9  ;;  %v16228_v9 = vld [vmem:[#allocation109_spill] sm:$0xff] }
 0x974   :  { %1882 = vmatpush2.msra.mxu0 %v16211_v25  ;;  %v11859_v25 = vld [vmem:[#allocation9 + $0xf8] sm:$0xff] }
 0x975   :  { %1883 = vmatprep.subr.mxu0 %v16212_v27  ;;  %v11881_v27 = vld [vmem:[#allocation9 + $0xc0] sm:$0xff] }
 0x976   :  { %1884 = vmatpush2.msra.mxu0 %v16213_v28  ;;  %v11884_v28 = vld [vmem:[#allocation9 + $0xb8] sm:$0xff] }
 0x977   :  { %1885 = vmatprep.subr.mxu0 %v16214_v45  ;;  %v11887_v45 = vld [vmem:[#allocation9 + $0xb0] sm:$0xff] }
 0x978   :  { %1886 = vmatpush2.msra.mxu0 %v16215_v29  ;;  %v11890_v29 = vld [vmem:[#allocation9 + $0xa8] sm:$0xff] }
 0x979   :  { %1887 = vmatprep.subr.mxu0 %v16216_v33  ;;  %v11893_v33 = vld [vmem:[#allocation9 + $0xa0] sm:$0xff] }
 0x97a   :  { %1888 = vmatpush2.msra.mxu0 %v16217_v6  ;;  %v11896_v6 = vld [vmem:[#allocation9 + $0x98] sm:$0xff] }
 0x97b   :  { %1889 = vmatprep.subr.mxu0 %v16218_v60  ;;  %v11899_v60 = vld [vmem:[#allocation9 + $0x90] sm:$0xff] }
 0x97c   :  { %1890 = vmatpush2.msra.mxu0 %v16219_v17  ;;  %v11902_v17 = vld [vmem:[#allocation9 + $0x88] sm:$0xff] }
 0x97d   :  { %1891 = vmatprep.subr.mxu0 %v16220_v11  ;;  %v11905_v11 = vld [vmem:[#allocation9 + $0x80] sm:$0xff] }
 0x97e   :  { %1892 = vmatpush2.msra.mxu0 %v16221_v63  ;;  %v11908_v63 = vld [vmem:[#allocation9 + $0x78] sm:$0xff] }
 0x97f   :  { %1893 = vmatprep.subr.mxu0 %v16222_v3  ;;  %16229 = vst [vmem:[#allocation25_spill] sm:$0xff] %v11908_v63  ;;  %v11911_v3 = vld [vmem:[#allocation9 + $0x70] sm:$0xff] }
 0x980   :  { %1894 = vmatpush2.msra.mxu0 %v16223_v24  ;;  %16230 = vst [vmem:[#allocation26_spill] sm:$0xff] %v11911_v3  ;;  %v11914_v24 = vld [vmem:[#allocation9 + $0x68] sm:$0xff] }
 0x981   :  { %1895 = vmatprep.subr.mxu0 %v16224_v51  ;;  %16231 = vst [vmem:[#allocation27_spill] sm:$0xff] %v11914_v24  ;;  %v11917_v51 = vld [vmem:[#allocation9 + $0x60] sm:$0xff] }
 0x982   :  { %1896 = vmatpush2.msra.mxu0 %v16225_v31  ;;  %16232 = vst [vmem:[#allocation28_spill] sm:$0xff] %v11917_v51  ;;  %v11920_v31 = vld [vmem:[#allocation9 + $0x58] sm:$0xff] }
 0x983   :  { %1897 = vmatprep.subr.mxu0 %v11203_v54  ;;  %v11862_v54 = vld [vmem:[#allocation9 + $0xf0] sm:$0xff]  ;;  %16233 = vst [vmem:[#allocation29_spill] sm:$0xff] %v11920_v31 }
 0x984   :  { %1898 = vmatpush2.msra.mxu0 %v11206_v57  ;;  %v11866_v57 = vld [vmem:[#allocation9 + $0xe8] sm:$0xff] }
 0x985   :  { %1899 = vmatprep.subr.mxu0 %v16226_v36  ;;  %v11923_v36 = vld [vmem:[#allocation9 + $0x50] sm:$0xff] }
 0x986   :  { %1900 = vmatpush2.msra.mxu0 %v16227_v38  ;;  %16234 = vst [vmem:[#allocation30_spill] sm:$0xff] %v11923_v36  ;;  %v11926_v38 = vld [vmem:[#allocation9 + $0x48] sm:$0xff] }
 0x987   :  { %1901 = vmatprep.subr.mxu0 %v11215_v12  ;;  %v11869_v12 = vld [vmem:[#allocation9 + $0xe0] sm:$0xff]  ;;  %16235 = vst [vmem:[#allocation31_spill] sm:$0xff] %v11926_v38 }
 0x988   :  { %1902 = vmatpush2.msra.mxu0 %v16228_v9  ;;  %v11929_v9 = vld [vmem:[#allocation9 + $0x40] sm:$0xff] }
 0x989   :  { %1903 = vmatprep.subr.mxu0 %v11221_v39  ;;  %v11872_v39 = vld [vmem:[#allocation9 + $0xd8] sm:$0xff]  ;;  %16236 = vst [vmem:[#allocation32_spill] sm:$0xff] %v11929_v9 }
 0x98a   :  { %1904 = vmatpush2.msra.mxu0 %v11224_v42  ;;  %v11875_v42 = vld [vmem:[#allocation9 + $0xd0] sm:$0xff] }
 0x98b   :  { %1906 = vmatmul.mubr.f32.vlgmr.msra.gmra.mxu0 %v11501_v15  ;;  %2069 = vmatprep.subr.mxu0 %v11859_v25  ;;  %v11878_v15 = vld [vmem:[#allocation9 + $0xc8] sm:$0xff] }
 0x98c   :  { %2070 = vmatpush1.msra.mxu0 %v11862_v54  ;;  %2133 = vmatprep.mubr.f32.mxu0 %v16109_v0 }
 0x98d   :  { %2071 = vmatprep.subr.mxu0 %v11866_v57 }
 0x98e   :  { %2072 = vmatpush1.msra.mxu0 %v11869_v12 }
 0x98f   :  { %2073 = vmatprep.subr.mxu0 %v11872_v39 }
 0x990   :  { %2074 = vmatpush1.msra.mxu0 %v11875_v42 }
 0x991   :  { %2075 = vmatprep.subr.mxu0 %v11878_v15 }
 0x992   :  { %2076 = vmatpush1.msra.mxu0 %v11881_v27 }
 0x993   :  { %2077 = vmatprep.subr.mxu0 %v11884_v28 }
 0x994   :  { %2078 = vmatpush1.msra.mxu0 %v11887_v45 }
 0x995   :  { %2079 = vmatprep.subr.mxu0 %v11890_v29 }
 0x996   :  { %2080 = vmatpush1.msra.mxu0 %v11893_v33 }
 0x997   :  { %2081 = vmatprep.subr.mxu0 %v11896_v6 }
 0x998   :  { %2082 = vmatpush1.msra.mxu0 %v11899_v60 }
 0x999   :  { %2083 = vmatprep.subr.mxu0 %v11902_v17 }
 0x99a   :  { %2084 = vmatpush1.msra.mxu0 %v11905_v11 }
 0x99b   :  { %2085 = vmatprep.subr.mxu0 %v11908_v63 }
 0x99c   :  { %2086 = vmatpush1.msra.mxu0 %v11911_v3 }
 0x99d   :  { %2087 = vmatprep.subr.mxu0 %v11914_v24  ;;  %v11932_v24 = vld [vmem:[#allocation9 + $0x38] sm:$0xff] }
 0x99e   :  { %2088 = vmatpush1.msra.mxu0 %v11917_v51  ;;  %16237 = vst [vmem:[#allocation33_spill] sm:$0xff] %v11932_v24  ;;  %v11935_v51 = vld [vmem:[#allocation9 + $0x30] sm:$0xff] }
 0x99f   :  { %2089 = vmatprep.subr.mxu0 %v11920_v31  ;;  %16238 = vst [vmem:[#allocation34_spill] sm:$0xff] %v11935_v51  ;;  %v11938_v31 = vld [vmem:[#allocation9 + $0x28] sm:$0xff] }
 0x9a0   :  { %2090 = vmatpush1.msra.mxu0 %v11923_v36  ;;  %16239 = vst [vmem:[#allocation35_spill] sm:$0xff] %v11938_v31  ;;  %v11941_v36 = vld [vmem:[#allocation9 + $0x20] sm:$0xff] }
 0x9a1   :  { %2091 = vmatprep.subr.mxu0 %v11926_v38  ;;  %16240 = vst [vmem:[#allocation36_spill] sm:$0xff] %v11941_v36  ;;  %v11944_v38 = vld [vmem:[#allocation9 + $0x18] sm:$0xff] }
 0x9a2   :  { %2092 = vmatpush1.msra.mxu0 %v11929_v9  ;;  %v11947_v9 = vld [vmem:[#allocation9 + $0x10] sm:$0xff] }
 0x9a3   :  { %2093 = vmatprep.subr.mxu0 %v11932_v24  ;;  %v11950_v24 = vld [vmem:[#allocation9 + $0x8] sm:$0xff] }
 0x9a4   :  { %2094 = vmatpush1.msra.mxu0 %v11935_v51  ;;  %v11953_v51 = vld [vmem:[#allocation9] sm:$0xff] }
 0x9a5   :  { %2095 = vmatprep.subr.mxu0 %v11938_v31 }
 0x9a6   :  { %2096 = vmatpush1.msra.mxu0 %v11941_v36 }
 0x9a7   :  { %2097 = vmatprep.subr.mxu0 %v11944_v38 }
 0x9a8   :  { %2098 = vmatpush1.msra.mxu0 %v11947_v9 }
 0x9a9   :  { %2099 = vmatprep.subr.mxu0 %v11950_v24 }
 0x9aa   :  { %2100 = vmatpush1.msra.mxu0 %v11953_v51 }
 0x9ab   :  { %7953 = vmatprep.subr.mxu0 %v16109_v0 }
 0xa0b   :  { %v1763_v31 = vpop.f32.mrf.mxu0 }
 0xa0c   :  { %v1764_v36 = vadd.f32 %v11275_v32, %v1763_v31  ;;  %v16241_v32 = vld [vmem:[#allocation110_spill] sm:$0xff] }
 0xa0d   :  { %v7812_v3 = vpop.f32.mrf.mxu0  ;;  %v16257_v31 = vld [vmem:[#allocation126_spill] sm:$0xff] }
 0xa0e   :  { %v1767_v63 = vmax.f32 %v1764_v36, 0.0  ;;  %v16256_v3 = vld [vmem:[#allocation125_spill] sm:$0xff]  ;;  %v16258_v36 = vld [vmem:[#allocation127_spill] sm:$0xff] }
 0xa10   :  { %7846 = vmatmul.mubr.f32.vlgmr.msra.gmra.mxu1 %v1767_v63  ;;  %v16255_v63 = vld [vmem:[#allocation124_spill] sm:$0xff] }
 0xa11   :  { %7849 = vmatpush3.msra.mxu1 %v11281_v41  ;;  %7880 = vmatprep.mubr.msk.f32.mxu1 %vm10383_vm0, %v16109_v0  ;;  %v1927_v41 = vld [vmem:[#allocation3 + $0x10] sm:$0xff] }
 0xa12   :  { %7850 = vmatprep.subr.mxu1 %v16109_v0 }
 0xa13   :  { %7851 = vmatpush3.msra.mxu1 %v11290_v43  ;;  %v16242_v43 = vld [vmem:[#allocation111_spill] sm:$0xff] }
 0xa14   :  { %7852 = vmatprep.subr.mxu1 %v16109_v0 }
 0xa15   :  { %7853 = vmatpush3.msra.mxu1 %v11297_v44  ;;  %v16243_v44 = vld [vmem:[#allocation112_spill] sm:$0xff] }
 0xa16   :  { %7854 = vmatprep.subr.mxu1 %v16109_v0 }
 0xa17   :  { %7855 = vmatpush3.msra.mxu1 %v11304_v46  ;;  %v16244_v46 = vld [vmem:[#allocation113_spill] sm:$0xff] }
 0xa18   :  { %7856 = vmatprep.subr.mxu1 %v16109_v0 }
 0xa19   :  { %7857 = vmatpush3.msra.mxu1 %v11311_v47  ;;  %v16245_v47 = vld [vmem:[#allocation114_spill] sm:$0xff] }
 0xa1a   :  { %7858 = vmatprep.subr.mxu1 %v16109_v0 }
 0xa1b   :  { %7859 = vmatpush3.msra.mxu1 %v11318_v49  ;;  %v16246_v49 = vld [vmem:[#allocation115_spill] sm:$0xff] }
 0xa1c   :  { %7860 = vmatprep.subr.mxu1 %v16109_v0 }
 0xa1d   :  { %7861 = vmatpush3.msra.mxu1 %v11325_v50  ;;  %v16247_v50 = vld [vmem:[#allocation116_spill] sm:$0xff] }
 0xa1e   :  { %7862 = vmatprep.subr.mxu1 %v16109_v0 }
 0xa1f   :  { %7863 = vmatpush3.msra.mxu1 %v11332_v52  ;;  %v16248_v52 = vld [vmem:[#allocation117_spill] sm:$0xff] }
 0xa20   :  { %7864 = vmatprep.subr.mxu1 %v16109_v0 }
 0xa21   :  { %7865 = vmatpush3.msra.mxu1 %v11339_v53  ;;  %v16249_v53 = vld [vmem:[#allocation118_spill] sm:$0xff] }
 0xa22   :  { %7866 = vmatprep.subr.mxu1 %v16109_v0 }
 0xa23   :  { %7867 = vmatpush3.msra.mxu1 %v11346_v55  ;;  %v16250_v55 = vld [vmem:[#allocation119_spill] sm:$0xff] }
 0xa24   :  { %7868 = vmatprep.subr.mxu1 %v16109_v0 }
 0xa25   :  { %7869 = vmatpush3.msra.mxu1 %v11353_v56  ;;  %v16251_v56 = vld [vmem:[#allocation120_spill] sm:$0xff] }
 0xa26   :  { %7870 = vmatprep.subr.mxu1 %v16109_v0 }
 0xa27   :  { %7871 = vmatpush3.msra.mxu1 %v11360_v58  ;;  %v16252_v58 = vld [vmem:[#allocation121_spill] sm:$0xff] }
 0xa28   :  { %7872 = vmatprep.subr.mxu1 %v16109_v0 }
 0xa29   :  { %7873 = vmatpush3.msra.mxu1 %v11367_v59  ;;  %v16253_v59 = vld [vmem:[#allocation122_spill] sm:$0xff] }
 0xa2a   :  { %7874 = vmatprep.subr.mxu1 %v16109_v0 }
 0xa2b   :  { %7875 = vmatpush3.msra.mxu1 %v11374_v61  ;;  %v16254_v61 = vld [vmem:[#allocation123_spill] sm:$0xff] }
 0xa2c   :  { %7876 = vmatprep.subr.mxu1 %v16109_v0 }
 0xa2d   :  { %7877 = vmatpush3.msra.mxu1 %v16241_v32 }
 0xa2e   :  { %7878 = vmatprep.subr.mxu1 %v16109_v0 }
 0xa2f   :  { %7879 = vmatpush3.msra.mxu1 %v16242_v43  ;;  %v16259_v43 = vld [vmem:[#allocation128_spill] sm:$0xff] }
 0xa30   :  { %7881 = vmatmul.mubr.f32.vlgmr.msra.gmra.mxu1 %v1927_v41  ;;  %7883 = vmatprep.subr.mxu1 %v16109_v0 }
 0xa31   :  { %7884 = vmatpush3.msra.mxu1 %v16243_v44  ;;  %7915 = vmatprep.mubr.msk.f32.mxu1 %vm10383_vm0, %v16109_v0 }
 0xa32   :  { %7885 = vmatprep.subr.mxu1 %v16109_v0 }
 0xa33   :  { %7886 = vmatpush3.msra.mxu1 %v16244_v46  ;;  %v16260_v46 = vld [vmem:[#allocation129_spill] sm:$0xff] }
 0xa34   :  { %7887 = vmatprep.subr.mxu1 %v16109_v0 }
 0xa35   :  { %7888 = vmatpush3.msra.mxu1 %v16245_v47 }
 0xa36   :  { %7889 = vmatprep.subr.mxu1 %v16109_v0 }
 0xa37   :  { %7890 = vmatpush3.msra.mxu1 %v16246_v49 }
 0xa38   :  { %7891 = vmatprep.subr.mxu1 %v16109_v0 }
 0xa39   :  { %7892 = vmatpush3.msra.mxu1 %v16247_v50 }
 0xa3a   :  { %7893 = vmatprep.subr.mxu1 %v16109_v0 }
 0xa3b   :  { %7894 = vmatpush3.msra.mxu1 %v16248_v52 }
 0xa3c   :  { %7895 = vmatprep.subr.mxu1 %v16109_v0 }
 0xa3d   :  { %7896 = vmatpush3.msra.mxu1 %v16249_v53 }
 0xa3e   :  { %7897 = vmatprep.subr.mxu1 %v16109_v0 }
 0xa3f   :  { %7898 = vmatpush3.msra.mxu1 %v16250_v55 }
 0xa40   :  { %7899 = vmatprep.subr.mxu1 %v16109_v0 }
 0xa41   :  { %7900 = vmatpush3.msra.mxu1 %v16251_v56 }
 0xa42   :  { %7901 = vmatprep.subr.mxu1 %v16109_v0 }
 0xa43   :  { %7902 = vmatpush3.msra.mxu1 %v16252_v58 }
 0xa44   :  { %7903 = vmatprep.subr.mxu1 %v16109_v0 }
 0xa45   :  { %7904 = vmatpush3.msra.mxu1 %v16253_v59 }
 0xa46   :  { %7905 = vmatprep.subr.mxu1 %v16109_v0 }
 0xa47   :  { %7906 = vmatpush3.msra.mxu1 %v16254_v61 }
 0xa48   :  { %7907 = vmatprep.subr.mxu1 %v16109_v0 }
 0xa49   :  { %7908 = vmatpush3.msra.mxu1 %v16255_v63 }
 0xa4a   :  { %7909 = vmatprep.subr.mxu1 %v16109_v0 }
 0xa4b   :  { %7910 = vmatpush3.msra.mxu1 %v16256_v3  ;;  %v1907_v32 = vpop.f32.mrf.mxu0 }
 0xa4c   :  { %7911 = vmatprep.subr.mxu1 %v16109_v0  ;;  %v1908_v47 = vadd.f32 %v1907_v32, %v16260_v46 }
 0xa4d   :  { %7912 = vmatpush3.msra.mxu1 %v16257_v31  ;;  %v1909_v41 = vpop.f32.mrf.mxu0 }
 0xa4e   :  { %7913 = vmatprep.subr.mxu1 %v16109_v0  ;;  %v1910_v44 = vadd.f32 %v1909_v41, %v16259_v43  ;;  %v1912_v50 = vmul.f32 0.5, %v1908_v47 }
 0xa4f   :  { %7914 = vmatpush3.msra.mxu1 %v16258_v36 }
 0xa50   :  { %7918 = vmatprep.subr.mxu1 %v16109_v0  ;;  %v1918_v49 = vmul.f32 0.5, %v1910_v44 }
 0xa52   :  { %9378 = vtanh.f32 %v1918_v49  ;;  %v16272_v49 = vld [vmem:[#allocation141_spill] sm:$0xff] }
 0xa53   :  { %9380 = vtanh.f32 %v1912_v50  ;;  %v16273_v50 = vld [vmem:[#allocation142_spill] sm:$0xff] }
 0xa5f   :  { %v9379_v59 = vpop.eup %9378 }
 0xa60   :  { %v9381_v61 = vpop.eup %9380  ;;  %v1920_v63 = vadd.f32 1.0, %v9379_v59  ;;  %v12155_v59 = vld [vmem:[#allocation12 + $0x20] sm:$0xff] }
 0xa61   :  { %v1914_v3 = vadd.f32 1.0, %v9381_v61  ;;  %v12159_v61 = vld [vmem:[#allocation12 + $0x18] sm:$0xff] }
 0xa62   :  { %v1921_v31 = vmul.f32 0.5, %v1920_v63  ;;  %v12163_v63 = vld [vmem:[#allocation12 + $0x10] sm:$0xff] }
 0xa63   :  { %v1915_v36 = vmul.f32 0.5, %v1914_v3  ;;  %v12167_v3 = vld [vmem:[#allocation12 + $0x8] sm:$0xff] }
 0xa64   :  { %v1922_v32 = vmul.f32 %v1921_v31, %v11474_v62  ;;  %v12171_v31 = vld [vmem:[#allocation12] sm:$0xff] }
 0xad0   :  { %v1834_v52 = vpop.f32.mrf.mxu1 }
 0xad1   :  { %v1835_v53 = vadd.f32 %v11470_v34, %v1834_v52  ;;  %v16274_v52 = vld [vmem:[#allocation143_spill] sm:$0xff] }
 0xad2   :  { %v7847_v55 = vpop.f32.mrf.mxu1 }
 0xad3   :  { %v1838_v56 = vmax.f32 %v1835_v53, 0.0  ;;  %v12129_v53 = vld [vmem:[#allocation12 + $0x50] sm:$0xff]  ;;  %v12143_v55 = vld [vmem:[#allocation12 + $0x38] sm:$0xff] }
 0xad5   :  { %v1839_v58 = vadd.f32 %v1838_v56, %v11792_v48  ;;  %v16271_v48 = vld [vmem:[#allocation140_spill] sm:$0xff]  ;;  %v12147_v56 = vld [vmem:[#allocation12 + $0x30] sm:$0xff] }
 0xad7   :  { %9382 = vtanh.f32 %v1839_v58  ;;  %v12151_v58 = vld [vmem:[#allocation12 + $0x28] sm:$0xff] }
 0xae4   :  { %v9383_v41 = vpop.eup %9382 }
 0xae5   :  { %v1917_v44 = vmul.f32 %v9383_v41, %v1915_v36 }
 0xae7   :  { %v12031_v47 = vadd.f32 %v1922_v32, %v1917_v44 }
 0xae9   :  { %7916 = vmatmul.mubr.f32.vlgmr.msra.gmra.mxu1 %v12031_v47  ;;  %1925 = vst [vmem:[#allocation18 + $0x8] sm:$0xff] %v12031_v47 }
 0xaea   :  { %7919 = vmatpush3.msra.mxu1 %v11478_v7  ;;  %7950 = vmatprep.mubr.msk.f32.mxu1 %vm10383_vm0, %v16109_v0 }
 0xaeb   :  { %7920 = vmatprep.subr.mxu1 %v16109_v0 }
 0xaec   :  { %7921 = vmatpush3.msra.mxu1 %v11484_v14 }
 0xaed   :  { %7922 = vmatprep.subr.mxu1 %v16109_v0 }
 0xaee   :  { %7923 = vmatpush3.msra.mxu1 %v11488_v2  ;;  %v16261_v2 = vld [vmem:[#allocation130_spill] sm:$0xff] }
 0xaef   :  { %7924 = vmatprep.subr.mxu1 %v16109_v0 }
 0xaf0   :  { %v1994_v62 = vpop.f32.mrf.mxu1  ;;  %7925 = vmatpush3.msra.mxu1 %v11492_v5  ;;  %v16262_v5 = vld [vmem:[#allocation131_spill] sm:$0xff] }
 0xaf1   :  { %v12045_v34 = vadd.f32 %v11498_v8, %v1994_v62  ;;  %7926 = vmatprep.subr.mxu1 %v16109_v0  ;;  %v16263_v8 = vld [vmem:[#allocation132_spill] sm:$0xff] }
 0xaf2   :  { %v7882_v7 = vpop.f32.mrf.mxu1  ;;  %7927 = vmatpush3.msra.mxu1 %v11504_v35  ;;  %v16264_v35 = vld [vmem:[#allocation133_spill] sm:$0xff] }
 0xaf3   :  { %v2068_v14 = vsub.f32 %v12031_v47, %v12045_v34  ;;  %7928 = vmatprep.subr.mxu1 %v16109_v0 }
 0xaf4   :  { %7929 = vmatpush3.msra.mxu1 %v11510_v18  ;;  %v16265_v18 = vld [vmem:[#allocation134_spill] sm:$0xff] }
 0xaf5   :  { %2134 = vmatmul.mubr.f32.vlgmr.msra.gmra.mxu0 %v2068_v14  ;;  %7930 = vmatprep.subr.mxu1 %v16109_v0 }
 0xaf6   :  { %7931 = vmatpush3.msra.mxu1 %v11514_v37  ;;  %7954 = vmatpush3.msra.mxu0 %v11520_v40  ;;  %v16266_v37 = vld [vmem:[#allocation135_spill] sm:$0xff]  ;;  %v16267_v40 = vld [vmem:[#allocation136_spill] sm:$0xff] }
 0xaf7   :  { %7932 = vmatprep.subr.mxu1 %v16109_v0  ;;  %7955 = vmatprep.subr.mxu0 %v16109_v0 }
 0xaf8   :  { %7933 = vmatpush3.msra.mxu1 %v11525_v19  ;;  %7956 = vmatpush3.msra.mxu0 %v11531_v13  ;;  %v16268_v19 = vld [vmem:[#allocation137_spill] sm:$0xff]  ;;  %v16269_v13 = vld [vmem:[#allocation138_spill] sm:$0xff] }
 0xaf9   :  { %7934 = vmatprep.subr.mxu1 %v16109_v0  ;;  %7957 = vmatprep.subr.mxu0 %v16109_v0 }
 0xafa   :  { %7935 = vmatpush3.msra.mxu1 %v11536_v1  ;;  %7958 = vmatpush3.msra.mxu0 %v16261_v2  ;;  %v16270_v1 = vld [vmem:[#allocation139_spill] sm:$0xff] }
 0xafb   :  { %7936 = vmatprep.subr.mxu1 %v16109_v0  ;;  %7959 = vmatprep.subr.mxu0 %v16109_v0 }
 0xafc   :  { %7937 = vmatpush3.msra.mxu1 %v16262_v5  ;;  %7960 = vmatpush3.msra.mxu0 %v16263_v8 }
 0xafd   :  { %7938 = vmatprep.subr.mxu1 %v16109_v0  ;;  %7961 = vmatprep.subr.mxu0 %v16109_v0 }
 0xafe   :  { %7939 = vmatpush3.msra.mxu1 %v16264_v35  ;;  %7962 = vmatpush3.msra.mxu0 %v16265_v18 }
 0xaff   :  { %7940 = vmatprep.subr.mxu1 %v16109_v0  ;;  %7963 = vmatprep.subr.mxu0 %v16109_v0 }
 0xb00   :  { %7941 = vmatpush3.msra.mxu1 %v16266_v37  ;;  %7964 = vmatpush3.msra.mxu0 %v16267_v40  ;;  %v12184_v40 = vld [vmem:[#allocation14 + $0x78] sm:$0xff] }
 0xb01   :  { %7942 = vmatprep.subr.mxu1 %v16109_v0  ;;  %7965 = vmatprep.subr.mxu0 %v16109_v0 }
 0xb02   :  { %7943 = vmatpush3.msra.mxu1 %v16268_v19  ;;  %7966 = vmatpush3.msra.mxu0 %v16269_v13  ;;  %v12194_v19 = vld [vmem:[#allocation14 + $0x68] sm:$0xff]  ;;  %v12198_v13 = vld [vmem:[#allocation14 + $0x60] sm:$0xff] }
 0xb03   :  { %7944 = vmatprep.subr.mxu1 %v16109_v0  ;;  %7967 = vmatprep.subr.mxu0 %v16109_v0 }
 0xb04   :  { %7945 = vmatpush3.msra.mxu1 %v16270_v1  ;;  %7968 = vmatpush3.msra.mxu0 %v16271_v48  ;;  %v12202_v1 = vld [vmem:[#allocation14 + $0x58] sm:$0xff]  ;;  %v12206_v48 = vld [vmem:[#allocation14 + $0x50] sm:$0xff] }
 0xb05   :  { %7946 = vmatprep.subr.mxu1 %v16109_v0  ;;  %7969 = vmatprep.subr.mxu0 %v16109_v0 }
 0xb06   :  { %7947 = vmatpush3.msra.mxu1 %v11602_v22  ;;  %7970 = vmatpush3.msra.mxu0 %v16272_v49  ;;  %v12100_v22 = vld [vmem:[#allocation12 + $0x78] sm:$0xff]  ;;  %v12210_v49 = vld [vmem:[#allocation14 + $0x48] sm:$0xff] }
 0xb07   :  { %7948 = vmatprep.subr.mxu1 %v16109_v0  ;;  %7971 = vmatprep.subr.mxu0 %v16109_v0 }
 0xb08   :  { %7949 = vmatpush3.msra.mxu1 %v11613_v16  ;;  %7972 = vmatpush3.msra.mxu0 %v16273_v50  ;;  %v12106_v16 = vld [vmem:[#allocation12 + $0x70] sm:$0xff]  ;;  %v12214_v50 = vld [vmem:[#allocation14 + $0x40] sm:$0xff] }
 0xb09   :  { %7951 = vmatmul.mubr.f32.vlgmr.msra.gmra.mxu1 %v12045_v34  ;;  %7973 = vmatprep.subr.mxu0 %v16109_v0 }
 0xb0a   :  { %7974 = vmatpush3.msra.mxu0 %v16274_v52  ;;  %7985 = vmatprep.mubr.msk.f32.mxu0 %vm10383_vm0, %v16109_v0  ;;  %v12218_v52 = vld [vmem:[#allocation14 + $0x38] sm:$0xff] }
 0xb0b   :  { %7975 = vmatprep.subr.mxu0 %v16109_v0  ;;  %7993 = vmatprep.subr.mxu1 %v16109_v0 }
 0xb0c   :  { %7976 = vmatpush3.msra.mxu0 %v11637_v4  ;;  %7994 = vmatpush3.msra.mxu1 %v12100_v22  ;;  %v12112_v4 = vld [vmem:[#allocation12 + $0x68] sm:$0xff] }
 0xb0d   :  { %7977 = vmatprep.subr.mxu0 %v16109_v0  ;;  %7995 = vmatprep.subr.mxu1 %v16109_v0 }
 0xb0e   :  { %7978 = vmatpush3.msra.mxu0 %v11646_v10  ;;  %7996 = vmatpush3.msra.mxu1 %v12106_v16  ;;  %v12118_v10 = vld [vmem:[#allocation12 + $0x60] sm:$0xff] }
 0xb0f   :  { %7979 = vmatprep.subr.mxu0 %v16109_v0  ;;  %7997 = vmatprep.subr.mxu1 %v16109_v0 }
 0xb10   :  { %7980 = vmatpush3.msra.mxu0 %v11655_v20  ;;  %7998 = vmatpush3.msra.mxu1 %v12112_v4  ;;  %v12124_v20 = vld [vmem:[#allocation12 + $0x58] sm:$0xff] }
 0xb11   :  { %7981 = vmatprep.subr.mxu0 %v16109_v0  ;;  %7999 = vmatprep.subr.mxu1 %v16109_v0 }
 0xb12   :  { %7982 = vmatpush3.msra.mxu0 %v11664_v21  ;;  %8000 = vmatpush3.msra.mxu1 %v12118_v10  ;;  %v12135_v21 = vld [vmem:[#allocation12 + $0x48] sm:$0xff] }
 0xb13   :  { %7983 = vmatprep.subr.mxu0 %v16109_v0  ;;  %8001 = vmatprep.subr.mxu1 %v16109_v0 }
 0xb14   :  { %7984 = vmatpush3.msra.mxu0 %v11673_v23  ;;  %8002 = vmatpush3.msra.mxu1 %v12124_v20  ;;  %v12139_v23 = vld [vmem:[#allocation12 + $0x40] sm:$0xff] }
 0xb15   :  { %7988 = vmatprep.subr.mxu0 %v16109_v0  ;;  %8003 = vmatprep.subr.mxu1 %v16109_v0 }
 0xb16   :  { %8004 = vmatpush3.msra.mxu1 %v12129_v53  ;;  %8025 = vmatprep.mubr.msk.f32.mxu1 %vm10383_vm0, %v16109_v0 }
 0xb17   :  { %8005 = vmatprep.subr.mxu1 %v16109_v0 }
 0xb18   :  { %8006 = vmatpush3.msra.mxu1 %v12135_v21 }
 0xb19   :  { %8007 = vmatprep.subr.mxu1 %v16109_v0 }
 0xb1a   :  { %8008 = vmatpush3.msra.mxu1 %v12139_v23 }
 0xb1b   :  { %8009 = vmatprep.subr.mxu1 %v16109_v0 }
 0xb1c   :  { %8010 = vmatpush3.msra.mxu1 %v12143_v55 }
 0xb1d   :  { %8011 = vmatprep.subr.mxu1 %v16109_v0 }
 0xb1e   :  { %8012 = vmatpush3.msra.mxu1 %v12147_v56 }
 0xb1f   :  { %8013 = vmatprep.subr.mxu1 %v16109_v0 }
 0xb20   :  { %8014 = vmatpush3.msra.mxu1 %v12151_v58 }
 0xb21   :  { %8015 = vmatprep.subr.mxu1 %v16109_v0 }
 0xb22   :  { %8016 = vmatpush3.msra.mxu1 %v12155_v59 }
 0xb23   :  { %8017 = vmatprep.subr.mxu1 %v16109_v0 }
 0xb24   :  { %8018 = vmatpush3.msra.mxu1 %v12159_v61 }
 0xb25   :  { %8019 = vmatprep.subr.mxu1 %v16109_v0 }
 0xb26   :  { %8020 = vmatpush3.msra.mxu1 %v12163_v63 }
 0xb27   :  { %8021 = vmatprep.subr.mxu1 %v16109_v0 }
 0xb28   :  { %8022 = vmatpush3.msra.mxu1 %v12167_v3 }
 0xb29   :  { %8023 = vmatprep.subr.mxu1 %v16109_v0 }
 0xb2a   :  { %8024 = vmatpush3.msra.mxu1 %v12171_v31 }
 0xb2b   :  { %8063 = vmatprep.subr.mxu1 %v16109_v0 }
 0xba9   :  { %v2064_v36 = vpop.f32.mrf.mxu1 }
 0xbaa   :  { %v2065_v32 = vadd.f32 %v11706_v26, %v2064_v36  ;;  %v12222_v36 = vld [vmem:[#allocation14 + $0x30] sm:$0xff] }
 0xbab   :  { %v7917_v41 = vpop.f32.mrf.mxu1 }
 0xbac   :  { %v12226_v41 = vld [vmem:[#allocation14 + $0x28] sm:$0xff] }
 0xbb5   :  { %v2135_v44 = vpop.f32.mrf.mxu0 }
 0xbb6   :  { %v2210_v62 = vmul.f32 %v2135_v44, %v2065_v32  ;;  %v12230_v32 = vld [vmem:[#allocation14 + $0x20] sm:$0xff]  ;;  %v12234_v44 = vld [vmem:[#allocation14 + $0x18] sm:$0xff] }
 0xbb7   :  { %v2137_v2 = vpop.f32.mrf.mxu0  ;;  %16275 = vst [vmem:[#allocation38_spill] sm:$0xff] %v12234_v44 }
 0xbb8   :  { %7986 = vmatmul.mubr.f32.vlgmr.msra.gmra.mxu0 %v2210_v62  ;;  %v12238_v62 = vld [vmem:[#allocation14 + $0x10] sm:$0xff] }
 0xbb9   :  { %7989 = vmatpush3.msk.msra.mxu0 %vm786_vm1, %v11712_v30  ;;  %7990 = vmatprep.mubr.msk.f32.mxu0 %vm10383_vm0, %v16109_v0  ;;  %v12190_v30 = vld [vmem:[#allocation14 + $0x70] sm:$0xff]  ;;  %16276 = vst [vmem:[#allocation37_spill] sm:$0xff] %v12238_v62 }
 0xbba   :  { %8028 = vmatprep.subr.mxu0 %v16109_v0 }
 0xbc9   :  { %v12181_v7 = vpop.f32.mrf.mxu1 }
 0xbcb   :  { %v7952_v14 = vpop.f32.mrf.mxu1 }
 0xbcc   :  { %v12242_v14 = vld [vmem:[#allocation14 + $0x8] sm:$0xff] }
 0xbcd   :  { %16277 = vst [vmem:[#allocation39_spill] sm:$0xff] %v12242_v14 }
 0xc78   :  { %v2277_v5 = vpop.f32.mrf.mxu0 }
 0xc79   :  { %v2281_v8 = vmul.f32 0.5, %v2277_v5  ;;  %v12246_v5 = vld [vmem:[#allocation14] sm:$0xff] }
 0xc7a   :  { %v7987_v35 = vpop.f32.mrf.mxu0 }
 0xc7b   :  { %9384 = vtanh.f32 %v2281_v8  ;;  %v12249_v8 = vld [vmem:[#allocation17 + $0xf8] sm:$0xff] }
 0xc7c   :  { %16278 = vst [vmem:[#allocation40_spill] sm:$0xff] %v12249_v8  ;;  %9386 = vtanh.f32 %v12031_v47 }
 0xc88   :  { %v9385_v26 = vpop.eup %9384 }
 0xc89   :  { %v2283_v18 = vadd.f32 1.0, %v9385_v26  ;;  %v12255_v26 = vld [vmem:[%s15523_s8] ss:$0 sm:$0xff] }
 0xc8b   :  { %v2284_v37 = vmul.f32 0.5, %v2283_v18  ;;  %v2207_v18 = vadd.f32 %v12255_v26, %v12181_v7  ;;  %v12269_v7 = vld [vmem:[#allocation15 + $0x68] sm:$0xff] }
 0xc8c   :  { %16280 = vst [vmem:[#allocation42_spill] sm:$0xff] %v12269_v7 }
 0xc8d   :  { %7991 = vmatmul.mubr.msk.f32.vlgmr.msra.gmra.mxu0 %vm782_vm2, %v2284_v37 }
 0xc8e   :  { %8029 = vmatpush3.msra.mxu0 %v12184_v40  ;;  %8060 = vmatprep.mubr.msk.f32.mxu0 %vm10383_vm0, %v16109_v0 }
 0xc8f   :  { %8030 = vmatprep.subr.mxu0 %v16109_v0 }
 0xc90   :  { %8031 = vmatpush3.msra.mxu0 %v12190_v30 }
 0xc91   :  { %8032 = vmatprep.subr.mxu0 %v16109_v0 }
 0xc92   :  { %8033 = vmatpush3.msra.mxu0 %v12194_v19 }
 0xc93   :  { %8034 = vmatprep.subr.mxu0 %v16109_v0 }
 0xc94   :  { %8035 = vmatpush3.msra.mxu0 %v12198_v13 }
 0xc95   :  { %8036 = vmatprep.subr.mxu0 %v16109_v0 }
 0xc96   :  { %8037 = vmatpush3.msra.mxu0 %v12202_v1 }
 0xc97   :  { %8038 = vmatprep.subr.mxu0 %v16109_v0 }
 0xc98   :  { %8039 = vmatpush3.msra.mxu0 %v12206_v48 }
 0xc99   :  { %8040 = vmatprep.subr.mxu0 %v16109_v0 }
 0xc9a   :  { %8041 = vmatpush3.msra.mxu0 %v12210_v49 }
 0xc9b   :  { %8042 = vmatprep.subr.mxu0 %v16109_v0 }
 0xc9c   :  { %8043 = vmatpush3.msra.mxu0 %v12214_v50 }
 0xc9d   :  { %8044 = vmatprep.subr.mxu0 %v16109_v0 }
 0xc9e   :  { %8045 = vmatpush3.msra.mxu0 %v12218_v52 }
 0xc9f   :  { %8046 = vmatprep.subr.mxu0 %v16109_v0 }
 0xca0   :  { %8047 = vmatpush3.msra.mxu0 %v12222_v36 }
 0xca1   :  { %8048 = vmatprep.subr.mxu0 %v16109_v0 }
 0xca2   :  { %8049 = vmatpush3.msra.mxu0 %v12226_v41 }
 0xca3   :  { %8050 = vmatprep.subr.mxu0 %v16109_v0 }
 0xca4   :  { %8051 = vmatpush3.msra.mxu0 %v12230_v32 }
 0xca5   :  { %8052 = vmatprep.subr.mxu0 %v16109_v0 }
 0xca6   :  { %8053 = vmatpush3.msra.mxu0 %v12234_v44  ;;  %v12259_v44 = vld [vmem:[#allocation15 + $0x78] sm:$0xff] }
 0xca7   :  { %8054 = vmatprep.subr.mxu0 %v16109_v0 }
 0xca8   :  { %8055 = vmatpush3.msra.mxu0 %v12238_v62 }
 0xca9   :  { %8056 = vmatprep.subr.mxu0 %v16109_v0 }
 0xcaa   :  { %8057 = vmatpush3.msra.mxu0 %v12242_v14 }
 0xcab   :  { %8058 = vmatprep.subr.mxu0 %v16109_v0 }
 0xcac   :  { %8059 = vmatpush3.msra.mxu0 %v12246_v5 }
 0xcad   :  { %2576 = vmatprep.subr.mxu0 %v12249_v8  ;;  %v12265_v8 = vld [vmem:[#allocation15 + $0x70] sm:$0xff] }
 0xcae   :  { %16279 = vst [vmem:[#allocation41_spill] sm:$0xff] %v12265_v8 }
 0xd4d   :  { %v2354_v35 = vpop.f32.mrf.mxu0 }
 0xd4e   :  { %v2358_v37 = vmul.f32 %v2354_v35, %v2137_v2  ;;  %v12273_v2 = vld [vmem:[#allocation15 + $0x60] sm:$0xff]  ;;  %v12285_v35 = vld [vmem:[#allocation15 + $0x48] sm:$0xff] }
 0xd4f   :  { %v7992_v14 = vpop.f32.mrf.mxu0  ;;  %16281 = vst [vmem:[#allocation43_spill] sm:$0xff] %v12273_v2  ;;  %16284 = vst [vmem:[#allocation46_spill] sm:$0xff] %v12285_v35 }
 0xd50   :  { %v2359_v62 = vadd.f32 %v2358_v37, %v2207_v18  ;;  %v12281_v14 = vld [vmem:[#allocation15 + $0x50] sm:$0xff]  ;;  %v12289_v18 = vld [vmem:[#allocation15 + $0x40] sm:$0xff]  ;;  %v12293_v37 = vld [vmem:[#allocation15 + $0x38] sm:$0xff] }
 0xd51   :  { %16283 = vst [vmem:[#allocation45_spill] sm:$0xff] %v12281_v14  ;;  %16285 = vst [vmem:[#allocation47_spill] sm:$0xff] %v12289_v18 }
 0xd52   :  { %8026 = vmatmul.mubr.f32.vlgmr.msra.gmra.mxu1 %v2359_v62  ;;  %v12277_v62 = vld [vmem:[#allocation15 + $0x58] sm:$0xff]  ;;  %16286 = vst [vmem:[#allocation48_spill] sm:$0xff] %v12293_v37 }
 0xd53   :  { %8064 = vmatpush3.msra.mxu1 %v12259_v44  ;;  %8095 = vmatprep.mubr.msk.f32.mxu1 %vm10383_vm0, %v16109_v0  ;;  %16282 = vst [vmem:[#allocation44_spill] sm:$0xff] %v12277_v62 }
 0xd54   :  { %8065 = vmatprep.subr.mxu1 %v16109_v0 }
 0xd55   :  { %8066 = vmatpush3.msra.mxu1 %v12265_v8  ;;  %v12339_v8 = vld [vmem:[#allocation17 + $0xe8] sm:$0xff] }
 0xd56   :  { %8067 = vmatprep.subr.mxu1 %v16109_v0  ;;  %16295 = vst [vmem:[#allocation57_spill] sm:$0xff] %v12339_v8 }
 0xd57   :  { %8068 = vmatpush3.msra.mxu1 %v12269_v7  ;;  %v9387_v7 = vpop.eup %9386 }
 0xd58   :  { %8069 = vmatprep.subr.mxu1 %v16109_v0 }
 0xd59   :  { %8070 = vmatpush3.msra.mxu1 %v12273_v2  ;;  %v12330_v2 = vld [vmem:[%s15525_s10] ss:$0 sm:$0xff] }
 0xd5a   :  { %8071 = vmatprep.subr.mxu1 %v16109_v0  ;;  %16294 = vst [vmem:[#allocation56_spill] sm:$0xff] %v12330_v2 }
 0xd5b   :  { %8072 = vmatpush3.msra.mxu1 %v12277_v62 }
 0xd5c   :  { %8073 = vmatprep.subr.mxu1 %v16109_v0 }
 0xd5d   :  { %8074 = vmatpush3.msra.mxu1 %v12281_v14  ;;  %v12297_v14 = vld [vmem:[#allocation15 + $0x30] sm:$0xff] }
 0xd5e   :  { %8075 = vmatprep.subr.mxu1 %v16109_v0  ;;  %16287 = vst [vmem:[#allocation49_spill] sm:$0xff] %v12297_v14 }
 0xd5f   :  { %8076 = vmatpush3.msra.mxu1 %v12285_v35  ;;  %v12301_v35 = vld [vmem:[#allocation15 + $0x28] sm:$0xff] }
 0xd60   :  { %8077 = vmatprep.subr.mxu1 %v16109_v0  ;;  %16288 = vst [vmem:[#allocation50_spill] sm:$0xff] %v12301_v35 }
 0xd61   :  { %8078 = vmatpush3.msra.mxu1 %v12289_v18  ;;  %v12305_v18 = vld [vmem:[#allocation15 + $0x20] sm:$0xff] }
 0xd62   :  { %8079 = vmatprep.subr.mxu1 %v16109_v0  ;;  %16289 = vst [vmem:[#allocation51_spill] sm:$0xff] %v12305_v18 }
 0xd63   :  { %8080 = vmatpush3.msra.mxu1 %v12293_v37  ;;  %v12309_v37 = vld [vmem:[#allocation15 + $0x18] sm:$0xff] }
 0xd64   :  { %8081 = vmatprep.subr.mxu1 %v16109_v0  ;;  %16290 = vst [vmem:[#allocation52_spill] sm:$0xff] %v12309_v37 }
 0xd65   :  { %8082 = vmatpush3.msra.mxu1 %v12297_v14  ;;  %v12313_v14 = vld [vmem:[#allocation15 + $0x10] sm:$0xff] }
 0xd66   :  { %8083 = vmatprep.subr.mxu1 %v16109_v0  ;;  %16291 = vst [vmem:[#allocation53_spill] sm:$0xff] %v12313_v14 }
 0xd67   :  { %8084 = vmatpush3.msra.mxu1 %v12301_v35  ;;  %v12317_v35 = vld [vmem:[#allocation15 + $0x8] sm:$0xff] }
 0xd68   :  { %8085 = vmatprep.subr.mxu1 %v16109_v0  ;;  %16292 = vst [vmem:[#allocation54_spill] sm:$0xff] %v12317_v35 }
 0xd69   :  { %8086 = vmatpush3.msra.mxu1 %v12305_v18  ;;  %v12321_v18 = vld [vmem:[#allocation15] sm:$0xff] }
 0xd6a   :  { %8087 = vmatprep.subr.mxu1 %v16109_v0  ;;  %16293 = vst [vmem:[#allocation55_spill] sm:$0xff] %v12321_v18 }
 0xd6b   :  { %8088 = vmatpush3.msra.mxu1 %v12309_v37 }
 0xd6c   :  { %8089 = vmatprep.subr.mxu1 %v16109_v0 }
 0xd6d   :  { %8090 = vmatpush3.msra.mxu1 %v12313_v14 }
 0xd6e   :  { %8091 = vmatprep.subr.mxu1 %v16109_v0 }
 0xd6f   :  { %8092 = vmatpush3.msra.mxu1 %v12317_v35 }
 0xd70   :  { %8093 = vmatprep.subr.mxu1 %v16109_v0 }
 0xd71   :  { %8094 = vmatpush3.msra.mxu1 %v12321_v18  ;;  %v12336_v18 = vld [vmem:[#allocation17 + $0xf0] sm:$0xff] }
 0xd72   :  { %8098 = vmatprep.subr.mxu1 %v16109_v0 }
 0xe12   :  { %v2426_v37 = vpop.f32.mrf.mxu1 }
 0xe13   :  { %v2430_v62 = vadd.f32 %v2426_v37, %v12031_v47  ;;  %v12345_v37 = vld [vmem:[#allocation17 + $0xd8] sm:$0xff] }
 0xe14   :  { %v8027_v14 = vpop.f32.mrf.mxu1  ;;  %16297 = vst [vmem:[#allocation59_spill] sm:$0xff] %v12345_v37 }
 0xe15   :  { %v12333_v35 = vadd.f32 %v12330_v2, %v2430_v62  ;;  %v12342_v14 = vld [vmem:[#allocation17 + $0xe0] sm:$0xff]  ;;  %v12348_v62 = vld [vmem:[#allocation17 + $0xd0] sm:$0xff]  ;;  %v12351_v2 = vld [vmem:[#allocation17 + $0xc8] sm:$0xff] }
 0xe16   :  { %16296 = vst [vmem:[#allocation58_spill] sm:$0xff] %v12342_v14  ;;  %16298 = vst [vmem:[#allocation60_spill] sm:$0xff] %v12348_v62 }
 0xe17   :  { %8061 = vmatmul.mubr.f32.vlgmr.msra.gmra.mxu0 %v12333_v35  ;;  %16299 = vst [vmem:[#allocation61_spill] sm:$0xff] %v12351_v2 }
 0xe18   :  { %2577 = vmatpush1.msra.mxu0 %v12336_v18  ;;  %2640 = vmatprep.mubr.f32.mxu0 %v9387_v7  ;;  %v12354_v7 = vld [vmem:[#allocation17 + $0xc0] sm:$0xff] }
 0xe19   :  { %2578 = vmatprep.subr.mxu0 %v12339_v8  ;;  %16300 = vst [vmem:[#allocation62_spill] sm:$0xff] %v12354_v7  ;;  %v12357_v8 = vld [vmem:[#allocation17 + $0xb8] sm:$0xff] }
 0xe1a   :  { %2579 = vmatpush1.msra.mxu0 %v12342_v14  ;;  %16301 = vst [vmem:[#allocation63_spill] sm:$0xff] %v12357_v8  ;;  %v12360_v14 = vld [vmem:[#allocation17 + $0xb0] sm:$0xff] }
 0xe1b   :  { %2580 = vmatprep.subr.mxu0 %v12345_v37  ;;  %16302 = vst [vmem:[#allocation64_spill] sm:$0xff] %v12360_v14  ;;  %v12363_v37 = vld [vmem:[#allocation17 + $0xa8] sm:$0xff] }
 0xe1c   :  { %2581 = vmatpush1.msra.mxu0 %v12348_v62  ;;  %16303 = vst [vmem:[#allocation65_spill] sm:$0xff] %v12363_v37  ;;  %v12366_v62 = vld [vmem:[#allocation17 + $0xa0] sm:$0xff] }
 0xe1d   :  { %2582 = vmatprep.subr.mxu0 %v12351_v2  ;;  %16304 = vst [vmem:[#allocation66_spill] sm:$0xff] %v12366_v62  ;;  %v12369_v2 = vld [vmem:[#allocation17 + $0x98] sm:$0xff] }
 0xe1e   :  { %2583 = vmatpush1.msra.mxu0 %v12354_v7  ;;  %16305 = vst [vmem:[#allocation67_spill] sm:$0xff] %v12369_v2  ;;  %v12372_v7 = vld [vmem:[#allocation17 + $0x90] sm:$0xff] }
 0xe1f   :  { %2584 = vmatprep.subr.mxu0 %v12357_v8  ;;  %16306 = vst [vmem:[#allocation68_spill] sm:$0xff] %v12372_v7  ;;  %v12375_v8 = vld [vmem:[#allocation17 + $0x88] sm:$0xff] }
 0xe20   :  { %2585 = vmatpush1.msra.mxu0 %v12360_v14  ;;  %16307 = vst [vmem:[#allocation69_spill] sm:$0xff] %v12375_v8  ;;  %v12378_v14 = vld [vmem:[#allocation17 + $0x80] sm:$0xff] }
 0xe21   :  { %2586 = vmatprep.subr.mxu0 %v12363_v37  ;;  %16308 = vst [vmem:[#allocation70_spill] sm:$0xff] %v12378_v14  ;;  %v12381_v37 = vld [vmem:[#allocation17 + $0x78] sm:$0xff] }
 0xe22   :  { %2587 = vmatpush1.msra.mxu0 %v12366_v62  ;;  %16309 = vst [vmem:[#allocation71_spill] sm:$0xff] %v12381_v37  ;;  %v12384_v62 = vld [vmem:[#allocation17 + $0x70] sm:$0xff] }
 0xe23   :  { %2588 = vmatprep.subr.mxu0 %v12369_v2  ;;  %16310 = vst [vmem:[#allocation72_spill] sm:$0xff] %v12384_v62  ;;  %v12387_v2 = vld [vmem:[#allocation17 + $0x68] sm:$0xff] }
 0xe24   :  { %2589 = vmatpush1.msra.mxu0 %v12372_v7  ;;  %16311 = vst [vmem:[#allocation73_spill] sm:$0xff] %v12387_v2  ;;  %v12390_v7 = vld [vmem:[#allocation17 + $0x60] sm:$0xff] }
 0xe25   :  { %2590 = vmatprep.subr.mxu0 %v12375_v8  ;;  %16312 = vst [vmem:[#allocation74_spill] sm:$0xff] %v12390_v7  ;;  %v12393_v8 = vld [vmem:[#allocation17 + $0x58] sm:$0xff] }
 0xe26   :  { %2591 = vmatpush1.msra.mxu0 %v12378_v14  ;;  %16313 = vst [vmem:[#allocation75_spill] sm:$0xff] %v12393_v8  ;;  %v12396_v14 = vld [vmem:[#allocation17 + $0x50] sm:$0xff] }
 0xe27   :  { %2592 = vmatprep.subr.mxu0 %v12381_v37  ;;  %16314 = vst [vmem:[#allocation76_spill] sm:$0xff] %v12396_v14  ;;  %v12399_v37 = vld [vmem:[#allocation17 + $0x48] sm:$0xff] }
 0xe28   :  { %2593 = vmatpush1.msra.mxu0 %v12384_v62  ;;  %16315 = vst [vmem:[#allocation77_spill] sm:$0xff] %v12399_v37  ;;  %v12402_v62 = vld [vmem:[#allocation17 + $0x40] sm:$0xff] }
 0xe29   :  { %2594 = vmatprep.subr.mxu0 %v12387_v2  ;;  %16316 = vst [vmem:[#allocation78_spill] sm:$0xff] %v12402_v62  ;;  %v12405_v2 = vld [vmem:[#allocation17 + $0x38] sm:$0xff] }
 0xe2a   :  { %2595 = vmatpush1.msra.mxu0 %v12390_v7  ;;  %16317 = vst [vmem:[#allocation79_spill] sm:$0xff] %v12405_v2  ;;  %v12408_v7 = vld [vmem:[#allocation17 + $0x30] sm:$0xff] }
 0xe2b   :  { %2596 = vmatprep.subr.mxu0 %v12393_v8  ;;  %16318 = vst [vmem:[#allocation80_spill] sm:$0xff] %v12408_v7  ;;  %v12411_v8 = vld [vmem:[#allocation17 + $0x28] sm:$0xff] }
 0xe2c   :  { %2597 = vmatpush1.msra.mxu0 %v12396_v14  ;;  %16319 = vst [vmem:[#allocation81_spill] sm:$0xff] %v12411_v8  ;;  %v12414_v14 = vld [vmem:[#allocation17 + $0x20] sm:$0xff] }
 0xe2d   :  { %2598 = vmatprep.subr.mxu0 %v12399_v37  ;;  %16320 = vst [vmem:[#allocation82_spill] sm:$0xff] %v12414_v14  ;;  %v12417_v37 = vld [vmem:[#allocation17 + $0x18] sm:$0xff] }
 0xe2e   :  { %2599 = vmatpush1.msra.mxu0 %v12402_v62  ;;  %16321 = vst [vmem:[#allocation83_spill] sm:$0xff] %v12417_v37  ;;  %v12420_v62 = vld [vmem:[#allocation17 + $0x10] sm:$0xff] }
 0xe2f   :  { %2600 = vmatprep.subr.mxu0 %v12405_v2  ;;  %16322 = vst [vmem:[#allocation84_spill] sm:$0xff] %v12420_v62  ;;  %v12423_v2 = vld [vmem:[#allocation17 + $0x8] sm:$0xff] }
 0xe30   :  { %2601 = vmatpush1.msra.mxu0 %v12408_v7  ;;  %16323 = vst [vmem:[#allocation85_spill] sm:$0xff] %v12423_v2  ;;  %v12426_v7 = vld [vmem:[#allocation17] sm:$0xff] }
 0xe31   :  { %2602 = vmatprep.subr.mxu0 %v12411_v8  ;;  %16324 = vst [vmem:[#allocation86_spill] sm:$0xff] %v12426_v7  ;;  %v12429_v8 = vld [vmem:[#allocation17 + $0x1f8] sm:$0xff] }
 0xe32   :  { %2603 = vmatpush1.msra.mxu0 %v12414_v14  ;;  %16325 = vst [vmem:[#allocation87_spill] sm:$0xff] %v12429_v8  ;;  %v12432_v14 = vld [vmem:[#allocation17 + $0x1f0] sm:$0xff] }
 0xe33   :  { %2604 = vmatprep.subr.mxu0 %v12417_v37  ;;  %16326 = vst [vmem:[#allocation88_spill] sm:$0xff] %v12432_v14  ;;  %v12435_v37 = vld [vmem:[#allocation17 + $0x1e8] sm:$0xff] }
 0xe34   :  { %2605 = vmatpush1.msra.mxu0 %v12420_v62  ;;  %16327 = vst [vmem:[#allocation89_spill] sm:$0xff] %v12435_v37  ;;  %v12438_v62 = vld [vmem:[#allocation17 + $0x1e0] sm:$0xff] }
 0xe35   :  { %2606 = vmatprep.subr.mxu0 %v12423_v2  ;;  %16328 = vst [vmem:[#allocation90_spill] sm:$0xff] %v12438_v62  ;;  %v12441_v2 = vld [vmem:[#allocation17 + $0x1d8] sm:$0xff] }
 0xe36   :  { %2607 = vmatpush1.msra.mxu0 %v12426_v7  ;;  %16329 = vst [vmem:[#allocation91_spill] sm:$0xff] %v12441_v2  ;;  %v12444_v7 = vld [vmem:[#allocation17 + $0x1d0] sm:$0xff] }
 0xe37   :  { %2608 = vmatprep.subr.mxu0 %v12429_v8  ;;  %16330 = vst [vmem:[#allocation92_spill] sm:$0xff] %v12444_v7  ;;  %v12447_v8 = vld [vmem:[#allocation17 + $0x1c8] sm:$0xff] }
 0xe38   :  { %2609 = vmatpush2.msra.mxu0 %v12432_v14  ;;  %16331 = vst [vmem:[#allocation93_spill] sm:$0xff] %v12447_v8  ;;  %v12450_v14 = vld [vmem:[#allocation17 + $0x1c0] sm:$0xff] }
 0xe39   :  { %2610 = vmatprep.subr.mxu0 %v12435_v37  ;;  %16332 = vst [vmem:[#allocation94_spill] sm:$0xff] %v12450_v14  ;;  %v12453_v37 = vld [vmem:[#allocation17 + $0x1b8] sm:$0xff] }
 0xe3a   :  { %2611 = vmatpush2.msra.mxu0 %v12438_v62  ;;  %16333 = vst [vmem:[#allocation95_spill] sm:$0xff] %v12453_v37  ;;  %v12456_v62 = vld [vmem:[#allocation17 + $0x1b0] sm:$0xff] }
 0xe3b   :  { %2612 = vmatprep.subr.mxu0 %v12441_v2  ;;  %16334 = vst [vmem:[#allocation96_spill] sm:$0xff] %v12456_v62  ;;  %v12459_v2 = vld [vmem:[#allocation17 + $0x1a8] sm:$0xff] }
 0xe3c   :  { %2613 = vmatpush2.msra.mxu0 %v12444_v7  ;;  %16335 = vst [vmem:[#allocation97_spill] sm:$0xff] %v12459_v2  ;;  %v12462_v7 = vld [vmem:[#allocation17 + $0x1a0] sm:$0xff] }
 0xe3d   :  { %2614 = vmatprep.subr.mxu0 %v12447_v8  ;;  %16336 = vst [vmem:[#allocation98_spill] sm:$0xff] %v12462_v7  ;;  %v12465_v8 = vld [vmem:[#allocation17 + $0x198] sm:$0xff] }
 0xe3e   :  { %2615 = vmatpush2.msra.mxu0 %v12450_v14  ;;  %16337 = vst [vmem:[#allocation99_spill] sm:$0xff] %v12465_v8  ;;  %v12468_v14 = vld [vmem:[#allocation17 + $0x190] sm:$0xff] }
 0xe3f   :  { %2616 = vmatprep.subr.mxu0 %v12453_v37  ;;  %16338 = vst [vmem:[#allocation100_spill] sm:$0xff] %v12468_v14  ;;  %v12471_v37 = vld [vmem:[#allocation17 + $0x188] sm:$0xff] }
 0xe40   :  { %2617 = vmatpush2.msra.mxu0 %v12456_v62  ;;  %16339 = vst [vmem:[#allocation101_spill] sm:$0xff] %v12471_v37  ;;  %v12474_v62 = vld [vmem:[#allocation17 + $0x180] sm:$0xff] }
 0xe41   :  { %2618 = vmatprep.subr.mxu0 %v12459_v2  ;;  %16340 = vst [vmem:[#allocation102_spill] sm:$0xff] %v12474_v62  ;;  %v12477_v2 = vld [vmem:[#allocation17 + $0x178] sm:$0xff] }
 0xe42   :  { %2619 = vmatpush2.msra.mxu0 %v12462_v7  ;;  %16341 = vst [vmem:[#allocation103_spill] sm:$0xff] %v12477_v2  ;;  %v12480_v7 = vld [vmem:[#allocation17 + $0x170] sm:$0xff] }
 0xe43   :  { %2620 = vmatprep.subr.mxu0 %v12465_v8  ;;  %16342 = vst [vmem:[#allocation104_spill] sm:$0xff] %v12480_v7  ;;  %v12483_v8 = vld [vmem:[#allocation17 + $0x168] sm:$0xff] }
 0xe44   :  { %2621 = vmatpush2.msra.mxu0 %v12468_v14  ;;  %16343 = vst [vmem:[#allocation105_spill] sm:$0xff] %v12483_v8  ;;  %v12486_v14 = vld [vmem:[#allocation17 + $0x160] sm:$0xff] }
 0xe45   :  { %2622 = vmatprep.subr.mxu0 %v12471_v37  ;;  %16344 = vst [vmem:[#allocation106_spill] sm:$0xff] %v12486_v14  ;;  %v12489_v37 = vld [vmem:[#allocation17 + $0x158] sm:$0xff] }
 0xe46   :  { %2623 = vmatpush2.msra.mxu0 %v12474_v62  ;;  %16345 = vst [vmem:[#allocation107_spill] sm:$0xff] %v12489_v37  ;;  %v12492_v62 = vld [vmem:[#allocation17 + $0x150] sm:$0xff] }
 0xe47   :  { %2624 = vmatprep.subr.mxu0 %v12477_v2  ;;  %16346 = vst [vmem:[#allocation108_spill] sm:$0xff] %v12492_v62  ;;  %v12495_v2 = vld [vmem:[#allocation17 + $0x148] sm:$0xff] }
 0xe48   :  { %2625 = vmatpush2.msra.mxu0 %v12480_v7  ;;  %16347 = vst [vmem:[#allocation109_spill] sm:$0xff] %v12495_v2  ;;  %v12498_v7 = vld [vmem:[#allocation17 + $0x140] sm:$0xff] }
 0xe49   :  { %2626 = vmatprep.subr.mxu0 %v12483_v8  ;;  %16348 = vst [vmem:[#allocation110_spill] sm:$0xff] %v12498_v7  ;;  %v12501_v8 = vld [vmem:[#allocation17 + $0x138] sm:$0xff] }
 0xe4a   :  { %2627 = vmatpush2.msra.mxu0 %v12486_v14  ;;  %16349 = vst [vmem:[#allocation111_spill] sm:$0xff] %v12501_v8  ;;  %v12504_v14 = vld [vmem:[#allocation17 + $0x130] sm:$0xff] }
 0xe4b   :  { %2628 = vmatprep.subr.mxu0 %v12489_v37  ;;  %16350 = vst [vmem:[#allocation112_spill] sm:$0xff] %v12504_v14  ;;  %v12507_v37 = vld [vmem:[#allocation17 + $0x128] sm:$0xff] }
 0xe4c   :  { %2629 = vmatpush2.msra.mxu0 %v12492_v62  ;;  %v12510_v62 = vld [vmem:[#allocation17 + $0x120] sm:$0xff] }
 0xe4d   :  { %2630 = vmatprep.subr.mxu0 %v12495_v2  ;;  %v12513_v2 = vld [vmem:[#allocation17 + $0x118] sm:$0xff] }
 0xe4e   :  { %2631 = vmatpush2.msra.mxu0 %v12498_v7  ;;  %v12516_v7 = vld [vmem:[#allocation17 + $0x110] sm:$0xff] }
 0xe4f   :  { %2632 = vmatprep.subr.mxu0 %v12501_v8  ;;  %v12519_v8 = vld [vmem:[#allocation17 + $0x108] sm:$0xff] }
 0xe50   :  { %2633 = vmatpush2.msra.mxu0 %v12504_v14  ;;  %v12522_v14 = vld [vmem:[#allocation17 + $0x100] sm:$0xff] }
 0xe51   :  { %2634 = vmatprep.subr.mxu0 %v12507_v37 }
 0xe52   :  { %2635 = vmatpush2.msra.mxu0 %v12510_v62 }
 0xe53   :  { %2636 = vmatprep.subr.mxu0 %v12513_v2 }
 0xe54   :  { %2637 = vmatpush2.msra.mxu0 %v12516_v7 }
 0xe55   :  { %2638 = vmatprep.subr.mxu0 %v12519_v8 }
 0xe56   :  { %2639 = vmatpush2.msra.mxu0 %v12522_v14 }
 0xe57   :  { %2641 = vmatmul.mubr.f32.vlgmr.msra.gmra.mxu0 %v12045_v34  ;;  %2804 = vmatprep.subr.mxu0 %v11859_v25  ;;  %v16351_v25 = vld [vmem:[#allocation25_spill] sm:$0xff] }
 0xe58   :  { %2805 = vmatpush1.msra.mxu0 %v11862_v54  ;;  %2868 = vmatprep.mubr.f32.mxu0 %v16109_v0  ;;  %v16352_v54 = vld [vmem:[#allocation26_spill] sm:$0xff] }
 0xe59   :  { %2806 = vmatprep.subr.mxu0 %v11866_v57  ;;  %v16353_v57 = vld [vmem:[#allocation27_spill] sm:$0xff] }
 0xe5a   :  { %2807 = vmatpush1.msra.mxu0 %v11869_v12  ;;  %v16354_v12 = vld [vmem:[#allocation28_spill] sm:$0xff] }
 0xe5b   :  { %2808 = vmatprep.subr.mxu0 %v11872_v39  ;;  %v16355_v39 = vld [vmem:[#allocation29_spill] sm:$0xff] }
 0xe5c   :  { %2809 = vmatpush1.msra.mxu0 %v11875_v42  ;;  %v16356_v42 = vld [vmem:[#allocation30_spill] sm:$0xff] }
 0xe5d   :  { %2810 = vmatprep.subr.mxu0 %v11878_v15  ;;  %v16357_v15 = vld [vmem:[#allocation31_spill] sm:$0xff] }
 0xe5e   :  { %2811 = vmatpush1.msra.mxu0 %v11881_v27  ;;  %v16358_v27 = vld [vmem:[#allocation32_spill] sm:$0xff] }
 0xe5f   :  { %2812 = vmatprep.subr.mxu0 %v11884_v28  ;;  %v16359_v28 = vld [vmem:[#allocation33_spill] sm:$0xff] }
 0xe60   :  { %2813 = vmatpush1.msra.mxu0 %v11887_v45  ;;  %v16360_v45 = vld [vmem:[#allocation34_spill] sm:$0xff] }
 0xe61   :  { %2814 = vmatprep.subr.mxu0 %v11890_v29  ;;  %v16361_v29 = vld [vmem:[#allocation35_spill] sm:$0xff] }
 0xe62   :  { %2815 = vmatpush1.msra.mxu0 %v11893_v33  ;;  %v16362_v33 = vld [vmem:[#allocation36_spill] sm:$0xff] }
 0xe63   :  { %2816 = vmatprep.subr.mxu0 %v11896_v6 }
 0xe64   :  { %2817 = vmatpush1.msra.mxu0 %v11899_v60  ;;  %v12563_v60 = vld [vmem:[%s15527_s12] ss:$0 sm:$0xff] }
 0xe65   :  { %2818 = vmatprep.subr.mxu0 %v11902_v17 }
 0xe66   :  { %2819 = vmatpush1.msra.mxu0 %v11905_v11 }
 0xe67   :  { %2820 = vmatprep.subr.mxu0 %v16351_v25  ;;  %v12599_v25 = vld [vmem:[%s16022_s25 + $0x58] sm:$0xff] }
 0xe68   :  { %2821 = vmatpush1.msra.mxu0 %v16352_v54  ;;  %v12606_v54 = vld [vmem:[%s16022_s25 + $0x50] sm:$0xff] }
 0xe69   :  { %2822 = vmatprep.subr.mxu0 %v16353_v57  ;;  %v12613_v57 = vld [vmem:[%s16022_s25 + $0x48] sm:$0xff] }
 0xe6a   :  { %2823 = vmatpush1.msra.mxu0 %v16354_v12  ;;  %16363 = vst [vmem:[#allocation113_spill] sm:$0xff] %v12613_v57  ;;  %v12620_v12 = vld [vmem:[%s16022_s25 + $0x40] sm:$0xff] }
 0xe6b   :  { %2824 = vmatprep.subr.mxu0 %v16355_v39  ;;  %16364 = vst [vmem:[#allocation114_spill] sm:$0xff] %v12620_v12  ;;  %v12627_v39 = vld [vmem:[%s16022_s25 + $0x38] sm:$0xff] }
 0xe6c   :  { %2825 = vmatpush1.msra.mxu0 %v16356_v42  ;;  %16365 = vst [vmem:[#allocation115_spill] sm:$0xff] %v12627_v39  ;;  %v12634_v42 = vld [vmem:[%s16022_s25 + $0x30] sm:$0xff] }
 0xe6d   :  { %2826 = vmatprep.subr.mxu0 %v16357_v15  ;;  %16366 = vst [vmem:[#allocation116_spill] sm:$0xff] %v12634_v42  ;;  %v12641_v15 = vld [vmem:[%s16022_s25 + $0x28] sm:$0xff] }
 0xe6e   :  { %2827 = vmatpush1.msra.mxu0 %v16358_v27  ;;  %16367 = vst [vmem:[#allocation117_spill] sm:$0xff] %v12641_v15  ;;  %v12648_v27 = vld [vmem:[%s16022_s25 + $0x20] sm:$0xff] }
 0xe6f   :  { %2828 = vmatprep.subr.mxu0 %v16359_v28  ;;  %16368 = vst [vmem:[#allocation118_spill] sm:$0xff] %v12648_v27  ;;  %v12655_v28 = vld [vmem:[%s16022_s25 + $0x18] sm:$0xff] }
 0xe70   :  { %2829 = vmatpush1.msra.mxu0 %v16360_v45  ;;  %16369 = vst [vmem:[#allocation119_spill] sm:$0xff] %v12655_v28  ;;  %v12662_v45 = vld [vmem:[%s16022_s25 + $0x10] sm:$0xff] }
 0xe71   :  { %2830 = vmatprep.subr.mxu0 %v16361_v29  ;;  %16370 = vst [vmem:[#allocation120_spill] sm:$0xff] %v12662_v45  ;;  %v12669_v29 = vld [vmem:[%s16022_s25 + $0x8] sm:$0xff] }
 0xe72   :  { %2831 = vmatpush1.msra.mxu0 %v16362_v33  ;;  %16371 = vst [vmem:[#allocation121_spill] sm:$0xff] %v12669_v29  ;;  %v2662_v33 = vld [vmem:[#allocation3 + $0x18] sm:$0xff] }
 0xe73   :  { %2832 = vmatprep.subr.mxu0 %v11944_v38  ;;  %v12569_v38 = vld [vmem:[%s16022_s25 + $0x78] sm:$0xff] }
 0xe74   :  { %2833 = vmatpush1.msra.mxu0 %v11947_v9  ;;  %v12592_v9 = vld [vmem:[%s16022_s25 + $0x60] sm:$0xff] }
 0xe75   :  { %2834 = vmatprep.subr.mxu0 %v11950_v24  ;;  %v12578_v24 = vld [vmem:[%s16022_s25 + $0x70] sm:$0xff] }
 0xe76   :  { %2835 = vmatpush1.msra.mxu0 %v11953_v51  ;;  %v12585_v51 = vld [vmem:[%s16022_s25 + $0x68] sm:$0xff] }
 0xe77   :  { %8203 = vmatprep.subr.mxu0 %v16109_v0 }
 0xed7   :  { %v2498_v6 = vpop.f32.mrf.mxu0 }
 0xed8   :  { %v2499_v17 = vadd.f32 %v12563_v60, %v2498_v6  ;;  %v12676_v6 = vld [vmem:[%s16022_s25] sm:$0xff] }
 0xed9   :  { %v8062_v11 = vpop.f32.mrf.mxu0  ;;  %16372 = vst [vmem:[#allocation122_spill] sm:$0xff] %v12676_v6 }
 0xeda   :  { %v2502_v34 = vmax.f32 %v2499_v17, 0.0  ;;  %v12680_v17 = vld [vmem:[#allocation8 + $0x78] sm:$0xff]  ;;  %v12686_v11 = vld [vmem:[#allocation8 + $0x70] sm:$0xff] }
 0xedb   :  { %16373 = vst [vmem:[#allocation123_spill] sm:$0xff] %v12680_v17  ;;  %16374 = vst [vmem:[#allocation124_spill] sm:$0xff] %v12686_v11 }
 0xedc   :  { %8096 = vmatmul.mubr.f32.vlgmr.msra.gmra.mxu1 %v2502_v34  ;;  %v12690_v34 = vld [vmem:[#allocation8 + $0x68] sm:$0xff] }
 0xedd   :  { %8099 = vmatpush3.msra.mxu1 %v12569_v38  ;;  %8130 = vmatprep.mubr.msk.f32.mxu1 %vm10383_vm0, %v16109_v0  ;;  %16375 = vst [vmem:[#allocation125_spill] sm:$0xff] %v12690_v34 }
 0xede   :  { %8100 = vmatprep.subr.mxu1 %v16109_v0 }
 0xedf   :  { %8101 = vmatpush3.msra.mxu1 %v12578_v24 }
 0xee0   :  { %8102 = vmatprep.subr.mxu1 %v16109_v0 }
 0xee1   :  { %8103 = vmatpush3.msra.mxu1 %v12585_v51 }
 0xee2   :  { %8104 = vmatprep.subr.mxu1 %v16109_v0 }
 0xee3   :  { %8105 = vmatpush3.msra.mxu1 %v12592_v9 }
 0xee4   :  { %8106 = vmatprep.subr.mxu1 %v16109_v0 }
 0xee5   :  { %8107 = vmatpush3.msra.mxu1 %v12599_v25 }
 0xee6   :  { %8108 = vmatprep.subr.mxu1 %v16109_v0 }
 0xee7   :  { %8109 = vmatpush3.msra.mxu1 %v12606_v54 }
 0xee8   :  { %8110 = vmatprep.subr.mxu1 %v16109_v0 }
 0xee9   :  { %8111 = vmatpush3.msra.mxu1 %v12613_v57 }
 0xeea   :  { %8112 = vmatprep.subr.mxu1 %v16109_v0 }
 0xeeb   :  { %8113 = vmatpush3.msra.mxu1 %v12620_v12 }
 0xeec   :  { %8114 = vmatprep.subr.mxu1 %v16109_v0 }
 0xeed   :  { %8115 = vmatpush3.msra.mxu1 %v12627_v39 }
 0xeee   :  { %8116 = vmatprep.subr.mxu1 %v16109_v0 }
 0xeef   :  { %8117 = vmatpush3.msra.mxu1 %v12634_v42 }
 0xef0   :  { %8118 = vmatprep.subr.mxu1 %v16109_v0 }
 0xef1   :  { %8119 = vmatpush3.msra.mxu1 %v12641_v15 }
 0xef2   :  { %8120 = vmatprep.subr.mxu1 %v16109_v0 }
 0xef3   :  { %8121 = vmatpush3.msra.mxu1 %v12648_v27 }
 0xef4   :  { %8122 = vmatprep.subr.mxu1 %v16109_v0 }
 0xef5   :  { %8123 = vmatpush3.msra.mxu1 %v12655_v28 }
 0xef6   :  { %8124 = vmatprep.subr.mxu1 %v16109_v0 }
 0xef7   :  { %8125 = vmatpush3.msra.mxu1 %v12662_v45 }
 0xef8   :  { %8126 = vmatprep.subr.mxu1 %v16109_v0 }
 0xef9   :  { %8127 = vmatpush3.msra.mxu1 %v12669_v29 }
 0xefa   :  { %8128 = vmatprep.subr.mxu1 %v16109_v0 }
 0xefb   :  { %8129 = vmatpush3.msra.mxu1 %v12676_v6 }
 0xefc   :  { %8131 = vmatmul.mubr.f32.vlgmr.msra.gmra.mxu1 %v2662_v33  ;;  %8133 = vmatprep.subr.mxu1 %v16109_v0  ;;  %v12694_v33 = vld [vmem:[#allocation8 + $0x60] sm:$0xff] }
 0xefd   :  { %8134 = vmatpush3.msra.mxu1 %v12680_v17  ;;  %8165 = vmatprep.mubr.msk.f32.mxu1 %vm10383_vm0, %v16109_v0  ;;  %16376 = vst [vmem:[#allocation126_spill] sm:$0xff] %v12694_v33  ;;  %v12698_v17 = vld [vmem:[#allocation8 + $0x58] sm:$0xff] }
 0xefe   :  { %8135 = vmatprep.subr.mxu1 %v16109_v0  ;;  %16377 = vst [vmem:[#allocation127_spill] sm:$0xff] %v12698_v17 }
 0xeff   :  { %8136 = vmatpush3.msra.mxu1 %v12686_v11  ;;  %v12702_v11 = vld [vmem:[#allocation8 + $0x50] sm:$0xff] }
 0xf00   :  { %8137 = vmatprep.subr.mxu1 %v16109_v0  ;;  %16378 = vst [vmem:[#allocation130_spill] sm:$0xff] %v12702_v11 }
 0xf01   :  { %8138 = vmatpush3.msra.mxu1 %v12690_v34  ;;  %v12706_v34 = vld [vmem:[#allocation8 + $0x48] sm:$0xff] }
 0xf02   :  { %8139 = vmatprep.subr.mxu1 %v16109_v0  ;;  %16379 = vst [vmem:[#allocation131_spill] sm:$0xff] %v12706_v34 }
 0xf03   :  { %8140 = vmatpush3.msra.mxu1 %v12694_v33  ;;  %v12710_v33 = vld [vmem:[#allocation8 + $0x40] sm:$0xff] }
 0xf04   :  { %8141 = vmatprep.subr.mxu1 %v16109_v0  ;;  %16380 = vst [vmem:[#allocation132_spill] sm:$0xff] %v12710_v33 }
 0xf05   :  { %8142 = vmatpush3.msra.mxu1 %v12698_v17  ;;  %v12714_v17 = vld [vmem:[#allocation8 + $0x38] sm:$0xff] }
 0xf06   :  { %8143 = vmatprep.subr.mxu1 %v16109_v0  ;;  %16381 = vst [vmem:[#allocation133_spill] sm:$0xff] %v12714_v17 }
 0xf07   :  { %8144 = vmatpush3.msra.mxu1 %v12702_v11  ;;  %v12718_v11 = vld [vmem:[#allocation8 + $0x30] sm:$0xff] }
 0xf08   :  { %8145 = vmatprep.subr.mxu1 %v16109_v0  ;;  %16382 = vst [vmem:[#allocation134_spill] sm:$0xff] %v12718_v11 }
 0xf09   :  { %8146 = vmatpush3.msra.mxu1 %v12706_v34  ;;  %v12722_v34 = vld [vmem:[#allocation8 + $0x28] sm:$0xff] }
 0xf0a   :  { %8147 = vmatprep.subr.mxu1 %v16109_v0  ;;  %16383 = vst [vmem:[#allocation135_spill] sm:$0xff] %v12722_v34 }
 0xf0b   :  { %8148 = vmatpush3.msra.mxu1 %v12710_v33  ;;  %v12726_v33 = vld [vmem:[#allocation8 + $0x20] sm:$0xff] }
 0xf0c   :  { %8149 = vmatprep.subr.mxu1 %v16109_v0  ;;  %16384 = vst [vmem:[#allocation136_spill] sm:$0xff] %v12726_v33 }
 0xf0d   :  { %8150 = vmatpush3.msra.mxu1 %v12714_v17  ;;  %v12730_v17 = vld [vmem:[#allocation8 + $0x18] sm:$0xff] }
 0xf0e   :  { %8151 = vmatprep.subr.mxu1 %v16109_v0  ;;  %16385 = vst [vmem:[#allocation137_spill] sm:$0xff] %v12730_v17 }
 0xf0f   :  { %8152 = vmatpush3.msra.mxu1 %v12718_v11  ;;  %v12734_v11 = vld [vmem:[#allocation8 + $0x10] sm:$0xff] }
 0xf10   :  { %8153 = vmatprep.subr.mxu1 %v16109_v0  ;;  %16386 = vst [vmem:[#allocation138_spill] sm:$0xff] %v12734_v11 }
 0xf11   :  { %8154 = vmatpush3.msra.mxu1 %v12722_v34  ;;  %v12738_v34 = vld [vmem:[#allocation8 + $0x8] sm:$0xff] }
 0xf12   :  { %8155 = vmatprep.subr.mxu1 %v16109_v0  ;;  %16387 = vst [vmem:[#allocation139_spill] sm:$0xff] %v12738_v34 }
 0xf13   :  { %8156 = vmatpush3.msra.mxu1 %v12726_v33  ;;  %v12742_v33 = vld [vmem:[#allocation8] sm:$0xff] }
 0xf14   :  { %8157 = vmatprep.subr.mxu1 %v16109_v0  ;;  %16388 = vst [vmem:[#allocation140_spill] sm:$0xff] %v12742_v33 }
 0xf15   :  { %8158 = vmatpush3.msra.mxu1 %v12730_v17 }
 0xf16   :  { %8159 = vmatprep.subr.mxu1 %v16109_v0 }
 0xf17   :  { %8160 = vmatpush3.msra.mxu1 %v12734_v11  ;;  %v2642_v17 = vpop.f32.mrf.mxu0 }
 0xf18   :  { %8161 = vmatprep.subr.mxu1 %v16109_v0  ;;  %v2643_v11 = vadd.f32 %v2642_v17, %v16260_v46 }
 0xf19   :  { %8162 = vmatpush3.msra.mxu1 %v12738_v34  ;;  %v2644_v6 = vpop.f32.mrf.mxu0  ;;  %v12751_v34 = vld [vmem:[%s15529_s14] ss:$0 sm:$0xff] }
 0xf1a   :  { %8163 = vmatprep.subr.mxu1 %v16109_v0  ;;  %v2645_v29 = vadd.f32 %v2644_v6, %v16259_v43  ;;  %v2647_v28 = vmul.f32 0.5, %v2643_v11 }
 0xf1b   :  { %8164 = vmatpush3.msra.mxu1 %v12742_v33 }
 0xf1c   :  { %8168 = vmatprep.subr.mxu1 %v16109_v0  ;;  %v2653_v45 = vmul.f32 0.5, %v2645_v29 }
 0xf1e   :  { %9388 = vtanh.f32 %v2653_v45 }
 0xf1f   :  { %9390 = vtanh.f32 %v2647_v28 }
 0xf2b   :  { %v9389_v6 = vpop.eup %9388 }
 0xf2c   :  { %v9391_v43 = vpop.eup %9390  ;;  %v2655_v17 = vadd.f32 1.0, %v9389_v6  ;;  %v12792_v6 = vld [vmem:[#allocation11 + $0x50] sm:$0xff] }
 0xf2d   :  { %v2649_v29 = vadd.f32 1.0, %v9391_v43  ;;  %v12766_v43 = vld [vmem:[#allocation11 + $0x70] sm:$0xff] }
 0xf2e   :  { %v2656_v11 = vmul.f32 0.5, %v2655_v17  ;;  %v12796_v17 = vld [vmem:[#allocation11 + $0x48] sm:$0xff] }
 0xf2f   :  { %v2650_v45 = vmul.f32 0.5, %v2649_v29  ;;  %v12802_v29 = vld [vmem:[%s15532_s17 + $0x78] sm:$0xff] }
 0xf30   :  { %v2657_v46 = vmul.f32 %v2656_v11, %v12031_v47  ;;  %v12807_v11 = vld [vmem:[#allocation11 + $0x40] sm:$0xff] }
 0xf9c   :  { %v2569_v27 = vpop.f32.mrf.mxu1 }
 0xf9d   :  { %v2570_v33 = vadd.f32 %v12751_v34, %v2569_v27  ;;  %v12786_v27 = vld [vmem:[#allocation11 + $0x58] sm:$0xff] }
 0xf9e   :  { %v8097_v15 = vpop.f32.mrf.mxu1 }
 0xf9f   :  { %v2573_v42 = vmax.f32 %v2570_v33, 0.0  ;;  %v12760_v15 = vld [vmem:[#allocation11 + $0x78] sm:$0xff] }
 0xfa1   :  { %v2574_v39 = vadd.f32 %v2573_v42, %v12333_v35  ;;  %v12774_v35 = vld [vmem:[#allocation11 + $0x60] sm:$0xff] }
 0xfa3   :  { %9392 = vtanh.f32 %v2574_v39 }
 0xfb0   :  { %v9393_v28 = vpop.eup %9392 }
 0xfb1   :  { %v2652_v12 = vmul.f32 %v9393_v28, %v2650_v45  ;;  %v12813_v45 = vld [vmem:[%s15532_s17 + $0x70] sm:$0xff]  ;;  %v12818_v28 = vld [vmem:[#allocation11 + $0x38] sm:$0xff] }
 0xfb2   :  { %16389 = vst [vmem:[#allocation141_spill] sm:$0xff] %v12818_v28 }
 0xfb3   :  { %v12756_v57 = vadd.f32 %v2657_v46, %v2652_v12  ;;  %v12770_v46 = vld [vmem:[#allocation11 + $0x68] sm:$0xff]  ;;  %v12780_v12 = vld [vmem:[%s16023_s2] ss:$0 sm:$0xff] }
 0xfb5   :  { %8166 = vmatmul.mubr.f32.vlgmr.msra.gmra.mxu1 %v12756_v57  ;;  %2660 = vst [vmem:[#allocation18 + $0x10] sm:$0xff] %v12756_v57 }
 0xfb6   :  { %8169 = vmatpush3.msra.mxu1 %v12760_v15  ;;  %8200 = vmatprep.mubr.msk.f32.mxu1 %vm10383_vm0, %v16109_v0 }
 0xfb7   :  { %8170 = vmatprep.subr.mxu1 %v16109_v0 }
 0xfb8   :  { %8171 = vmatpush3.msra.mxu1 %v12766_v43 }
 0xfb9   :  { %8172 = vmatprep.subr.mxu1 %v16109_v0 }
 0xfba   :  { %8173 = vmatpush3.msra.mxu1 %v12770_v46 }
 0xfbb   :  { %8174 = vmatprep.subr.mxu1 %v16109_v0 }
 0xfbc   :  { %v2729_v47 = vpop.f32.mrf.mxu1  ;;  %8175 = vmatpush3.msra.mxu1 %v12774_v35 }
 0xfbd   :  { %v12783_v39 = vadd.f32 %v12780_v12, %v2729_v47  ;;  %8176 = vmatprep.subr.mxu1 %v16109_v0  ;;  %v12824_v47 = vld [vmem:[%s15532_s17 + $0x68] sm:$0xff] }
 0xfbe   :  { %v8132_v42 = vpop.f32.mrf.mxu1  ;;  %8177 = vmatpush3.msra.mxu1 %v12786_v27  ;;  %16390 = vst [vmem:[#allocation142_spill] sm:$0xff] %v12824_v47 }
 0xfbf   :  { %v2803_v33 = vsub.f32 %v12756_v57, %v12783_v39  ;;  %8178 = vmatprep.subr.mxu1 %v16109_v0  ;;  %v12829_v42 = vld [vmem:[#allocation11 + $0x30] sm:$0xff] }
 0xfc0   :  { %8179 = vmatpush3.msra.mxu1 %v12792_v6  ;;  %16391 = vst [vmem:[#allocation143_spill] sm:$0xff] %v12829_v42 }
 0xfc1   :  { %2869 = vmatmul.mubr.f32.vlgmr.msra.gmra.mxu0 %v2803_v33  ;;  %8180 = vmatprep.subr.mxu1 %v16109_v0  ;;  %v12835_v33 = vld [vmem:[%s15532_s17 + $0x60] sm:$0xff] }
 0xfc2   :  { %8181 = vmatpush3.msra.mxu1 %v12796_v17  ;;  %8204 = vmatpush3.msra.mxu0 %v12802_v29  ;;  %16392 = vst [vmem:[#allocation25_spill] sm:$0xff] %v12835_v33 }
 0xfc3   :  { %8182 = vmatprep.subr.mxu1 %v16109_v0  ;;  %8205 = vmatprep.subr.mxu0 %v16109_v0 }
 0xfc4   :  { %8183 = vmatpush3.msra.mxu1 %v12807_v11  ;;  %8206 = vmatpush3.msra.mxu0 %v12813_v45 }
 0xfc5   :  { %8184 = vmatprep.subr.mxu1 %v16109_v0  ;;  %8207 = vmatprep.subr.mxu0 %v16109_v0 }
 0xfc6   :  { %8185 = vmatpush3.msra.mxu1 %v12818_v28  ;;  %8208 = vmatpush3.msra.mxu0 %v12824_v47  ;;  %v12840_v47 = vld [vmem:[#allocation11 + $0x28] sm:$0xff]  ;;  %v12846_v28 = vld [vmem:[%s15532_s17 + $0x58] sm:$0xff] }
 0xfc7   :  { %8186 = vmatprep.subr.mxu1 %v16109_v0  ;;  %8209 = vmatprep.subr.mxu0 %v16109_v0  ;;  %16393 = vst [vmem:[#allocation26_spill] sm:$0xff] %v12840_v47  ;;  %16394 = vst [vmem:[#allocation27_spill] sm:$0xff] %v12846_v28 }
 0xfc8   :  { %8187 = vmatpush3.msra.mxu1 %v12829_v42  ;;  %8210 = vmatpush3.msra.mxu0 %v12835_v33  ;;  %v12851_v33 = vld [vmem:[#allocation11 + $0x20] sm:$0xff]  ;;  %v12857_v42 = vld [vmem:[%s15532_s17 + $0x50] sm:$0xff] }
 0xfc9   :  { %8188 = vmatprep.subr.mxu1 %v16109_v0  ;;  %8211 = vmatprep.subr.mxu0 %v16109_v0  ;;  %16395 = vst [vmem:[#allocation28_spill] sm:$0xff] %v12851_v33  ;;  %16396 = vst [vmem:[#allocation29_spill] sm:$0xff] %v12857_v42 }
 0xfca   :  { %8189 = vmatpush3.msra.mxu1 %v12840_v47  ;;  %8212 = vmatpush3.msra.mxu0 %v12846_v28  ;;  %v12862_v28 = vld [vmem:[#allocation11 + $0x18] sm:$0xff]  ;;  %v12868_v47 = vld [vmem:[%s15532_s17 + $0x48] sm:$0xff] }
 0xfcb   :  { %8190 = vmatprep.subr.mxu1 %v16109_v0  ;;  %8213 = vmatprep.subr.mxu0 %v16109_v0  ;;  %16397 = vst [vmem:[#allocation30_spill] sm:$0xff] %v12862_v28  ;;  %16398 = vst [vmem:[#allocation31_spill] sm:$0xff] %v12868_v47 }
 0xfcc   :  { %8191 = vmatpush3.msra.mxu1 %v12851_v33  ;;  %8214 = vmatpush3.msra.mxu0 %v12857_v42  ;;  %v12873_v42 = vld [vmem:[#allocation11 + $0x10] sm:$0xff]  ;;  %v12879_v33 = vld [vmem:[%s15532_s17 + $0x40] sm:$0xff] }
 0xfcd   :  { %8192 = vmatprep.subr.mxu1 %v16109_v0  ;;  %8215 = vmatprep.subr.mxu0 %v16109_v0  ;;  %16399 = vst [vmem:[#allocation32_spill] sm:$0xff] %v12873_v42  ;;  %16400 = vst [vmem:[#allocation33_spill] sm:$0xff] %v12879_v33 }
 0xfce   :  { %8193 = vmatpush3.msra.mxu1 %v12862_v28  ;;  %8216 = vmatpush3.msra.mxu0 %v12868_v47  ;;  %v12884_v47 = vld [vmem:[#allocation11 + $0x8] sm:$0xff]  ;;  %v12890_v28 = vld [vmem:[%s15532_s17 + $0x38] sm:$0xff] }
 0xfcf   :  { %8194 = vmatprep.subr.mxu1 %v16109_v0  ;;  %8217 = vmatprep.subr.mxu0 %v16109_v0  ;;  %16401 = vst [vmem:[#allocation34_spill] sm:$0xff] %v12890_v28 }
 0xfd0   :  { %8195 = vmatpush3.msra.mxu1 %v12873_v42  ;;  %8218 = vmatpush3.msra.mxu0 %v12879_v33  ;;  %v12895_v33 = vld [vmem:[#allocation11] sm:$0xff]  ;;  %v12901_v42 = vld [vmem:[%s15532_s17 + $0x30] sm:$0xff] }
 0xfd1   :  { %8196 = vmatprep.subr.mxu1 %v16109_v0  ;;  %8219 = vmatprep.subr.mxu0 %v16109_v0  ;;  %16402 = vst [vmem:[#allocation35_spill] sm:$0xff] %v12901_v42 }
 0xfd2   :  { %8197 = vmatpush3.msra.mxu1 %v12884_v47  ;;  %8220 = vmatpush3.msra.mxu0 %v12890_v28  ;;  %v12909_v28 = vld [vmem:[%s15532_s17 + $0x28] sm:$0xff] }
 0xfd3   :  { %8198 = vmatprep.subr.mxu1 %v16109_v0  ;;  %8221 = vmatprep.subr.mxu0 %v16109_v0  ;;  %16403 = vst [vmem:[#allocation36_spill] sm:$0xff] %v12909_v28 }
 0xfd4   :  { %8199 = vmatpush3.msra.mxu1 %v12895_v33  ;;  %8222 = vmatpush3.msra.mxu0 %v12901_v42  ;;  %v12919_v42 = vld [vmem:[%s15532_s17 + $0x20] sm:$0xff] }
 0xfd5   :  { %8201 = vmatmul.mubr.f32.vlgmr.msra.gmra.mxu1 %v12783_v39  ;;  %8223 = vmatprep.subr.mxu0 %v16109_v0 }
 0xfd6   :  { %8224 = vmatpush3.msra.mxu0 %v12909_v28  ;;  %8235 = vmatprep.mubr.msk.f32.mxu0 %vm10383_vm0, %v16109_v0  ;;  %v12928_v28 = vld [vmem:[%s15532_s17 + $0x18] sm:$0xff] }
 0xfd7   :  { %8225 = vmatprep.subr.mxu0 %v16109_v0  ;;  %8243 = vmatprep.subr.mxu1 %v16109_v0 }
 0xfd8   :  { %8226 = vmatpush3.msra.mxu0 %v12919_v42  ;;  %8244 = vmatpush3.msra.mxu1 %v12100_v22  ;;  %v12937_v22 = vld [vmem:[%s15532_s17 + $0x10] sm:$0xff] }
 0xfd9   :  { %8227 = vmatprep.subr.mxu0 %v16109_v0  ;;  %8245 = vmatprep.subr.mxu1 %v16109_v0 }
 0xfda   :  { %8228 = vmatpush3.msra.mxu0 %v12928_v28  ;;  %8246 = vmatpush3.msra.mxu1 %v12106_v16  ;;  %v12946_v16 = vld [vmem:[%s15532_s17 + $0x8] sm:$0xff] }
 0xfdb   :  { %8229 = vmatprep.subr.mxu0 %v16109_v0  ;;  %8247 = vmatprep.subr.mxu1 %v16109_v0 }
 0xfdc   :  { %8230 = vmatpush3.msra.mxu0 %v12937_v22  ;;  %8248 = vmatpush3.msra.mxu1 %v12112_v4  ;;  %v12955_v4 = vld [vmem:[%s15532_s17] sm:$0xff] }
 0xfdd   :  { %8231 = vmatprep.subr.mxu0 %v16109_v0  ;;  %8249 = vmatprep.subr.mxu1 %v16109_v0 }
 0xfde   :  { %8232 = vmatpush3.msra.mxu0 %v12946_v16  ;;  %8250 = vmatpush3.msra.mxu1 %v12118_v10 }
 0xfdf   :  { %8233 = vmatprep.subr.mxu0 %v16109_v0  ;;  %8251 = vmatprep.subr.mxu1 %v16109_v0 }
 0xfe0   :  { %8234 = vmatpush3.msra.mxu0 %v12955_v4  ;;  %8252 = vmatpush3.msra.mxu1 %v12124_v20 }
 0xfe1   :  { %8238 = vmatprep.subr.mxu0 %v16109_v0  ;;  %8253 = vmatprep.subr.mxu1 %v16109_v0 }
 0xfe2   :  { %8254 = vmatpush3.msra.mxu1 %v12129_v53  ;;  %8275 = vmatprep.mubr.msk.f32.mxu1 %vm10383_vm0, %v16109_v0  ;;  %v12988_v53 = vld [vmem:[%s15520_s5] ss:$0 sm:$0xff] }
 0xfe3   :  { %8255 = vmatprep.subr.mxu1 %v16109_v0 }
 0xfe4   :  { %8256 = vmatpush3.msra.mxu1 %v12135_v21 }
 0xfe5   :  { %8257 = vmatprep.subr.mxu1 %v16109_v0 }
 0xfe6   :  { %8258 = vmatpush3.msra.mxu1 %v12139_v23 }
 0xfe7   :  { %8259 = vmatprep.subr.mxu1 %v16109_v0 }
 0xfe8   :  { %8260 = vmatpush3.msra.mxu1 %v12143_v55 }
 0xfe9   :  { %8261 = vmatprep.subr.mxu1 %v16109_v0 }
 0xfea   :  { %8262 = vmatpush3.msra.mxu1 %v12147_v56  ;;  %v12994_v56 = vld [vmem:[%s15533_s18] sm:$0xf] }
 0xfeb   :  { %8263 = vmatprep.subr.mxu1 %v16109_v0 }
 0xfec   :  { %8264 = vmatpush3.msra.mxu1 %v12151_v58 }
 0xfed   :  { %8265 = vmatprep.subr.mxu1 %v16109_v0 }
 0xfee   :  { %8266 = vmatpush3.msra.mxu1 %v12155_v59 }
 0xfef   :  { %8267 = vmatprep.subr.mxu1 %v16109_v0 }
 0xff0   :  { %8268 = vmatpush3.msra.mxu1 %v12159_v61 }
 0xff1   :  { %8269 = vmatprep.subr.mxu1 %v16109_v0 }
 0xff2   :  { %8270 = vmatpush3.msra.mxu1 %v12163_v63 }
 0xff3   :  { %8271 = vmatprep.subr.mxu1 %v16109_v0 }
 0xff4   :  { %8272 = vmatpush3.msra.mxu1 %v12167_v3 }
 0xff5   :  { %8273 = vmatprep.subr.mxu1 %v16109_v0 }
 0xff6   :  { %8274 = vmatpush3.msra.mxu1 %v12171_v31 }
 0xff7   :  { %8313 = vmatprep.subr.mxu1 %v16109_v0 }
0x1075   :  { %v2799_v10 = vpop.f32.mrf.mxu1 }
0x1076   :  { %v2800_v21 = vadd.f32 %v12988_v53, %v2799_v10 }
0x1077   :  { %v8167_v20 = vpop.f32.mrf.mxu1 }
0x1081   :  { %v2870_v23 = vpop.f32.mrf.mxu0 }
0x1082   :  { %v2945_v55 = vmul.f32 %v2870_v23, %v2800_v21  ;;  %v16414_v23 = vld [vmem:[#allocation47_spill] sm:$0xff] }
0x1083   :  { %v2872_v61 = vpop.f32.mrf.mxu0 }
0x1084   :  { %8236 = vmatmul.mubr.f32.vlgmr.msra.gmra.mxu0 %v2945_v55  ;;  %v16415_v55 = vld [vmem:[#allocation48_spill] sm:$0xff] }
0x1085   :  { %8239 = vmatpush3.msk.msra.mxu0 %vm786_vm1, %v12994_v56  ;;  %8240 = vmatprep.mubr.msk.f32.mxu0 %vm10383_vm0, %v16109_v0 }
0x1086   :  { %8278 = vmatprep.subr.mxu0 %v16109_v0 }
0x1095   :  { %v2941_v58 = vpop.f32.mrf.mxu1 }
0x1097   :  { %v8202_v59 = vpop.f32.mrf.mxu1 }
0x1098   :  { %v16417_v59 = vld [vmem:[#allocation50_spill] sm:$0xff] }
0x1144   :  { %v3012_v63 = vpop.f32.mrf.mxu0 }
0x1145   :  { %v3016_v3 = vmul.f32 0.5, %v3012_v63  ;;  %v16419_v63 = vld [vmem:[#allocation52_spill] sm:$0xff] }
0x1146   :  { %v8237_v31 = vpop.f32.mrf.mxu0 }
0x1147   :  { %9394 = vtanh.f32 %v3016_v3  ;;  %v16420_v3 = vld [vmem:[#allocation53_spill] sm:$0xff]  ;;  %v16421_v31 = vld [vmem:[#allocation54_spill] sm:$0xff] }
0x1148   :  { %9396 = vtanh.f32 %v12756_v57 }
0x1154   :  { %v9395_v10 = vpop.eup %9394 }
0x1155   :  { %v3018_v20 = vadd.f32 1.0, %v9395_v10  ;;  %v16422_v10 = vld [vmem:[#allocation55_spill] sm:$0xff] }
0x1157   :  { %v3019_v21 = vmul.f32 0.5, %v3018_v20 }
0x1159   :  { %8241 = vmatmul.mubr.msk.f32.vlgmr.msra.gmra.mxu0 %vm782_vm2, %v3019_v21 }
0x115a   :  { %8279 = vmatpush3.msra.mxu0 %v12184_v40  ;;  %8310 = vmatprep.mubr.msk.f32.mxu0 %vm10383_vm0, %v16109_v0  ;;  %v16404_v40 = vld [vmem:[#allocation38_spill] sm:$0xff] }
0x115b   :  { %8280 = vmatprep.subr.mxu0 %v16109_v0 }
0x115c   :  { %8281 = vmatpush3.msra.mxu0 %v12190_v30  ;;  %v16405_v30 = vld [vmem:[#allocation37_spill] sm:$0xff] }
0x115d   :  { %8282 = vmatprep.subr.mxu0 %v16109_v0 }
0x115e   :  { %8283 = vmatpush3.msra.mxu0 %v12194_v19  ;;  %v16406_v19 = vld [vmem:[#allocation39_spill] sm:$0xff] }
0x115f   :  { %8284 = vmatprep.subr.mxu0 %v16109_v0 }
0x1160   :  { %8285 = vmatpush3.msra.mxu0 %v12198_v13  ;;  %v16407_v13 = vld [vmem:[#allocation40_spill] sm:$0xff] }
0x1161   :  { %8286 = vmatprep.subr.mxu0 %v16109_v0 }
0x1162   :  { %8287 = vmatpush3.msra.mxu0 %v12202_v1 }
0x1163   :  { %8288 = vmatprep.subr.mxu0 %v16109_v0 }
0x1164   :  { %8289 = vmatpush3.msra.mxu0 %v12206_v48  ;;  %v2942_v48 = vadd.f32 %v12255_v26, %v2941_v58  ;;  %v16413_v26 = vld [vmem:[#allocation46_spill] sm:$0xff]  ;;  %v16416_v58 = vld [vmem:[#allocation49_spill] sm:$0xff] }
0x1165   :  { %8290 = vmatprep.subr.mxu0 %v16109_v0 }
0x1166   :  { %8291 = vmatpush3.msra.mxu0 %v12210_v49 }
0x1167   :  { %8292 = vmatprep.subr.mxu0 %v16109_v0 }
0x1168   :  { %8293 = vmatpush3.msra.mxu0 %v12214_v50 }
0x1169   :  { %8294 = vmatprep.subr.mxu0 %v16109_v0 }
0x116a   :  { %8295 = vmatpush3.msra.mxu0 %v12218_v52 }
0x116b   :  { %8296 = vmatprep.subr.mxu0 %v16109_v0 }
0x116c   :  { %8297 = vmatpush3.msra.mxu0 %v12222_v36  ;;  %v16408_v36 = vld [vmem:[#allocation41_spill] sm:$0xff] }
0x116d   :  { %8298 = vmatprep.subr.mxu0 %v16109_v0 }
0x116e   :  { %8299 = vmatpush3.msra.mxu0 %v12226_v41  ;;  %v16409_v41 = vld [vmem:[#allocation42_spill] sm:$0xff] }
0x116f   :  { %8300 = vmatprep.subr.mxu0 %v16109_v0 }
0x1170   :  { %8301 = vmatpush3.msra.mxu0 %v12230_v32  ;;  %v16410_v32 = vld [vmem:[#allocation43_spill] sm:$0xff] }
0x1171   :  { %8302 = vmatprep.subr.mxu0 %v16109_v0 }
0x1172   :  { %8303 = vmatpush3.msra.mxu0 %v16404_v40 }
0x1173   :  { %8304 = vmatprep.subr.mxu0 %v16109_v0 }
0x1174   :  { %8305 = vmatpush3.msra.mxu0 %v16405_v30  ;;  %v16423_v30 = vld [vmem:[#allocation56_spill] sm:$0xff] }
0x1175   :  { %8306 = vmatprep.subr.mxu0 %v16109_v0 }
0x1176   :  { %8307 = vmatpush3.msra.mxu0 %v16406_v19 }
0x1177   :  { %8308 = vmatprep.subr.mxu0 %v16109_v0 }
0x1178   :  { %8309 = vmatpush3.msra.mxu0 %v12246_v5  ;;  %v16411_v5 = vld [vmem:[#allocation44_spill] sm:$0xff] }
0x1179   :  { %3311 = vmatprep.subr.mxu0 %v16407_v13  ;;  %v9397_v13 = vpop.eup %9396 }
0x1219   :  { %v3089_v1 = vpop.f32.mrf.mxu0 }
0x121a   :  { %v3093_v49 = vmul.f32 %v3089_v1, %v2872_v61  ;;  %v16418_v61 = vld [vmem:[#allocation51_spill] sm:$0xff]  ;;  %v16424_v1 = vld [vmem:[#allocation57_spill] sm:$0xff] }
0x121b   :  { %v8242_v50 = vpop.f32.mrf.mxu0 }
0x121c   :  { %v3094_v52 = vadd.f32 %v3093_v49, %v2942_v48  ;;  %v16425_v48 = vld [vmem:[#allocation58_spill] sm:$0xff]  ;;  %v16426_v49 = vld [vmem:[#allocation59_spill] sm:$0xff]  ;;  %v16427_v50 = vld [vmem:[#allocation60_spill] sm:$0xff] }
0x121e   :  { %8276 = vmatmul.mubr.f32.vlgmr.msra.gmra.mxu1 %v3094_v52  ;;  %v16428_v52 = vld [vmem:[#allocation61_spill] sm:$0xff] }
0x121f   :  { %8314 = vmatpush3.msra.mxu1 %v12259_v44  ;;  %8345 = vmatprep.mubr.msk.f32.mxu1 %vm10383_vm0, %v16109_v0  ;;  %v16412_v44 = vld [vmem:[#allocation45_spill] sm:$0xff] }
0x1220   :  { %8315 = vmatprep.subr.mxu1 %v16109_v0 }
0x1221   :  { %8316 = vmatpush3.msra.mxu1 %v16408_v36  ;;  %v16429_v36 = vld [vmem:[#allocation62_spill] sm:$0xff] }
0x1222   :  { %8317 = vmatprep.subr.mxu1 %v16109_v0 }
0x1223   :  { %8318 = vmatpush3.msra.mxu1 %v16409_v41  ;;  %v16430_v41 = vld [vmem:[#allocation63_spill] sm:$0xff] }
0x1224   :  { %8319 = vmatprep.subr.mxu1 %v16109_v0 }
0x1225   :  { %8320 = vmatpush3.msra.mxu1 %v16410_v32  ;;  %v16431_v32 = vld [vmem:[#allocation64_spill] sm:$0xff] }
0x1226   :  { %8321 = vmatprep.subr.mxu1 %v16109_v0 }
0x1227   :  { %8322 = vmatpush3.msra.mxu1 %v16411_v5  ;;  %v16432_v5 = vld [vmem:[#allocation65_spill] sm:$0xff] }
0x1228   :  { %8323 = vmatprep.subr.mxu1 %v16109_v0 }
0x1229   :  { %8324 = vmatpush3.msra.mxu1 %v16412_v44  ;;  %v16434_v44 = vld [vmem:[#allocation67_spill] sm:$0xff] }
0x122a   :  { %8325 = vmatprep.subr.mxu1 %v16109_v0 }
0x122b   :  { %8326 = vmatpush3.msra.mxu1 %v16413_v26  ;;  %v16435_v26 = vld [vmem:[#allocation68_spill] sm:$0xff] }
0x122c   :  { %8327 = vmatprep.subr.mxu1 %v16109_v0 }
0x122d   :  { %8328 = vmatpush3.msra.mxu1 %v16414_v23  ;;  %v16436_v23 = vld [vmem:[#allocation69_spill] sm:$0xff] }
0x122e   :  { %8329 = vmatprep.subr.mxu1 %v16109_v0 }
0x122f   :  { %8330 = vmatpush3.msra.mxu1 %v16415_v55  ;;  %v16437_v55 = vld [vmem:[#allocation70_spill] sm:$0xff] }
0x1230   :  { %8331 = vmatprep.subr.mxu1 %v16109_v0 }
0x1231   :  { %8332 = vmatpush3.msra.mxu1 %v16416_v58  ;;  %v16438_v58 = vld [vmem:[#allocation71_spill] sm:$0xff] }
0x1232   :  { %8333 = vmatprep.subr.mxu1 %v16109_v0 }
0x1233   :  { %8334 = vmatpush3.msra.mxu1 %v16417_v59  ;;  %v16439_v59 = vld [vmem:[#allocation72_spill] sm:$0xff] }
0x1234   :  { %8335 = vmatprep.subr.mxu1 %v16109_v0 }
0x1235   :  { %8336 = vmatpush3.msra.mxu1 %v16418_v61  ;;  %v16440_v61 = vld [vmem:[#allocation73_spill] sm:$0xff] }
0x1236   :  { %8337 = vmatprep.subr.mxu1 %v16109_v0 }
0x1237   :  { %8338 = vmatpush3.msra.mxu1 %v16419_v63  ;;  %v16441_v63 = vld [vmem:[#allocation74_spill] sm:$0xff] }
0x1238   :  { %8339 = vmatprep.subr.mxu1 %v16109_v0 }
0x1239   :  { %8340 = vmatpush3.msra.mxu1 %v16420_v3  ;;  %v16442_v3 = vld [vmem:[#allocation75_spill] sm:$0xff] }
0x123a   :  { %8341 = vmatprep.subr.mxu1 %v16109_v0 }
0x123b   :  { %8342 = vmatpush3.msra.mxu1 %v16421_v31  ;;  %v16443_v31 = vld [vmem:[#allocation76_spill] sm:$0xff] }
0x123c   :  { %8343 = vmatprep.subr.mxu1 %v16109_v0 }
0x123d   :  { %8344 = vmatpush3.msra.mxu1 %v16422_v10  ;;  %v16444_v10 = vld [vmem:[#allocation77_spill] sm:$0xff] }
0x123e   :  { %8348 = vmatprep.subr.mxu1 %v16109_v0 }
0x12de   :  { %v3161_v20 = vpop.f32.mrf.mxu1 }
0x12df   :  { %v3165_v21 = vadd.f32 %v3161_v20, %v12756_v57  ;;  %v16445_v20 = vld [vmem:[#allocation78_spill] sm:$0xff] }
0x12e0   :  { %v8277_v40 = vpop.f32.mrf.mxu1 }
0x12e1   :  { %v13074_v19 = vadd.f32 %v16423_v30, %v3165_v21  ;;  %v16446_v21 = vld [vmem:[#allocation79_spill] sm:$0xff]  ;;  %v16447_v40 = vld [vmem:[#allocation80_spill] sm:$0xff]  ;;  %v16448_v30 = vld [vmem:[#allocation81_spill] sm:$0xff] }
0x12e3   :  { %8311 = vmatmul.mubr.f32.vlgmr.msra.gmra.mxu0 %v13074_v19 }
0x12e4   :  { %3312 = vmatpush1.msra.mxu0 %v12336_v18  ;;  %3375 = vmatprep.mubr.f32.mxu0 %v9397_v13  ;;  %v16433_v18 = vld [vmem:[#allocation66_spill] sm:$0xff] }
0x12e5   :  { %3313 = vmatprep.subr.mxu0 %v16424_v1  ;;  %v16449_v13 = vld [vmem:[#allocation82_spill] sm:$0xff]  ;;  %v16450_v1 = vld [vmem:[#allocation83_spill] sm:$0xff] }
0x12e6   :  { %3314 = vmatpush1.msra.mxu0 %v16425_v48  ;;  %v16451_v48 = vld [vmem:[#allocation84_spill] sm:$0xff] }
0x12e7   :  { %3315 = vmatprep.subr.mxu0 %v16426_v49  ;;  %v16452_v49 = vld [vmem:[#allocation85_spill] sm:$0xff] }
0x12e8   :  { %3316 = vmatpush1.msra.mxu0 %v16427_v50  ;;  %v16453_v50 = vld [vmem:[#allocation86_spill] sm:$0xff] }
0x12e9   :  { %3317 = vmatprep.subr.mxu0 %v16428_v52  ;;  %v16454_v52 = vld [vmem:[#allocation87_spill] sm:$0xff] }
0x12ea   :  { %3318 = vmatpush1.msra.mxu0 %v16429_v36  ;;  %v16455_v36 = vld [vmem:[#allocation88_spill] sm:$0xff] }
0x12eb   :  { %3319 = vmatprep.subr.mxu0 %v16430_v41  ;;  %v16456_v41 = vld [vmem:[#allocation89_spill] sm:$0xff] }
0x12ec   :  { %3320 = vmatpush1.msra.mxu0 %v16431_v32  ;;  %v16457_v32 = vld [vmem:[#allocation90_spill] sm:$0xff] }
0x12ed   :  { %3321 = vmatprep.subr.mxu0 %v16432_v5  ;;  %v16458_v5 = vld [vmem:[#allocation91_spill] sm:$0xff] }
0x12ee   :  { %3322 = vmatpush1.msra.mxu0 %v16433_v18  ;;  %v16459_v18 = vld [vmem:[#allocation92_spill] sm:$0xff] }
0x12ef   :  { %3323 = vmatprep.subr.mxu0 %v16434_v44  ;;  %v16460_v44 = vld [vmem:[#allocation93_spill] sm:$0xff] }
0x12f0   :  { %3324 = vmatpush1.msra.mxu0 %v16435_v26  ;;  %v16461_v26 = vld [vmem:[#allocation94_spill] sm:$0xff] }
0x12f1   :  { %3325 = vmatprep.subr.mxu0 %v16436_v23  ;;  %v16462_v23 = vld [vmem:[#allocation95_spill] sm:$0xff] }
0x12f2   :  { %3326 = vmatpush1.msra.mxu0 %v16437_v55  ;;  %v16463_v55 = vld [vmem:[#allocation96_spill] sm:$0xff] }
0x12f3   :  { %3327 = vmatprep.subr.mxu0 %v16438_v58  ;;  %v16464_v58 = vld [vmem:[#allocation97_spill] sm:$0xff] }
0x12f4   :  { %3328 = vmatpush1.msra.mxu0 %v16439_v59  ;;  %v16465_v59 = vld [vmem:[#allocation98_spill] sm:$0xff] }
0x12f5   :  { %3329 = vmatprep.subr.mxu0 %v16440_v61  ;;  %v16466_v61 = vld [vmem:[#allocation99_spill] sm:$0xff] }
0x12f6   :  { %3330 = vmatpush1.msra.mxu0 %v16441_v63  ;;  %v16467_v63 = vld [vmem:[#allocation100_spill] sm:$0xff] }
0x12f7   :  { %3331 = vmatprep.subr.mxu0 %v16442_v3  ;;  %v16468_v3 = vld [vmem:[#allocation101_spill] sm:$0xff] }
0x12f8   :  { %3332 = vmatpush1.msra.mxu0 %v16443_v31  ;;  %v16469_v31 = vld [vmem:[#allocation102_spill] sm:$0xff] }
0x12f9   :  { %3333 = vmatprep.subr.mxu0 %v16444_v10  ;;  %v16470_v10 = vld [vmem:[#allocation103_spill] sm:$0xff] }
0x12fa   :  { %3334 = vmatpush1.msra.mxu0 %v16445_v20  ;;  %v16471_v20 = vld [vmem:[#allocation104_spill] sm:$0xff] }
0x12fb   :  { %3335 = vmatprep.subr.mxu0 %v16446_v21  ;;  %v16472_v21 = vld [vmem:[#allocation105_spill] sm:$0xff] }
0x12fc   :  { %3336 = vmatpush1.msra.mxu0 %v16447_v40  ;;  %v16473_v40 = vld [vmem:[#allocation106_spill] sm:$0xff] }
0x12fd   :  { %3337 = vmatprep.subr.mxu0 %v16448_v30  ;;  %v16474_v30 = vld [vmem:[#allocation107_spill] sm:$0xff] }
0x12fe   :  { %3338 = vmatpush1.msra.mxu0 %v16449_v13  ;;  %v16475_v13 = vld [vmem:[#allocation108_spill] sm:$0xff] }
0x12ff   :  { %3339 = vmatprep.subr.mxu0 %v16450_v1  ;;  %v16476_v1 = vld [vmem:[#allocation109_spill] sm:$0xff] }
0x1300   :  { %3340 = vmatpush1.msra.mxu0 %v16451_v48  ;;  %v16477_v48 = vld [vmem:[#allocation110_spill] sm:$0xff] }
0x1301   :  { %3341 = vmatprep.subr.mxu0 %v16452_v49  ;;  %v16478_v49 = vld [vmem:[#allocation111_spill] sm:$0xff] }
0x1302   :  { %3342 = vmatpush1.msra.mxu0 %v16453_v50  ;;  %v16479_v50 = vld [vmem:[#allocation112_spill] sm:$0xff] }
0x1303   :  { %3343 = vmatprep.subr.mxu0 %v16454_v52  ;;  %v13141_v52 = vld [vmem:[#allocation9 + $0xf8] sm:$0xff] }
0x1304   :  { %3344 = vmatpush2.msra.mxu0 %v16455_v36  ;;  %v13144_v36 = vld [vmem:[#allocation9 + $0xf0] sm:$0xff] }
0x1305   :  { %3345 = vmatprep.subr.mxu0 %v16456_v41  ;;  %v13169_v41 = vld [vmem:[#allocation9 + $0xb0] sm:$0xff] }
0x1306   :  { %3346 = vmatpush2.msra.mxu0 %v16457_v32  ;;  %v13172_v32 = vld [vmem:[#allocation9 + $0xa8] sm:$0xff] }
0x1307   :  { %3347 = vmatprep.subr.mxu0 %v16458_v5  ;;  %v13175_v5 = vld [vmem:[#allocation9 + $0xa0] sm:$0xff] }
0x1308   :  { %3348 = vmatpush2.msra.mxu0 %v16459_v18  ;;  %v13178_v18 = vld [vmem:[#allocation9 + $0x98] sm:$0xff] }
0x1309   :  { %3349 = vmatprep.subr.mxu0 %v16460_v44  ;;  %v13181_v44 = vld [vmem:[#allocation9 + $0x90] sm:$0xff] }
0x130a   :  { %3350 = vmatpush2.msra.mxu0 %v16461_v26  ;;  %v13184_v26 = vld [vmem:[#allocation9 + $0x88] sm:$0xff] }
0x130b   :  { %3351 = vmatprep.subr.mxu0 %v16462_v23  ;;  %v13187_v23 = vld [vmem:[#allocation9 + $0x80] sm:$0xff] }
0x130c   :  { %3352 = vmatpush2.msra.mxu0 %v16463_v55  ;;  %v13190_v55 = vld [vmem:[#allocation9 + $0x78] sm:$0xff] }
0x130d   :  { %3353 = vmatprep.subr.mxu0 %v16464_v58  ;;  %v13193_v58 = vld [vmem:[#allocation9 + $0x70] sm:$0xff] }
0x130e   :  { %3354 = vmatpush2.msra.mxu0 %v16465_v59  ;;  %v13196_v59 = vld [vmem:[#allocation9 + $0x68] sm:$0xff] }
0x130f   :  { %3355 = vmatprep.subr.mxu0 %v16466_v61  ;;  %v13199_v61 = vld [vmem:[#allocation9 + $0x60] sm:$0xff] }
0x1310   :  { %3356 = vmatpush2.msra.mxu0 %v16467_v63  ;;  %v13202_v63 = vld [vmem:[#allocation9 + $0x58] sm:$0xff] }
0x1311   :  { %3357 = vmatprep.subr.mxu0 %v16468_v3  ;;  %v13205_v3 = vld [vmem:[#allocation9 + $0x50] sm:$0xff] }
0x1312   :  { %3358 = vmatpush2.msra.mxu0 %v16469_v31  ;;  %v13208_v31 = vld [vmem:[#allocation9 + $0x48] sm:$0xff] }
0x1313   :  { %3359 = vmatprep.subr.mxu0 %v16470_v10  ;;  %16480 = vst [vmem:[#allocation38_spill] sm:$0xff] %v13208_v31  ;;  %v13211_v10 = vld [vmem:[#allocation9 + $0x40] sm:$0xff] }
0x1314   :  { %3360 = vmatpush2.msra.mxu0 %v16471_v20  ;;  %16481 = vst [vmem:[#allocation37_spill] sm:$0xff] %v13211_v10  ;;  %v13214_v20 = vld [vmem:[#allocation9 + $0x38] sm:$0xff] }
0x1315   :  { %3361 = vmatprep.subr.mxu0 %v16472_v21  ;;  %16482 = vst [vmem:[#allocation39_spill] sm:$0xff] %v13214_v20  ;;  %v13217_v21 = vld [vmem:[#allocation9 + $0x30] sm:$0xff] }
0x1316   :  { %3362 = vmatpush2.msra.mxu0 %v16473_v40  ;;  %16483 = vst [vmem:[#allocation40_spill] sm:$0xff] %v13217_v21  ;;  %v13220_v40 = vld [vmem:[#allocation9 + $0x28] sm:$0xff] }
0x1317   :  { %3363 = vmatprep.subr.mxu0 %v16474_v30  ;;  %16484 = vst [vmem:[#allocation41_spill] sm:$0xff] %v13220_v40  ;;  %v13223_v30 = vld [vmem:[#allocation9 + $0x20] sm:$0xff] }
0x1318   :  { %3364 = vmatpush2.msra.mxu0 %v16475_v13  ;;  %16485 = vst [vmem:[#allocation42_spill] sm:$0xff] %v13223_v30  ;;  %v13226_v13 = vld [vmem:[#allocation9 + $0x18] sm:$0xff] }
0x1319   :  { %3365 = vmatprep.subr.mxu0 %v16476_v1  ;;  %16486 = vst [vmem:[#allocation43_spill] sm:$0xff] %v13226_v13  ;;  %v13229_v1 = vld [vmem:[#allocation9 + $0x10] sm:$0xff] }
0x131a   :  { %3366 = vmatpush2.msra.mxu0 %v16477_v48  ;;  %16487 = vst [vmem:[#allocation44_spill] sm:$0xff] %v13229_v1  ;;  %v13232_v48 = vld [vmem:[#allocation9 + $0x8] sm:$0xff] }
0x131b   :  { %3367 = vmatprep.subr.mxu0 %v16478_v49  ;;  %16488 = vst [vmem:[#allocation45_spill] sm:$0xff] %v13232_v48  ;;  %v13235_v49 = vld [vmem:[#allocation9] sm:$0xff] }
0x131c   :  { %3368 = vmatpush2.msra.mxu0 %v16479_v50  ;;  %16489 = vst [vmem:[#allocation46_spill] sm:$0xff] %v13235_v49 }
0x131d   :  { %3369 = vmatprep.subr.mxu0 %v12507_v37  ;;  %v13148_v37 = vld [vmem:[#allocation9 + $0xe8] sm:$0xff] }
0x131e   :  { %3370 = vmatpush2.msra.mxu0 %v12510_v62  ;;  %v13160_v62 = vld [vmem:[#allocation9 + $0xc8] sm:$0xff] }
0x131f   :  { %3371 = vmatprep.subr.mxu0 %v12513_v2  ;;  %v13151_v2 = vld [vmem:[#allocation9 + $0xe0] sm:$0xff] }
0x1320   :  { %3372 = vmatpush2.msra.mxu0 %v12516_v7  ;;  %v13163_v7 = vld [vmem:[#allocation9 + $0xc0] sm:$0xff] }
0x1321   :  { %3373 = vmatprep.subr.mxu0 %v12519_v8  ;;  %v13154_v8 = vld [vmem:[#allocation9 + $0xd8] sm:$0xff] }
0x1322   :  { %3374 = vmatpush2.msra.mxu0 %v12522_v14  ;;  %v13157_v14 = vld [vmem:[#allocation9 + $0xd0] sm:$0xff] }
0x1323   :  { %3376 = vmatmul.mubr.f32.vlgmr.msra.gmra.mxu0 %v12783_v39  ;;  %3539 = vmatprep.subr.mxu0 %v13141_v52  ;;  %v13166_v39 = vld [vmem:[#allocation9 + $0xb8] sm:$0xff] }
0x1324   :  { %3540 = vmatpush1.msra.mxu0 %v13144_v36  ;;  %3603 = vmatprep.mubr.f32.mxu0 %v16109_v0 }
0x1325   :  { %3541 = vmatprep.subr.mxu0 %v13148_v37 }
0x1326   :  { %3542 = vmatpush1.msra.mxu0 %v13151_v2 }
0x1327   :  { %3543 = vmatprep.subr.mxu0 %v13154_v8 }
0x1328   :  { %3544 = vmatpush1.msra.mxu0 %v13157_v14 }
0x1329   :  { %3545 = vmatprep.subr.mxu0 %v13160_v62 }
0x132a   :  { %3546 = vmatpush1.msra.mxu0 %v13163_v7 }
0x132b   :  { %3547 = vmatprep.subr.mxu0 %v13166_v39 }
0x132c   :  { %3548 = vmatpush1.msra.mxu0 %v13169_v41 }
0x132d   :  { %3549 = vmatprep.subr.mxu0 %v13172_v32 }
0x132e   :  { %3550 = vmatpush1.msra.mxu0 %v13175_v5 }
0x132f   :  { %3551 = vmatprep.subr.mxu0 %v13178_v18 }
0x1330   :  { %3552 = vmatpush1.msra.mxu0 %v13181_v44 }
0x1331   :  { %3553 = vmatprep.subr.mxu0 %v13184_v26 }
0x1332   :  { %3554 = vmatpush1.msra.mxu0 %v13187_v23 }
0x1333   :  { %3555 = vmatprep.subr.mxu0 %v13190_v55 }
0x1334   :  { %3556 = vmatpush1.msra.mxu0 %v13193_v58 }
0x1335   :  { %3557 = vmatprep.subr.mxu0 %v13196_v59 }
0x1336   :  { %3558 = vmatpush1.msra.mxu0 %v13199_v61 }
0x1337   :  { %3559 = vmatprep.subr.mxu0 %v13202_v63 }
0x1338   :  { %3560 = vmatpush1.msra.mxu0 %v13205_v3 }
0x1339   :  { %3561 = vmatprep.subr.mxu0 %v13208_v31 }
0x133a   :  { %3562 = vmatpush1.msra.mxu0 %v13211_v10 }
0x133b   :  { %3563 = vmatprep.subr.mxu0 %v13214_v20 }
0x133c   :  { %3564 = vmatpush1.msra.mxu0 %v13217_v21 }
0x133d   :  { %3565 = vmatprep.subr.mxu0 %v13220_v40 }
0x133e   :  { %3566 = vmatpush1.msra.mxu0 %v13223_v30 }
0x133f   :  { %3567 = vmatprep.subr.mxu0 %v13226_v13 }
0x1340   :  { %3568 = vmatpush1.msra.mxu0 %v13229_v1 }
0x1341   :  { %3569 = vmatprep.subr.mxu0 %v13232_v48 }
0x1342   :  { %3570 = vmatpush1.msra.mxu0 %v13235_v49 }
0x1343   :  { %8453 = vmatprep.subr.mxu0 %v16109_v0 }
0x13a3   :  { %v3233_v50 = vpop.f32.mrf.mxu0 }
0x13a4   :  { %v3234_v30 = vadd.f32 %v12563_v60, %v3233_v50  ;;  %v16490_v60 = vld [vmem:[#allocation113_spill] sm:$0xff]  ;;  %v16499_v50 = vld [vmem:[#allocation122_spill] sm:$0xff] }
0x13a5   :  { %v8312_v40 = vpop.f32.mrf.mxu0 }
0x13a6   :  { %v3237_v21 = vmax.f32 %v3234_v30, 0.0  ;;  %v16498_v40 = vld [vmem:[#allocation121_spill] sm:$0xff]  ;;  %v3397_v30 = vld [vmem:[#allocation3 + $0x20] sm:$0xff] }
0x13a8   :  { %8346 = vmatmul.mubr.f32.vlgmr.msra.gmra.mxu1 %v3237_v21  ;;  %v16497_v21 = vld [vmem:[#allocation120_spill] sm:$0xff] }
0x13a9   :  { %8349 = vmatpush3.msra.mxu1 %v12569_v38  ;;  %8380 = vmatprep.mubr.msk.f32.mxu1 %vm10383_vm0, %v16109_v0  ;;  %v16491_v38 = vld [vmem:[#allocation114_spill] sm:$0xff] }
0x13aa   :  { %8350 = vmatprep.subr.mxu1 %v16109_v0 }
0x13ab   :  { %8351 = vmatpush3.msra.mxu1 %v12578_v24  ;;  %v16492_v24 = vld [vmem:[#allocation115_spill] sm:$0xff] }
0x13ac   :  { %8352 = vmatprep.subr.mxu1 %v16109_v0 }
0x13ad   :  { %8353 = vmatpush3.msra.mxu1 %v12585_v51  ;;  %v16493_v51 = vld [vmem:[#allocation116_spill] sm:$0xff] }
0x13ae   :  { %8354 = vmatprep.subr.mxu1 %v16109_v0 }
0x13af   :  { %8355 = vmatpush3.msra.mxu1 %v12592_v9  ;;  %v16494_v9 = vld [vmem:[#allocation117_spill] sm:$0xff] }
0x13b0   :  { %8356 = vmatprep.subr.mxu1 %v16109_v0 }
0x13b1   :  { %8357 = vmatpush3.msra.mxu1 %v12599_v25  ;;  %v16495_v25 = vld [vmem:[#allocation118_spill] sm:$0xff] }
0x13b2   :  { %8358 = vmatprep.subr.mxu1 %v16109_v0 }
0x13b3   :  { %8359 = vmatpush3.msra.mxu1 %v12606_v54  ;;  %v16496_v54 = vld [vmem:[#allocation119_spill] sm:$0xff] }
0x13b4   :  { %8360 = vmatprep.subr.mxu1 %v16109_v0 }
0x13b5   :  { %8361 = vmatpush3.msra.mxu1 %v16490_v60  ;;  %v16500_v60 = vld [vmem:[#allocation123_spill] sm:$0xff] }
0x13b6   :  { %8362 = vmatprep.subr.mxu1 %v16109_v0 }
0x13b7   :  { %8363 = vmatpush3.msra.mxu1 %v16491_v38  ;;  %v16501_v38 = vld [vmem:[#allocation124_spill] sm:$0xff] }
0x13b8   :  { %8364 = vmatprep.subr.mxu1 %v16109_v0 }
0x13b9   :  { %8365 = vmatpush3.msra.mxu1 %v16492_v24  ;;  %v16502_v24 = vld [vmem:[#allocation125_spill] sm:$0xff] }
0x13ba   :  { %8366 = vmatprep.subr.mxu1 %v16109_v0 }
0x13bb   :  { %8367 = vmatpush3.msra.mxu1 %v16493_v51  ;;  %v16503_v51 = vld [vmem:[#allocation126_spill] sm:$0xff] }
0x13bc   :  { %8368 = vmatprep.subr.mxu1 %v16109_v0 }
0x13bd   :  { %8369 = vmatpush3.msra.mxu1 %v16494_v9  ;;  %v16504_v9 = vld [vmem:[#allocation127_spill] sm:$0xff] }
0x13be   :  { %8370 = vmatprep.subr.mxu1 %v16109_v0 }
0x13bf   :  { %8371 = vmatpush3.msra.mxu1 %v16495_v25  ;;  %v16505_v25 = vld [vmem:[#allocation130_spill] sm:$0xff] }
0x13c0   :  { %8372 = vmatprep.subr.mxu1 %v16109_v0 }
0x13c1   :  { %8373 = vmatpush3.msra.mxu1 %v16496_v54  ;;  %v16506_v54 = vld [vmem:[#allocation131_spill] sm:$0xff] }
0x13c2   :  { %8374 = vmatprep.subr.mxu1 %v16109_v0 }
0x13c3   :  { %8375 = vmatpush3.msra.mxu1 %v16497_v21  ;;  %v16507_v21 = vld [vmem:[#allocation132_spill] sm:$0xff] }
0x13c4   :  { %8376 = vmatprep.subr.mxu1 %v16109_v0 }
0x13c5   :  { %8377 = vmatpush3.msra.mxu1 %v16498_v40  ;;  %v16508_v40 = vld [vmem:[#allocation133_spill] sm:$0xff] }
0x13c6   :  { %8378 = vmatprep.subr.mxu1 %v16109_v0 }
0x13c7   :  { %8379 = vmatpush3.msra.mxu1 %v16499_v50  ;;  %v16510_v50 = vld [vmem:[#allocation135_spill] sm:$0xff] }
0x13c8   :  { %8381 = vmatmul.mubr.f32.vlgmr.msra.gmra.mxu1 %v3397_v30  ;;  %8383 = vmatprep.subr.mxu1 %v16109_v0  ;;  %v16509_v30 = vld [vmem:[#allocation134_spill] sm:$0xff] }
0x13c9   :  { %8384 = vmatpush3.msra.mxu1 %v16500_v60  ;;  %8415 = vmatprep.mubr.msk.f32.mxu1 %vm10383_vm0, %v16109_v0  ;;  %v16511_v60 = vld [vmem:[#allocation136_spill] sm:$0xff] }
0x13ca   :  { %8385 = vmatprep.subr.mxu1 %v16109_v0 }
0x13cb   :  { %8386 = vmatpush3.msra.mxu1 %v16501_v38  ;;  %v16512_v38 = vld [vmem:[#allocation137_spill] sm:$0xff] }
0x13cc   :  { %8387 = vmatprep.subr.mxu1 %v16109_v0 }
0x13cd   :  { %8388 = vmatpush3.msra.mxu1 %v16502_v24  ;;  %v16513_v24 = vld [vmem:[#allocation138_spill] sm:$0xff] }
0x13ce   :  { %8389 = vmatprep.subr.mxu1 %v16109_v0 }
0x13cf   :  { %8390 = vmatpush3.msra.mxu1 %v16503_v51  ;;  %v16514_v51 = vld [vmem:[#allocation139_spill] sm:$0xff] }
0x13d0   :  { %8391 = vmatprep.subr.mxu1 %v16109_v0 }
0x13d1   :  { %8392 = vmatpush3.msra.mxu1 %v16504_v9  ;;  %v16515_v9 = vld [vmem:[#allocation140_spill] sm:$0xff] }
0x13d2   :  { %8393 = vmatprep.subr.mxu1 %v16109_v0 }
0x13d3   :  { %8394 = vmatpush3.msra.mxu1 %v16505_v25 }
0x13d4   :  { %8395 = vmatprep.subr.mxu1 %v16109_v0 }
0x13d5   :  { %8396 = vmatpush3.msra.mxu1 %v16506_v54 }
0x13d6   :  { %8397 = vmatprep.subr.mxu1 %v16109_v0 }
0x13d7   :  { %8398 = vmatpush3.msra.mxu1 %v16507_v21  ;;  %v16516_v21 = vld [vmem:[#allocation128_spill] sm:$0xff] }
0x13d8   :  { %8399 = vmatprep.subr.mxu1 %v16109_v0 }
0x13d9   :  { %8400 = vmatpush3.msra.mxu1 %v16508_v40 }
0x13da   :  { %8401 = vmatprep.subr.mxu1 %v16109_v0 }
0x13db   :  { %8402 = vmatpush3.msra.mxu1 %v16509_v30  ;;  %v16517_v30 = vld [vmem:[#allocation129_spill] sm:$0xff] }
0x13dc   :  { %8403 = vmatprep.subr.mxu1 %v16109_v0 }
0x13dd   :  { %8404 = vmatpush3.msra.mxu1 %v16510_v50 }
0x13de   :  { %8405 = vmatprep.subr.mxu1 %v16109_v0 }
0x13df   :  { %8406 = vmatpush3.msra.mxu1 %v16511_v60 }
0x13e0   :  { %8407 = vmatprep.subr.mxu1 %v16109_v0 }
0x13e1   :  { %8408 = vmatpush3.msra.mxu1 %v16512_v38 }
0x13e2   :  { %8409 = vmatprep.subr.mxu1 %v16109_v0 }
0x13e3   :  { %8410 = vmatpush3.msra.mxu1 %v16513_v24  ;;  %v3377_v25 = vpop.f32.mrf.mxu0 }
0x13e4   :  { %8411 = vmatprep.subr.mxu1 %v16109_v0  ;;  %v3378_v50 = vadd.f32 %v3377_v25, %v16517_v30 }
0x13e5   :  { %8412 = vmatpush3.msra.mxu1 %v16514_v51  ;;  %v3379_v54 = vpop.f32.mrf.mxu0 }
0x13e6   :  { %8413 = vmatprep.subr.mxu1 %v16109_v0  ;;  %v3380_v40 = vadd.f32 %v3379_v54, %v16516_v21  ;;  %v3382_v38 = vmul.f32 0.5, %v3378_v50 }
0x13e7   :  { %8414 = vmatpush3.msra.mxu1 %v16515_v9 }
0x13e8   :  { %8418 = vmatprep.subr.mxu1 %v16109_v0  ;;  %v3388_v60 = vmul.f32 0.5, %v3380_v40 }
0x13ea   :  { %9398 = vtanh.f32 %v3388_v60  ;;  %v13427_v60 = vld [vmem:[#allocation14 + $0x40] sm:$0xff] }
0x13eb   :  { %9400 = vtanh.f32 %v3382_v38 }
0x13f7   :  { %v9399_v9 = vpop.eup %9398 }
0x13f8   :  { %v9401_v13 = vpop.eup %9400  ;;  %v3390_v20 = vadd.f32 1.0, %v9399_v9  ;;  %v13437_v9 = vld [vmem:[#allocation14 + $0x30] sm:$0xff] }
0x13f9   :  { %v3384_v10 = vadd.f32 1.0, %v9401_v13  ;;  %v16531_v13 = vld [vmem:[#allocation35_spill] sm:$0xff] }
0x13fa   :  { %v3391_v31 = vmul.f32 0.5, %v3390_v20  ;;  %v16530_v20 = vld [vmem:[#allocation34_spill] sm:$0xff] }
0x13fb   :  { %v3385_v54 = vmul.f32 0.5, %v3384_v10  ;;  %v16529_v10 = vld [vmem:[#allocation33_spill] sm:$0xff] }
0x13fc   :  { %v3392_v25 = vmul.f32 %v3391_v31, %v12756_v57  ;;  %v16528_v31 = vld [vmem:[#allocation32_spill] sm:$0xff] }
0x1468   :  { %v3304_v24 = vpop.f32.mrf.mxu1 }
0x1469   :  { %v3305_v49 = vadd.f32 %v12751_v34, %v3304_v24  ;;  %v13433_v24 = vld [vmem:[#allocation14 + $0x38] sm:$0xff] }
0x146a   :  { %v8347_v51 = vpop.f32.mrf.mxu1 }
0x146b   :  { %v3308_v48 = vmax.f32 %v3305_v49, 0.0  ;;  %v13419_v49 = vld [vmem:[#allocation14 + $0x50] sm:$0xff] }
0x146d   :  { %v3309_v1 = vadd.f32 %v3308_v48, %v13074_v19  ;;  %v16527_v19 = vld [vmem:[#allocation31_spill] sm:$0xff]  ;;  %v13397_v48 = vld [vmem:[#allocation14 + $0x78] sm:$0xff] }
0x146f   :  { %9402 = vtanh.f32 %v3309_v1  ;;  %v16532_v1 = vld [vmem:[#allocation36_spill] sm:$0xff] }
0x147c   :  { %v9403_v21 = vpop.eup %9402 }
0x147d   :  { %v3387_v40 = vmul.f32 %v9403_v21, %v3385_v54  ;;  %v13423_v21 = vld [vmem:[#allocation14 + $0x48] sm:$0xff] }
0x147e   :  { %v13441_v54 = vld [vmem:[#allocation14 + $0x28] sm:$0xff] }
0x147f   :  { %v13313_v50 = vadd.f32 %v3392_v25, %v3387_v40  ;;  %v13445_v25 = vld [vmem:[#allocation14 + $0x20] sm:$0xff]  ;;  %v13449_v40 = vld [vmem:[#allocation14 + $0x18] sm:$0xff] }
0x1481   :  { %8416 = vmatmul.mubr.f32.vlgmr.msra.gmra.mxu1 %v13313_v50  ;;  %3395 = vst [vmem:[#allocation18 + $0x18] sm:$0xff] %v13313_v50 }
0x1482   :  { %8419 = vmatpush3.msra.mxu1 %v12760_v15  ;;  %8450 = vmatprep.mubr.msk.f32.mxu1 %vm10383_vm0, %v16109_v0 }
0x1483   :  { %8420 = vmatprep.subr.mxu1 %v16109_v0 }
0x1484   :  { %8421 = vmatpush3.msra.mxu1 %v12766_v43 }
0x1485   :  { %8422 = vmatprep.subr.mxu1 %v16109_v0 }
0x1486   :  { %8423 = vmatpush3.msra.mxu1 %v12770_v46  ;;  %v16518_v46 = vld [vmem:[#allocation141_spill] sm:$0xff] }
0x1487   :  { %8424 = vmatprep.subr.mxu1 %v16109_v0 }
0x1488   :  { %v3464_v57 = vpop.f32.mrf.mxu1  ;;  %8425 = vmatpush3.msra.mxu1 %v12774_v35  ;;  %v16519_v35 = vld [vmem:[#allocation142_spill] sm:$0xff] }
0x1489   :  { %v13327_v34 = vadd.f32 %v12780_v12, %v3464_v57  ;;  %8426 = vmatprep.subr.mxu1 %v16109_v0  ;;  %v16520_v12 = vld [vmem:[#allocation143_spill] sm:$0xff] }
0x148a   :  { %v8382_v15 = vpop.f32.mrf.mxu1  ;;  %8427 = vmatpush3.msra.mxu1 %v12786_v27  ;;  %v16521_v27 = vld [vmem:[#allocation25_spill] sm:$0xff]  ;;  %v13453_v57 = vld [vmem:[#allocation14 + $0x10] sm:$0xff] }
0x148b   :  { %v3538_v43 = vsub.f32 %v13313_v50, %v13327_v34  ;;  %8428 = vmatprep.subr.mxu1 %v16109_v0  ;;  %v13457_v15 = vld [vmem:[#allocation14 + $0x8] sm:$0xff] }
0x148c   :  { %8429 = vmatpush3.msra.mxu1 %v12792_v6  ;;  %v16522_v6 = vld [vmem:[#allocation26_spill] sm:$0xff] }
0x148d   :  { %3604 = vmatmul.mubr.f32.vlgmr.msra.gmra.mxu0 %v3538_v43  ;;  %8430 = vmatprep.subr.mxu1 %v16109_v0  ;;  %v13461_v43 = vld [vmem:[#allocation14] sm:$0xff] }
0x148e   :  { %8431 = vmatpush3.msra.mxu1 %v12796_v17  ;;  %8454 = vmatpush3.msra.mxu0 %v12802_v29  ;;  %v16523_v17 = vld [vmem:[#allocation27_spill] sm:$0xff]  ;;  %v16524_v29 = vld [vmem:[#allocation28_spill] sm:$0xff] }
0x148f   :  { %8432 = vmatprep.subr.mxu1 %v16109_v0  ;;  %8455 = vmatprep.subr.mxu0 %v16109_v0 }
0x1490   :  { %8433 = vmatpush3.msra.mxu1 %v12807_v11  ;;  %8456 = vmatpush3.msra.mxu0 %v12813_v45  ;;  %v16525_v11 = vld [vmem:[#allocation29_spill] sm:$0xff]  ;;  %v16526_v45 = vld [vmem:[#allocation30_spill] sm:$0xff] }
0x1491   :  { %8434 = vmatprep.subr.mxu1 %v16109_v0  ;;  %8457 = vmatprep.subr.mxu0 %v16109_v0 }
0x1492   :  { %8435 = vmatpush3.msra.mxu1 %v16518_v46  ;;  %8458 = vmatpush3.msra.mxu0 %v16519_v35  ;;  %v13464_v46 = vld [vmem:[#allocation17 + $0xf8] sm:$0xff] }
0x1493   :  { %8436 = vmatprep.subr.mxu1 %v16109_v0  ;;  %8459 = vmatprep.subr.mxu0 %v16109_v0 }
0x1494   :  { %8437 = vmatpush3.msra.mxu1 %v16520_v12  ;;  %8460 = vmatpush3.msra.mxu0 %v16521_v27 }
0x1495   :  { %8438 = vmatprep.subr.mxu1 %v16109_v0  ;;  %8461 = vmatprep.subr.mxu0 %v16109_v0 }
0x1496   :  { %8439 = vmatpush3.msra.mxu1 %v16522_v6  ;;  %8462 = vmatpush3.msra.mxu0 %v16523_v17 }
0x1497   :  { %8440 = vmatprep.subr.mxu1 %v16109_v0  ;;  %8463 = vmatprep.subr.mxu0 %v16109_v0 }
0x1498   :  { %8441 = vmatpush3.msra.mxu1 %v16524_v29  ;;  %8464 = vmatpush3.msra.mxu0 %v16525_v11 }
0x1499   :  { %8442 = vmatprep.subr.mxu1 %v16109_v0  ;;  %8465 = vmatprep.subr.mxu0 %v16109_v0 }
0x149a   :  { %8443 = vmatpush3.msra.mxu1 %v16526_v45  ;;  %8466 = vmatpush3.msra.mxu0 %v16527_v19  ;;  %v13468_v45 = vld [vmem:[#allocation12 + $0x78] sm:$0xff]  ;;  %v13474_v19 = vld [vmem:[#allocation12 + $0x70] sm:$0xff] }
0x149b   :  { %8444 = vmatprep.subr.mxu1 %v16109_v0  ;;  %8467 = vmatprep.subr.mxu0 %v16109_v0 }
0x149c   :  { %8445 = vmatpush3.msra.mxu1 %v16528_v31  ;;  %8468 = vmatpush3.msra.mxu0 %v16529_v10  ;;  %v13478_v31 = vld [vmem:[#allocation12 + $0x68] sm:$0xff]  ;;  %v13482_v10 = vld [vmem:[#allocation12 + $0x60] sm:$0xff] }
0x149d   :  { %8446 = vmatprep.subr.mxu1 %v16109_v0  ;;  %8469 = vmatprep.subr.mxu0 %v16109_v0 }
0x149e   :  { %8447 = vmatpush3.msra.mxu1 %v12884_v47  ;;  %8470 = vmatpush3.msra.mxu0 %v16530_v20  ;;  %v13486_v20 = vld [vmem:[#allocation12 + $0x58] sm:$0xff] }
0x149f   :  { %8448 = vmatprep.subr.mxu1 %v16109_v0  ;;  %8471 = vmatprep.subr.mxu0 %v16109_v0 }
0x14a0   :  { %8449 = vmatpush3.msra.mxu1 %v12895_v33  ;;  %8472 = vmatpush3.msra.mxu0 %v16531_v13  ;;  %v13490_v13 = vld [vmem:[#allocation12 + $0x50] sm:$0xff] }
0x14a1   :  { %8451 = vmatmul.mubr.f32.vlgmr.msra.gmra.mxu1 %v13327_v34  ;;  %8473 = vmatprep.subr.mxu0 %v16109_v0 }
0x14a2   :  { %8474 = vmatpush3.msra.mxu0 %v16532_v1  ;;  %8485 = vmatprep.mubr.msk.f32.mxu0 %vm10383_vm0, %v16109_v0  ;;  %v13494_v1 = vld [vmem:[#allocation12 + $0x48] sm:$0xff] }
0x14a3   :  { %8475 = vmatprep.subr.mxu0 %v16109_v0  ;;  %8488 = vmatprep.subr.mxu1 %v16109_v0 }
0x14a4   :  { %8476 = vmatpush3.msra.mxu0 %v12919_v42  ;;  %8489 = vmatpush3.msk.msra.mxu1 %vm786_vm1, %v12994_v56 }
0x14a5   :  { %8477 = vmatprep.subr.mxu0 %v16109_v0  ;;  %8490 = vmatprep.mubr.msk.f32.mxu1 %vm10383_vm0, %v16109_v0 }
0x14a6   :  { %8478 = vmatpush3.msra.mxu0 %v12928_v28  ;;  %8493 = vmatprep.subr.mxu1 %v16109_v0 }
0x14a7   :  { %8479 = vmatprep.subr.mxu0 %v16109_v0 }
0x14a8   :  { %8480 = vmatpush3.msra.mxu0 %v12937_v22  ;;  %v13403_v22 = vld [vmem:[#allocation14 + $0x70] sm:$0xff] }
0x14a9   :  { %8481 = vmatprep.subr.mxu0 %v16109_v0 }
0x14aa   :  { %8482 = vmatpush3.msra.mxu0 %v12946_v16  ;;  %v13407_v16 = vld [vmem:[#allocation14 + $0x68] sm:$0xff] }
0x14ab   :  { %8483 = vmatprep.subr.mxu0 %v16109_v0 }
0x14ac   :  { %8484 = vmatpush3.msra.mxu0 %v12955_v4  ;;  %v13411_v4 = vld [vmem:[#allocation14 + $0x60] sm:$0xff] }
0x14ad   :  { %8528 = vmatprep.subr.mxu0 %v16109_v0 }
0x1541   :  { %v3534_v47 = vpop.f32.mrf.mxu1 }
0x1542   :  { %v3535_v28 = vadd.f32 %v12988_v53, %v3534_v47  ;;  %v13415_v53 = vld [vmem:[#allocation14 + $0x58] sm:$0xff]  ;;  %v13498_v47 = vld [vmem:[#allocation12 + $0x40] sm:$0xff] }
0x1543   :  { %v8417_v42 = vpop.f32.mrf.mxu1 }
0x1544   :  { %v13502_v42 = vld [vmem:[#allocation12 + $0x38] sm:$0xff] }
0x154d   :  { %v3605_v33 = vpop.f32.mrf.mxu0 }
0x154e   :  { %v3680_v56 = vmul.f32 %v3605_v33, %v3535_v28  ;;  %v13506_v28 = vld [vmem:[#allocation12 + $0x30] sm:$0xff]  ;;  %v13510_v33 = vld [vmem:[#allocation12 + $0x28] sm:$0xff] }
0x154f   :  { %v3607_v35 = vpop.f32.mrf.mxu0 }
0x1550   :  { %8486 = vmatmul.mubr.f32.vlgmr.msra.gmra.mxu0 %v3680_v56  ;;  %v13514_v56 = vld [vmem:[#allocation12 + $0x20] sm:$0xff] }
0x1551   :  { %8529 = vmatpush3.msra.mxu0 %v13397_v48  ;;  %8560 = vmatprep.mubr.msk.f32.mxu0 %vm10383_vm0, %v16109_v0  ;;  %16533 = vst [vmem:[#allocation47_spill] sm:$0xff] %v13514_v56 }
0x1552   :  { %8530 = vmatprep.subr.mxu0 %v16109_v0 }
0x1553   :  { %8531 = vmatpush3.msra.mxu0 %v13403_v22 }
0x1554   :  { %8532 = vmatprep.subr.mxu0 %v16109_v0 }
0x1555   :  { %8533 = vmatpush3.msra.mxu0 %v13407_v16 }
0x1556   :  { %8534 = vmatprep.subr.mxu0 %v16109_v0 }
0x1557   :  { %8535 = vmatpush3.msra.mxu0 %v13411_v4 }
0x1558   :  { %8536 = vmatprep.subr.mxu0 %v16109_v0 }
0x1559   :  { %8537 = vmatpush3.msra.mxu0 %v13415_v53 }
0x155a   :  { %8538 = vmatprep.subr.mxu0 %v16109_v0 }
0x155b   :  { %8539 = vmatpush3.msra.mxu0 %v13419_v49 }
0x155c   :  { %8540 = vmatprep.subr.mxu0 %v16109_v0 }
0x155d   :  { %8541 = vmatpush3.msra.mxu0 %v13423_v21 }
0x155e   :  { %8542 = vmatprep.subr.mxu0 %v16109_v0 }
0x155f   :  { %8543 = vmatpush3.msra.mxu0 %v13427_v60 }
0x1560   :  { %8544 = vmatprep.subr.mxu0 %v16109_v0 }
0x1561   :  { %v13431_v38 = vpop.f32.mrf.mxu1  ;;  %8545 = vmatpush3.msra.mxu0 %v13433_v24 }
0x1562   :  { %8546 = vmatprep.subr.mxu0 %v16109_v0 }
0x1563   :  { %v8452_v51 = vpop.f32.mrf.mxu1  ;;  %8547 = vmatpush3.msra.mxu0 %v13437_v9 }
0x1564   :  { %8548 = vmatprep.subr.mxu0 %v16109_v0  ;;  %v13518_v51 = vld [vmem:[#allocation12 + $0x18] sm:$0xff] }
0x1565   :  { %8549 = vmatpush3.msra.mxu0 %v13441_v54  ;;  %16534 = vst [vmem:[#allocation48_spill] sm:$0xff] %v13518_v51 }
0x1566   :  { %8550 = vmatprep.subr.mxu0 %v16109_v0 }
0x1567   :  { %8551 = vmatpush3.msra.mxu0 %v13445_v25 }
0x1568   :  { %8552 = vmatprep.subr.mxu0 %v16109_v0 }
0x1569   :  { %8553 = vmatpush3.msra.mxu0 %v13449_v40 }
0x156a   :  { %8554 = vmatprep.subr.mxu0 %v16109_v0 }
0x156b   :  { %8555 = vmatpush3.msra.mxu0 %v13453_v57 }
0x156c   :  { %8556 = vmatprep.subr.mxu0 %v16109_v0 }
0x156d   :  { %8557 = vmatpush3.msra.mxu0 %v13457_v15 }
0x156e   :  { %8558 = vmatprep.subr.mxu0 %v16109_v0 }
0x156f   :  { %8559 = vmatpush3.msra.mxu0 %v13461_v43 }
0x1570   :  { %4046 = vmatprep.subr.mxu0 %v13464_v46 }
0x1610   :  { %v3747_v12 = vpop.f32.mrf.mxu0 }
0x1611   :  { %v3751_v27 = vmul.f32 0.5, %v3747_v12  ;;  %v13522_v12 = vld [vmem:[#allocation12 + $0x10] sm:$0xff] }
0x1612   :  { %v8487_v6 = vpop.f32.mrf.mxu0  ;;  %16535 = vst [vmem:[#allocation49_spill] sm:$0xff] %v13522_v12 }
0x1613   :  { %9404 = vtanh.f32 %v3751_v27  ;;  %v13526_v27 = vld [vmem:[#allocation12 + $0x8] sm:$0xff]  ;;  %v13530_v6 = vld [vmem:[#allocation12] sm:$0xff] }
0x1614   :  { %16536 = vst [vmem:[#allocation50_spill] sm:$0xff] %v13526_v27  ;;  %16537 = vst [vmem:[#allocation51_spill] sm:$0xff] %v13530_v6  ;;  %9406 = vtanh.f32 %v13313_v50 }
0x1620   :  { %v9405_v17 = vpop.eup %9404 }
0x1621   :  { %v3753_v29 = vadd.f32 1.0, %v9405_v17 }
0x1623   :  { %v3754_v11 = vmul.f32 0.5, %v3753_v29  ;;  %v13537_v29 = vld [vmem:[%s15523_s8] ss:$0 sm:$0xff] }
0x1625   :  { %8491 = vmatmul.mubr.msk.f32.vlgmr.msra.gmra.mxu1 %vm782_vm2, %v3754_v11  ;;  %v3677_v11 = vadd.f32 %v13537_v29, %v13431_v38  ;;  %v13551_v38 = vld [vmem:[#allocation15 + $0x68] sm:$0xff] }
0x1626   :  { %8494 = vmatpush3.msra.mxu1 %v13468_v45  ;;  %8525 = vmatprep.mubr.msk.f32.mxu1 %vm10383_vm0, %v16109_v0  ;;  %16539 = vst [vmem:[#allocation53_spill] sm:$0xff] %v13551_v38 }
0x1627   :  { %8495 = vmatprep.subr.mxu1 %v16109_v0 }
0x1628   :  { %8496 = vmatpush3.msra.mxu1 %v13474_v19 }
0x1629   :  { %8497 = vmatprep.subr.mxu1 %v16109_v0 }
0x162a   :  { %8498 = vmatpush3.msra.mxu1 %v13478_v31 }
0x162b   :  { %8499 = vmatprep.subr.mxu1 %v16109_v0 }
0x162c   :  { %8500 = vmatpush3.msra.mxu1 %v13482_v10 }
0x162d   :  { %8501 = vmatprep.subr.mxu1 %v16109_v0 }
0x162e   :  { %8502 = vmatpush3.msra.mxu1 %v13486_v20 }
0x162f   :  { %8503 = vmatprep.subr.mxu1 %v16109_v0 }
0x1630   :  { %8504 = vmatpush3.msra.mxu1 %v13490_v13 }
0x1631   :  { %8505 = vmatprep.subr.mxu1 %v16109_v0 }
0x1632   :  { %8506 = vmatpush3.msra.mxu1 %v13494_v1 }
0x1633   :  { %8507 = vmatprep.subr.mxu1 %v16109_v0 }
0x1634   :  { %8508 = vmatpush3.msra.mxu1 %v13498_v47 }
0x1635   :  { %8509 = vmatprep.subr.mxu1 %v16109_v0 }
0x1636   :  { %8510 = vmatpush3.msra.mxu1 %v13502_v42 }
0x1637   :  { %8511 = vmatprep.subr.mxu1 %v16109_v0 }
0x1638   :  { %8512 = vmatpush3.msra.mxu1 %v13506_v28 }
0x1639   :  { %8513 = vmatprep.subr.mxu1 %v16109_v0 }
0x163a   :  { %8514 = vmatpush3.msra.mxu1 %v13510_v33 }
0x163b   :  { %8515 = vmatprep.subr.mxu1 %v16109_v0 }
0x163c   :  { %8516 = vmatpush3.msra.mxu1 %v13514_v56  ;;  %v13541_v56 = vld [vmem:[#allocation15 + $0x78] sm:$0xff] }
0x163d   :  { %8517 = vmatprep.subr.mxu1 %v16109_v0 }
0x163e   :  { %8518 = vmatpush3.msra.mxu1 %v13518_v51 }
0x163f   :  { %8519 = vmatprep.subr.mxu1 %v16109_v0 }
0x1640   :  { %8520 = vmatpush3.msra.mxu1 %v13522_v12 }
0x1641   :  { %8521 = vmatprep.subr.mxu1 %v16109_v0 }
0x1642   :  { %8522 = vmatpush3.msra.mxu1 %v13526_v27 }
0x1643   :  { %8523 = vmatprep.subr.mxu1 %v16109_v0 }
0x1644   :  { %8524 = vmatpush3.msra.mxu1 %v13530_v6  ;;  %v13547_v6 = vld [vmem:[#allocation15 + $0x70] sm:$0xff] }
0x1645   :  { %8563 = vmatprep.subr.mxu1 %v16109_v0  ;;  %16538 = vst [vmem:[#allocation52_spill] sm:$0xff] %v13547_v6 }
0x16e5   :  { %v3824_v17 = vpop.f32.mrf.mxu1 }
0x16e6   :  { %v3828_v12 = vmul.f32 %v3824_v17, %v3607_v35  ;;  %v13555_v35 = vld [vmem:[#allocation15 + $0x60] sm:$0xff] }
0x16e7   :  { %v8492_v51 = vpop.f32.mrf.mxu1  ;;  %16540 = vst [vmem:[#allocation54_spill] sm:$0xff] %v13555_v35  ;;  %v13571_v17 = vld [vmem:[#allocation15 + $0x40] sm:$0xff] }
0x16e8   :  { %v3829_v27 = vadd.f32 %v3828_v12, %v3677_v11  ;;  %v13559_v51 = vld [vmem:[#allocation15 + $0x58] sm:$0xff]  ;;  %v13563_v12 = vld [vmem:[#allocation15 + $0x50] sm:$0xff]  ;;  %16544 = vst [vmem:[#allocation58_spill] sm:$0xff] %v13571_v17 }
0x16e9   :  { %16541 = vst [vmem:[#allocation55_spill] sm:$0xff] %v13559_v51  ;;  %16542 = vst [vmem:[#allocation56_spill] sm:$0xff] %v13563_v12  ;;  %v13575_v11 = vld [vmem:[#allocation15 + $0x38] sm:$0xff] }
0x16ea   :  { %8526 = vmatmul.mubr.f32.vlgmr.msra.gmra.mxu1 %v3829_v27  ;;  %v13567_v27 = vld [vmem:[#allocation15 + $0x48] sm:$0xff]  ;;  %16545 = vst [vmem:[#allocation59_spill] sm:$0xff] %v13575_v11 }
0x16eb   :  { %8564 = vmatpush3.msra.mxu1 %v13541_v56  ;;  %8595 = vmatprep.mubr.msk.f32.mxu1 %vm10383_vm0, %v16109_v0  ;;  %16543 = vst [vmem:[#allocation57_spill] sm:$0xff] %v13567_v27 }
0x16ec   :  { %8565 = vmatprep.subr.mxu1 %v16109_v0 }
0x16ed   :  { %8566 = vmatpush3.msra.mxu1 %v13547_v6  ;;  %v13621_v6 = vld [vmem:[#allocation17 + $0xe8] sm:$0xff] }
0x16ee   :  { %8567 = vmatprep.subr.mxu1 %v16109_v0  ;;  %16554 = vst [vmem:[#allocation68_spill] sm:$0xff] %v13621_v6 }
0x16ef   :  { %8568 = vmatpush3.msra.mxu1 %v13551_v38  ;;  %v9407_v38 = vpop.eup %9406 }
0x16f0   :  { %8569 = vmatprep.subr.mxu1 %v16109_v0 }
0x16f1   :  { %8570 = vmatpush3.msra.mxu1 %v13555_v35  ;;  %v13612_v35 = vld [vmem:[%s15525_s10] ss:$0 sm:$0xff] }
0x16f2   :  { %8571 = vmatprep.subr.mxu1 %v16109_v0  ;;  %16553 = vst [vmem:[#allocation67_spill] sm:$0xff] %v13612_v35 }
0x16f3   :  { %8572 = vmatpush3.msra.mxu1 %v13559_v51 }
0x16f4   :  { %8573 = vmatprep.subr.mxu1 %v16109_v0 }
0x16f5   :  { %8574 = vmatpush3.msra.mxu1 %v13563_v12  ;;  %v13579_v12 = vld [vmem:[#allocation15 + $0x30] sm:$0xff] }
0x16f6   :  { %8575 = vmatprep.subr.mxu1 %v16109_v0  ;;  %16546 = vst [vmem:[#allocation60_spill] sm:$0xff] %v13579_v12 }
0x16f7   :  { %8576 = vmatpush3.msra.mxu1 %v13567_v27  ;;  %v13583_v27 = vld [vmem:[#allocation15 + $0x28] sm:$0xff] }
0x16f8   :  { %8577 = vmatprep.subr.mxu1 %v16109_v0  ;;  %16547 = vst [vmem:[#allocation61_spill] sm:$0xff] %v13583_v27 }
0x16f9   :  { %8578 = vmatpush3.msra.mxu1 %v13571_v17  ;;  %v13587_v17 = vld [vmem:[#allocation15 + $0x20] sm:$0xff] }
0x16fa   :  { %8579 = vmatprep.subr.mxu1 %v16109_v0  ;;  %16548 = vst [vmem:[#allocation62_spill] sm:$0xff] %v13587_v17 }
0x16fb   :  { %8580 = vmatpush3.msra.mxu1 %v13575_v11  ;;  %v13591_v11 = vld [vmem:[#allocation15 + $0x18] sm:$0xff] }
0x16fc   :  { %8581 = vmatprep.subr.mxu1 %v16109_v0  ;;  %16549 = vst [vmem:[#allocation63_spill] sm:$0xff] %v13591_v11 }
0x16fd   :  { %8582 = vmatpush3.msra.mxu1 %v13579_v12  ;;  %v13595_v12 = vld [vmem:[#allocation15 + $0x10] sm:$0xff] }
0x16fe   :  { %8583 = vmatprep.subr.mxu1 %v16109_v0  ;;  %16550 = vst [vmem:[#allocation64_spill] sm:$0xff] %v13595_v12 }
0x16ff   :  { %8584 = vmatpush3.msra.mxu1 %v13583_v27  ;;  %v13599_v27 = vld [vmem:[#allocation15 + $0x8] sm:$0xff] }
0x1700   :  { %8585 = vmatprep.subr.mxu1 %v16109_v0  ;;  %16551 = vst [vmem:[#allocation65_spill] sm:$0xff] %v13599_v27 }
0x1701   :  { %8586 = vmatpush3.msra.mxu1 %v13587_v17  ;;  %v13603_v17 = vld [vmem:[#allocation15] sm:$0xff] }
0x1702   :  { %8587 = vmatprep.subr.mxu1 %v16109_v0  ;;  %16552 = vst [vmem:[#allocation66_spill] sm:$0xff] %v13603_v17 }
0x1703   :  { %8588 = vmatpush3.msra.mxu1 %v13591_v11 }
0x1704   :  { %8589 = vmatprep.subr.mxu1 %v16109_v0 }
0x1705   :  { %8590 = vmatpush3.msra.mxu1 %v13595_v12 }
0x1706   :  { %8591 = vmatprep.subr.mxu1 %v16109_v0 }
0x1707   :  { %8592 = vmatpush3.msra.mxu1 %v13599_v27 }
0x1708   :  { %8593 = vmatprep.subr.mxu1 %v16109_v0 }
0x1709   :  { %8594 = vmatpush3.msra.mxu1 %v13603_v17  ;;  %v13618_v17 = vld [vmem:[#allocation17 + $0xf0] sm:$0xff] }
0x170a   :  { %8598 = vmatprep.subr.mxu1 %v16109_v0 }
0x17aa   :  { %v3896_v11 = vpop.f32.mrf.mxu1 }
0x17ab   :  { %v3900_v51 = vadd.f32 %v3896_v11, %v13313_v50  ;;  %v13627_v11 = vld [vmem:[#allocation17 + $0xd8] sm:$0xff] }
0x17ac   :  { %v8527_v12 = vpop.f32.mrf.mxu1  ;;  %16556 = vst [vmem:[#allocation70_spill] sm:$0xff] %v13627_v11 }
0x17ad   :  { %v13615_v27 = vadd.f32 %v13612_v35, %v3900_v51  ;;  %v13624_v12 = vld [vmem:[#allocation17 + $0xe0] sm:$0xff]  ;;  %v13630_v51 = vld [vmem:[#allocation17 + $0xd0] sm:$0xff]  ;;  %v13633_v35 = vld [vmem:[#allocation17 + $0xc8] sm:$0xff] }
0x17ae   :  { %16555 = vst [vmem:[#allocation69_spill] sm:$0xff] %v13624_v12  ;;  %16557 = vst [vmem:[#allocation71_spill] sm:$0xff] %v13630_v51 }
0x17af   :  { %8561 = vmatmul.mubr.f32.vlgmr.msra.gmra.mxu0 %v13615_v27  ;;  %16558 = vst [vmem:[#allocation72_spill] sm:$0xff] %v13633_v35 }
0x17b0   :  { %4047 = vmatpush1.msra.mxu0 %v13618_v17  ;;  %4110 = vmatprep.mubr.f32.mxu0 %v9407_v38  ;;  %v13636_v38 = vld [vmem:[#allocation17 + $0xc0] sm:$0xff] }
0x17b1   :  { %4048 = vmatprep.subr.mxu0 %v13621_v6  ;;  %16559 = vst [vmem:[#allocation73_spill] sm:$0xff] %v13636_v38  ;;  %v13639_v6 = vld [vmem:[#allocation17 + $0xb8] sm:$0xff] }
0x17b2   :  { %4049 = vmatpush1.msra.mxu0 %v13624_v12  ;;  %16560 = vst [vmem:[#allocation74_spill] sm:$0xff] %v13639_v6  ;;  %v13642_v12 = vld [vmem:[#allocation17 + $0xb0] sm:$0xff] }
0x17b3   :  { %4050 = vmatprep.subr.mxu0 %v13627_v11  ;;  %16561 = vst [vmem:[#allocation75_spill] sm:$0xff] %v13642_v12  ;;  %v13645_v11 = vld [vmem:[#allocation17 + $0xa8] sm:$0xff] }
0x17b4   :  { %4051 = vmatpush1.msra.mxu0 %v13630_v51  ;;  %16562 = vst [vmem:[#allocation76_spill] sm:$0xff] %v13645_v11  ;;  %v13648_v51 = vld [vmem:[#allocation17 + $0xa0] sm:$0xff] }
0x17b5   :  { %4052 = vmatprep.subr.mxu0 %v13633_v35  ;;  %16563 = vst [vmem:[#allocation77_spill] sm:$0xff] %v13648_v51  ;;  %v13651_v35 = vld [vmem:[#allocation17 + $0x98] sm:$0xff] }
0x17b6   :  { %4053 = vmatpush1.msra.mxu0 %v13636_v38  ;;  %16564 = vst [vmem:[#allocation78_spill] sm:$0xff] %v13651_v35  ;;  %v13654_v38 = vld [vmem:[#allocation17 + $0x90] sm:$0xff] }
0x17b7   :  { %4054 = vmatprep.subr.mxu0 %v13639_v6  ;;  %16565 = vst [vmem:[#allocation79_spill] sm:$0xff] %v13654_v38  ;;  %v13657_v6 = vld [vmem:[#allocation17 + $0x88] sm:$0xff] }
0x17b8   :  { %4055 = vmatpush1.msra.mxu0 %v13642_v12  ;;  %16566 = vst [vmem:[#allocation80_spill] sm:$0xff] %v13657_v6  ;;  %v13660_v12 = vld [vmem:[#allocation17 + $0x80] sm:$0xff] }
0x17b9   :  { %4056 = vmatprep.subr.mxu0 %v13645_v11  ;;  %16567 = vst [vmem:[#allocation81_spill] sm:$0xff] %v13660_v12  ;;  %v13663_v11 = vld [vmem:[#allocation17 + $0x78] sm:$0xff] }
0x17ba   :  { %4057 = vmatpush1.msra.mxu0 %v13648_v51  ;;  %16568 = vst [vmem:[#allocation82_spill] sm:$0xff] %v13663_v11  ;;  %v13666_v51 = vld [vmem:[#allocation17 + $0x70] sm:$0xff] }
0x17bb   :  { %4058 = vmatprep.subr.mxu0 %v13651_v35  ;;  %16569 = vst [vmem:[#allocation83_spill] sm:$0xff] %v13666_v51  ;;  %v13669_v35 = vld [vmem:[#allocation17 + $0x68] sm:$0xff] }
0x17bc   :  { %4059 = vmatpush1.msra.mxu0 %v13654_v38  ;;  %16570 = vst [vmem:[#allocation84_spill] sm:$0xff] %v13669_v35  ;;  %v13672_v38 = vld [vmem:[#allocation17 + $0x60] sm:$0xff] }
0x17bd   :  { %4060 = vmatprep.subr.mxu0 %v13657_v6  ;;  %16571 = vst [vmem:[#allocation85_spill] sm:$0xff] %v13672_v38  ;;  %v13675_v6 = vld [vmem:[#allocation17 + $0x58] sm:$0xff] }
0x17be   :  { %4061 = vmatpush1.msra.mxu0 %v13660_v12  ;;  %16572 = vst [vmem:[#allocation86_spill] sm:$0xff] %v13675_v6  ;;  %v13678_v12 = vld [vmem:[#allocation17 + $0x50] sm:$0xff] }
0x17bf   :  { %4062 = vmatprep.subr.mxu0 %v13663_v11  ;;  %16573 = vst [vmem:[#allocation87_spill] sm:$0xff] %v13678_v12  ;;  %v13681_v11 = vld [vmem:[#allocation17 + $0x48] sm:$0xff] }
0x17c0   :  { %4063 = vmatpush1.msra.mxu0 %v13666_v51  ;;  %16574 = vst [vmem:[#allocation88_spill] sm:$0xff] %v13681_v11  ;;  %v13684_v51 = vld [vmem:[#allocation17 + $0x40] sm:$0xff] }
0x17c1   :  { %4064 = vmatprep.subr.mxu0 %v13669_v35  ;;  %16575 = vst [vmem:[#allocation89_spill] sm:$0xff] %v13684_v51  ;;  %v13687_v35 = vld [vmem:[#allocation17 + $0x38] sm:$0xff] }
0x17c2   :  { %4065 = vmatpush1.msra.mxu0 %v13672_v38  ;;  %16576 = vst [vmem:[#allocation90_spill] sm:$0xff] %v13687_v35  ;;  %v13690_v38 = vld [vmem:[#allocation17 + $0x30] sm:$0xff] }
0x17c3   :  { %4066 = vmatprep.subr.mxu0 %v13675_v6  ;;  %16577 = vst [vmem:[#allocation91_spill] sm:$0xff] %v13690_v38  ;;  %v13693_v6 = vld [vmem:[#allocation17 + $0x28] sm:$0xff] }
0x17c4   :  { %4067 = vmatpush1.msra.mxu0 %v13678_v12  ;;  %16578 = vst [vmem:[#allocation92_spill] sm:$0xff] %v13693_v6  ;;  %v13696_v12 = vld [vmem:[#allocation17 + $0x20] sm:$0xff] }
0x17c5   :  { %4068 = vmatprep.subr.mxu0 %v13681_v11  ;;  %16579 = vst [vmem:[#allocation93_spill] sm:$0xff] %v13696_v12  ;;  %v13699_v11 = vld [vmem:[#allocation17 + $0x18] sm:$0xff] }
0x17c6   :  { %4069 = vmatpush1.msra.mxu0 %v13684_v51  ;;  %16580 = vst [vmem:[#allocation94_spill] sm:$0xff] %v13699_v11  ;;  %v13702_v51 = vld [vmem:[#allocation17 + $0x10] sm:$0xff] }
0x17c7   :  { %4070 = vmatprep.subr.mxu0 %v13687_v35  ;;  %16581 = vst [vmem:[#allocation95_spill] sm:$0xff] %v13702_v51  ;;  %v13705_v35 = vld [vmem:[#allocation17 + $0x8] sm:$0xff] }
0x17c8   :  { %4071 = vmatpush1.msra.mxu0 %v13690_v38  ;;  %16582 = vst [vmem:[#allocation96_spill] sm:$0xff] %v13705_v35  ;;  %v13708_v38 = vld [vmem:[#allocation17] sm:$0xff] }
0x17c9   :  { %4072 = vmatprep.subr.mxu0 %v13693_v6  ;;  %16583 = vst [vmem:[#allocation97_spill] sm:$0xff] %v13708_v38  ;;  %v13711_v6 = vld [vmem:[#allocation17 + $0x1f8] sm:$0xff] }
0x17ca   :  { %4073 = vmatpush1.msra.mxu0 %v13696_v12  ;;  %16584 = vst [vmem:[#allocation98_spill] sm:$0xff] %v13711_v6  ;;  %v13714_v12 = vld [vmem:[#allocation17 + $0x1f0] sm:$0xff] }
0x17cb   :  { %4074 = vmatprep.subr.mxu0 %v13699_v11  ;;  %16585 = vst [vmem:[#allocation99_spill] sm:$0xff] %v13714_v12  ;;  %v13717_v11 = vld [vmem:[#allocation17 + $0x1e8] sm:$0xff] }
0x17cc   :  { %4075 = vmatpush1.msra.mxu0 %v13702_v51  ;;  %16586 = vst [vmem:[#allocation100_spill] sm:$0xff] %v13717_v11  ;;  %v13720_v51 = vld [vmem:[#allocation17 + $0x1e0] sm:$0xff] }
0x17cd   :  { %4076 = vmatprep.subr.mxu0 %v13705_v35  ;;  %16587 = vst [vmem:[#allocation101_spill] sm:$0xff] %v13720_v51  ;;  %v13723_v35 = vld [vmem:[#allocation17 + $0x1d8] sm:$0xff] }
0x17ce   :  { %4077 = vmatpush1.msra.mxu0 %v13708_v38  ;;  %16588 = vst [vmem:[#allocation102_spill] sm:$0xff] %v13723_v35  ;;  %v13726_v38 = vld [vmem:[#allocation17 + $0x1d0] sm:$0xff] }
0x17cf   :  { %4078 = vmatprep.subr.mxu0 %v13711_v6  ;;  %16589 = vst [vmem:[#allocation103_spill] sm:$0xff] %v13726_v38  ;;  %v13729_v6 = vld [vmem:[#allocation17 + $0x1c8] sm:$0xff] }
0x17d0   :  { %4079 = vmatpush2.msra.mxu0 %v13714_v12  ;;  %16590 = vst [vmem:[#allocation104_spill] sm:$0xff] %v13729_v6  ;;  %v13732_v12 = vld [vmem:[#allocation17 + $0x1c0] sm:$0xff] }
0x17d1   :  { %4080 = vmatprep.subr.mxu0 %v13717_v11  ;;  %16591 = vst [vmem:[#allocation105_spill] sm:$0xff] %v13732_v12  ;;  %v13735_v11 = vld [vmem:[#allocation17 + $0x1b8] sm:$0xff] }
0x17d2   :  { %4081 = vmatpush2.msra.mxu0 %v13720_v51  ;;  %16592 = vst [vmem:[#allocation106_spill] sm:$0xff] %v13735_v11  ;;  %v13738_v51 = vld [vmem:[#allocation17 + $0x1b0] sm:$0xff] }
0x17d3   :  { %4082 = vmatprep.subr.mxu0 %v13723_v35  ;;  %16593 = vst [vmem:[#allocation107_spill] sm:$0xff] %v13738_v51  ;;  %v13741_v35 = vld [vmem:[#allocation17 + $0x1a8] sm:$0xff] }
0x17d4   :  { %4083 = vmatpush2.msra.mxu0 %v13726_v38  ;;  %16594 = vst [vmem:[#allocation108_spill] sm:$0xff] %v13741_v35  ;;  %v13744_v38 = vld [vmem:[#allocation17 + $0x1a0] sm:$0xff] }
0x17d5   :  { %4084 = vmatprep.subr.mxu0 %v13729_v6  ;;  %16595 = vst [vmem:[#allocation109_spill] sm:$0xff] %v13744_v38  ;;  %v13747_v6 = vld [vmem:[#allocation17 + $0x198] sm:$0xff] }
0x17d6   :  { %4085 = vmatpush2.msra.mxu0 %v13732_v12  ;;  %16596 = vst [vmem:[#allocation110_spill] sm:$0xff] %v13747_v6  ;;  %v13750_v12 = vld [vmem:[#allocation17 + $0x190] sm:$0xff] }
0x17d7   :  { %4086 = vmatprep.subr.mxu0 %v13735_v11  ;;  %16597 = vst [vmem:[#allocation111_spill] sm:$0xff] %v13750_v12  ;;  %v13753_v11 = vld [vmem:[#allocation17 + $0x188] sm:$0xff] }
0x17d8   :  { %4087 = vmatpush2.msra.mxu0 %v13738_v51  ;;  %16598 = vst [vmem:[#allocation112_spill] sm:$0xff] %v13753_v11  ;;  %v13756_v51 = vld [vmem:[#allocation17 + $0x180] sm:$0xff] }
0x17d9   :  { %4088 = vmatprep.subr.mxu0 %v13741_v35  ;;  %16599 = vst [vmem:[#allocation113_spill] sm:$0xff] %v13756_v51  ;;  %v13759_v35 = vld [vmem:[#allocation17 + $0x178] sm:$0xff] }
0x17da   :  { %4089 = vmatpush2.msra.mxu0 %v13744_v38  ;;  %16600 = vst [vmem:[#allocation114_spill] sm:$0xff] %v13759_v35  ;;  %v13762_v38 = vld [vmem:[#allocation17 + $0x170] sm:$0xff] }
0x17db   :  { %4090 = vmatprep.subr.mxu0 %v13747_v6  ;;  %16601 = vst [vmem:[#allocation115_spill] sm:$0xff] %v13762_v38  ;;  %v13765_v6 = vld [vmem:[#allocation17 + $0x168] sm:$0xff] }
0x17dc   :  { %4091 = vmatpush2.msra.mxu0 %v13750_v12  ;;  %16602 = vst [vmem:[#allocation116_spill] sm:$0xff] %v13765_v6  ;;  %v13768_v12 = vld [vmem:[#allocation17 + $0x160] sm:$0xff] }
0x17dd   :  { %4092 = vmatprep.subr.mxu0 %v13753_v11  ;;  %16603 = vst [vmem:[#allocation117_spill] sm:$0xff] %v13768_v12  ;;  %v13771_v11 = vld [vmem:[#allocation17 + $0x158] sm:$0xff] }
0x17de   :  { %4093 = vmatpush2.msra.mxu0 %v13756_v51  ;;  %16604 = vst [vmem:[#allocation118_spill] sm:$0xff] %v13771_v11  ;;  %v13774_v51 = vld [vmem:[#allocation17 + $0x150] sm:$0xff] }
0x17df   :  { %4094 = vmatprep.subr.mxu0 %v13759_v35  ;;  %16605 = vst [vmem:[#allocation119_spill] sm:$0xff] %v13774_v51  ;;  %v13777_v35 = vld [vmem:[#allocation17 + $0x148] sm:$0xff] }
0x17e0   :  { %4095 = vmatpush2.msra.mxu0 %v13762_v38  ;;  %16606 = vst [vmem:[#allocation120_spill] sm:$0xff] %v13777_v35  ;;  %v13780_v38 = vld [vmem:[#allocation17 + $0x140] sm:$0xff] }
0x17e1   :  { %4096 = vmatprep.subr.mxu0 %v13765_v6  ;;  %16607 = vst [vmem:[#allocation121_spill] sm:$0xff] %v13780_v38  ;;  %v13783_v6 = vld [vmem:[#allocation17 + $0x138] sm:$0xff] }
0x17e2   :  { %4097 = vmatpush2.msra.mxu0 %v13768_v12  ;;  %16608 = vst [vmem:[#allocation122_spill] sm:$0xff] %v13783_v6  ;;  %v13786_v12 = vld [vmem:[#allocation17 + $0x130] sm:$0xff] }
0x17e3   :  { %4098 = vmatprep.subr.mxu0 %v13771_v11  ;;  %16609 = vst [vmem:[#allocation123_spill] sm:$0xff] %v13786_v12  ;;  %v13789_v11 = vld [vmem:[#allocation17 + $0x128] sm:$0xff] }
0x17e4   :  { %4099 = vmatpush2.msra.mxu0 %v13774_v51  ;;  %v13792_v51 = vld [vmem:[#allocation17 + $0x120] sm:$0xff] }
0x17e5   :  { %4100 = vmatprep.subr.mxu0 %v13777_v35  ;;  %v13795_v35 = vld [vmem:[#allocation17 + $0x118] sm:$0xff] }
0x17e6   :  { %4101 = vmatpush2.msra.mxu0 %v13780_v38  ;;  %v13798_v38 = vld [vmem:[#allocation17 + $0x110] sm:$0xff] }
0x17e7   :  { %4102 = vmatprep.subr.mxu0 %v13783_v6  ;;  %v13801_v6 = vld [vmem:[#allocation17 + $0x108] sm:$0xff] }
0x17e8   :  { %4103 = vmatpush2.msra.mxu0 %v13786_v12  ;;  %v13804_v12 = vld [vmem:[#allocation17 + $0x100] sm:$0xff] }
0x17e9   :  { %4104 = vmatprep.subr.mxu0 %v13789_v11 }
0x17ea   :  { %4105 = vmatpush2.msra.mxu0 %v13792_v51 }
0x17eb   :  { %4106 = vmatprep.subr.mxu0 %v13795_v35 }
0x17ec   :  { %4107 = vmatpush2.msra.mxu0 %v13798_v38 }
0x17ed   :  { %4108 = vmatprep.subr.mxu0 %v13801_v6 }
0x17ee   :  { %4109 = vmatpush2.msra.mxu0 %v13804_v12 }
0x17ef   :  { %4111 = vmatmul.mubr.f32.vlgmr.msra.gmra.mxu0 %v13327_v34  ;;  %4274 = vmatprep.subr.mxu0 %v13141_v52  ;;  %v16610_v52 = vld [vmem:[#allocation38_spill] sm:$0xff]  ;;  %v13902_v34 = vld [vmem:[%s16022_s25 + $0x40] sm:$0xff] }
0x17f0   :  { %4275 = vmatpush1.msra.mxu0 %v13144_v36  ;;  %4338 = vmatprep.mubr.f32.mxu0 %v16109_v0  ;;  %v16611_v36 = vld [vmem:[#allocation37_spill] sm:$0xff]  ;;  %16620 = vst [vmem:[#allocation124_spill] sm:$0xff] %v13902_v34 }
0x17f1   :  { %4276 = vmatprep.subr.mxu0 %v13148_v37  ;;  %v16612_v37 = vld [vmem:[#allocation39_spill] sm:$0xff] }
0x17f2   :  { %4277 = vmatpush1.msra.mxu0 %v13151_v2  ;;  %v16613_v2 = vld [vmem:[#allocation40_spill] sm:$0xff] }
0x17f3   :  { %4278 = vmatprep.subr.mxu0 %v13154_v8  ;;  %v16614_v8 = vld [vmem:[#allocation41_spill] sm:$0xff] }
0x17f4   :  { %4279 = vmatpush1.msra.mxu0 %v13157_v14  ;;  %v16615_v14 = vld [vmem:[#allocation42_spill] sm:$0xff] }
0x17f5   :  { %4280 = vmatprep.subr.mxu0 %v13160_v62  ;;  %v16616_v62 = vld [vmem:[#allocation43_spill] sm:$0xff] }
0x17f6   :  { %4281 = vmatpush1.msra.mxu0 %v13163_v7  ;;  %v16617_v7 = vld [vmem:[#allocation44_spill] sm:$0xff] }
0x17f7   :  { %4282 = vmatprep.subr.mxu0 %v13166_v39  ;;  %v16618_v39 = vld [vmem:[#allocation45_spill] sm:$0xff] }
0x17f8   :  { %4283 = vmatpush1.msra.mxu0 %v13169_v41  ;;  %v16619_v41 = vld [vmem:[#allocation46_spill] sm:$0xff] }
0x17f9   :  { %4284 = vmatprep.subr.mxu0 %v13172_v32 }
0x17fa   :  { %4285 = vmatpush1.msra.mxu0 %v13175_v5  ;;  %v13845_v5 = vld [vmem:[%s15527_s12] ss:$0 sm:$0xff] }
0x17fb   :  { %4286 = vmatprep.subr.mxu0 %v13178_v18 }
0x17fc   :  { %4287 = vmatpush1.msra.mxu0 %v13181_v44 }
0x17fd   :  { %4288 = vmatprep.subr.mxu0 %v13184_v26 }
0x17fe   :  { %4289 = vmatpush1.msra.mxu0 %v13187_v23  ;;  %v13851_v23 = vld [vmem:[%s16022_s25 + $0x78] sm:$0xff] }
0x17ff   :  { %4290 = vmatprep.subr.mxu0 %v13190_v55  ;;  %v13860_v55 = vld [vmem:[%s16022_s25 + $0x70] sm:$0xff] }
0x1800   :  { %4291 = vmatpush1.msra.mxu0 %v13193_v58  ;;  %v13867_v58 = vld [vmem:[%s16022_s25 + $0x68] sm:$0xff] }
0x1801   :  { %4292 = vmatprep.subr.mxu0 %v13196_v59  ;;  %v13874_v59 = vld [vmem:[%s16022_s25 + $0x60] sm:$0xff] }
0x1802   :  { %4293 = vmatpush1.msra.mxu0 %v13199_v61  ;;  %v13881_v61 = vld [vmem:[%s16022_s25 + $0x58] sm:$0xff] }
0x1803   :  { %4294 = vmatprep.subr.mxu0 %v13202_v63  ;;  %v13888_v63 = vld [vmem:[%s16022_s25 + $0x50] sm:$0xff] }
0x1804   :  { %4295 = vmatpush1.msra.mxu0 %v13205_v3  ;;  %v13895_v3 = vld [vmem:[%s16022_s25 + $0x48] sm:$0xff] }
0x1805   :  { %4296 = vmatprep.subr.mxu0 %v16610_v52  ;;  %v13909_v52 = vld [vmem:[%s16022_s25 + $0x38] sm:$0xff] }
0x1806   :  { %4297 = vmatpush1.msra.mxu0 %v16611_v36  ;;  %16621 = vst [vmem:[#allocation125_spill] sm:$0xff] %v13909_v52  ;;  %v13916_v36 = vld [vmem:[%s16022_s25 + $0x30] sm:$0xff] }
0x1807   :  { %4298 = vmatprep.subr.mxu0 %v16612_v37  ;;  %16622 = vst [vmem:[#allocation126_spill] sm:$0xff] %v13916_v36  ;;  %v13923_v37 = vld [vmem:[%s16022_s25 + $0x28] sm:$0xff] }
0x1808   :  { %4299 = vmatpush1.msra.mxu0 %v16613_v2  ;;  %16623 = vst [vmem:[#allocation127_spill] sm:$0xff] %v13923_v37  ;;  %v13930_v2 = vld [vmem:[%s16022_s25 + $0x20] sm:$0xff] }
0x1809   :  { %4300 = vmatprep.subr.mxu0 %v16614_v8  ;;  %16624 = vst [vmem:[#allocation130_spill] sm:$0xff] %v13930_v2  ;;  %v13937_v8 = vld [vmem:[%s16022_s25 + $0x18] sm:$0xff] }
0x180a   :  { %4301 = vmatpush1.msra.mxu0 %v16615_v14  ;;  %16625 = vst [vmem:[#allocation131_spill] sm:$0xff] %v13937_v8  ;;  %v13944_v14 = vld [vmem:[%s16022_s25 + $0x10] sm:$0xff] }
0x180b   :  { %4302 = vmatprep.subr.mxu0 %v16616_v62  ;;  %16626 = vst [vmem:[#allocation132_spill] sm:$0xff] %v13944_v14  ;;  %v13951_v62 = vld [vmem:[%s16022_s25 + $0x8] sm:$0xff] }
0x180c   :  { %4303 = vmatpush1.msra.mxu0 %v16617_v7  ;;  %16627 = vst [vmem:[#allocation133_spill] sm:$0xff] %v13951_v62  ;;  %v4132_v7 = vld [vmem:[#allocation3 + $0x28] sm:$0xff] }
0x180d   :  { %4304 = vmatprep.subr.mxu0 %v16618_v39  ;;  %v13958_v39 = vld [vmem:[%s16022_s25] sm:$0xff] }
0x180e   :  { %4305 = vmatpush1.msra.mxu0 %v16619_v41  ;;  %16628 = vst [vmem:[#allocation134_spill] sm:$0xff] %v13958_v39  ;;  %v13962_v41 = vld [vmem:[#allocation8 + $0x78] sm:$0xff] }
0x180f   :  { %8703 = vmatprep.subr.mxu0 %v16109_v0  ;;  %16629 = vst [vmem:[#allocation135_spill] sm:$0xff] %v13962_v41 }
0x186f   :  { %v3968_v32 = vpop.f32.mrf.mxu0 }
0x1870   :  { %v3969_v18 = vadd.f32 %v13845_v5, %v3968_v32  ;;  %v13968_v32 = vld [vmem:[#allocation8 + $0x70] sm:$0xff] }
0x1871   :  { %v8562_v44 = vpop.f32.mrf.mxu0  ;;  %16630 = vst [vmem:[#allocation136_spill] sm:$0xff] %v13968_v32 }
0x1872   :  { %v3972_v26 = vmax.f32 %v3969_v18, 0.0  ;;  %v13972_v18 = vld [vmem:[#allocation8 + $0x68] sm:$0xff]  ;;  %v13976_v44 = vld [vmem:[#allocation8 + $0x60] sm:$0xff] }
0x1873   :  { %16631 = vst [vmem:[#allocation137_spill] sm:$0xff] %v13972_v18  ;;  %16632 = vst [vmem:[#allocation138_spill] sm:$0xff] %v13976_v44 }
0x1874   :  { %8596 = vmatmul.mubr.f32.vlgmr.msra.gmra.mxu1 %v3972_v26  ;;  %v13980_v26 = vld [vmem:[#allocation8 + $0x58] sm:$0xff] }
0x1875   :  { %8599 = vmatpush3.msra.mxu1 %v13851_v23  ;;  %8630 = vmatprep.mubr.msk.f32.mxu1 %vm10383_vm0, %v16109_v0  ;;  %16633 = vst [vmem:[#allocation139_spill] sm:$0xff] %v13980_v26 }
0x1876   :  { %8600 = vmatprep.subr.mxu1 %v16109_v0 }
0x1877   :  { %8601 = vmatpush3.msra.mxu1 %v13860_v55 }
0x1878   :  { %8602 = vmatprep.subr.mxu1 %v16109_v0 }
0x1879   :  { %8603 = vmatpush3.msra.mxu1 %v13867_v58 }
0x187a   :  { %8604 = vmatprep.subr.mxu1 %v16109_v0 }
0x187b   :  { %8605 = vmatpush3.msra.mxu1 %v13874_v59 }
0x187c   :  { %8606 = vmatprep.subr.mxu1 %v16109_v0 }
0x187d   :  { %8607 = vmatpush3.msra.mxu1 %v13881_v61 }
0x187e   :  { %8608 = vmatprep.subr.mxu1 %v16109_v0 }
0x187f   :  { %8609 = vmatpush3.msra.mxu1 %v13888_v63 }
0x1880   :  { %8610 = vmatprep.subr.mxu1 %v16109_v0 }
0x1881   :  { %8611 = vmatpush3.msra.mxu1 %v13895_v3 }
0x1882   :  { %8612 = vmatprep.subr.mxu1 %v16109_v0 }
0x1883   :  { %8613 = vmatpush3.msra.mxu1 %v13902_v34 }
0x1884   :  { %8614 = vmatprep.subr.mxu1 %v16109_v0 }
0x1885   :  { %8615 = vmatpush3.msra.mxu1 %v13909_v52 }
0x1886   :  { %8616 = vmatprep.subr.mxu1 %v16109_v0 }
0x1887   :  { %8617 = vmatpush3.msra.mxu1 %v13916_v36 }
0x1888   :  { %8618 = vmatprep.subr.mxu1 %v16109_v0 }
0x1889   :  { %8619 = vmatpush3.msra.mxu1 %v13923_v37 }
0x188a   :  { %8620 = vmatprep.subr.mxu1 %v16109_v0 }
0x188b   :  { %8621 = vmatpush3.msra.mxu1 %v13930_v2 }
0x188c   :  { %8622 = vmatprep.subr.mxu1 %v16109_v0 }
0x188d   :  { %8623 = vmatpush3.msra.mxu1 %v13937_v8 }
0x188e   :  { %8624 = vmatprep.subr.mxu1 %v16109_v0 }
0x188f   :  { %8625 = vmatpush3.msra.mxu1 %v13944_v14 }
0x1890   :  { %8626 = vmatprep.subr.mxu1 %v16109_v0 }
0x1891   :  { %8627 = vmatpush3.msra.mxu1 %v13951_v62 }
0x1892   :  { %8628 = vmatprep.subr.mxu1 %v16109_v0 }
0x1893   :  { %8629 = vmatpush3.msra.mxu1 %v13958_v39 }
0x1894   :  { %8631 = vmatmul.mubr.f32.vlgmr.msra.gmra.mxu1 %v4132_v7  ;;  %8633 = vmatprep.subr.mxu1 %v16109_v0  ;;  %v13984_v7 = vld [vmem:[#allocation8 + $0x50] sm:$0xff] }
0x1895   :  { %8634 = vmatpush3.msra.mxu1 %v13962_v41  ;;  %8665 = vmatprep.mubr.msk.f32.mxu1 %vm10383_vm0, %v16109_v0  ;;  %16634 = vst [vmem:[#allocation140_spill] sm:$0xff] %v13984_v7  ;;  %v16645_v41 = vld [vmem:[#allocation128_spill] sm:$0xff] }
0x1896   :  { %8635 = vmatprep.subr.mxu1 %v16109_v0 }
0x1897   :  { %8636 = vmatpush3.msra.mxu1 %v13968_v32 }
0x1898   :  { %8637 = vmatprep.subr.mxu1 %v16109_v0 }
0x1899   :  { %8638 = vmatpush3.msra.mxu1 %v13972_v18  ;;  %v13988_v18 = vld [vmem:[#allocation8 + $0x48] sm:$0xff] }
0x189a   :  { %8639 = vmatprep.subr.mxu1 %v16109_v0  ;;  %16635 = vst [vmem:[#allocation141_spill] sm:$0xff] %v13988_v18 }
0x189b   :  { %8640 = vmatpush3.msra.mxu1 %v13976_v44  ;;  %v13992_v44 = vld [vmem:[#allocation8 + $0x40] sm:$0xff] }
0x189c   :  { %8641 = vmatprep.subr.mxu1 %v16109_v0  ;;  %16636 = vst [vmem:[#allocation142_spill] sm:$0xff] %v13992_v44 }
0x189d   :  { %8642 = vmatpush3.msra.mxu1 %v13980_v26  ;;  %v13996_v26 = vld [vmem:[#allocation8 + $0x38] sm:$0xff] }
0x189e   :  { %8643 = vmatprep.subr.mxu1 %v16109_v0  ;;  %16637 = vst [vmem:[#allocation143_spill] sm:$0xff] %v13996_v26 }
0x189f   :  { %8644 = vmatpush3.msra.mxu1 %v13984_v7  ;;  %v14000_v7 = vld [vmem:[#allocation8 + $0x30] sm:$0xff] }
0x18a0   :  { %8645 = vmatprep.subr.mxu1 %v16109_v0  ;;  %16638 = vst [vmem:[#allocation25_spill] sm:$0xff] %v14000_v7 }
0x18a1   :  { %8646 = vmatpush3.msra.mxu1 %v13988_v18  ;;  %v14004_v18 = vld [vmem:[#allocation8 + $0x28] sm:$0xff] }
0x18a2   :  { %8647 = vmatprep.subr.mxu1 %v16109_v0  ;;  %16639 = vst [vmem:[#allocation26_spill] sm:$0xff] %v14004_v18 }
0x18a3   :  { %8648 = vmatpush3.msra.mxu1 %v13992_v44  ;;  %v14008_v44 = vld [vmem:[#allocation8 + $0x20] sm:$0xff] }
0x18a4   :  { %8649 = vmatprep.subr.mxu1 %v16109_v0  ;;  %16640 = vst [vmem:[#allocation27_spill] sm:$0xff] %v14008_v44 }
0x18a5   :  { %8650 = vmatpush3.msra.mxu1 %v13996_v26  ;;  %v14012_v26 = vld [vmem:[#allocation8 + $0x18] sm:$0xff] }
0x18a6   :  { %8651 = vmatprep.subr.mxu1 %v16109_v0  ;;  %16641 = vst [vmem:[#allocation28_spill] sm:$0xff] %v14012_v26 }
0x18a7   :  { %8652 = vmatpush3.msra.mxu1 %v14000_v7  ;;  %v14016_v7 = vld [vmem:[#allocation8 + $0x10] sm:$0xff] }
0x18a8   :  { %8653 = vmatprep.subr.mxu1 %v16109_v0  ;;  %16642 = vst [vmem:[#allocation29_spill] sm:$0xff] %v14016_v7 }
0x18a9   :  { %8654 = vmatpush3.msra.mxu1 %v14004_v18  ;;  %v14020_v18 = vld [vmem:[#allocation8 + $0x8] sm:$0xff] }
0x18aa   :  { %8655 = vmatprep.subr.mxu1 %v16109_v0  ;;  %16643 = vst [vmem:[#allocation30_spill] sm:$0xff] %v14020_v18 }
0x18ab   :  { %8656 = vmatpush3.msra.mxu1 %v14008_v44  ;;  %v14024_v44 = vld [vmem:[#allocation8] sm:$0xff] }
0x18ac   :  { %8657 = vmatprep.subr.mxu1 %v16109_v0  ;;  %16644 = vst [vmem:[#allocation31_spill] sm:$0xff] %v14024_v44 }
0x18ad   :  { %8658 = vmatpush3.msra.mxu1 %v14012_v26 }
0x18ae   :  { %8659 = vmatprep.subr.mxu1 %v16109_v0 }
0x18af   :  { %8660 = vmatpush3.msra.mxu1 %v14016_v7  ;;  %v4112_v26 = vpop.f32.mrf.mxu0 }
0x18b0   :  { %8661 = vmatprep.subr.mxu1 %v16109_v0  ;;  %v4113_v7 = vadd.f32 %v4112_v26, %v16517_v30 }
0x18b1   :  { %8662 = vmatpush3.msra.mxu1 %v14020_v18  ;;  %v4114_v32 = vpop.f32.mrf.mxu0  ;;  %v14033_v18 = vld [vmem:[%s15529_s14] ss:$0 sm:$0xff] }
0x18b2   :  { %8663 = vmatprep.subr.mxu1 %v16109_v0  ;;  %v4115_v39 = vadd.f32 %v4114_v32, %v16645_v41  ;;  %v4117_v14 = vmul.f32 0.5, %v4113_v7 }
0x18b3   :  { %8664 = vmatpush3.msra.mxu1 %v14024_v44 }
0x18b4   :  { %8668 = vmatprep.subr.mxu1 %v16109_v0  ;;  %v4123_v62 = vmul.f32 0.5, %v4115_v39 }
0x18b6   :  { %9408 = vtanh.f32 %v4123_v62 }
0x18b7   :  { %9410 = vtanh.f32 %v4117_v14 }
0x18c3   :  { %v9409_v32 = vpop.eup %9408 }
0x18c4   :  { %v9411_v41 = vpop.eup %9410  ;;  %v4125_v26 = vadd.f32 1.0, %v9409_v32  ;;  %v14074_v32 = vld [vmem:[#allocation11 + $0x50] sm:$0xff] }
0x18c5   :  { %v4119_v39 = vadd.f32 1.0, %v9411_v41  ;;  %v14068_v41 = vld [vmem:[#allocation11 + $0x58] sm:$0xff] }
0x18c6   :  { %v4126_v7 = vmul.f32 0.5, %v4125_v26  ;;  %v14078_v26 = vld [vmem:[#allocation11 + $0x48] sm:$0xff] }
0x18c7   :  { %v4120_v62 = vmul.f32 0.5, %v4119_v39  ;;  %v14084_v39 = vld [vmem:[%s15532_s17 + $0x78] sm:$0xff] }
0x18c8   :  { %v4127_v30 = vmul.f32 %v4126_v7, %v13313_v50  ;;  %16646 = vst [vmem:[#allocation32_spill] sm:$0xff] %v14084_v39  ;;  %v14089_v7 = vld [vmem:[#allocation11 + $0x40] sm:$0xff] }
0x18c9   :  { %16647 = vst [vmem:[#allocation33_spill] sm:$0xff] %v14089_v7 }
0x1934   :  { %v4039_v8 = vpop.f32.mrf.mxu1 }
0x1935   :  { %v4040_v44 = vadd.f32 %v14033_v18, %v4039_v8 }
0x1936   :  { %v8597_v2 = vpop.f32.mrf.mxu1 }
0x1937   :  { %v4043_v37 = vmax.f32 %v4040_v44, 0.0  ;;  %v14042_v2 = vld [vmem:[#allocation11 + $0x78] sm:$0xff] }
0x1939   :  { %v4044_v36 = vadd.f32 %v4043_v37, %v13615_v27  ;;  %v14048_v27 = vld [vmem:[#allocation11 + $0x70] sm:$0xff] }
0x193b   :  { %9412 = vtanh.f32 %v4044_v36  ;;  %v14062_v36 = vld [vmem:[%s16023_s2] ss:$0 sm:$0xff] }
0x1948   :  { %v9413_v14 = vpop.eup %9412 }
0x1949   :  { %v4122_v52 = vmul.f32 %v9413_v14, %v4120_v62  ;;  %v14095_v62 = vld [vmem:[%s15532_s17 + $0x70] sm:$0xff]  ;;  %v14100_v14 = vld [vmem:[#allocation11 + $0x38] sm:$0xff] }
0x194a   :  { %16648 = vst [vmem:[#allocation34_spill] sm:$0xff] %v14095_v62  ;;  %16649 = vst [vmem:[#allocation35_spill] sm:$0xff] %v14100_v14 }
0x194b   :  { %v14038_v34 = vadd.f32 %v4127_v30, %v4122_v52  ;;  %v14052_v30 = vld [vmem:[#allocation11 + $0x68] sm:$0xff]  ;;  %v14056_v52 = vld [vmem:[#allocation11 + $0x60] sm:$0xff] }
0x194d   :  { %8666 = vmatmul.mubr.f32.vlgmr.msra.gmra.mxu1 %v14038_v34  ;;  %4130 = vst [vmem:[#allocation18 + $0x20] sm:$0xff] %v14038_v34 }
0x194e   :  { %8669 = vmatpush3.msra.mxu1 %v14042_v2  ;;  %8700 = vmatprep.mubr.msk.f32.mxu1 %vm10383_vm0, %v16109_v0 }
0x194f   :  { %8670 = vmatprep.subr.mxu1 %v16109_v0 }
0x1950   :  { %8671 = vmatpush3.msra.mxu1 %v14048_v27 }
0x1951   :  { %8672 = vmatprep.subr.mxu1 %v16109_v0 }
0x1952   :  { %8673 = vmatpush3.msra.mxu1 %v14052_v30 }
0x1953   :  { %8674 = vmatprep.subr.mxu1 %v16109_v0 }
0x1954   :  { %v4199_v50 = vpop.f32.mrf.mxu1  ;;  %8675 = vmatpush3.msra.mxu1 %v14056_v52 }
0x1955   :  { %v14065_v37 = vadd.f32 %v14062_v36, %v4199_v50  ;;  %8676 = vmatprep.subr.mxu1 %v16109_v0  ;;  %v14106_v50 = vld [vmem:[%s15532_s17 + $0x68] sm:$0xff] }
0x1956   :  { %v8632_v8 = vpop.f32.mrf.mxu1  ;;  %8677 = vmatpush3.msra.mxu1 %v14068_v41  ;;  %16650 = vst [vmem:[#allocation36_spill] sm:$0xff] %v14106_v50 }
0x1957   :  { %v4273_v44 = vsub.f32 %v14038_v34, %v14065_v37  ;;  %8678 = vmatprep.subr.mxu1 %v16109_v0  ;;  %v14111_v8 = vld [vmem:[#allocation11 + $0x30] sm:$0xff] }
0x1958   :  { %8679 = vmatpush3.msra.mxu1 %v14074_v32  ;;  %16651 = vst [vmem:[#allocation38_spill] sm:$0xff] %v14111_v8 }
0x1959   :  { %4339 = vmatmul.mubr.f32.vlgmr.msra.gmra.mxu0 %v4273_v44  ;;  %8680 = vmatprep.subr.mxu1 %v16109_v0  ;;  %v14117_v44 = vld [vmem:[%s15532_s17 + $0x60] sm:$0xff] }
0x195a   :  { %8681 = vmatpush3.msra.mxu1 %v14078_v26  ;;  %8704 = vmatpush3.msra.mxu0 %v14084_v39  ;;  %16652 = vst [vmem:[#allocation37_spill] sm:$0xff] %v14117_v44 }
0x195b   :  { %8682 = vmatprep.subr.mxu1 %v16109_v0  ;;  %8705 = vmatprep.subr.mxu0 %v16109_v0 }
0x195c   :  { %8683 = vmatpush3.msra.mxu1 %v14089_v7  ;;  %8706 = vmatpush3.msra.mxu0 %v14095_v62  ;;  %v14246_v62 = vld [vmem:[%s15520_s5] ss:$0 sm:$0xff] }
0x195d   :  { %8684 = vmatprep.subr.mxu1 %v16109_v0  ;;  %8707 = vmatprep.subr.mxu0 %v16109_v0 }
0x195e   :  { %8685 = vmatpush3.msra.mxu1 %v14100_v14  ;;  %8708 = vmatpush3.msra.mxu0 %v14106_v50  ;;  %v14122_v50 = vld [vmem:[#allocation11 + $0x28] sm:$0xff]  ;;  %v14128_v14 = vld [vmem:[%s15532_s17 + $0x58] sm:$0xff] }
0x195f   :  { %8686 = vmatprep.subr.mxu1 %v16109_v0  ;;  %8709 = vmatprep.subr.mxu0 %v16109_v0  ;;  %16653 = vst [vmem:[#allocation39_spill] sm:$0xff] %v14122_v50  ;;  %16654 = vst [vmem:[#allocation40_spill] sm:$0xff] %v14128_v14 }
0x1960   :  { %8687 = vmatpush3.msra.mxu1 %v14111_v8  ;;  %8710 = vmatpush3.msra.mxu0 %v14117_v44  ;;  %v14133_v44 = vld [vmem:[#allocation11 + $0x20] sm:$0xff]  ;;  %v14139_v8 = vld [vmem:[%s15532_s17 + $0x50] sm:$0xff] }
0x1961   :  { %8688 = vmatprep.subr.mxu1 %v16109_v0  ;;  %8711 = vmatprep.subr.mxu0 %v16109_v0  ;;  %16655 = vst [vmem:[#allocation41_spill] sm:$0xff] %v14133_v44  ;;  %16656 = vst [vmem:[#allocation42_spill] sm:$0xff] %v14139_v8 }
0x1962   :  { %8689 = vmatpush3.msra.mxu1 %v14122_v50  ;;  %8712 = vmatpush3.msra.mxu0 %v14128_v14  ;;  %v14144_v14 = vld [vmem:[#allocation11 + $0x18] sm:$0xff]  ;;  %v14150_v50 = vld [vmem:[%s15532_s17 + $0x48] sm:$0xff] }
0x1963   :  { %8690 = vmatprep.subr.mxu1 %v16109_v0  ;;  %8713 = vmatprep.subr.mxu0 %v16109_v0  ;;  %16657 = vst [vmem:[#allocation43_spill] sm:$0xff] %v14144_v14  ;;  %16658 = vst [vmem:[#allocation44_spill] sm:$0xff] %v14150_v50 }
0x1964   :  { %8691 = vmatpush3.msra.mxu1 %v14133_v44  ;;  %8714 = vmatpush3.msra.mxu0 %v14139_v8  ;;  %v14155_v8 = vld [vmem:[#allocation11 + $0x10] sm:$0xff]  ;;  %v14161_v44 = vld [vmem:[%s15532_s17 + $0x40] sm:$0xff] }
0x1965   :  { %8692 = vmatprep.subr.mxu1 %v16109_v0  ;;  %8715 = vmatprep.subr.mxu0 %v16109_v0  ;;  %16659 = vst [vmem:[#allocation45_spill] sm:$0xff] %v14155_v8  ;;  %16660 = vst [vmem:[#allocation46_spill] sm:$0xff] %v14161_v44 }
0x1966   :  { %8693 = vmatpush3.msra.mxu1 %v14144_v14  ;;  %8716 = vmatpush3.msra.mxu0 %v14150_v50  ;;  %v14166_v50 = vld [vmem:[#allocation11 + $0x8] sm:$0xff]  ;;  %v14172_v14 = vld [vmem:[%s15532_s17 + $0x38] sm:$0xff] }
0x1967   :  { %8694 = vmatprep.subr.mxu1 %v16109_v0  ;;  %8717 = vmatprep.subr.mxu0 %v16109_v0  ;;  %16661 = vst [vmem:[#allocation144_spill] sm:$0xff] %v14166_v50  ;;  %16662 = vst [vmem:[#allocation145_spill] sm:$0xff] %v14172_v14 }
0x1968   :  { %8695 = vmatpush3.msra.mxu1 %v14155_v8  ;;  %8718 = vmatpush3.msra.mxu0 %v14161_v44  ;;  %v14177_v44 = vld [vmem:[#allocation11] sm:$0xff]  ;;  %v14183_v8 = vld [vmem:[%s15532_s17 + $0x30] sm:$0xff] }
0x1969   :  { %8696 = vmatprep.subr.mxu1 %v16109_v0  ;;  %8719 = vmatprep.subr.mxu0 %v16109_v0  ;;  %16663 = vst [vmem:[#allocation146_spill] sm:$0xff] %v14177_v44  ;;  %16664 = vst [vmem:[#allocation147_spill] sm:$0xff] %v14183_v8 }
0x196a   :  { %8697 = vmatpush3.msra.mxu1 %v14166_v50  ;;  %8720 = vmatpush3.msra.mxu0 %v14172_v14  ;;  %v14191_v14 = vld [vmem:[%s15532_s17 + $0x28] sm:$0xff] }
0x196b   :  { %8698 = vmatprep.subr.mxu1 %v16109_v0  ;;  %8721 = vmatprep.subr.mxu0 %v16109_v0  ;;  %16665 = vst [vmem:[#allocation148_spill] sm:$0xff] %v14191_v14 }
0x196c   :  { %8699 = vmatpush3.msra.mxu1 %v14177_v44  ;;  %8722 = vmatpush3.msra.mxu0 %v14183_v8  ;;  %v14201_v8 = vld [vmem:[%s15532_s17 + $0x20] sm:$0xff] }
0x196d   :  { %8701 = vmatmul.mubr.f32.vlgmr.msra.gmra.mxu1 %v14065_v37  ;;  %8723 = vmatprep.subr.mxu0 %v16109_v0  ;;  %16666 = vst [vmem:[#allocation149_spill] sm:$0xff] %v14201_v8  ;;  %v14207_v44 = vld [vmem:[%s15533_s18] sm:$0xf] }
0x196e   :  { %8724 = vmatpush3.msra.mxu0 %v14191_v14  ;;  %8735 = vmatprep.mubr.msk.f32.mxu0 %vm10383_vm0, %v16109_v0  ;;  %16667 = vst [vmem:[#allocation150_spill] sm:$0xff] %v14207_v44  ;;  %v14217_v14 = vld [vmem:[%s15532_s17 + $0x18] sm:$0xff] }
0x196f   :  { %8725 = vmatprep.subr.mxu0 %v16109_v0  ;;  %8738 = vmatprep.subr.mxu1 %v16109_v0  ;;  %16668 = vst [vmem:[#allocation151_spill] sm:$0xff] %v14217_v14 }
0x1970   :  { %8726 = vmatpush3.msra.mxu0 %v14201_v8  ;;  %8739 = vmatpush3.msk.msra.mxu1 %vm786_vm1, %v14207_v44  ;;  %v14225_v44 = vld [vmem:[%s15532_s17 + $0x10] sm:$0xff]  ;;  %v14232_v8 = vld [vmem:[%s15532_s17 + $0x8] sm:$0xff] }
0x1971   :  { %8727 = vmatprep.subr.mxu0 %v16109_v0  ;;  %8740 = vmatprep.mubr.msk.f32.mxu1 %vm10383_vm0, %v16109_v0  ;;  %16669 = vst [vmem:[#allocation152_spill] sm:$0xff] %v14225_v44  ;;  %16670 = vst [vmem:[#allocation153_spill] sm:$0xff] %v14232_v8 }
0x1972   :  { %8728 = vmatpush3.msra.mxu0 %v14217_v14  ;;  %8743 = vmatprep.subr.mxu1 %v16109_v0  ;;  %v14239_v14 = vld [vmem:[%s15532_s17] sm:$0xff] }
0x1973   :  { %8729 = vmatprep.subr.mxu0 %v16109_v0 }
0x1974   :  { %8730 = vmatpush3.msra.mxu0 %v14225_v44 }
0x1975   :  { %8731 = vmatprep.subr.mxu0 %v16109_v0 }
0x1976   :  { %8732 = vmatpush3.msra.mxu0 %v14232_v8 }
0x1977   :  { %8733 = vmatprep.subr.mxu0 %v16109_v0 }
0x1978   :  { %8734 = vmatpush3.msra.mxu0 %v14239_v14 }
0x1979   :  { %8778 = vmatprep.subr.mxu0 %v16109_v0 }
0x1a0d   :  { %v4269_v44 = vpop.f32.mrf.mxu1 }
0x1a0e   :  { %v4270_v8 = vadd.f32 %v14246_v62, %v4269_v44 }
0x1a0f   :  { %v8667_v50 = vpop.f32.mrf.mxu1 }
0x1a10   :  { %v16689_v50 = vld [vmem:[#allocation65_spill] sm:$0xff] }
0x1a19   :  { %v4340_v7 = vpop.f32.mrf.mxu0 }
0x1a1a   :  { %v4415_v39 = vmul.f32 %v4340_v7, %v4270_v8  ;;  %v16688_v7 = vld [vmem:[#allocation64_spill] sm:$0xff]  ;;  %v16690_v8 = vld [vmem:[#allocation66_spill] sm:$0xff] }
0x1a1c   :  { %8736 = vmatmul.mubr.f32.vlgmr.msra.gmra.mxu0 %v4415_v39  ;;  %v16687_v39 = vld [vmem:[#allocation63_spill] sm:$0xff] }
0x1a1d   :  { %8779 = vmatpush3.msra.mxu0 %v13397_v48  ;;  %8810 = vmatprep.mubr.msk.f32.mxu0 %vm10383_vm0, %v16109_v0 }
0x1a1e   :  { %8780 = vmatprep.subr.mxu0 %v16109_v0 }
0x1a1f   :  { %8781 = vmatpush3.msra.mxu0 %v13403_v22 }
0x1a20   :  { %8782 = vmatprep.subr.mxu0 %v16109_v0 }
0x1a21   :  { %8783 = vmatpush3.msra.mxu0 %v13407_v16  ;;  %v4342_v16 = vpop.f32.mrf.mxu0 }
0x1a22   :  { %8784 = vmatprep.subr.mxu0 %v16109_v0 }
0x1a23   :  { %8785 = vmatpush3.msra.mxu0 %v13411_v4 }
0x1a24   :  { %8786 = vmatprep.subr.mxu0 %v16109_v0 }
0x1a25   :  { %8787 = vmatpush3.msra.mxu0 %v13415_v53 }
0x1a26   :  { %8788 = vmatprep.subr.mxu0 %v16109_v0 }
0x1a27   :  { %8789 = vmatpush3.msra.mxu0 %v13419_v49 }
0x1a28   :  { %8790 = vmatprep.subr.mxu0 %v16109_v0 }
0x1a29   :  { %8791 = vmatpush3.msra.mxu0 %v13423_v21 }
0x1a2a   :  { %8792 = vmatprep.subr.mxu0 %v16109_v0 }
0x1a2b   :  { %8793 = vmatpush3.msra.mxu0 %v13427_v60 }
0x1a2c   :  { %8794 = vmatprep.subr.mxu0 %v16109_v0 }
0x1a2d   :  { %v4411_v48 = vpop.f32.mrf.mxu1  ;;  %8795 = vmatpush3.msra.mxu0 %v13433_v24 }
0x1a2e   :  { %8796 = vmatprep.subr.mxu0 %v16109_v0 }
0x1a2f   :  { %v8702_v22 = vpop.f32.mrf.mxu1  ;;  %8797 = vmatpush3.msra.mxu0 %v13437_v9  ;;  %v16671_v9 = vld [vmem:[#allocation47_spill] sm:$0xff] }
0x1a30   :  { %8798 = vmatprep.subr.mxu0 %v16109_v0 }
0x1a31   :  { %8799 = vmatpush3.msra.mxu0 %v13441_v54  ;;  %v16672_v54 = vld [vmem:[#allocation48_spill] sm:$0xff] }
0x1a32   :  { %8800 = vmatprep.subr.mxu0 %v16109_v0 }
0x1a33   :  { %8801 = vmatpush3.msra.mxu0 %v13445_v25  ;;  %v16673_v25 = vld [vmem:[#allocation49_spill] sm:$0xff] }
0x1a34   :  { %8802 = vmatprep.subr.mxu0 %v16109_v0 }
0x1a35   :  { %8803 = vmatpush3.msra.mxu0 %v13449_v40  ;;  %v16674_v40 = vld [vmem:[#allocation50_spill] sm:$0xff] }
0x1a36   :  { %8804 = vmatprep.subr.mxu0 %v16109_v0 }
0x1a37   :  { %8805 = vmatpush3.msra.mxu0 %v13453_v57  ;;  %v16675_v57 = vld [vmem:[#allocation51_spill] sm:$0xff] }
0x1a38   :  { %8806 = vmatprep.subr.mxu0 %v16109_v0 }
0x1a39   :  { %8807 = vmatpush3.msra.mxu0 %v13457_v15 }
0x1a3a   :  { %8808 = vmatprep.subr.mxu0 %v16109_v0 }
0x1a3b   :  { %8809 = vmatpush3.msra.mxu0 %v13461_v43  ;;  %v4412_v43 = vadd.f32 %v13537_v29, %v4411_v48  ;;  %v16686_v29 = vld [vmem:[#allocation62_spill] sm:$0xff] }
0x1a3c   :  { %4781 = vmatprep.subr.mxu0 %v13464_v46 }
0x1adc   :  { %v4482_v4 = vpop.f32.mrf.mxu0 }
0x1add   :  { %v4486_v53 = vmul.f32 0.5, %v4482_v4 }
0x1ade   :  { %v8737_v49 = vpop.f32.mrf.mxu0 }
0x1adf   :  { %9414 = vtanh.f32 %v4486_v53  ;;  %v16692_v49 = vld [vmem:[#allocation68_spill] sm:$0xff] }
0x1ae0   :  { %9416 = vtanh.f32 %v14038_v34 }
0x1aec   :  { %v9415_v21 = vpop.eup %9414 }
0x1aed   :  { %v4488_v60 = vadd.f32 1.0, %v9415_v21  ;;  %v9417_v53 = vpop.eup %9416  ;;  %v16693_v21 = vld [vmem:[#allocation69_spill] sm:$0xff] }
0x1aef   :  { %v4489_v24 = vmul.f32 0.5, %v4488_v60  ;;  %v16694_v60 = vld [vmem:[#allocation70_spill] sm:$0xff] }
0x1af1   :  { %8741 = vmatmul.mubr.msk.f32.vlgmr.msra.gmra.mxu1 %vm782_vm2, %v4489_v24  ;;  %v16695_v24 = vld [vmem:[#allocation71_spill] sm:$0xff] }
0x1af2   :  { %8744 = vmatpush3.msra.mxu1 %v13468_v45  ;;  %8775 = vmatprep.mubr.msk.f32.mxu1 %vm10383_vm0, %v16109_v0 }
0x1af3   :  { %8745 = vmatprep.subr.mxu1 %v16109_v0 }
0x1af4   :  { %8746 = vmatpush3.msra.mxu1 %v13474_v19 }
0x1af5   :  { %8747 = vmatprep.subr.mxu1 %v16109_v0 }
0x1af6   :  { %8748 = vmatpush3.msra.mxu1 %v13478_v31  ;;  %v16676_v31 = vld [vmem:[#allocation52_spill] sm:$0xff] }
0x1af7   :  { %8749 = vmatprep.subr.mxu1 %v16109_v0 }
0x1af8   :  { %8750 = vmatpush3.msra.mxu1 %v13482_v10  ;;  %v16677_v10 = vld [vmem:[#allocation53_spill] sm:$0xff] }
0x1af9   :  { %8751 = vmatprep.subr.mxu1 %v16109_v0 }
0x1afa   :  { %8752 = vmatpush3.msra.mxu1 %v13486_v20  ;;  %v16678_v20 = vld [vmem:[#allocation54_spill] sm:$0xff] }
0x1afb   :  { %8753 = vmatprep.subr.mxu1 %v16109_v0 }
0x1afc   :  { %8754 = vmatpush3.msra.mxu1 %v13490_v13  ;;  %v16679_v13 = vld [vmem:[#allocation55_spill] sm:$0xff] }
0x1afd   :  { %8755 = vmatprep.subr.mxu1 %v16109_v0 }
0x1afe   :  { %8756 = vmatpush3.msra.mxu1 %v13494_v1  ;;  %v16680_v1 = vld [vmem:[#allocation56_spill] sm:$0xff] }
0x1aff   :  { %8757 = vmatprep.subr.mxu1 %v16109_v0 }
0x1b00   :  { %8758 = vmatpush3.msra.mxu1 %v13498_v47  ;;  %v16681_v47 = vld [vmem:[#allocation57_spill] sm:$0xff] }
0x1b01   :  { %8759 = vmatprep.subr.mxu1 %v16109_v0 }
0x1b02   :  { %8760 = vmatpush3.msra.mxu1 %v13502_v42  ;;  %v16682_v42 = vld [vmem:[#allocation58_spill] sm:$0xff] }
0x1b03   :  { %8761 = vmatprep.subr.mxu1 %v16109_v0 }
0x1b04   :  { %8762 = vmatpush3.msra.mxu1 %v13506_v28  ;;  %v16683_v28 = vld [vmem:[#allocation59_spill] sm:$0xff] }
0x1b05   :  { %8763 = vmatprep.subr.mxu1 %v16109_v0 }
0x1b06   :  { %8764 = vmatpush3.msra.mxu1 %v13510_v33  ;;  %v16684_v33 = vld [vmem:[#allocation60_spill] sm:$0xff] }
0x1b07   :  { %8765 = vmatprep.subr.mxu1 %v16109_v0 }
0x1b08   :  { %8766 = vmatpush3.msra.mxu1 %v16671_v9  ;;  %v16696_v9 = vld [vmem:[#allocation72_spill] sm:$0xff] }
0x1b09   :  { %8767 = vmatprep.subr.mxu1 %v16109_v0 }
0x1b0a   :  { %8768 = vmatpush3.msra.mxu1 %v16672_v54  ;;  %v16697_v54 = vld [vmem:[#allocation73_spill] sm:$0xff] }
0x1b0b   :  { %8769 = vmatprep.subr.mxu1 %v16109_v0 }
0x1b0c   :  { %8770 = vmatpush3.msra.mxu1 %v16673_v25  ;;  %v16698_v25 = vld [vmem:[#allocation74_spill] sm:$0xff] }
0x1b0d   :  { %8771 = vmatprep.subr.mxu1 %v16109_v0 }
0x1b0e   :  { %8772 = vmatpush3.msra.mxu1 %v16674_v40  ;;  %v16699_v40 = vld [vmem:[#allocation75_spill] sm:$0xff] }
0x1b0f   :  { %8773 = vmatprep.subr.mxu1 %v16109_v0 }
0x1b10   :  { %8774 = vmatpush3.msra.mxu1 %v16675_v57  ;;  %v16700_v57 = vld [vmem:[#allocation76_spill] sm:$0xff] }
0x1b11   :  { %8813 = vmatprep.subr.mxu1 %v16109_v0 }
0x1bb1   :  { %v4559_v15 = vpop.f32.mrf.mxu1 }
0x1bb2   :  { %v4563_v46 = vmul.f32 %v4559_v15, %v4342_v16  ;;  %v16691_v16 = vld [vmem:[#allocation67_spill] sm:$0xff]  ;;  %v16702_v15 = vld [vmem:[#allocation78_spill] sm:$0xff] }
0x1bb3   :  { %v8742_v45 = vpop.f32.mrf.mxu1 }
0x1bb4   :  { %v4564_v19 = vadd.f32 %v4563_v46, %v4412_v43  ;;  %v16703_v43 = vld [vmem:[#allocation79_spill] sm:$0xff]  ;;  %v16704_v46 = vld [vmem:[#allocation80_spill] sm:$0xff]  ;;  %v16705_v45 = vld [vmem:[#allocation81_spill] sm:$0xff] }
0x1bb6   :  { %8776 = vmatmul.mubr.f32.vlgmr.msra.gmra.mxu1 %v4564_v19  ;;  %v16706_v19 = vld [vmem:[#allocation82_spill] sm:$0xff] }
0x1bb7   :  { %8814 = vmatpush3.msra.mxu1 %v13541_v56  ;;  %8845 = vmatprep.mubr.msk.f32.mxu1 %vm10383_vm0, %v16109_v0  ;;  %v16685_v56 = vld [vmem:[#allocation61_spill] sm:$0xff] }
0x1bb8   :  { %8815 = vmatprep.subr.mxu1 %v16109_v0 }
0x1bb9   :  { %8816 = vmatpush3.msra.mxu1 %v16676_v31  ;;  %v16707_v31 = vld [vmem:[#allocation83_spill] sm:$0xff] }
0x1bba   :  { %8817 = vmatprep.subr.mxu1 %v16109_v0 }
0x1bbb   :  { %8818 = vmatpush3.msra.mxu1 %v16677_v10  ;;  %v16708_v10 = vld [vmem:[#allocation84_spill] sm:$0xff] }
0x1bbc   :  { %8819 = vmatprep.subr.mxu1 %v16109_v0 }
0x1bbd   :  { %8820 = vmatpush3.msra.mxu1 %v16678_v20  ;;  %v16709_v20 = vld [vmem:[#allocation85_spill] sm:$0xff] }
0x1bbe   :  { %8821 = vmatprep.subr.mxu1 %v16109_v0 }
0x1bbf   :  { %8822 = vmatpush3.msra.mxu1 %v16679_v13  ;;  %v16710_v13 = vld [vmem:[#allocation86_spill] sm:$0xff] }
0x1bc0   :  { %8823 = vmatprep.subr.mxu1 %v16109_v0 }
0x1bc1   :  { %8824 = vmatpush3.msra.mxu1 %v16680_v1  ;;  %v16711_v1 = vld [vmem:[#allocation87_spill] sm:$0xff] }
0x1bc2   :  { %8825 = vmatprep.subr.mxu1 %v16109_v0 }
0x1bc3   :  { %8826 = vmatpush3.msra.mxu1 %v16681_v47  ;;  %v16712_v47 = vld [vmem:[#allocation88_spill] sm:$0xff] }
0x1bc4   :  { %8827 = vmatprep.subr.mxu1 %v16109_v0 }
0x1bc5   :  { %8828 = vmatpush3.msra.mxu1 %v16682_v42  ;;  %v16713_v42 = vld [vmem:[#allocation89_spill] sm:$0xff] }
0x1bc6   :  { %8829 = vmatprep.subr.mxu1 %v16109_v0 }
0x1bc7   :  { %8830 = vmatpush3.msra.mxu1 %v16683_v28  ;;  %v16714_v28 = vld [vmem:[#allocation90_spill] sm:$0xff] }
0x1bc8   :  { %8831 = vmatprep.subr.mxu1 %v16109_v0 }
0x1bc9   :  { %8832 = vmatpush3.msra.mxu1 %v16684_v33  ;;  %v16715_v33 = vld [vmem:[#allocation91_spill] sm:$0xff] }
0x1bca   :  { %8833 = vmatprep.subr.mxu1 %v16109_v0 }
0x1bcb   :  { %8834 = vmatpush3.msra.mxu1 %v16685_v56  ;;  %v16716_v56 = vld [vmem:[#allocation92_spill] sm:$0xff] }
0x1bcc   :  { %8835 = vmatprep.subr.mxu1 %v16109_v0 }
0x1bcd   :  { %8836 = vmatpush3.msra.mxu1 %v16686_v29  ;;  %v16717_v29 = vld [vmem:[#allocation93_spill] sm:$0xff] }
0x1bce   :  { %8837 = vmatprep.subr.mxu1 %v16109_v0 }
0x1bcf   :  { %8838 = vmatpush3.msra.mxu1 %v16687_v39  ;;  %v16718_v39 = vld [vmem:[#allocation94_spill] sm:$0xff] }
0x1bd0   :  { %8839 = vmatprep.subr.mxu1 %v16109_v0 }
0x1bd1   :  { %8840 = vmatpush3.msra.mxu1 %v16688_v7  ;;  %v16719_v7 = vld [vmem:[#allocation95_spill] sm:$0xff] }
0x1bd2   :  { %8841 = vmatprep.subr.mxu1 %v16109_v0 }
0x1bd3   :  { %8842 = vmatpush3.msra.mxu1 %v16689_v50  ;;  %v16720_v50 = vld [vmem:[#allocation96_spill] sm:$0xff] }
0x1bd4   :  { %8843 = vmatprep.subr.mxu1 %v16109_v0 }
0x1bd5   :  { %8844 = vmatpush3.msra.mxu1 %v16690_v8  ;;  %v16721_v8 = vld [vmem:[#allocation97_spill] sm:$0xff] }
0x1bd6   :  { %8848 = vmatprep.subr.mxu1 %v16109_v0 }
0x1c76   :  { %v4631_v44 = vpop.f32.mrf.mxu1 }
0x1c77   :  { %v4635_v48 = vadd.f32 %v4631_v44, %v14038_v34  ;;  %v16722_v44 = vld [vmem:[#allocation98_spill] sm:$0xff] }
0x1c78   :  { %v8777_v22 = vpop.f32.mrf.mxu1 }
0x1c79   :  { %v14356_v4 = vadd.f32 %v16691_v16, %v4635_v48  ;;  %v16723_v48 = vld [vmem:[#allocation99_spill] sm:$0xff]  ;;  %v16724_v22 = vld [vmem:[#allocation100_spill] sm:$0xff]  ;;  %v16725_v16 = vld [vmem:[#allocation101_spill] sm:$0xff] }
0x1c7b   :  { %8811 = vmatmul.mubr.f32.vlgmr.msra.gmra.mxu0 %v14356_v4 }
0x1c7c   :  { %4782 = vmatpush1.msra.mxu0 %v13618_v17  ;;  %4845 = vmatprep.mubr.f32.mxu0 %v9417_v53  ;;  %v16701_v17 = vld [vmem:[#allocation77_spill] sm:$0xff]  ;;  %v16726_v53 = vld [vmem:[#allocation102_spill] sm:$0xff] }
0x1c7d   :  { %4783 = vmatprep.subr.mxu0 %v16692_v49  ;;  %v16727_v49 = vld [vmem:[#allocation103_spill] sm:$0xff] }
0x1c7e   :  { %4784 = vmatpush1.msra.mxu0 %v16693_v21  ;;  %v16728_v21 = vld [vmem:[#allocation104_spill] sm:$0xff] }
0x1c7f   :  { %4785 = vmatprep.subr.mxu0 %v16694_v60  ;;  %v16729_v60 = vld [vmem:[#allocation105_spill] sm:$0xff] }
0x1c80   :  { %4786 = vmatpush1.msra.mxu0 %v16695_v24  ;;  %v16730_v24 = vld [vmem:[#allocation106_spill] sm:$0xff] }
0x1c81   :  { %4787 = vmatprep.subr.mxu0 %v16696_v9  ;;  %v16731_v9 = vld [vmem:[#allocation107_spill] sm:$0xff] }
0x1c82   :  { %4788 = vmatpush1.msra.mxu0 %v16697_v54  ;;  %v16732_v54 = vld [vmem:[#allocation108_spill] sm:$0xff] }
0x1c83   :  { %4789 = vmatprep.subr.mxu0 %v16698_v25  ;;  %v16733_v25 = vld [vmem:[#allocation109_spill] sm:$0xff] }
0x1c84   :  { %4790 = vmatpush1.msra.mxu0 %v16699_v40  ;;  %v16734_v40 = vld [vmem:[#allocation110_spill] sm:$0xff] }
0x1c85   :  { %4791 = vmatprep.subr.mxu0 %v16700_v57  ;;  %v16735_v57 = vld [vmem:[#allocation111_spill] sm:$0xff] }
0x1c86   :  { %4792 = vmatpush1.msra.mxu0 %v16701_v17  ;;  %v16736_v17 = vld [vmem:[#allocation112_spill] sm:$0xff] }
0x1c87   :  { %4793 = vmatprep.subr.mxu0 %v16702_v15  ;;  %v16737_v15 = vld [vmem:[#allocation113_spill] sm:$0xff] }
0x1c88   :  { %4794 = vmatpush1.msra.mxu0 %v16703_v43  ;;  %v16738_v43 = vld [vmem:[#allocation114_spill] sm:$0xff] }
0x1c89   :  { %4795 = vmatprep.subr.mxu0 %v16704_v46  ;;  %v16739_v46 = vld [vmem:[#allocation115_spill] sm:$0xff] }
0x1c8a   :  { %4796 = vmatpush1.msra.mxu0 %v16705_v45  ;;  %v16740_v45 = vld [vmem:[#allocation116_spill] sm:$0xff] }
0x1c8b   :  { %4797 = vmatprep.subr.mxu0 %v16706_v19  ;;  %v16741_v19 = vld [vmem:[#allocation117_spill] sm:$0xff] }
0x1c8c   :  { %4798 = vmatpush1.msra.mxu0 %v16707_v31  ;;  %v16742_v31 = vld [vmem:[#allocation118_spill] sm:$0xff] }
0x1c8d   :  { %4799 = vmatprep.subr.mxu0 %v16708_v10  ;;  %v16743_v10 = vld [vmem:[#allocation119_spill] sm:$0xff] }
0x1c8e   :  { %4800 = vmatpush1.msra.mxu0 %v16709_v20  ;;  %v16744_v20 = vld [vmem:[#allocation120_spill] sm:$0xff] }
0x1c8f   :  { %4801 = vmatprep.subr.mxu0 %v16710_v13  ;;  %v16745_v13 = vld [vmem:[#allocation121_spill] sm:$0xff] }
0x1c90   :  { %4802 = vmatpush1.msra.mxu0 %v16711_v1  ;;  %v16746_v1 = vld [vmem:[#allocation122_spill] sm:$0xff] }
0x1c91   :  { %4803 = vmatprep.subr.mxu0 %v16712_v47  ;;  %v16747_v47 = vld [vmem:[#allocation123_spill] sm:$0xff] }
0x1c92   :  { %4804 = vmatpush1.msra.mxu0 %v16713_v42  ;;  %v14423_v42 = vld [vmem:[#allocation9 + $0xf8] sm:$0xff] }
0x1c93   :  { %4805 = vmatprep.subr.mxu0 %v16714_v28  ;;  %v14426_v28 = vld [vmem:[#allocation9 + $0xf0] sm:$0xff] }
0x1c94   :  { %4806 = vmatpush1.msra.mxu0 %v16715_v33  ;;  %v14451_v33 = vld [vmem:[#allocation9 + $0xb0] sm:$0xff] }
0x1c95   :  { %4807 = vmatprep.subr.mxu0 %v16716_v56  ;;  %v14454_v56 = vld [vmem:[#allocation9 + $0xa8] sm:$0xff] }
0x1c96   :  { %4808 = vmatpush1.msra.mxu0 %v16717_v29  ;;  %v14457_v29 = vld [vmem:[#allocation9 + $0xa0] sm:$0xff] }
0x1c97   :  { %4809 = vmatprep.subr.mxu0 %v16718_v39  ;;  %v14460_v39 = vld [vmem:[#allocation9 + $0x98] sm:$0xff] }
0x1c98   :  { %4810 = vmatpush1.msra.mxu0 %v16719_v7  ;;  %v14463_v7 = vld [vmem:[#allocation9 + $0x90] sm:$0xff] }
0x1c99   :  { %4811 = vmatprep.subr.mxu0 %v16720_v50  ;;  %v14466_v50 = vld [vmem:[#allocation9 + $0x88] sm:$0xff] }
0x1c9a   :  { %4812 = vmatpush1.msra.mxu0 %v16721_v8  ;;  %v14469_v8 = vld [vmem:[#allocation9 + $0x80] sm:$0xff] }
0x1c9b   :  { %4813 = vmatprep.subr.mxu0 %v16722_v44  ;;  %v14472_v44 = vld [vmem:[#allocation9 + $0x78] sm:$0xff] }
0x1c9c   :  { %4814 = vmatpush2.msra.mxu0 %v16723_v48  ;;  %v14475_v48 = vld [vmem:[#allocation9 + $0x70] sm:$0xff] }
0x1c9d   :  { %4815 = vmatprep.subr.mxu0 %v16724_v22  ;;  %v14478_v22 = vld [vmem:[#allocation9 + $0x68] sm:$0xff] }
0x1c9e   :  { %4816 = vmatpush2.msra.mxu0 %v16725_v16  ;;  %v14481_v16 = vld [vmem:[#allocation9 + $0x60] sm:$0xff] }
0x1c9f   :  { %4817 = vmatprep.subr.mxu0 %v16726_v53  ;;  %v14484_v53 = vld [vmem:[#allocation9 + $0x58] sm:$0xff] }
0x1ca0   :  { %4818 = vmatpush2.msra.mxu0 %v16727_v49  ;;  %v14487_v49 = vld [vmem:[#allocation9 + $0x50] sm:$0xff] }
0x1ca1   :  { %4819 = vmatprep.subr.mxu0 %v16728_v21  ;;  %v14490_v21 = vld [vmem:[#allocation9 + $0x48] sm:$0xff] }
0x1ca2   :  { %4820 = vmatpush2.msra.mxu0 %v16729_v60  ;;  %v14493_v60 = vld [vmem:[#allocation9 + $0x40] sm:$0xff] }
0x1ca3   :  { %4821 = vmatprep.subr.mxu0 %v16730_v24  ;;  %v14496_v24 = vld [vmem:[#allocation9 + $0x38] sm:$0xff] }
0x1ca4   :  { %4822 = vmatpush2.msra.mxu0 %v16731_v9  ;;  %v14499_v9 = vld [vmem:[#allocation9 + $0x30] sm:$0xff] }
0x1ca5   :  { %4823 = vmatprep.subr.mxu0 %v16732_v54  ;;  %v14502_v54 = vld [vmem:[#allocation9 + $0x28] sm:$0xff] }
0x1ca6   :  { %4824 = vmatpush2.msra.mxu0 %v16733_v25  ;;  %v14505_v25 = vld [vmem:[#allocation9 + $0x20] sm:$0xff] }
0x1ca7   :  { %4825 = vmatprep.subr.mxu0 %v16734_v40  ;;  %v14508_v40 = vld [vmem:[#allocation9 + $0x18] sm:$0xff] }
0x1ca8   :  { %4826 = vmatpush2.msra.mxu0 %v16735_v57  ;;  %v14511_v57 = vld [vmem:[#allocation9 + $0x10] sm:$0xff] }
0x1ca9   :  { %4827 = vmatprep.subr.mxu0 %v16736_v17  ;;  %v14514_v17 = vld [vmem:[#allocation9 + $0x8] sm:$0xff] }
0x1caa   :  { %4828 = vmatpush2.msra.mxu0 %v16737_v15  ;;  %v14517_v15 = vld [vmem:[#allocation9] sm:$0xff] }
0x1cab   :  { %4829 = vmatprep.subr.mxu0 %v16738_v43 }
0x1cac   :  { %4830 = vmatpush2.msra.mxu0 %v16739_v46 }
0x1cad   :  { %4831 = vmatprep.subr.mxu0 %v16740_v45 }
0x1cae   :  { %4832 = vmatpush2.msra.mxu0 %v16741_v19 }
0x1caf   :  { %4833 = vmatprep.subr.mxu0 %v16742_v31  ;;  %v4867_v31 = vld [vmem:[#allocation3 + $0x30] sm:$0xff] }
0x1cb0   :  { %4834 = vmatpush2.msra.mxu0 %v16743_v10  ;;  %v16756_v10 = vld [vmem:[#allocation134_spill] sm:$0xff] }
0x1cb1   :  { %4835 = vmatprep.subr.mxu0 %v16744_v20  ;;  %v16757_v20 = vld [vmem:[#allocation135_spill] sm:$0xff] }
0x1cb2   :  { %4836 = vmatpush2.msra.mxu0 %v16745_v13  ;;  %v16758_v13 = vld [vmem:[#allocation136_spill] sm:$0xff] }
0x1cb3   :  { %4837 = vmatprep.subr.mxu0 %v16746_v1  ;;  %v16759_v1 = vld [vmem:[#allocation137_spill] sm:$0xff] }
0x1cb4   :  { %4838 = vmatpush2.msra.mxu0 %v16747_v47  ;;  %v16760_v47 = vld [vmem:[#allocation138_spill] sm:$0xff] }
0x1cb5   :  { %4839 = vmatprep.subr.mxu0 %v13789_v11  ;;  %v14430_v11 = vld [vmem:[#allocation9 + $0xe8] sm:$0xff] }
0x1cb6   :  { %4840 = vmatpush2.msra.mxu0 %v13792_v51  ;;  %v14442_v51 = vld [vmem:[#allocation9 + $0xc8] sm:$0xff] }
0x1cb7   :  { %4841 = vmatprep.subr.mxu0 %v13795_v35  ;;  %v14433_v35 = vld [vmem:[#allocation9 + $0xe0] sm:$0xff] }
0x1cb8   :  { %4842 = vmatpush2.msra.mxu0 %v13798_v38  ;;  %v14445_v38 = vld [vmem:[#allocation9 + $0xc0] sm:$0xff] }
0x1cb9   :  { %4843 = vmatprep.subr.mxu0 %v13801_v6  ;;  %v14436_v6 = vld [vmem:[#allocation9 + $0xd8] sm:$0xff] }
0x1cba   :  { %4844 = vmatpush2.msra.mxu0 %v13804_v12  ;;  %v14439_v12 = vld [vmem:[#allocation9 + $0xd0] sm:$0xff] }
0x1cbb   :  { %4846 = vmatmul.mubr.f32.vlgmr.msra.gmra.mxu0 %v14065_v37  ;;  %5009 = vmatprep.subr.mxu0 %v14423_v42  ;;  %v14448_v37 = vld [vmem:[#allocation9 + $0xb8] sm:$0xff] }
0x1cbc   :  { %5010 = vmatpush1.msra.mxu0 %v14426_v28  ;;  %5073 = vmatprep.mubr.f32.mxu0 %v16109_v0 }
0x1cbd   :  { %5011 = vmatprep.subr.mxu0 %v14430_v11 }
0x1cbe   :  { %5012 = vmatpush1.msra.mxu0 %v14433_v35 }
0x1cbf   :  { %5013 = vmatprep.subr.mxu0 %v14436_v6 }
0x1cc0   :  { %5014 = vmatpush1.msra.mxu0 %v14439_v12 }
0x1cc1   :  { %5015 = vmatprep.subr.mxu0 %v14442_v51 }
0x1cc2   :  { %5016 = vmatpush1.msra.mxu0 %v14445_v38 }
0x1cc3   :  { %5017 = vmatprep.subr.mxu0 %v14448_v37 }
0x1cc4   :  { %5018 = vmatpush1.msra.mxu0 %v14451_v33 }
0x1cc5   :  { %5019 = vmatprep.subr.mxu0 %v14454_v56 }
0x1cc6   :  { %5020 = vmatpush1.msra.mxu0 %v14457_v29 }
0x1cc7   :  { %5021 = vmatprep.subr.mxu0 %v14460_v39 }
0x1cc8   :  { %5022 = vmatpush1.msra.mxu0 %v14463_v7 }
0x1cc9   :  { %5023 = vmatprep.subr.mxu0 %v14466_v50 }
0x1cca   :  { %5024 = vmatpush1.msra.mxu0 %v14469_v8 }
0x1ccb   :  { %5025 = vmatprep.subr.mxu0 %v14472_v44 }
0x1ccc   :  { %5026 = vmatpush1.msra.mxu0 %v14475_v48 }
0x1ccd   :  { %5027 = vmatprep.subr.mxu0 %v14478_v22 }
0x1cce   :  { %5028 = vmatpush1.msra.mxu0 %v14481_v16 }
0x1ccf   :  { %5029 = vmatprep.subr.mxu0 %v14484_v53 }
0x1cd0   :  { %5030 = vmatpush1.msra.mxu0 %v14487_v49 }
0x1cd1   :  { %5031 = vmatprep.subr.mxu0 %v14490_v21 }
0x1cd2   :  { %5032 = vmatpush1.msra.mxu0 %v14493_v60 }
0x1cd3   :  { %5033 = vmatprep.subr.mxu0 %v14496_v24 }
0x1cd4   :  { %5034 = vmatpush1.msra.mxu0 %v14499_v9 }
0x1cd5   :  { %5035 = vmatprep.subr.mxu0 %v14502_v54 }
0x1cd6   :  { %5036 = vmatpush1.msra.mxu0 %v14505_v25 }
0x1cd7   :  { %5037 = vmatprep.subr.mxu0 %v14508_v40 }
0x1cd8   :  { %5038 = vmatpush1.msra.mxu0 %v14511_v57 }
0x1cd9   :  { %5039 = vmatprep.subr.mxu0 %v14514_v17 }
0x1cda   :  { %5040 = vmatpush1.msra.mxu0 %v14517_v15 }
0x1cdb   :  { %8953 = vmatprep.subr.mxu0 %v16109_v0 }
0x1d3b   :  { %v4703_v43 = vpop.f32.mrf.mxu0 }
0x1d3c   :  { %v4704_v46 = vadd.f32 %v13845_v5, %v4703_v43  ;;  %v16748_v5 = vld [vmem:[#allocation124_spill] sm:$0xff]  ;;  %v16761_v43 = vld [vmem:[#allocation139_spill] sm:$0xff] }
0x1d3d   :  { %v8812_v45 = vpop.f32.mrf.mxu0 }
0x1d3e   :  { %v4707_v19 = vmax.f32 %v4704_v46, 0.0  ;;  %v16762_v46 = vld [vmem:[#allocation140_spill] sm:$0xff]  ;;  %v16763_v45 = vld [vmem:[#allocation141_spill] sm:$0xff] }
0x1d40   :  { %8846 = vmatmul.mubr.f32.vlgmr.msra.gmra.mxu1 %v4707_v19  ;;  %v16764_v19 = vld [vmem:[#allocation142_spill] sm:$0xff] }
0x1d41   :  { %8849 = vmatpush3.msra.mxu1 %v13851_v23  ;;  %8880 = vmatprep.mubr.msk.f32.mxu1 %vm10383_vm0, %v16109_v0  ;;  %v16749_v23 = vld [vmem:[#allocation125_spill] sm:$0xff] }
0x1d42   :  { %8850 = vmatprep.subr.mxu1 %v16109_v0 }
0x1d43   :  { %8851 = vmatpush3.msra.mxu1 %v13860_v55  ;;  %v16750_v55 = vld [vmem:[#allocation126_spill] sm:$0xff] }
0x1d44   :  { %8852 = vmatprep.subr.mxu1 %v16109_v0 }
0x1d45   :  { %8853 = vmatpush3.msra.mxu1 %v13867_v58  ;;  %v16751_v58 = vld [vmem:[#allocation127_spill] sm:$0xff] }
0x1d46   :  { %8854 = vmatprep.subr.mxu1 %v16109_v0 }
0x1d47   :  { %8855 = vmatpush3.msra.mxu1 %v13874_v59  ;;  %v16752_v59 = vld [vmem:[#allocation130_spill] sm:$0xff] }
0x1d48   :  { %8856 = vmatprep.subr.mxu1 %v16109_v0 }
0x1d49   :  { %8857 = vmatpush3.msra.mxu1 %v13881_v61  ;;  %v16753_v61 = vld [vmem:[#allocation131_spill] sm:$0xff] }
0x1d4a   :  { %8858 = vmatprep.subr.mxu1 %v16109_v0 }
0x1d4b   :  { %8859 = vmatpush3.msra.mxu1 %v13888_v63  ;;  %v16754_v63 = vld [vmem:[#allocation132_spill] sm:$0xff] }
0x1d4c   :  { %8860 = vmatprep.subr.mxu1 %v16109_v0 }
0x1d4d   :  { %8861 = vmatpush3.msra.mxu1 %v13895_v3  ;;  %v16755_v3 = vld [vmem:[#allocation133_spill] sm:$0xff] }
0x1d4e   :  { %8862 = vmatprep.subr.mxu1 %v16109_v0 }
0x1d4f   :  { %8863 = vmatpush3.msra.mxu1 %v16748_v5  ;;  %v16765_v5 = vld [vmem:[#allocation143_spill] sm:$0xff] }
0x1d50   :  { %8864 = vmatprep.subr.mxu1 %v16109_v0 }
0x1d51   :  { %8865 = vmatpush3.msra.mxu1 %v16749_v23  ;;  %v16766_v23 = vld [vmem:[#allocation25_spill] sm:$0xff] }
0x1d52   :  { %8866 = vmatprep.subr.mxu1 %v16109_v0 }
0x1d53   :  { %8867 = vmatpush3.msra.mxu1 %v16750_v55  ;;  %v16767_v55 = vld [vmem:[#allocation26_spill] sm:$0xff] }
0x1d54   :  { %8868 = vmatprep.subr.mxu1 %v16109_v0 }
0x1d55   :  { %8869 = vmatpush3.msra.mxu1 %v16751_v58  ;;  %v16768_v58 = vld [vmem:[#allocation27_spill] sm:$0xff] }
0x1d56   :  { %8870 = vmatprep.subr.mxu1 %v16109_v0 }
0x1d57   :  { %8871 = vmatpush3.msra.mxu1 %v16752_v59  ;;  %v16769_v59 = vld [vmem:[#allocation28_spill] sm:$0xff] }
0x1d58   :  { %8872 = vmatprep.subr.mxu1 %v16109_v0 }
0x1d59   :  { %8873 = vmatpush3.msra.mxu1 %v16753_v61  ;;  %v16770_v61 = vld [vmem:[#allocation29_spill] sm:$0xff] }
0x1d5a   :  { %8874 = vmatprep.subr.mxu1 %v16109_v0 }
0x1d5b   :  { %8875 = vmatpush3.msra.mxu1 %v16754_v63  ;;  %v16771_v63 = vld [vmem:[#allocation30_spill] sm:$0xff] }
0x1d5c   :  { %8876 = vmatprep.subr.mxu1 %v16109_v0 }
0x1d5d   :  { %8877 = vmatpush3.msra.mxu1 %v16755_v3  ;;  %v16772_v3 = vld [vmem:[#allocation31_spill] sm:$0xff] }
0x1d5e   :  { %8878 = vmatprep.subr.mxu1 %v16109_v0 }
0x1d5f   :  { %8879 = vmatpush3.msra.mxu1 %v16756_v10 }
0x1d60   :  { %8881 = vmatmul.mubr.f32.vlgmr.msra.gmra.mxu1 %v4867_v31  ;;  %8883 = vmatprep.subr.mxu1 %v16109_v0 }
0x1d61   :  { %8884 = vmatpush3.msra.mxu1 %v16757_v20  ;;  %8915 = vmatprep.mubr.msk.f32.mxu1 %vm10383_vm0, %v16109_v0  ;;  %v16773_v20 = vld [vmem:[#allocation128_spill] sm:$0xff] }
0x1d62   :  { %8885 = vmatprep.subr.mxu1 %v16109_v0 }
0x1d63   :  { %8886 = vmatpush3.msra.mxu1 %v16758_v13 }
0x1d64   :  { %8887 = vmatprep.subr.mxu1 %v16109_v0 }
0x1d65   :  { %8888 = vmatpush3.msra.mxu1 %v16759_v1  ;;  %v16774_v1 = vld [vmem:[#allocation129_spill] sm:$0xff] }
0x1d66   :  { %8889 = vmatprep.subr.mxu1 %v16109_v0 }
0x1d67   :  { %8890 = vmatpush3.msra.mxu1 %v16760_v47 }
0x1d68   :  { %8891 = vmatprep.subr.mxu1 %v16109_v0 }
0x1d69   :  { %8892 = vmatpush3.msra.mxu1 %v16761_v43 }
0x1d6a   :  { %8893 = vmatprep.subr.mxu1 %v16109_v0 }
0x1d6b   :  { %8894 = vmatpush3.msra.mxu1 %v16762_v46 }
0x1d6c   :  { %8895 = vmatprep.subr.mxu1 %v16109_v0 }
0x1d6d   :  { %8896 = vmatpush3.msra.mxu1 %v16763_v45 }
0x1d6e   :  { %8897 = vmatprep.subr.mxu1 %v16109_v0 }
0x1d6f   :  { %8898 = vmatpush3.msra.mxu1 %v16764_v19 }
0x1d70   :  { %8899 = vmatprep.subr.mxu1 %v16109_v0 }
0x1d71   :  { %8900 = vmatpush3.msra.mxu1 %v16765_v5 }
0x1d72   :  { %8901 = vmatprep.subr.mxu1 %v16109_v0 }
0x1d73   :  { %8902 = vmatpush3.msra.mxu1 %v16766_v23 }
0x1d74   :  { %8903 = vmatprep.subr.mxu1 %v16109_v0 }
0x1d75   :  { %8904 = vmatpush3.msra.mxu1 %v16767_v55 }
0x1d76   :  { %8905 = vmatprep.subr.mxu1 %v16109_v0 }
0x1d77   :  { %8906 = vmatpush3.msra.mxu1 %v16768_v58 }
0x1d78   :  { %8907 = vmatprep.subr.mxu1 %v16109_v0 }
0x1d79   :  { %8908 = vmatpush3.msra.mxu1 %v16769_v59 }
0x1d7a   :  { %8909 = vmatprep.subr.mxu1 %v16109_v0 }
0x1d7b   :  { %8910 = vmatpush3.msra.mxu1 %v16770_v61  ;;  %v4847_v31 = vpop.f32.mrf.mxu0 }
0x1d7c   :  { %8911 = vmatprep.subr.mxu1 %v16109_v0  ;;  %v4848_v47 = vadd.f32 %v4847_v31, %v16774_v1 }
0x1d7d   :  { %8912 = vmatpush3.msra.mxu1 %v16771_v63  ;;  %v4849_v10 = vpop.f32.mrf.mxu0 }
0x1d7e   :  { %8913 = vmatprep.subr.mxu1 %v16109_v0  ;;  %v4850_v13 = vadd.f32 %v4849_v10, %v16773_v20  ;;  %v4852_v46 = vmul.f32 0.5, %v4848_v47 }
0x1d7f   :  { %8914 = vmatpush3.msra.mxu1 %v16772_v3 }
0x1d80   :  { %8918 = vmatprep.subr.mxu1 %v16109_v0  ;;  %v4858_v43 = vmul.f32 0.5, %v4850_v13 }
0x1d82   :  { %9418 = vtanh.f32 %v4858_v43  ;;  %v16783_v43 = vld [vmem:[#allocation40_spill] sm:$0xff] }
0x1d83   :  { %9420 = vtanh.f32 %v4852_v46  ;;  %v16784_v46 = vld [vmem:[#allocation41_spill] sm:$0xff] }
0x1d8f   :  { %v9419_v58 = vpop.eup %9418 }
0x1d90   :  { %v9421_v59 = vpop.eup %9420  ;;  %v4860_v61 = vadd.f32 1.0, %v9419_v58  ;;  %v16790_v58 = vld [vmem:[#allocation144_spill] sm:$0xff] }
0x1d91   :  { %v4854_v63 = vadd.f32 1.0, %v9421_v59  ;;  %v16791_v59 = vld [vmem:[#allocation145_spill] sm:$0xff] }
0x1d92   :  { %v4861_v3 = vmul.f32 0.5, %v4860_v61  ;;  %v16792_v61 = vld [vmem:[#allocation146_spill] sm:$0xff] }
0x1d93   :  { %v4855_v10 = vmul.f32 0.5, %v4854_v63  ;;  %v16793_v63 = vld [vmem:[#allocation147_spill] sm:$0xff] }
0x1d94   :  { %v4862_v31 = vmul.f32 %v4861_v3, %v14038_v34  ;;  %v16794_v3 = vld [vmem:[#allocation148_spill] sm:$0xff] }
0x1e00   :  { %v4774_v45 = vpop.f32.mrf.mxu1 }
0x1e01   :  { %v4775_v19 = vadd.f32 %v14033_v18, %v4774_v45  ;;  %v16785_v45 = vld [vmem:[#allocation42_spill] sm:$0xff] }
0x1e02   :  { %v8847_v5 = vpop.f32.mrf.mxu1 }
0x1e03   :  { %v4778_v23 = vmax.f32 %v4775_v19, 0.0  ;;  %v16786_v19 = vld [vmem:[#allocation43_spill] sm:$0xff]  ;;  %v16787_v5 = vld [vmem:[#allocation44_spill] sm:$0xff] }
0x1e05   :  { %v4779_v55 = vadd.f32 %v4778_v23, %v14356_v4  ;;  %v16781_v4 = vld [vmem:[#allocation37_spill] sm:$0xff] }
0x1e06   :  { %v16788_v23 = vld [vmem:[#allocation45_spill] sm:$0xff] }
0x1e07   :  { %9422 = vtanh.f32 %v4779_v55  ;;  %v16789_v55 = vld [vmem:[#allocation46_spill] sm:$0xff] }
0x1e14   :  { %v9423_v20 = vpop.eup %9422 }
0x1e15   :  { %v4857_v13 = vmul.f32 %v9423_v20, %v4855_v10  ;;  %v16782_v20 = vld [vmem:[#allocation39_spill] sm:$0xff]  ;;  %v16795_v10 = vld [vmem:[#allocation149_spill] sm:$0xff] }
0x1e17   :  { %v14595_v47 = vadd.f32 %v4862_v31, %v4857_v13  ;;  %v16796_v31 = vld [vmem:[#allocation150_spill] sm:$0xff]  ;;  %v16797_v13 = vld [vmem:[#allocation151_spill] sm:$0xff] }
0x1e19   :  { %8916 = vmatmul.mubr.f32.vlgmr.msra.gmra.mxu1 %v14595_v47  ;;  %4865 = vst [vmem:[#allocation18 + $0x28] sm:$0xff] %v14595_v47 }
0x1e1a   :  { %8919 = vmatpush3.msra.mxu1 %v14042_v2  ;;  %8950 = vmatprep.mubr.msk.f32.mxu1 %vm10383_vm0, %v16109_v0 }
0x1e1b   :  { %8920 = vmatprep.subr.mxu1 %v16109_v0 }
0x1e1c   :  { %8921 = vmatpush3.msra.mxu1 %v14048_v27 }
0x1e1d   :  { %8922 = vmatprep.subr.mxu1 %v16109_v0 }
0x1e1e   :  { %8923 = vmatpush3.msra.mxu1 %v14052_v30  ;;  %v16775_v30 = vld [vmem:[#allocation32_spill] sm:$0xff] }
0x1e1f   :  { %8924 = vmatprep.subr.mxu1 %v16109_v0 }
0x1e20   :  { %v4934_v34 = vpop.f32.mrf.mxu1  ;;  %8925 = vmatpush3.msra.mxu1 %v14056_v52  ;;  %v16776_v52 = vld [vmem:[#allocation33_spill] sm:$0xff] }
0x1e21   :  { %v14609_v18 = vadd.f32 %v14062_v36, %v4934_v34  ;;  %8926 = vmatprep.subr.mxu1 %v16109_v0  ;;  %v16777_v36 = vld [vmem:[#allocation34_spill] sm:$0xff]  ;;  %v16798_v34 = vld [vmem:[#allocation152_spill] sm:$0xff] }
0x1e22   :  { %v8882_v2 = vpop.f32.mrf.mxu1  ;;  %8927 = vmatpush3.msra.mxu1 %v14068_v41  ;;  %v16778_v41 = vld [vmem:[#allocation35_spill] sm:$0xff] }
0x1e23   :  { %v5008_v27 = vsub.f32 %v14595_v47, %v14609_v18  ;;  %8928 = vmatprep.subr.mxu1 %v16109_v0  ;;  %v16799_v2 = vld [vmem:[#allocation153_spill] sm:$0xff] }
0x1e24   :  { %8929 = vmatpush3.msra.mxu1 %v14074_v32  ;;  %v16779_v32 = vld [vmem:[#allocation36_spill] sm:$0xff] }
0x1e25   :  { %5074 = vmatmul.mubr.f32.vlgmr.msra.gmra.mxu0 %v5008_v27  ;;  %8930 = vmatprep.subr.mxu1 %v16109_v0 }
0x1e26   :  { %8931 = vmatpush3.msra.mxu1 %v14078_v26  ;;  %8954 = vmatpush3.msra.mxu0 %v16775_v30  ;;  %v16780_v26 = vld [vmem:[#allocation38_spill] sm:$0xff] }
0x1e27   :  { %8932 = vmatprep.subr.mxu1 %v16109_v0  ;;  %8955 = vmatprep.subr.mxu0 %v16109_v0 }
0x1e28   :  { %8933 = vmatpush3.msra.mxu1 %v16776_v52  ;;  %8956 = vmatpush3.msra.mxu0 %v16777_v36 }
0x1e29   :  { %8934 = vmatprep.subr.mxu1 %v16109_v0  ;;  %8957 = vmatprep.subr.mxu0 %v16109_v0 }
0x1e2a   :  { %8935 = vmatpush3.msra.mxu1 %v16778_v41  ;;  %8958 = vmatpush3.msra.mxu0 %v16779_v32  ;;  %v14679_v32 = vld [vmem:[#allocation14 + $0x78] sm:$0xff] }
0x1e2b   :  { %8936 = vmatprep.subr.mxu1 %v16109_v0  ;;  %8959 = vmatprep.subr.mxu0 %v16109_v0 }
0x1e2c   :  { %8937 = vmatpush3.msra.mxu1 %v16780_v26  ;;  %8960 = vmatpush3.msra.mxu0 %v16781_v4  ;;  %v14685_v26 = vld [vmem:[#allocation14 + $0x70] sm:$0xff]  ;;  %v14697_v4 = vld [vmem:[#allocation14 + $0x58] sm:$0xff] }
0x1e2d   :  { %8938 = vmatprep.subr.mxu1 %v16109_v0  ;;  %8961 = vmatprep.subr.mxu0 %v16109_v0  ;;  %16802 = vst [vmem:[#allocation49_spill] sm:$0xff] %v14697_v4 }
0x1e2e   :  { %8939 = vmatpush3.msra.mxu1 %v16782_v20  ;;  %8962 = vmatpush3.msra.mxu0 %v16783_v43  ;;  %v14701_v20 = vld [vmem:[#allocation14 + $0x50] sm:$0xff]  ;;  %v14705_v43 = vld [vmem:[#allocation14 + $0x48] sm:$0xff] }
0x1e2f   :  { %8940 = vmatprep.subr.mxu1 %v16109_v0  ;;  %8963 = vmatprep.subr.mxu0 %v16109_v0  ;;  %16803 = vst [vmem:[#allocation50_spill] sm:$0xff] %v14701_v20  ;;  %16804 = vst [vmem:[#allocation51_spill] sm:$0xff] %v14705_v43 }
0x1e30   :  { %8941 = vmatpush3.msra.mxu1 %v16784_v46  ;;  %8964 = vmatpush3.msra.mxu0 %v16785_v45  ;;  %v14709_v46 = vld [vmem:[#allocation14 + $0x40] sm:$0xff] }
0x1e31   :  { %8942 = vmatprep.subr.mxu1 %v16109_v0  ;;  %8965 = vmatprep.subr.mxu0 %v16109_v0  ;;  %16805 = vst [vmem:[#allocation52_spill] sm:$0xff] %v14709_v46 }
0x1e32   :  { %8943 = vmatpush3.msra.mxu1 %v16786_v19  ;;  %8966 = vmatpush3.msra.mxu0 %v16787_v5  ;;  %v14715_v19 = vld [vmem:[#allocation14 + $0x38] sm:$0xff] }
0x1e33   :  { %8944 = vmatprep.subr.mxu1 %v16109_v0  ;;  %8967 = vmatprep.subr.mxu0 %v16109_v0  ;;  %16806 = vst [vmem:[#allocation53_spill] sm:$0xff] %v14715_v19 }
0x1e34   :  { %8945 = vmatpush3.msra.mxu1 %v16788_v23  ;;  %8968 = vmatpush3.msra.mxu0 %v16789_v55  ;;  %v14719_v23 = vld [vmem:[#allocation14 + $0x30] sm:$0xff]  ;;  %v14723_v55 = vld [vmem:[#allocation14 + $0x28] sm:$0xff] }
0x1e35   :  { %8946 = vmatprep.subr.mxu1 %v16109_v0  ;;  %8969 = vmatprep.subr.mxu0 %v16109_v0  ;;  %16807 = vst [vmem:[#allocation54_spill] sm:$0xff] %v14719_v23  ;;  %16808 = vst [vmem:[#allocation55_spill] sm:$0xff] %v14723_v55 }
0x1e36   :  { %8947 = vmatpush3.msra.mxu1 %v16790_v58  ;;  %8970 = vmatpush3.msra.mxu0 %v16791_v59  ;;  %v14727_v58 = vld [vmem:[#allocation14 + $0x20] sm:$0xff]  ;;  %v14731_v59 = vld [vmem:[#allocation14 + $0x18] sm:$0xff] }
0x1e37   :  { %8948 = vmatprep.subr.mxu1 %v16109_v0  ;;  %8971 = vmatprep.subr.mxu0 %v16109_v0  ;;  %16809 = vst [vmem:[#allocation56_spill] sm:$0xff] %v14727_v58  ;;  %16810 = vst [vmem:[#allocation57_spill] sm:$0xff] %v14731_v59 }
0x1e38   :  { %8949 = vmatpush3.msra.mxu1 %v16792_v61  ;;  %8972 = vmatpush3.msra.mxu0 %v16793_v63  ;;  %v14735_v61 = vld [vmem:[#allocation14 + $0x10] sm:$0xff]  ;;  %v14739_v63 = vld [vmem:[#allocation14 + $0x8] sm:$0xff] }
0x1e39   :  { %8951 = vmatmul.mubr.f32.vlgmr.msra.gmra.mxu1 %v14609_v18  ;;  %8973 = vmatprep.subr.mxu0 %v16109_v0  ;;  %16811 = vst [vmem:[#allocation58_spill] sm:$0xff] %v14735_v61  ;;  %16812 = vst [vmem:[#allocation59_spill] sm:$0xff] %v14739_v63 }
0x1e3a   :  { %8974 = vmatpush3.msra.mxu0 %v16794_v3  ;;  %8985 = vmatprep.mubr.msk.f32.mxu0 %vm10383_vm0, %v16109_v0  ;;  %v14743_v3 = vld [vmem:[#allocation14] sm:$0xff] }
0x1e3b   :  { %8975 = vmatprep.subr.mxu0 %v16109_v0  ;;  %8988 = vmatprep.subr.mxu1 %v16109_v0  ;;  %16813 = vst [vmem:[#allocation60_spill] sm:$0xff] %v14743_v3 }
0x1e3c   :  { %8976 = vmatpush3.msra.mxu0 %v16795_v10  ;;  %8989 = vmatpush3.msk.msra.mxu1 %vm786_vm1, %v16796_v31  ;;  %v14746_v10 = vld [vmem:[#allocation17 + $0xf8] sm:$0xff] }
0x1e3d   :  { %8977 = vmatprep.subr.mxu0 %v16109_v0  ;;  %8990 = vmatprep.mubr.msk.f32.mxu1 %vm10383_vm0, %v16109_v0  ;;  %16814 = vst [vmem:[#allocation61_spill] sm:$0xff] %v14746_v10 }
0x1e3e   :  { %8978 = vmatpush3.msra.mxu0 %v16797_v13  ;;  %8993 = vmatprep.subr.mxu1 %v16109_v0 }
0x1e3f   :  { %8979 = vmatprep.subr.mxu0 %v16109_v0 }
0x1e40   :  { %8980 = vmatpush3.msra.mxu0 %v16798_v34 }
0x1e41   :  { %8981 = vmatprep.subr.mxu0 %v16109_v0 }
0x1e42   :  { %8982 = vmatpush3.msra.mxu0 %v16799_v2 }
0x1e43   :  { %8983 = vmatprep.subr.mxu0 %v16109_v0 }
0x1e44   :  { %8984 = vmatpush3.msra.mxu0 %v14239_v14  ;;  %v14689_v14 = vld [vmem:[#allocation14 + $0x68] sm:$0xff] }
0x1e45   :  { %9028 = vmatprep.subr.mxu0 %v16109_v0  ;;  %16800 = vst [vmem:[#allocation47_spill] sm:$0xff] %v14689_v14 }
0x1ed9   :  { %v5004_v27 = vpop.f32.mrf.mxu1 }
0x1eda   :  { %v5005_v52 = vadd.f32 %v14246_v62, %v5004_v27  ;;  %v14693_v62 = vld [vmem:[#allocation14 + $0x60] sm:$0xff] }
0x1edb   :  { %v8917_v30 = vpop.f32.mrf.mxu1  ;;  %16801 = vst [vmem:[#allocation48_spill] sm:$0xff] %v14693_v62 }
0x1ee5   :  { %v5075_v36 = vpop.f32.mrf.mxu0 }
0x1ee6   :  { %v5150_v41 = vmul.f32 %v5075_v36, %v5005_v52  ;;  %v14750_v36 = vld [vmem:[#allocation12 + $0x78] sm:$0xff] }
0x1ee7   :  { %v5077_v31 = vpop.f32.mrf.mxu0 }
0x1ee8   :  { %8986 = vmatmul.mubr.f32.vlgmr.msra.gmra.mxu0 %v5150_v41  ;;  %v14756_v41 = vld [vmem:[#allocation12 + $0x70] sm:$0xff] }
0x1ee9   :  { %9029 = vmatpush3.msra.mxu0 %v14679_v32  ;;  %9060 = vmatprep.mubr.msk.f32.mxu0 %vm10383_vm0, %v16109_v0 }
0x1eea   :  { %9030 = vmatprep.subr.mxu0 %v16109_v0 }
0x1eeb   :  { %9031 = vmatpush3.msra.mxu0 %v14685_v26 }
0x1eec   :  { %9032 = vmatprep.subr.mxu0 %v16109_v0 }
0x1eed   :  { %9033 = vmatpush3.msra.mxu0 %v14689_v14  ;;  %v14829_v14 = vld [vmem:[#allocation15 + $0x70] sm:$0xff] }
0x1eee   :  { %9034 = vmatprep.subr.mxu0 %v16109_v0  ;;  %16815 = vst [vmem:[#allocation62_spill] sm:$0xff] %v14829_v14 }
0x1eef   :  { %9035 = vmatpush3.msra.mxu0 %v14693_v62  ;;  %v14823_v62 = vld [vmem:[#allocation15 + $0x78] sm:$0xff] }
0x1ef0   :  { %9036 = vmatprep.subr.mxu0 %v16109_v0 }
0x1ef1   :  { %9037 = vmatpush3.msra.mxu0 %v14697_v4 }
0x1ef2   :  { %9038 = vmatprep.subr.mxu0 %v16109_v0 }
0x1ef3   :  { %9039 = vmatpush3.msra.mxu0 %v14701_v20 }
0x1ef4   :  { %9040 = vmatprep.subr.mxu0 %v16109_v0 }
0x1ef5   :  { %9041 = vmatpush3.msra.mxu0 %v14705_v43 }
0x1ef6   :  { %9042 = vmatprep.subr.mxu0 %v16109_v0 }
0x1ef7   :  { %9043 = vmatpush3.msra.mxu0 %v14709_v46 }
0x1ef8   :  { %9044 = vmatprep.subr.mxu0 %v16109_v0 }
0x1ef9   :  { %v14713_v45 = vpop.f32.mrf.mxu1  ;;  %9045 = vmatpush3.msra.mxu0 %v14715_v19  ;;  %v14819_v19 = vld [vmem:[%s15523_s8] ss:$0 sm:$0xff] }
0x1efa   :  { %9046 = vmatprep.subr.mxu0 %v16109_v0  ;;  %v5147_v46 = vadd.f32 %v14819_v19, %v14713_v45  ;;  %v14833_v45 = vld [vmem:[#allocation15 + $0x68] sm:$0xff] }
0x1efb   :  { %v8952_v5 = vpop.f32.mrf.mxu1  ;;  %9047 = vmatpush3.msra.mxu0 %v14719_v23  ;;  %16816 = vst [vmem:[#allocation63_spill] sm:$0xff] %v14833_v45 }
0x1efc   :  { %9048 = vmatprep.subr.mxu0 %v16109_v0  ;;  %v14760_v5 = vld [vmem:[#allocation12 + $0x68] sm:$0xff] }
0x1efd   :  { %9049 = vmatpush3.msra.mxu0 %v14723_v55  ;;  %v14812_v55 = vld [vmem:[#allocation12] sm:$0xff] }
0x1efe   :  { %9050 = vmatprep.subr.mxu0 %v16109_v0 }
0x1eff   :  { %9051 = vmatpush3.msra.mxu0 %v14727_v58  ;;  %v14808_v58 = vld [vmem:[#allocation12 + $0x8] sm:$0xff] }
0x1f00   :  { %9052 = vmatprep.subr.mxu0 %v16109_v0 }
0x1f01   :  { %9053 = vmatpush3.msra.mxu0 %v14731_v59  ;;  %v14804_v59 = vld [vmem:[#allocation12 + $0x10] sm:$0xff] }
0x1f02   :  { %9054 = vmatprep.subr.mxu0 %v16109_v0 }
0x1f03   :  { %9055 = vmatpush3.msra.mxu0 %v14735_v61  ;;  %v14800_v61 = vld [vmem:[#allocation12 + $0x18] sm:$0xff] }
0x1f04   :  { %9056 = vmatprep.subr.mxu0 %v16109_v0 }
0x1f05   :  { %9057 = vmatpush3.msra.mxu0 %v14739_v63  ;;  %v14796_v63 = vld [vmem:[#allocation12 + $0x20] sm:$0xff] }
0x1f06   :  { %9058 = vmatprep.subr.mxu0 %v16109_v0 }
0x1f07   :  { %9059 = vmatpush3.msra.mxu0 %v14743_v3  ;;  %v14792_v3 = vld [vmem:[#allocation12 + $0x28] sm:$0xff] }
0x1f08   :  { %5516 = vmatprep.subr.mxu0 %v14746_v10  ;;  %v14788_v10 = vld [vmem:[#allocation12 + $0x30] sm:$0xff] }
0x1fa8   :  { %v5217_v13 = vpop.f32.mrf.mxu0 }
0x1fa9   :  { %v5221_v34 = vmul.f32 0.5, %v5217_v13  ;;  %v14764_v13 = vld [vmem:[#allocation12 + $0x60] sm:$0xff] }
0x1faa   :  { %v8987_v2 = vpop.f32.mrf.mxu0 }
0x1fab   :  { %9424 = vtanh.f32 %v5221_v34  ;;  %v14768_v34 = vld [vmem:[#allocation12 + $0x58] sm:$0xff]  ;;  %v14772_v2 = vld [vmem:[#allocation12 + $0x50] sm:$0xff] }
0x1fac   :  { %9426 = vtanh.f32 %v14595_v47 }
0x1fb8   :  { %v9425_v27 = vpop.eup %9424 }
0x1fb9   :  { %v5223_v30 = vadd.f32 1.0, %v9425_v27  ;;  %v14776_v27 = vld [vmem:[#allocation12 + $0x48] sm:$0xff] }
0x1fbb   :  { %v5224_v52 = vmul.f32 0.5, %v5223_v30  ;;  %v14780_v30 = vld [vmem:[#allocation12 + $0x40] sm:$0xff] }
0x1fbd   :  { %8991 = vmatmul.mubr.msk.f32.vlgmr.msra.gmra.mxu1 %vm782_vm2, %v5224_v52  ;;  %v14784_v52 = vld [vmem:[#allocation12 + $0x38] sm:$0xff] }
0x1fbe   :  { %8994 = vmatpush3.msra.mxu1 %v14750_v36  ;;  %9025 = vmatprep.mubr.msk.f32.mxu1 %vm10383_vm0, %v16109_v0 }
0x1fbf   :  { %8995 = vmatprep.subr.mxu1 %v16109_v0 }
0x1fc0   :  { %8996 = vmatpush3.msra.mxu1 %v14756_v41 }
0x1fc1   :  { %8997 = vmatprep.subr.mxu1 %v16109_v0 }
0x1fc2   :  { %8998 = vmatpush3.msra.mxu1 %v14760_v5 }
0x1fc3   :  { %8999 = vmatprep.subr.mxu1 %v16109_v0 }
0x1fc4   :  { %9000 = vmatpush3.msra.mxu1 %v14764_v13 }
0x1fc5   :  { %9001 = vmatprep.subr.mxu1 %v16109_v0 }
0x1fc6   :  { %9002 = vmatpush3.msra.mxu1 %v14768_v34 }
0x1fc7   :  { %9003 = vmatprep.subr.mxu1 %v16109_v0 }
0x1fc8   :  { %9004 = vmatpush3.msra.mxu1 %v14772_v2 }
0x1fc9   :  { %9005 = vmatprep.subr.mxu1 %v16109_v0 }
0x1fca   :  { %9006 = vmatpush3.msra.mxu1 %v14776_v27 }
0x1fcb   :  { %9007 = vmatprep.subr.mxu1 %v16109_v0 }
0x1fcc   :  { %9008 = vmatpush3.msra.mxu1 %v14780_v30 }
0x1fcd   :  { %9009 = vmatprep.subr.mxu1 %v16109_v0 }
0x1fce   :  { %9010 = vmatpush3.msra.mxu1 %v14784_v52 }
0x1fcf   :  { %9011 = vmatprep.subr.mxu1 %v16109_v0 }
0x1fd0   :  { %9012 = vmatpush3.msra.mxu1 %v14788_v10 }
0x1fd1   :  { %9013 = vmatprep.subr.mxu1 %v16109_v0 }
0x1fd2   :  { %9014 = vmatpush3.msra.mxu1 %v14792_v3 }
0x1fd3   :  { %9015 = vmatprep.subr.mxu1 %v16109_v0 }
0x1fd4   :  { %9016 = vmatpush3.msra.mxu1 %v14796_v63 }
0x1fd5   :  { %9017 = vmatprep.subr.mxu1 %v16109_v0 }
0x1fd6   :  { %9018 = vmatpush3.msra.mxu1 %v14800_v61 }
0x1fd7   :  { %9019 = vmatprep.subr.mxu1 %v16109_v0 }
0x1fd8   :  { %9020 = vmatpush3.msra.mxu1 %v14804_v59 }
0x1fd9   :  { %9021 = vmatprep.subr.mxu1 %v16109_v0 }
0x1fda   :  { %9022 = vmatpush3.msra.mxu1 %v14808_v58 }
0x1fdb   :  { %9023 = vmatprep.subr.mxu1 %v16109_v0 }
0x1fdc   :  { %9024 = vmatpush3.msra.mxu1 %v14812_v55 }
0x1fdd   :  { %9063 = vmatprep.subr.mxu1 %v16109_v0 }
0x207d   :  { %v5294_v23 = vpop.f32.mrf.mxu1 }
0x207e   :  { %v5298_v43 = vmul.f32 %v5294_v23, %v5077_v31  ;;  %v14853_v23 = vld [vmem:[#allocation15 + $0x40] sm:$0xff]  ;;  %v14857_v31 = vld [vmem:[#allocation15 + $0x38] sm:$0xff] }
0x207f   :  { %v8992_v20 = vpop.f32.mrf.mxu1  ;;  %16821 = vst [vmem:[#allocation68_spill] sm:$0xff] %v14853_v23  ;;  %16822 = vst [vmem:[#allocation69_spill] sm:$0xff] %v14857_v31 }
0x2080   :  { %v5299_v4 = vadd.f32 %v5298_v43, %v5147_v46  ;;  %v14841_v20 = vld [vmem:[#allocation15 + $0x58] sm:$0xff]  ;;  %v14845_v43 = vld [vmem:[#allocation15 + $0x50] sm:$0xff]  ;;  %v14849_v46 = vld [vmem:[#allocation15 + $0x48] sm:$0xff] }
0x2081   :  { %16818 = vst [vmem:[#allocation65_spill] sm:$0xff] %v14841_v20  ;;  %16819 = vst [vmem:[#allocation66_spill] sm:$0xff] %v14845_v43 }
0x2082   :  { %9026 = vmatmul.mubr.f32.vlgmr.msra.gmra.mxu1 %v5299_v4  ;;  %v14837_v4 = vld [vmem:[#allocation15 + $0x60] sm:$0xff]  ;;  %16820 = vst [vmem:[#allocation67_spill] sm:$0xff] %v14849_v46 }
0x2083   :  { %9064 = vmatpush3.msra.mxu1 %v14823_v62  ;;  %9095 = vmatprep.mubr.msk.f32.mxu1 %vm10383_vm0, %v16109_v0  ;;  %16817 = vst [vmem:[#allocation64_spill] sm:$0xff] %v14837_v4 }
0x2084   :  { %9065 = vmatprep.subr.mxu1 %v16109_v0 }
0x2085   :  { %9066 = vmatpush3.msra.mxu1 %v14829_v14  ;;  %v14903_v14 = vld [vmem:[#allocation17 + $0xe8] sm:$0xff] }
0x2086   :  { %9067 = vmatprep.subr.mxu1 %v16109_v0  ;;  %16831 = vst [vmem:[#allocation78_spill] sm:$0xff] %v14903_v14 }
0x2087   :  { %9068 = vmatpush3.msra.mxu1 %v14833_v45  ;;  %v9427_v45 = vpop.eup %9426 }
0x2088   :  { %9069 = vmatprep.subr.mxu1 %v16109_v0 }
0x2089   :  { %9070 = vmatpush3.msra.mxu1 %v14837_v4  ;;  %v14894_v4 = vld [vmem:[%s15525_s10] ss:$0 sm:$0xff] }
0x208a   :  { %9071 = vmatprep.subr.mxu1 %v16109_v0  ;;  %16830 = vst [vmem:[#allocation77_spill] sm:$0xff] %v14894_v4 }
0x208b   :  { %9072 = vmatpush3.msra.mxu1 %v14841_v20 }
0x208c   :  { %9073 = vmatprep.subr.mxu1 %v16109_v0 }
0x208d   :  { %9074 = vmatpush3.msra.mxu1 %v14845_v43  ;;  %v14861_v43 = vld [vmem:[#allocation15 + $0x30] sm:$0xff] }
0x208e   :  { %9075 = vmatprep.subr.mxu1 %v16109_v0  ;;  %16823 = vst [vmem:[#allocation70_spill] sm:$0xff] %v14861_v43 }
0x208f   :  { %9076 = vmatpush3.msra.mxu1 %v14849_v46  ;;  %v14865_v46 = vld [vmem:[#allocation15 + $0x28] sm:$0xff] }
0x2090   :  { %9077 = vmatprep.subr.mxu1 %v16109_v0  ;;  %16824 = vst [vmem:[#allocation71_spill] sm:$0xff] %v14865_v46 }
0x2091   :  { %9078 = vmatpush3.msra.mxu1 %v14853_v23  ;;  %v14869_v23 = vld [vmem:[#allocation15 + $0x20] sm:$0xff] }
0x2092   :  { %9079 = vmatprep.subr.mxu1 %v16109_v0  ;;  %16825 = vst [vmem:[#allocation72_spill] sm:$0xff] %v14869_v23 }
0x2093   :  { %9080 = vmatpush3.msra.mxu1 %v14857_v31  ;;  %v14873_v31 = vld [vmem:[#allocation15 + $0x18] sm:$0xff] }
0x2094   :  { %9081 = vmatprep.subr.mxu1 %v16109_v0  ;;  %16826 = vst [vmem:[#allocation73_spill] sm:$0xff] %v14873_v31 }
0x2095   :  { %9082 = vmatpush3.msra.mxu1 %v14861_v43  ;;  %v14877_v43 = vld [vmem:[#allocation15 + $0x10] sm:$0xff] }
0x2096   :  { %9083 = vmatprep.subr.mxu1 %v16109_v0  ;;  %16827 = vst [vmem:[#allocation74_spill] sm:$0xff] %v14877_v43 }
0x2097   :  { %9084 = vmatpush3.msra.mxu1 %v14865_v46  ;;  %v14881_v46 = vld [vmem:[#allocation15 + $0x8] sm:$0xff] }
0x2098   :  { %9085 = vmatprep.subr.mxu1 %v16109_v0  ;;  %16828 = vst [vmem:[#allocation75_spill] sm:$0xff] %v14881_v46 }
0x2099   :  { %9086 = vmatpush3.msra.mxu1 %v14869_v23  ;;  %v14885_v23 = vld [vmem:[#allocation15] sm:$0xff] }
0x209a   :  { %9087 = vmatprep.subr.mxu1 %v16109_v0  ;;  %16829 = vst [vmem:[#allocation76_spill] sm:$0xff] %v14885_v23 }
0x209b   :  { %9088 = vmatpush3.msra.mxu1 %v14873_v31 }
0x209c   :  { %9089 = vmatprep.subr.mxu1 %v16109_v0 }
0x209d   :  { %9090 = vmatpush3.msra.mxu1 %v14877_v43 }
0x209e   :  { %9091 = vmatprep.subr.mxu1 %v16109_v0 }
0x209f   :  { %9092 = vmatpush3.msra.mxu1 %v14881_v46 }
0x20a0   :  { %9093 = vmatprep.subr.mxu1 %v16109_v0 }
0x20a1   :  { %9094 = vmatpush3.msra.mxu1 %v14885_v23  ;;  %v14900_v23 = vld [vmem:[#allocation17 + $0xf0] sm:$0xff] }
0x20a2   :  { %9098 = vmatprep.subr.mxu1 %v16109_v0 }
0x2142   :  { %v5366_v31 = vpop.f32.mrf.mxu1 }
0x2143   :  { %v5370_v20 = vadd.f32 %v5366_v31, %v14595_v47  ;;  %v14909_v31 = vld [vmem:[#allocation17 + $0xd8] sm:$0xff] }
0x2144   :  { %v9027_v43 = vpop.f32.mrf.mxu1  ;;  %16833 = vst [vmem:[#allocation80_spill] sm:$0xff] %v14909_v31 }
0x2145   :  { %v14897_v46 = vadd.f32 %v14894_v4, %v5370_v20  ;;  %v14906_v43 = vld [vmem:[#allocation17 + $0xe0] sm:$0xff]  ;;  %v14912_v20 = vld [vmem:[#allocation17 + $0xd0] sm:$0xff]  ;;  %v14915_v4 = vld [vmem:[#allocation17 + $0xc8] sm:$0xff] }
0x2146   :  { %16832 = vst [vmem:[#allocation79_spill] sm:$0xff] %v14906_v43  ;;  %16834 = vst [vmem:[#allocation81_spill] sm:$0xff] %v14912_v20 }
0x2147   :  { %9061 = vmatmul.mubr.f32.vlgmr.msra.gmra.mxu0 %v14897_v46  ;;  %16835 = vst [vmem:[#allocation82_spill] sm:$0xff] %v14915_v4 }
0x2148   :  { %5517 = vmatpush1.msra.mxu0 %v14900_v23  ;;  %5580 = vmatprep.mubr.f32.mxu0 %v9427_v45  ;;  %v14918_v45 = vld [vmem:[#allocation17 + $0xc0] sm:$0xff] }
0x2149   :  { %5518 = vmatprep.subr.mxu0 %v14903_v14  ;;  %16836 = vst [vmem:[#allocation83_spill] sm:$0xff] %v14918_v45  ;;  %v14921_v14 = vld [vmem:[#allocation17 + $0xb8] sm:$0xff] }
0x214a   :  { %5519 = vmatpush1.msra.mxu0 %v14906_v43  ;;  %16837 = vst [vmem:[#allocation84_spill] sm:$0xff] %v14921_v14  ;;  %v14924_v43 = vld [vmem:[#allocation17 + $0xb0] sm:$0xff] }
0x214b   :  { %5520 = vmatprep.subr.mxu0 %v14909_v31  ;;  %16838 = vst [vmem:[#allocation85_spill] sm:$0xff] %v14924_v43  ;;  %v14927_v31 = vld [vmem:[#allocation17 + $0xa8] sm:$0xff] }
0x214c   :  { %5521 = vmatpush1.msra.mxu0 %v14912_v20  ;;  %16839 = vst [vmem:[#allocation86_spill] sm:$0xff] %v14927_v31  ;;  %v14930_v20 = vld [vmem:[#allocation17 + $0xa0] sm:$0xff] }
0x214d   :  { %5522 = vmatprep.subr.mxu0 %v14915_v4  ;;  %16840 = vst [vmem:[#allocation87_spill] sm:$0xff] %v14930_v20  ;;  %v14933_v4 = vld [vmem:[#allocation17 + $0x98] sm:$0xff] }
0x214e   :  { %5523 = vmatpush1.msra.mxu0 %v14918_v45  ;;  %16841 = vst [vmem:[#allocation88_spill] sm:$0xff] %v14933_v4  ;;  %v14936_v45 = vld [vmem:[#allocation17 + $0x90] sm:$0xff] }
0x214f   :  { %5524 = vmatprep.subr.mxu0 %v14921_v14  ;;  %16842 = vst [vmem:[#allocation89_spill] sm:$0xff] %v14936_v45  ;;  %v14939_v14 = vld [vmem:[#allocation17 + $0x88] sm:$0xff] }
0x2150   :  { %5525 = vmatpush1.msra.mxu0 %v14924_v43  ;;  %16843 = vst [vmem:[#allocation90_spill] sm:$0xff] %v14939_v14  ;;  %v14942_v43 = vld [vmem:[#allocation17 + $0x80] sm:$0xff] }
0x2151   :  { %5526 = vmatprep.subr.mxu0 %v14927_v31  ;;  %16844 = vst [vmem:[#allocation91_spill] sm:$0xff] %v14942_v43  ;;  %v14945_v31 = vld [vmem:[#allocation17 + $0x78] sm:$0xff] }
0x2152   :  { %5527 = vmatpush1.msra.mxu0 %v14930_v20  ;;  %16845 = vst [vmem:[#allocation92_spill] sm:$0xff] %v14945_v31  ;;  %v14948_v20 = vld [vmem:[#allocation17 + $0x70] sm:$0xff] }
0x2153   :  { %5528 = vmatprep.subr.mxu0 %v14933_v4  ;;  %16846 = vst [vmem:[#allocation93_spill] sm:$0xff] %v14948_v20  ;;  %v14951_v4 = vld [vmem:[#allocation17 + $0x68] sm:$0xff] }
0x2154   :  { %5529 = vmatpush1.msra.mxu0 %v14936_v45  ;;  %16847 = vst [vmem:[#allocation94_spill] sm:$0xff] %v14951_v4  ;;  %v14954_v45 = vld [vmem:[#allocation17 + $0x60] sm:$0xff] }
0x2155   :  { %5530 = vmatprep.subr.mxu0 %v14939_v14  ;;  %16848 = vst [vmem:[#allocation95_spill] sm:$0xff] %v14954_v45  ;;  %v14957_v14 = vld [vmem:[#allocation17 + $0x58] sm:$0xff] }
0x2156   :  { %5531 = vmatpush1.msra.mxu0 %v14942_v43  ;;  %16849 = vst [vmem:[#allocation96_spill] sm:$0xff] %v14957_v14  ;;  %v14960_v43 = vld [vmem:[#allocation17 + $0x50] sm:$0xff] }
0x2157   :  { %5532 = vmatprep.subr.mxu0 %v14945_v31  ;;  %16850 = vst [vmem:[#allocation97_spill] sm:$0xff] %v14960_v43  ;;  %v14963_v31 = vld [vmem:[#allocation17 + $0x48] sm:$0xff] }
0x2158   :  { %5533 = vmatpush1.msra.mxu0 %v14948_v20  ;;  %16851 = vst [vmem:[#allocation98_spill] sm:$0xff] %v14963_v31  ;;  %v14966_v20 = vld [vmem:[#allocation17 + $0x40] sm:$0xff] }
0x2159   :  { %5534 = vmatprep.subr.mxu0 %v14951_v4  ;;  %16852 = vst [vmem:[#allocation99_spill] sm:$0xff] %v14966_v20  ;;  %v14969_v4 = vld [vmem:[#allocation17 + $0x38] sm:$0xff] }
0x215a   :  { %5535 = vmatpush1.msra.mxu0 %v14954_v45  ;;  %16853 = vst [vmem:[#allocation100_spill] sm:$0xff] %v14969_v4  ;;  %v14972_v45 = vld [vmem:[#allocation17 + $0x30] sm:$0xff] }
0x215b   :  { %5536 = vmatprep.subr.mxu0 %v14957_v14  ;;  %16854 = vst [vmem:[#allocation101_spill] sm:$0xff] %v14972_v45  ;;  %v14975_v14 = vld [vmem:[#allocation17 + $0x28] sm:$0xff] }
0x215c   :  { %5537 = vmatpush1.msra.mxu0 %v14960_v43  ;;  %16855 = vst [vmem:[#allocation102_spill] sm:$0xff] %v14975_v14  ;;  %v14978_v43 = vld [vmem:[#allocation17 + $0x20] sm:$0xff] }
0x215d   :  { %5538 = vmatprep.subr.mxu0 %v14963_v31  ;;  %16856 = vst [vmem:[#allocation103_spill] sm:$0xff] %v14978_v43  ;;  %v14981_v31 = vld [vmem:[#allocation17 + $0x18] sm:$0xff] }
0x215e   :  { %5539 = vmatpush1.msra.mxu0 %v14966_v20  ;;  %16857 = vst [vmem:[#allocation104_spill] sm:$0xff] %v14981_v31  ;;  %v14984_v20 = vld [vmem:[#allocation17 + $0x10] sm:$0xff] }
0x215f   :  { %5540 = vmatprep.subr.mxu0 %v14969_v4  ;;  %16858 = vst [vmem:[#allocation105_spill] sm:$0xff] %v14984_v20  ;;  %v14987_v4 = vld [vmem:[#allocation17 + $0x8] sm:$0xff] }
0x2160   :  { %5541 = vmatpush1.msra.mxu0 %v14972_v45  ;;  %16859 = vst [vmem:[#allocation106_spill] sm:$0xff] %v14987_v4  ;;  %v14990_v45 = vld [vmem:[#allocation17] sm:$0xff] }
0x2161   :  { %5542 = vmatprep.subr.mxu0 %v14975_v14  ;;  %16860 = vst [vmem:[#allocation107_spill] sm:$0xff] %v14990_v45  ;;  %v14993_v14 = vld [vmem:[#allocation17 + $0x1f8] sm:$0xff] }
0x2162   :  { %5543 = vmatpush1.msra.mxu0 %v14978_v43  ;;  %16861 = vst [vmem:[#allocation108_spill] sm:$0xff] %v14993_v14  ;;  %v14996_v43 = vld [vmem:[#allocation17 + $0x1f0] sm:$0xff] }
0x2163   :  { %5544 = vmatprep.subr.mxu0 %v14981_v31  ;;  %16862 = vst [vmem:[#allocation109_spill] sm:$0xff] %v14996_v43  ;;  %v14999_v31 = vld [vmem:[#allocation17 + $0x1e8] sm:$0xff] }
0x2164   :  { %5545 = vmatpush1.msra.mxu0 %v14984_v20  ;;  %16863 = vst [vmem:[#allocation110_spill] sm:$0xff] %v14999_v31  ;;  %v15002_v20 = vld [vmem:[#allocation17 + $0x1e0] sm:$0xff] }
0x2165   :  { %5546 = vmatprep.subr.mxu0 %v14987_v4  ;;  %16864 = vst [vmem:[#allocation111_spill] sm:$0xff] %v15002_v20  ;;  %v15005_v4 = vld [vmem:[#allocation17 + $0x1d8] sm:$0xff] }
0x2166   :  { %5547 = vmatpush1.msra.mxu0 %v14990_v45  ;;  %16865 = vst [vmem:[#allocation112_spill] sm:$0xff] %v15005_v4  ;;  %v15008_v45 = vld [vmem:[#allocation17 + $0x1d0] sm:$0xff] }
0x2167   :  { %5548 = vmatprep.subr.mxu0 %v14993_v14  ;;  %16866 = vst [vmem:[#allocation113_spill] sm:$0xff] %v15008_v45  ;;  %v15011_v14 = vld [vmem:[#allocation17 + $0x1c8] sm:$0xff] }
0x2168   :  { %5549 = vmatpush2.msra.mxu0 %v14996_v43  ;;  %16867 = vst [vmem:[#allocation114_spill] sm:$0xff] %v15011_v14  ;;  %v15014_v43 = vld [vmem:[#allocation17 + $0x1c0] sm:$0xff] }
0x2169   :  { %5550 = vmatprep.subr.mxu0 %v14999_v31  ;;  %16868 = vst [vmem:[#allocation115_spill] sm:$0xff] %v15014_v43  ;;  %v15017_v31 = vld [vmem:[#allocation17 + $0x1b8] sm:$0xff] }
0x216a   :  { %5551 = vmatpush2.msra.mxu0 %v15002_v20  ;;  %16869 = vst [vmem:[#allocation116_spill] sm:$0xff] %v15017_v31  ;;  %v15020_v20 = vld [vmem:[#allocation17 + $0x1b0] sm:$0xff] }
0x216b   :  { %5552 = vmatprep.subr.mxu0 %v15005_v4  ;;  %16870 = vst [vmem:[#allocation117_spill] sm:$0xff] %v15020_v20  ;;  %v15023_v4 = vld [vmem:[#allocation17 + $0x1a8] sm:$0xff] }
0x216c   :  { %5553 = vmatpush2.msra.mxu0 %v15008_v45  ;;  %16871 = vst [vmem:[#allocation118_spill] sm:$0xff] %v15023_v4  ;;  %v15026_v45 = vld [vmem:[#allocation17 + $0x1a0] sm:$0xff] }
0x216d   :  { %5554 = vmatprep.subr.mxu0 %v15011_v14  ;;  %16872 = vst [vmem:[#allocation119_spill] sm:$0xff] %v15026_v45  ;;  %v15029_v14 = vld [vmem:[#allocation17 + $0x198] sm:$0xff] }
0x216e   :  { %5555 = vmatpush2.msra.mxu0 %v15014_v43  ;;  %16873 = vst [vmem:[#allocation120_spill] sm:$0xff] %v15029_v14  ;;  %v15032_v43 = vld [vmem:[#allocation17 + $0x190] sm:$0xff] }
0x216f   :  { %5556 = vmatprep.subr.mxu0 %v15017_v31  ;;  %16874 = vst [vmem:[#allocation121_spill] sm:$0xff] %v15032_v43  ;;  %v15035_v31 = vld [vmem:[#allocation17 + $0x188] sm:$0xff] }
0x2170   :  { %5557 = vmatpush2.msra.mxu0 %v15020_v20  ;;  %16875 = vst [vmem:[#allocation122_spill] sm:$0xff] %v15035_v31  ;;  %v15038_v20 = vld [vmem:[#allocation17 + $0x180] sm:$0xff] }
0x2171   :  { %5558 = vmatprep.subr.mxu0 %v15023_v4  ;;  %16876 = vst [vmem:[#allocation123_spill] sm:$0xff] %v15038_v20  ;;  %v15041_v4 = vld [vmem:[#allocation17 + $0x178] sm:$0xff] }
0x2172   :  { %5559 = vmatpush2.msra.mxu0 %v15026_v45  ;;  %16877 = vst [vmem:[#allocation124_spill] sm:$0xff] %v15041_v4  ;;  %v15044_v45 = vld [vmem:[#allocation17 + $0x170] sm:$0xff] }
0x2173   :  { %5560 = vmatprep.subr.mxu0 %v15029_v14  ;;  %16878 = vst [vmem:[#allocation125_spill] sm:$0xff] %v15044_v45  ;;  %v15047_v14 = vld [vmem:[#allocation17 + $0x168] sm:$0xff] }
0x2174   :  { %5561 = vmatpush2.msra.mxu0 %v15032_v43  ;;  %16879 = vst [vmem:[#allocation126_spill] sm:$0xff] %v15047_v14  ;;  %v15050_v43 = vld [vmem:[#allocation17 + $0x160] sm:$0xff] }
0x2175   :  { %5562 = vmatprep.subr.mxu0 %v15035_v31  ;;  %16880 = vst [vmem:[#allocation127_spill] sm:$0xff] %v15050_v43  ;;  %v15053_v31 = vld [vmem:[#allocation17 + $0x158] sm:$0xff] }
0x2176   :  { %5563 = vmatpush2.msra.mxu0 %v15038_v20  ;;  %16881 = vst [vmem:[#allocation130_spill] sm:$0xff] %v15053_v31  ;;  %v15056_v20 = vld [vmem:[#allocation17 + $0x150] sm:$0xff] }
0x2177   :  { %5564 = vmatprep.subr.mxu0 %v15041_v4  ;;  %16882 = vst [vmem:[#allocation131_spill] sm:$0xff] %v15056_v20  ;;  %v15059_v4 = vld [vmem:[#allocation17 + $0x148] sm:$0xff] }
0x2178   :  { %5565 = vmatpush2.msra.mxu0 %v15044_v45  ;;  %16883 = vst [vmem:[#allocation132_spill] sm:$0xff] %v15059_v4  ;;  %v15062_v45 = vld [vmem:[#allocation17 + $0x140] sm:$0xff] }
0x2179   :  { %5566 = vmatprep.subr.mxu0 %v15047_v14  ;;  %16884 = vst [vmem:[#allocation133_spill] sm:$0xff] %v15062_v45  ;;  %v15065_v14 = vld [vmem:[#allocation17 + $0x138] sm:$0xff] }
0x217a   :  { %5567 = vmatpush2.msra.mxu0 %v15050_v43  ;;  %16885 = vst [vmem:[#allocation134_spill] sm:$0xff] %v15065_v14  ;;  %v15068_v43 = vld [vmem:[#allocation17 + $0x130] sm:$0xff] }
0x217b   :  { %5568 = vmatprep.subr.mxu0 %v15053_v31  ;;  %16886 = vst [vmem:[#allocation135_spill] sm:$0xff] %v15068_v43  ;;  %v15071_v31 = vld [vmem:[#allocation17 + $0x128] sm:$0xff] }
0x217c   :  { %5569 = vmatpush2.msra.mxu0 %v15056_v20  ;;  %v15074_v20 = vld [vmem:[#allocation17 + $0x120] sm:$0xff] }
0x217d   :  { %5570 = vmatprep.subr.mxu0 %v15059_v4  ;;  %v15077_v4 = vld [vmem:[#allocation17 + $0x118] sm:$0xff] }
0x217e   :  { %5571 = vmatpush2.msra.mxu0 %v15062_v45  ;;  %v15080_v45 = vld [vmem:[#allocation17 + $0x110] sm:$0xff] }
0x217f   :  { %5572 = vmatprep.subr.mxu0 %v15065_v14  ;;  %v15083_v14 = vld [vmem:[#allocation17 + $0x108] sm:$0xff] }
0x2180   :  { %5573 = vmatpush2.msra.mxu0 %v15068_v43  ;;  %v15086_v43 = vld [vmem:[#allocation17 + $0x100] sm:$0xff] }
0x2181   :  { %5574 = vmatprep.subr.mxu0 %v15071_v31 }
0x2182   :  { %5575 = vmatpush2.msra.mxu0 %v15074_v20 }
0x2183   :  { %5576 = vmatprep.subr.mxu0 %v15077_v4 }
0x2184   :  { %5577 = vmatpush2.msra.mxu0 %v15080_v45 }
0x2185   :  { %5578 = vmatprep.subr.mxu0 %v15083_v14 }
0x2186   :  { %5579 = vmatpush2.msra.mxu0 %v15086_v43 }
0x2187   :  { %5581 = vmatmul.mubr.f32.vlgmr.msra.gmra.mxu0 %v14609_v18  ;;  %5744 = vmatprep.subr.mxu0 %v14423_v42  ;;  %v10115_v18 = vld [vmem:[#allocation8 + $0x28] sm:$0xff] }
0x2188   :  { %5745 = vmatpush1.msra.mxu0 %v14426_v28  ;;  %5808 = vmatprep.mubr.f32.mxu0 %v16109_v0  ;;  %v15127_v28 = vld [vmem:[%s15527_s12] ss:$0 sm:$0xff] }
0x2189   :  { %5746 = vmatprep.subr.mxu0 %v14430_v11 }
0x218a   :  { %5747 = vmatpush1.msra.mxu0 %v14433_v35 }
0x218b   :  { %5748 = vmatprep.subr.mxu0 %v14436_v6 }
0x218c   :  { %5749 = vmatpush1.msra.mxu0 %v14439_v12  ;;  %v10089_v12 = vld [vmem:[%s16022_s25 + $0x78] sm:$0xff] }
0x218d   :  { %5750 = vmatprep.subr.mxu0 %v14442_v51  ;;  %v10090_v51 = vld [vmem:[%s16022_s25 + $0x70] sm:$0xff] }
0x218e   :  { %5751 = vmatpush1.msra.mxu0 %v14445_v38  ;;  %v10091_v38 = vld [vmem:[%s16022_s25 + $0x68] sm:$0xff] }
0x218f   :  { %5752 = vmatprep.subr.mxu0 %v14448_v37  ;;  %v10092_v37 = vld [vmem:[%s16022_s25 + $0x60] sm:$0xff] }
0x2190   :  { %5753 = vmatpush1.msra.mxu0 %v14451_v33  ;;  %v10093_v33 = vld [vmem:[%s16022_s25 + $0x58] sm:$0xff] }
0x2191   :  { %5754 = vmatprep.subr.mxu0 %v14454_v56  ;;  %v10094_v56 = vld [vmem:[%s16022_s25 + $0x50] sm:$0xff] }
0x2192   :  { %5755 = vmatpush1.msra.mxu0 %v14457_v29  ;;  %v10095_v29 = vld [vmem:[%s16022_s25 + $0x48] sm:$0xff] }
0x2193   :  { %5756 = vmatprep.subr.mxu0 %v14460_v39  ;;  %v10096_v39 = vld [vmem:[%s16022_s25 + $0x40] sm:$0xff] }
0x2194   :  { %5757 = vmatpush1.msra.mxu0 %v14463_v7  ;;  %v10097_v7 = vld [vmem:[%s16022_s25 + $0x38] sm:$0xff] }
0x2195   :  { %5758 = vmatprep.subr.mxu0 %v14466_v50  ;;  %v10098_v50 = vld [vmem:[%s16022_s25 + $0x30] sm:$0xff] }
0x2196   :  { %5759 = vmatpush1.msra.mxu0 %v14469_v8  ;;  %v10099_v8 = vld [vmem:[%s16022_s25 + $0x28] sm:$0xff] }
0x2197   :  { %5760 = vmatprep.subr.mxu0 %v14472_v44  ;;  %v10100_v44 = vld [vmem:[%s16022_s25 + $0x20] sm:$0xff] }
0x2198   :  { %5761 = vmatpush1.msra.mxu0 %v14475_v48  ;;  %v10101_v48 = vld [vmem:[%s16022_s25 + $0x18] sm:$0xff] }
0x2199   :  { %5762 = vmatprep.subr.mxu0 %v14478_v22  ;;  %v10102_v22 = vld [vmem:[%s16022_s25 + $0x10] sm:$0xff] }
0x219a   :  { %5763 = vmatpush1.msra.mxu0 %v14481_v16  ;;  %v10103_v16 = vld [vmem:[%s16022_s25 + $0x8] sm:$0xff] }
0x219b   :  { %5764 = vmatprep.subr.mxu0 %v14484_v53  ;;  %v5602_v53 = vld [vmem:[#allocation3 + $0x38] sm:$0xff] }
0x219c   :  { %5765 = vmatpush1.msra.mxu0 %v14487_v49  ;;  %v10104_v49 = vld [vmem:[%s16022_s25] sm:$0xff] }
0x219d   :  { %5766 = vmatprep.subr.mxu0 %v14490_v21  ;;  %v10105_v21 = vld [vmem:[#allocation8 + $0x78] sm:$0xff] }
0x219e   :  { %5767 = vmatpush1.msra.mxu0 %v14493_v60  ;;  %v10106_v60 = vld [vmem:[#allocation8 + $0x70] sm:$0xff] }
0x219f   :  { %5768 = vmatprep.subr.mxu0 %v14496_v24  ;;  %v10107_v24 = vld [vmem:[#allocation8 + $0x68] sm:$0xff] }
0x21a0   :  { %5769 = vmatpush1.msra.mxu0 %v14499_v9  ;;  %v10108_v9 = vld [vmem:[#allocation8 + $0x60] sm:$0xff] }
0x21a1   :  { %5770 = vmatprep.subr.mxu0 %v14502_v54  ;;  %v10109_v54 = vld [vmem:[#allocation8 + $0x58] sm:$0xff] }
0x21a2   :  { %5771 = vmatpush1.msra.mxu0 %v14505_v25  ;;  %v10110_v25 = vld [vmem:[#allocation8 + $0x50] sm:$0xff] }
0x21a3   :  { %5772 = vmatprep.subr.mxu0 %v14508_v40  ;;  %v10111_v40 = vld [vmem:[#allocation8 + $0x48] sm:$0xff] }
0x21a4   :  { %5773 = vmatpush1.msra.mxu0 %v14511_v57  ;;  %v10112_v57 = vld [vmem:[#allocation8 + $0x40] sm:$0xff] }
0x21a5   :  { %5774 = vmatprep.subr.mxu0 %v14514_v17  ;;  %v10113_v17 = vld [vmem:[#allocation8 + $0x38] sm:$0xff] }
0x21a6   :  { %5775 = vmatpush1.msra.mxu0 %v14517_v15  ;;  %v10114_v15 = vld [vmem:[#allocation8 + $0x30] sm:$0xff] }
0x21a7   :  { %9203 = vmatprep.subr.mxu0 %v16109_v0 }
0x2207   :  { %v5438_v42 = vpop.f32.mrf.mxu0 }
0x2208   :  { %v5439_v11 = vadd.f32 %v15127_v28, %v5438_v42  ;;  %v10116_v42 = vld [vmem:[#allocation8 + $0x20] sm:$0xff] }
0x2209   :  { %v9062_v35 = vpop.f32.mrf.mxu0 }
0x220a   :  { %v5442_v6 = vmax.f32 %v5439_v11, 0.0  ;;  %v10117_v11 = vld [vmem:[#allocation8 + $0x18] sm:$0xff]  ;;  %v10118_v35 = vld [vmem:[#allocation8 + $0x10] sm:$0xff] }
0x220c   :  { %9096 = vmatmul.mubr.f32.vlgmr.msra.gmra.mxu1 %v5442_v6  ;;  %v10119_v6 = vld [vmem:[#allocation8 + $0x8] sm:$0xff] }
0x220d   :  { %9099 = vmatpush3.msra.mxu1 %v10089_v12  ;;  %9130 = vmatprep.mubr.msk.f32.mxu1 %vm10383_vm0, %v16109_v0  ;;  %v10120_v12 = vld [vmem:[#allocation8] sm:$0xff] }
0x220e   :  { %9100 = vmatprep.subr.mxu1 %v16109_v0 }
0x220f   :  { %9101 = vmatpush3.msra.mxu1 %v10090_v51 }
0x2210   :  { %9102 = vmatprep.subr.mxu1 %v16109_v0 }
0x2211   :  { %9103 = vmatpush3.msra.mxu1 %v10091_v38 }
0x2212   :  { %9104 = vmatprep.subr.mxu1 %v16109_v0 }
0x2213   :  { %9105 = vmatpush3.msra.mxu1 %v10092_v37  ;;  %v16887_v37 = vld [vmem:[#allocation128_spill] sm:$0xff] }
0x2214   :  { %9106 = vmatprep.subr.mxu1 %v16109_v0 }
0x2215   :  { %9107 = vmatpush3.msra.mxu1 %v10093_v33 }
0x2216   :  { %9108 = vmatprep.subr.mxu1 %v16109_v0 }
0x2217   :  { %9109 = vmatpush3.msra.mxu1 %v10094_v56 }
0x2218   :  { %9110 = vmatprep.subr.mxu1 %v16109_v0 }
0x2219   :  { %9111 = vmatpush3.msra.mxu1 %v10095_v29 }
0x221a   :  { %9112 = vmatprep.subr.mxu1 %v16109_v0 }
0x221b   :  { %9113 = vmatpush3.msra.mxu1 %v10096_v39 }
0x221c   :  { %9114 = vmatprep.subr.mxu1 %v16109_v0 }
0x221d   :  { %9115 = vmatpush3.msra.mxu1 %v10097_v7 }
0x221e   :  { %9116 = vmatprep.subr.mxu1 %v16109_v0 }
0x221f   :  { %9117 = vmatpush3.msra.mxu1 %v10098_v50  ;;  %v15219_v50 = vld [vmem:[%s15529_s14] ss:$0 sm:$0xff] }
0x2220   :  { %9118 = vmatprep.subr.mxu1 %v16109_v0 }
0x2221   :  { %9119 = vmatpush3.msra.mxu1 %v10099_v8 }
0x2222   :  { %9120 = vmatprep.subr.mxu1 %v16109_v0 }
0x2223   :  { %9121 = vmatpush3.msra.mxu1 %v10100_v44 }
0x2224   :  { %9122 = vmatprep.subr.mxu1 %v16109_v0 }
0x2225   :  { %9123 = vmatpush3.msra.mxu1 %v10101_v48 }
0x2226   :  { %9124 = vmatprep.subr.mxu1 %v16109_v0 }
0x2227   :  { %9125 = vmatpush3.msra.mxu1 %v10102_v22 }
0x2228   :  { %9126 = vmatprep.subr.mxu1 %v16109_v0 }
0x2229   :  { %9127 = vmatpush3.msra.mxu1 %v10103_v16 }
0x222a   :  { %9128 = vmatprep.subr.mxu1 %v16109_v0 }
0x222b   :  { %9129 = vmatpush3.msra.mxu1 %v10104_v49 }
0x222c   :  { %9131 = vmatmul.mubr.f32.vlgmr.msra.gmra.mxu1 %v5602_v53  ;;  %9133 = vmatprep.subr.mxu1 %v16109_v0 }
0x222d   :  { %9134 = vmatpush3.msra.mxu1 %v10105_v21  ;;  %9165 = vmatprep.mubr.msk.f32.mxu1 %vm10383_vm0, %v16109_v0 }
0x222e   :  { %9135 = vmatprep.subr.mxu1 %v16109_v0 }
0x222f   :  { %9136 = vmatpush3.msra.mxu1 %v10106_v60 }
0x2230   :  { %9137 = vmatprep.subr.mxu1 %v16109_v0 }
0x2231   :  { %9138 = vmatpush3.msra.mxu1 %v10107_v24 }
0x2232   :  { %9139 = vmatprep.subr.mxu1 %v16109_v0 }
0x2233   :  { %9140 = vmatpush3.msra.mxu1 %v10108_v9 }
0x2234   :  { %9141 = vmatprep.subr.mxu1 %v16109_v0 }
0x2235   :  { %9142 = vmatpush3.msra.mxu1 %v10109_v54 }
0x2236   :  { %9143 = vmatprep.subr.mxu1 %v16109_v0 }
0x2237   :  { %9144 = vmatpush3.msra.mxu1 %v10110_v25 }
0x2238   :  { %9145 = vmatprep.subr.mxu1 %v16109_v0 }
0x2239   :  { %9146 = vmatpush3.msra.mxu1 %v10111_v40 }
0x223a   :  { %9147 = vmatprep.subr.mxu1 %v16109_v0 }
0x223b   :  { %9148 = vmatpush3.msra.mxu1 %v10112_v57  ;;  %v10122_v57 = vld [vmem:[#allocation11 + $0x78] sm:$0xff] }
0x223c   :  { %9149 = vmatprep.subr.mxu1 %v16109_v0 }
0x223d   :  { %9150 = vmatpush3.msra.mxu1 %v10113_v17  ;;  %v10124_v17 = vld [vmem:[#allocation11 + $0x68] sm:$0xff] }
0x223e   :  { %9151 = vmatprep.subr.mxu1 %v16109_v0 }
0x223f   :  { %9152 = vmatpush3.msra.mxu1 %v10114_v15  ;;  %v10125_v15 = vld [vmem:[#allocation11 + $0x60] sm:$0xff] }
0x2240   :  { %9153 = vmatprep.subr.mxu1 %v16109_v0 }
0x2241   :  { %9154 = vmatpush3.msra.mxu1 %v10115_v18  ;;  %v10126_v18 = vld [vmem:[%s16023_s2] ss:$0 sm:$0xff] }
0x2242   :  { %9155 = vmatprep.subr.mxu1 %v16109_v0 }
0x2243   :  { %9156 = vmatpush3.msra.mxu1 %v10116_v42 }
0x2244   :  { %9157 = vmatprep.subr.mxu1 %v16109_v0 }
0x2245   :  { %9158 = vmatpush3.msra.mxu1 %v10117_v11 }
0x2246   :  { %9159 = vmatprep.subr.mxu1 %v16109_v0 }
0x2247   :  { %9160 = vmatpush3.msra.mxu1 %v10118_v35  ;;  %v5582_v51 = vpop.f32.mrf.mxu0  ;;  %v10127_v35 = vld [vmem:[#allocation11 + $0x58] sm:$0xff] }
0x2248   :  { %9161 = vmatprep.subr.mxu1 %v16109_v0  ;;  %v5583_v56 = vadd.f32 %v5582_v51, %v16774_v1  ;;  %v10129_v51 = vld [vmem:[#allocation11 + $0x48] sm:$0xff] }
0x2249   :  { %9162 = vmatpush3.msra.mxu1 %v10119_v6  ;;  %v5584_v38 = vpop.f32.mrf.mxu0 }
0x224a   :  { %9163 = vmatprep.subr.mxu1 %v16109_v0  ;;  %v5585_v33 = vadd.f32 %v5584_v38, %v16887_v37  ;;  %v5587_v39 = vmul.f32 0.5, %v5583_v56  ;;  %v10130_v38 = vld [vmem:[%s15532_s17 + $0x78] sm:$0xff]  ;;  %v10132_v56 = vld [vmem:[%s15532_s17 + $0x70] sm:$0xff] }
0x224b   :  { %9164 = vmatpush3.msra.mxu1 %v10120_v12  ;;  %v10128_v12 = vld [vmem:[#allocation11 + $0x50] sm:$0xff] }
0x224c   :  { %9168 = vmatprep.subr.mxu1 %v16109_v0  ;;  %v5593_v29 = vmul.f32 0.5, %v5585_v33  ;;  %v10131_v33 = vld [vmem:[#allocation11 + $0x40] sm:$0xff] }
0x224e   :  { %9428 = vtanh.f32 %v5593_v29  ;;  %v10133_v29 = vld [vmem:[#allocation11 + $0x38] sm:$0xff] }
0x224f   :  { %9430 = vtanh.f32 %v5587_v39  ;;  %v10134_v39 = vld [vmem:[%s15532_s17 + $0x68] sm:$0xff] }
0x225b   :  { %v9429_v16 = vpop.eup %9428 }
0x225c   :  { %v9431_v53 = vpop.eup %9430  ;;  %v5595_v49 = vadd.f32 1.0, %v9429_v16  ;;  %v10140_v16 = vld [vmem:[%s15532_s17 + $0x50] sm:$0xff] }
0x225d   :  { %v5589_v21 = vadd.f32 1.0, %v9431_v53  ;;  %v10141_v53 = vld [vmem:[#allocation11 + $0x18] sm:$0xff] }
0x225e   :  { %v5596_v60 = vmul.f32 0.5, %v5595_v49  ;;  %v10142_v49 = vld [vmem:[%s15532_s17 + $0x48] sm:$0xff] }
0x225f   :  { %v5590_v24 = vmul.f32 0.5, %v5589_v21  ;;  %v10143_v21 = vld [vmem:[#allocation11 + $0x10] sm:$0xff] }
0x2260   :  { %v5597_v54 = vmul.f32 %v5596_v60, %v14595_v47  ;;  %v10144_v60 = vld [vmem:[%s15532_s17 + $0x40] sm:$0xff] }
0x22cc   :  { %v5509_v7 = vpop.f32.mrf.mxu1 }
0x22cd   :  { %v5510_v8 = vadd.f32 %v15219_v50, %v5509_v7  ;;  %v10135_v7 = vld [vmem:[#allocation11 + $0x30] sm:$0xff] }
0x22ce   :  { %v9097_v44 = vpop.f32.mrf.mxu1 }
0x22cf   :  { %v5513_v48 = vmax.f32 %v5510_v8, 0.0  ;;  %v10136_v8 = vld [vmem:[%s15532_s17 + $0x60] sm:$0xff]  ;;  %v10137_v44 = vld [vmem:[#allocation11 + $0x28] sm:$0xff] }
0x22d1   :  { %v5514_v22 = vadd.f32 %v5513_v48, %v14897_v46  ;;  %v10123_v46 = vld [vmem:[#allocation11 + $0x70] sm:$0xff] }
0x22d2   :  { %v10138_v48 = vld [vmem:[%s15532_s17 + $0x58] sm:$0xff] }
0x22d3   :  { %9432 = vtanh.f32 %v5514_v22  ;;  %v10139_v22 = vld [vmem:[#allocation11 + $0x20] sm:$0xff] }
0x22e0   :  { %v9433_v9 = vpop.eup %9432 }
0x22e1   :  { %v5592_v25 = vmul.f32 %v9433_v9, %v5590_v24  ;;  %v10145_v24 = vld [vmem:[#allocation11 + $0x8] sm:$0xff]  ;;  %v10146_v9 = vld [vmem:[%s15532_s17 + $0x38] sm:$0xff] }
0x22e3   :  { %v15224_v40 = vadd.f32 %v5597_v54, %v5592_v25  ;;  %v10147_v54 = vld [vmem:[#allocation11] sm:$0xff]  ;;  %v10148_v25 = vld [vmem:[%s15532_s17 + $0x30] sm:$0xff] }
0x22e5   :  { %9166 = vmatmul.mubr.f32.vlgmr.msra.gmra.mxu1 %v15224_v40  ;;  %5600 = vst [vmem:[#allocation18 + $0x30] sm:$0xff] %v15224_v40 }
0x22e6   :  { %9169 = vmatpush3.msra.mxu1 %v10122_v57  ;;  %9200 = vmatprep.mubr.msk.f32.mxu1 %vm10383_vm0, %v16109_v0  ;;  %v10149_v57 = vld [vmem:[%s15532_s17 + $0x28] sm:$0xff] }
0x22e7   :  { %9170 = vmatprep.subr.mxu1 %v16109_v0 }
0x22e8   :  { %9171 = vmatpush3.msra.mxu1 %v10123_v46  ;;  %v10150_v46 = vld [vmem:[%s15532_s17 + $0x20] sm:$0xff] }
0x22e9   :  { %9172 = vmatprep.subr.mxu1 %v16109_v0 }
0x22ea   :  { %9173 = vmatpush3.msra.mxu1 %v10124_v17  ;;  %v10151_v17 = vld [vmem:[%s15533_s18] sm:$0xf] }
0x22eb   :  { %9174 = vmatprep.subr.mxu1 %v16109_v0 }
0x22ec   :  { %v5669_v47 = vpop.f32.mrf.mxu1  ;;  %9175 = vmatpush3.msra.mxu1 %v10125_v15  ;;  %v10153_v15 = vld [vmem:[%s15532_s17 + $0x10] sm:$0xff] }
0x22ed   :  { %v15236_v42 = vadd.f32 %v10126_v18, %v5669_v47  ;;  %9176 = vmatprep.subr.mxu1 %v16109_v0  ;;  %v10152_v47 = vld [vmem:[%s15532_s17 + $0x18] sm:$0xff]  ;;  %v10154_v18 = vld [vmem:[%s15532_s17 + $0x8] sm:$0xff] }
0x22ee   :  { %v9132_v11 = vpop.f32.mrf.mxu1  ;;  %9177 = vmatpush3.msra.mxu1 %v10127_v35 }
0x22ef   :  { %v5743_v6 = vsub.f32 %v15224_v40, %v15236_v42  ;;  %9178 = vmatprep.subr.mxu1 %v16109_v0  ;;  %v10155_v11 = vld [vmem:[%s15532_s17] sm:$0xff] }
0x22f0   :  { %9179 = vmatpush3.msra.mxu1 %v10128_v12  ;;  %v10156_v12 = vld [vmem:[%s15520_s5] ss:$0 sm:$0xff]  ;;  %s10384_s5 = smov [#allocation18]  }
0x22f1   :  { %5809 = vmatmul.mubr.f32.vlgmr.msra.gmra.mxu0 %v5743_v6  ;;  %9180 = vmatprep.subr.mxu1 %v16109_v0  ;;  %s6342_s17 = sshll.u32 %s10384_s5, 4  ;;  %s6343_s17 = int_to_ptr.vmem [resolvable:$true] %s6342_s17 }
0x22f2   :  { %9181 = vmatpush3.msra.mxu1 %v10129_v51  ;;  %9204 = vmatpush3.msra.mxu0 %v10130_v38  ;;  %s10337_s28 = scalar_lea.vmem %s6343_s17, 1024  ;;  %p10342_p4 = scmp.lt.s32.totalorder %s6343_s17, %s6343_s17 }
0x22f3   :  { %9182 = vmatprep.subr.mxu1 %v16109_v0  ;;  %9205 = vmatprep.subr.mxu0 %v16109_v0  ;;  %p10338_p3 = scmp.ne.s32.totalorder %s6343_s17, %s10337_s28  ;;  %p10343_p5 = scmp.lt.s32.totalorder %s10337_s28, %s10337_s28 }
0x22f4   :  { %9183 = vmatpush3.msra.mxu1 %v10131_v33  ;;  %9206 = vmatpush3.msra.mxu0 %v10132_v56  ;;  %v16897_v56 = vld [vmem:[#allocation56_spill] sm:$0xff] }
0x22f5   :  { %9184 = vmatprep.subr.mxu1 %v16109_v0  ;;  %9207 = vmatprep.subr.mxu0 %v16109_v0  ;;  %p10344_p6 = por %p10343_p5, %p10342_p4 }
0x22f6   :  { %9185 = vmatpush3.msra.mxu1 %v10133_v29  ;;  %9208 = vmatpush3.msra.mxu0 %v10134_v39  ;;  %v16898_v29 = vld [vmem:[#allocation57_spill] sm:$0xff]  ;;  %v16899_v39 = vld [vmem:[#allocation58_spill] sm:$0xff] }
0x22f7   :  { %9186 = vmatprep.subr.mxu1 %v16109_v0  ;;  %9209 = vmatprep.subr.mxu0 %v16109_v0  ;;  %p10345_p7 = pnand %p10344_p6, %p10338_p3 }
0x22f8   :  { %9187 = vmatpush3.msra.mxu1 %v10135_v7  ;;  %9210 = vmatpush3.msra.mxu0 %v10136_v8  ;;  %v16900_v7 = vld [vmem:[#allocation59_spill] sm:$0xff]  ;;  %v16901_v8 = vld [vmem:[#allocation60_spill] sm:$0xff] }
0x22f9   :  { %9188 = vmatprep.subr.mxu1 %v16109_v0  ;;  %9211 = vmatprep.subr.mxu0 %v16109_v0 }
0x22fa   :  { %9189 = vmatpush3.msra.mxu1 %v10137_v44  ;;  %9212 = vmatpush3.msra.mxu0 %v10138_v48  ;;  %v16902_v44 = vld [vmem:[#allocation61_spill] sm:$0xff] }
0x22fb   :  { %9190 = vmatprep.subr.mxu1 %v16109_v0  ;;  %9213 = vmatprep.subr.mxu0 %v16109_v0 }
0x22fc   :  { %9191 = vmatpush3.msra.mxu1 %v10139_v22  ;;  %9214 = vmatpush3.msra.mxu0 %v10140_v16 }
0x22fd   :  { %9192 = vmatprep.subr.mxu1 %v16109_v0  ;;  %9215 = vmatprep.subr.mxu0 %v16109_v0 }
0x22fe   :  { %9193 = vmatpush3.msra.mxu1 %v10141_v53  ;;  %9216 = vmatpush3.msra.mxu0 %v10142_v49 }
0x22ff   :  { %9194 = vmatprep.subr.mxu1 %v16109_v0  ;;  %9217 = vmatprep.subr.mxu0 %v16109_v0 }
0x2300   :  { %9195 = vmatpush3.msra.mxu1 %v10143_v21  ;;  %9218 = vmatpush3.msra.mxu0 %v10144_v60  ;;  %v16903_v21 = vld [vmem:[#allocation62_spill] sm:$0xff]  ;;  %v16904_v60 = vld [vmem:[#allocation63_spill] sm:$0xff] }
0x2301   :  { %9196 = vmatprep.subr.mxu1 %v16109_v0  ;;  %9219 = vmatprep.subr.mxu0 %v16109_v0 }
0x2302   :  { %9197 = vmatpush3.msra.mxu1 %v10145_v24  ;;  %9220 = vmatpush3.msra.mxu0 %v10146_v9  ;;  %v16906_v24 = vld [vmem:[#allocation65_spill] sm:$0xff]  ;;  %v16908_v9 = vld [vmem:[#allocation67_spill] sm:$0xff] }
0x2303   :  { %9198 = vmatprep.subr.mxu1 %v16109_v0  ;;  %9221 = vmatprep.subr.mxu0 %v16109_v0 }
0x2304   :  { %9199 = vmatpush3.msra.mxu1 %v10147_v54  ;;  %9222 = vmatpush3.msra.mxu0 %v10148_v25  ;;  %v16909_v54 = vld [vmem:[#allocation68_spill] sm:$0xff]  ;;  %v16910_v25 = vld [vmem:[#allocation69_spill] sm:$0xff] }
0x2305   :  { %9201 = vmatmul.mubr.f32.vlgmr.msra.gmra.mxu1 %v15236_v42  ;;  %9223 = vmatprep.subr.mxu0 %v16109_v0 }
0x2306   :  { %9224 = vmatpush3.msra.mxu0 %v10149_v57  ;;  %9235 = vmatprep.mubr.msk.f32.mxu0 %vm10383_vm0, %v16109_v0  ;;  %v16911_v57 = vld [vmem:[#allocation70_spill] sm:$0xff] }
0x2307   :  { %9225 = vmatprep.subr.mxu0 %v16109_v0  ;;  %9238 = vmatprep.subr.mxu1 %v16109_v0 }
0x2308   :  { %9226 = vmatpush3.msra.mxu0 %v10150_v46  ;;  %9239 = vmatpush3.msk.msra.mxu1 %vm786_vm1, %v10151_v17  ;;  %v16912_v46 = vld [vmem:[#allocation71_spill] sm:$0xff]  ;;  %v16913_v17 = vld [vmem:[#allocation72_spill] sm:$0xff] }
0x2309   :  { %9227 = vmatprep.subr.mxu0 %v16109_v0  ;;  %9240 = vmatprep.mubr.msk.f32.mxu1 %vm10383_vm0, %v16109_v0 }
0x230a   :  { %9228 = vmatpush3.msra.mxu0 %v10152_v47  ;;  %9278 = vmatprep.subr.mxu1 %v16109_v0  ;;  %v16914_v47 = vld [vmem:[#allocation73_spill] sm:$0xff] }
0x230b   :  { %9229 = vmatprep.subr.mxu0 %v16109_v0 }
0x230c   :  { %9230 = vmatpush3.msra.mxu0 %v10153_v15  ;;  %v16915_v15 = vld [vmem:[#allocation74_spill] sm:$0xff] }
0x230d   :  { %9231 = vmatprep.subr.mxu0 %v16109_v0 }
0x230e   :  { %9232 = vmatpush3.msra.mxu0 %v10154_v18  ;;  %v16916_v18 = vld [vmem:[#allocation75_spill] sm:$0xff] }
0x230f   :  { %9233 = vmatprep.subr.mxu0 %v16109_v0 }
0x2310   :  { %9234 = vmatpush3.msra.mxu0 %v10155_v11  ;;  %v16917_v11 = vld [vmem:[#allocation76_spill] sm:$0xff] }
0x2311   :  { %9243 = vmatprep.subr.mxu0 %v16109_v0 }
0x23a5   :  { %v5739_v35 = vpop.f32.mrf.mxu1 }
0x23a6   :  { %v5740_v51 = vadd.f32 %v10156_v12, %v5739_v35 }
0x23a7   :  { %v9167_v6 = vpop.f32.mrf.mxu1 }
0x23b1   :  { %v5810_v38 = vpop.f32.mrf.mxu0 }
0x23b2   :  { %v5885_v33 = vmul.f32 %v5810_v38, %v5740_v51  ;;  %v16918_v51 = vld [vmem:[#allocation77_spill] sm:$0xff] }
0x23b4   :  { %9236 = vmatmul.mubr.f32.vlgmr.msra.gmra.mxu0 %v5885_v33 }
0x23b5   :  { %9244 = vmatpush3.msra.mxu0 %v14750_v36  ;;  %9275 = vmatprep.mubr.msk.f32.mxu0 %vm10383_vm0, %v16109_v0 }
0x23b6   :  { %9245 = vmatprep.subr.mxu0 %v16109_v0 }
0x23b7   :  { %9246 = vmatpush3.msra.mxu0 %v14756_v41 }
0x23b8   :  { %9247 = vmatprep.subr.mxu0 %v16109_v0 }
0x23b9   :  { %9248 = vmatpush3.msra.mxu0 %v14760_v5 }
0x23ba   :  { %9249 = vmatprep.subr.mxu0 %v16109_v0 }
0x23bb   :  { %9250 = vmatpush3.msra.mxu0 %v14764_v13 }
0x23bc   :  { %9251 = vmatprep.subr.mxu0 %v16109_v0 }
0x23bd   :  { %9252 = vmatpush3.msra.mxu0 %v14768_v34 }
0x23be   :  { %9253 = vmatprep.subr.mxu0 %v16109_v0 }
0x23bf   :  { %9254 = vmatpush3.msra.mxu0 %v14772_v2  ;;  %v16892_v2 = vld [vmem:[#allocation51_spill] sm:$0xff] }
0x23c0   :  { %9255 = vmatprep.subr.mxu0 %v16109_v0 }
0x23c1   :  { %9256 = vmatpush3.msra.mxu0 %v14776_v27  ;;  %v16894_v27 = vld [vmem:[#allocation53_spill] sm:$0xff] }
0x23c2   :  { %9257 = vmatprep.subr.mxu0 %v16109_v0 }
0x23c3   :  { %9258 = vmatpush3.msra.mxu0 %v14780_v30  ;;  %v16895_v30 = vld [vmem:[#allocation54_spill] sm:$0xff] }
0x23c4   :  { %9259 = vmatprep.subr.mxu0 %v16109_v0 }
0x23c5   :  { %v5881_v36 = vpop.f32.mrf.mxu1  ;;  %9260 = vmatpush3.msra.mxu0 %v14784_v52  ;;  %v16896_v52 = vld [vmem:[#allocation55_spill] sm:$0xff] }
0x23c6   :  { %9261 = vmatprep.subr.mxu0 %v16109_v0  ;;  %v5882_v22 = vadd.f32 %v14819_v19, %v5881_v36  ;;  %v16905_v19 = vld [vmem:[#allocation64_spill] sm:$0xff]  ;;  %v16919_v36 = vld [vmem:[#allocation78_spill] sm:$0xff] }
0x23c7   :  { %v9202_v41 = vpop.f32.mrf.mxu1  ;;  %9262 = vmatpush3.msra.mxu0 %v14788_v10 }
0x23c8   :  { %9263 = vmatprep.subr.mxu0 %v16109_v0  ;;  %v16921_v41 = vld [vmem:[#allocation80_spill] sm:$0xff] }
0x23c9   :  { %9264 = vmatpush3.msra.mxu0 %v14792_v3  ;;  %v5812_v3 = vpop.f32.mrf.mxu0 }
0x23ca   :  { %9265 = vmatprep.subr.mxu0 %v16109_v0 }
0x23cb   :  { %9266 = vmatpush3.msra.mxu0 %v14796_v63 }
0x23cc   :  { %9267 = vmatprep.subr.mxu0 %v16109_v0 }
0x23cd   :  { %9268 = vmatpush3.msra.mxu0 %v14800_v61 }
0x23ce   :  { %9269 = vmatprep.subr.mxu0 %v16109_v0 }
0x23cf   :  { %9270 = vmatpush3.msra.mxu0 %v14804_v59  ;;  %v16890_v59 = vld [vmem:[#allocation49_spill] sm:$0xff] }
0x23d0   :  { %9271 = vmatprep.subr.mxu0 %v16109_v0 }
0x23d1   :  { %9272 = vmatpush3.msra.mxu0 %v14808_v58  ;;  %v16889_v58 = vld [vmem:[#allocation48_spill] sm:$0xff] }
0x23d2   :  { %9273 = vmatprep.subr.mxu0 %v16109_v0 }
0x23d3   :  { %9274 = vmatpush3.msra.mxu0 %v14812_v55  ;;  %v16888_v55 = vld [vmem:[#allocation47_spill] sm:$0xff] }
0x23d4   :  { %9313 = vmatprep.subr.mxu0 %v16109_v0 }
0x2474   :  { %v5952_v63 = vpop.f32.mrf.mxu0 }
0x2475   :  { %v5956_v10 = vmul.f32 0.5, %v5952_v63  ;;  %v16923_v63 = vld [vmem:[#allocation82_spill] sm:$0xff] }
0x2476   :  { %v9237_v5 = vpop.f32.mrf.mxu0 }
0x2477   :  { %9434 = vtanh.f32 %v5956_v10  ;;  %v16924_v10 = vld [vmem:[#allocation83_spill] sm:$0xff]  ;;  %v16925_v5 = vld [vmem:[#allocation84_spill] sm:$0xff] }
0x2478   :  { %9436 = vtanh.f32 %v15224_v40 }
0x2484   :  { %v9435_v61 = vpop.eup %9434 }
0x2485   :  { %v5958_v13 = vadd.f32 1.0, %v9435_v61  ;;  %v9437_v33 = vpop.eup %9436  ;;  %v16926_v61 = vld [vmem:[#allocation85_spill] sm:$0xff] }
0x2487   :  { %v5959_v34 = vmul.f32 0.5, %v5958_v13  ;;  %v16927_v13 = vld [vmem:[#allocation86_spill] sm:$0xff] }
0x2489   :  { %9241 = vmatmul.mubr.msk.f32.vlgmr.msra.gmra.mxu1 %vm782_vm2, %v5959_v34  ;;  %v16929_v34 = vld [vmem:[#allocation88_spill] sm:$0xff] }
0x248a   :  { %9279 = vmatpush3.msra.mxu1 %v14679_v32  ;;  %9310 = vmatprep.mubr.msk.f32.mxu1 %vm10383_vm0, %v16109_v0  ;;  %v16891_v32 = vld [vmem:[#allocation50_spill] sm:$0xff] }
0x248b   :  { %9280 = vmatprep.subr.mxu1 %v16109_v0 }
0x248c   :  { %9281 = vmatpush3.msra.mxu1 %v14685_v26  ;;  %v16893_v26 = vld [vmem:[#allocation52_spill] sm:$0xff] }
0x248d   :  { %9282 = vmatprep.subr.mxu1 %v16109_v0 }
0x248e   :  { %9283 = vmatpush3.msra.mxu1 %v16888_v55  ;;  %v16930_v55 = vld [vmem:[#allocation89_spill] sm:$0xff] }
0x248f   :  { %9284 = vmatprep.subr.mxu1 %v16109_v0 }
0x2490   :  { %9285 = vmatpush3.msra.mxu1 %v16889_v58  ;;  %v16931_v58 = vld [vmem:[#allocation90_spill] sm:$0xff] }
0x2491   :  { %9286 = vmatprep.subr.mxu1 %v16109_v0 }
0x2492   :  { %9287 = vmatpush3.msra.mxu1 %v16890_v59  ;;  %v16932_v59 = vld [vmem:[#allocation91_spill] sm:$0xff] }
0x2493   :  { %9288 = vmatprep.subr.mxu1 %v16109_v0 }
0x2494   :  { %9289 = vmatpush3.msra.mxu1 %v16891_v32  ;;  %v16933_v32 = vld [vmem:[#allocation92_spill] sm:$0xff] }
0x2495   :  { %9290 = vmatprep.subr.mxu1 %v16109_v0 }
0x2496   :  { %9291 = vmatpush3.msra.mxu1 %v16892_v2  ;;  %v16934_v2 = vld [vmem:[#allocation93_spill] sm:$0xff] }
0x2497   :  { %9292 = vmatprep.subr.mxu1 %v16109_v0 }
0x2498   :  { %9293 = vmatpush3.msra.mxu1 %v16893_v26  ;;  %v16935_v26 = vld [vmem:[#allocation94_spill] sm:$0xff] }
0x2499   :  { %9294 = vmatprep.subr.mxu1 %v16109_v0 }
0x249a   :  { %9295 = vmatpush3.msra.mxu1 %v16894_v27  ;;  %v16936_v27 = vld [vmem:[#allocation95_spill] sm:$0xff] }
0x249b   :  { %9296 = vmatprep.subr.mxu1 %v16109_v0 }
0x249c   :  { %9297 = vmatpush3.msra.mxu1 %v16895_v30  ;;  %v16937_v30 = vld [vmem:[#allocation96_spill] sm:$0xff] }
0x249d   :  { %9298 = vmatprep.subr.mxu1 %v16109_v0 }
0x249e   :  { %9299 = vmatpush3.msra.mxu1 %v16896_v52  ;;  %v16938_v52 = vld [vmem:[#allocation97_spill] sm:$0xff] }
0x249f   :  { %9300 = vmatprep.subr.mxu1 %v16109_v0 }
0x24a0   :  { %9301 = vmatpush3.msra.mxu1 %v16897_v56  ;;  %v16939_v56 = vld [vmem:[#allocation98_spill] sm:$0xff] }
0x24a1   :  { %9302 = vmatprep.subr.mxu1 %v16109_v0 }
0x24a2   :  { %9303 = vmatpush3.msra.mxu1 %v16898_v29  ;;  %v16940_v29 = vld [vmem:[#allocation99_spill] sm:$0xff] }
0x24a3   :  { %9304 = vmatprep.subr.mxu1 %v16109_v0 }
0x24a4   :  { %9305 = vmatpush3.msra.mxu1 %v16899_v39  ;;  %v16941_v39 = vld [vmem:[#allocation100_spill] sm:$0xff] }
0x24a5   :  { %9306 = vmatprep.subr.mxu1 %v16109_v0 }
0x24a6   :  { %9307 = vmatpush3.msra.mxu1 %v16900_v7  ;;  %v16942_v7 = vld [vmem:[#allocation101_spill] sm:$0xff] }
0x24a7   :  { %9308 = vmatprep.subr.mxu1 %v16109_v0 }
0x24a8   :  { %9309 = vmatpush3.msra.mxu1 %v16901_v8  ;;  %v16943_v8 = vld [vmem:[#allocation102_spill] sm:$0xff] }
0x24a9   :  { %6251 = vmatprep.subr.mxu1 %v16902_v44  ;;  %v16944_v44 = vld [vmem:[#allocation103_spill] sm:$0xff] }
0x2549   :  { %v6029_v48 = vpop.f32.mrf.mxu1 }
0x254a   :  { %v6033_v16 = vmul.f32 %v6029_v48, %v5812_v3  ;;  %v16922_v3 = vld [vmem:[#allocation81_spill] sm:$0xff]  ;;  %v16945_v48 = vld [vmem:[#allocation104_spill] sm:$0xff] }
0x254b   :  { %v9242_v53 = vpop.f32.mrf.mxu1 }
0x254c   :  { %v6034_v49 = vadd.f32 %v6033_v16, %v5882_v22  ;;  %v16946_v22 = vld [vmem:[#allocation105_spill] sm:$0xff]  ;;  %v16947_v16 = vld [vmem:[#allocation106_spill] sm:$0xff]  ;;  %v16948_v53 = vld [vmem:[#allocation107_spill] sm:$0xff] }
0x254e   :  { %9276 = vmatmul.mubr.f32.vlgmr.msra.gmra.mxu0 %v6034_v49  ;;  %v16949_v49 = vld [vmem:[#allocation108_spill] sm:$0xff] }
0x254f   :  { %9314 = vmatpush3.msra.mxu0 %v14823_v62  ;;  %9345 = vmatprep.mubr.msk.f32.mxu0 %vm10383_vm0, %v16109_v0  ;;  %v16907_v62 = vld [vmem:[#allocation66_spill] sm:$0xff] }
0x2550   :  { %9315 = vmatprep.subr.mxu0 %v16109_v0 }
0x2551   :  { %9316 = vmatpush3.msra.mxu0 %v16903_v21  ;;  %v16950_v21 = vld [vmem:[#allocation109_spill] sm:$0xff] }
0x2552   :  { %9317 = vmatprep.subr.mxu0 %v16109_v0 }
0x2553   :  { %9318 = vmatpush3.msra.mxu0 %v16904_v60  ;;  %v16951_v60 = vld [vmem:[#allocation110_spill] sm:$0xff] }
0x2554   :  { %9319 = vmatprep.subr.mxu0 %v16109_v0 }
0x2555   :  { %9320 = vmatpush3.msra.mxu0 %v16905_v19  ;;  %v16952_v19 = vld [vmem:[#allocation111_spill] sm:$0xff] }
0x2556   :  { %9321 = vmatprep.subr.mxu0 %v16109_v0 }
0x2557   :  { %9322 = vmatpush3.msra.mxu0 %v16906_v24  ;;  %v16953_v24 = vld [vmem:[#allocation112_spill] sm:$0xff] }
0x2558   :  { %9323 = vmatprep.subr.mxu0 %v16109_v0 }
0x2559   :  { %9324 = vmatpush3.msra.mxu0 %v16907_v62  ;;  %v16954_v62 = vld [vmem:[#allocation113_spill] sm:$0xff] }
0x255a   :  { %9325 = vmatprep.subr.mxu0 %v16109_v0 }
0x255b   :  { %9326 = vmatpush3.msra.mxu0 %v16908_v9  ;;  %v16955_v9 = vld [vmem:[#allocation114_spill] sm:$0xff] }
0x255c   :  { %9327 = vmatprep.subr.mxu0 %v16109_v0 }
0x255d   :  { %9328 = vmatpush3.msra.mxu0 %v16909_v54  ;;  %v16956_v54 = vld [vmem:[#allocation115_spill] sm:$0xff] }
0x255e   :  { %9329 = vmatprep.subr.mxu0 %v16109_v0 }
0x255f   :  { %9330 = vmatpush3.msra.mxu0 %v16910_v25  ;;  %v16957_v25 = vld [vmem:[#allocation116_spill] sm:$0xff] }
0x2560   :  { %9331 = vmatprep.subr.mxu0 %v16109_v0 }
0x2561   :  { %9332 = vmatpush3.msra.mxu0 %v16911_v57  ;;  %v16958_v57 = vld [vmem:[#allocation117_spill] sm:$0xff] }
0x2562   :  { %9333 = vmatprep.subr.mxu0 %v16109_v0 }
0x2563   :  { %9334 = vmatpush3.msra.mxu0 %v16912_v46  ;;  %v16959_v46 = vld [vmem:[#allocation118_spill] sm:$0xff] }
0x2564   :  { %9335 = vmatprep.subr.mxu0 %v16109_v0 }
0x2565   :  { %9336 = vmatpush3.msra.mxu0 %v16913_v17  ;;  %v16960_v17 = vld [vmem:[#allocation119_spill] sm:$0xff] }
0x2566   :  { %9337 = vmatprep.subr.mxu0 %v16109_v0 }
0x2567   :  { %9338 = vmatpush3.msra.mxu0 %v16914_v47  ;;  %v16961_v47 = vld [vmem:[#allocation120_spill] sm:$0xff] }
0x2568   :  { %9339 = vmatprep.subr.mxu0 %v16109_v0 }
0x2569   :  { %9340 = vmatpush3.msra.mxu0 %v16915_v15  ;;  %v16962_v15 = vld [vmem:[#allocation121_spill] sm:$0xff] }
0x256a   :  { %9341 = vmatprep.subr.mxu0 %v16109_v0 }
0x256b   :  { %9342 = vmatpush3.msra.mxu0 %v16916_v18  ;;  %v16963_v18 = vld [vmem:[#allocation122_spill] sm:$0xff] }
0x256c   :  { %9343 = vmatprep.subr.mxu0 %v16109_v0  ;;  %v16920_v0 = vld [vmem:[#allocation79_spill] sm:$0xff] }
0x256d   :  { %9344 = vmatpush3.msra.mxu0 %v16917_v11  ;;  %v16964_v11 = vld [vmem:[#allocation123_spill] sm:$0xff] }
0x260e   :  { %v6101_v35 = vpop.f32.mrf.mxu0 }
0x260f   :  { %v6105_v6 = vadd.f32 %v6101_v35, %v15224_v40  ;;  %v16965_v35 = vld [vmem:[#allocation124_spill] sm:$0xff] }
0x2610   :  { %v9277_v12 = vpop.f32.mrf.mxu0 }
0x2611   :  { %v15436_v38 = vadd.f32 %v16918_v51, %v6105_v6  ;;  %v16966_v6 = vld [vmem:[#allocation125_spill] sm:$0xff]  ;;  %v16967_v12 = vld [vmem:[#allocation126_spill] sm:$0xff]  ;;  %v16968_v51 = vld [vmem:[#allocation127_spill] sm:$0xff] }
0x2613   :  { %9311 = vmatmul.mubr.f32.vlgmr.msra.gmra.mxu1 %v15436_v38 }
0x2614   :  { %6252 = vmatpush1.msra.mxu1 %v14900_v23  ;;  %6315 = vmatprep.mubr.f32.mxu1 %v9437_v33  ;;  %v16928_v23 = vld [vmem:[#allocation87_spill] sm:$0xff]  ;;  %v16969_v33 = vld [vmem:[#allocation130_spill] sm:$0xff] }
0x2615   :  { %6253 = vmatprep.subr.mxu1 %v16919_v36  ;;  %v16970_v36 = vld [vmem:[#allocation131_spill] sm:$0xff] }
0x2616   :  { %6254 = vmatpush1.msra.mxu1 %v16920_v0  ;;  %v16971_v0 = vld [vmem:[#allocation132_spill] sm:$0xff] }
0x2617   :  { %6255 = vmatprep.subr.mxu1 %v16921_v41  ;;  %v16972_v41 = vld [vmem:[#allocation133_spill] sm:$0xff] }
0x2618   :  { %6256 = vmatpush1.msra.mxu1 %v16922_v3  ;;  %v16973_v3 = vld [vmem:[#allocation134_spill] sm:$0xff] }
0x2619   :  { %6257 = vmatprep.subr.mxu1 %v16923_v63  ;;  %v16974_v63 = vld [vmem:[#allocation135_spill] sm:$0xff] }
0x261a   :  { %6258 = vmatpush1.msra.mxu1 %v16924_v10 }
0x261b   :  { %6259 = vmatprep.subr.mxu1 %v16925_v5 }
0x261c   :  { %6260 = vmatpush1.msra.mxu1 %v16926_v61 }
0x261d   :  { %6261 = vmatprep.subr.mxu1 %v16927_v13 }
0x261e   :  { %6262 = vmatpush1.msra.mxu1 %v16928_v23 }
0x261f   :  { %6263 = vmatprep.subr.mxu1 %v16929_v34 }
0x2620   :  { %6264 = vmatpush1.msra.mxu1 %v16930_v55 }
0x2621   :  { %6265 = vmatprep.subr.mxu1 %v16931_v58 }
0x2622   :  { %6266 = vmatpush1.msra.mxu1 %v16932_v59 }
0x2623   :  { %6267 = vmatprep.subr.mxu1 %v16933_v32 }
0x2624   :  { %6268 = vmatpush1.msra.mxu1 %v16934_v2 }
0x2625   :  { %6269 = vmatprep.subr.mxu1 %v16935_v26 }
0x2626   :  { %6270 = vmatpush1.msra.mxu1 %v16936_v27 }
0x2627   :  { %6271 = vmatprep.subr.mxu1 %v16937_v30 }
0x2628   :  { %6272 = vmatpush1.msra.mxu1 %v16938_v52 }
0x2629   :  { %6273 = vmatprep.subr.mxu1 %v16939_v56 }
0x262a   :  { %6274 = vmatpush1.msra.mxu1 %v16940_v29 }
0x262b   :  { %6275 = vmatprep.subr.mxu1 %v16941_v39 }
0x262c   :  { %6276 = vmatpush1.msra.mxu1 %v16942_v7 }
0x262d   :  { %6277 = vmatprep.subr.mxu1 %v16943_v8 }
0x262e   :  { %6278 = vmatpush1.msra.mxu1 %v16944_v44 }
0x262f   :  { %6279 = vmatprep.subr.mxu1 %v16945_v48 }
0x2630   :  { %6280 = vmatpush1.msra.mxu1 %v16946_v22 }
0x2631   :  { %6281 = vmatprep.subr.mxu1 %v16947_v16 }
0x2632   :  { %6282 = vmatpush1.msra.mxu1 %v16948_v53 }
0x2633   :  { %6283 = vmatprep.subr.mxu1 %v16949_v49 }
0x2634   :  { %6284 = vmatpush2.msra.mxu1 %v16950_v21 }
0x2635   :  { %6285 = vmatprep.subr.mxu1 %v16951_v60 }
0x2636   :  { %6286 = vmatpush2.msra.mxu1 %v16952_v19 }
0x2637   :  { %6287 = vmatprep.subr.mxu1 %v16953_v24 }
0x2638   :  { %6288 = vmatpush2.msra.mxu1 %v16954_v62 }
0x2639   :  { %6289 = vmatprep.subr.mxu1 %v16955_v9 }
0x263a   :  { %6290 = vmatpush2.msra.mxu1 %v16956_v54 }
0x263b   :  { %6291 = vmatprep.subr.mxu1 %v16957_v25 }
0x263c   :  { %6292 = vmatpush2.msra.mxu1 %v16958_v57 }
0x263d   :  { %6293 = vmatprep.subr.mxu1 %v16959_v46 }
0x263e   :  { %6294 = vmatpush2.msra.mxu1 %v16960_v17 }
0x263f   :  { %6295 = vmatprep.subr.mxu1 %v16961_v47 }
0x2640   :  { %6296 = vmatpush2.msra.mxu1 %v16962_v15 }
0x2641   :  { %6297 = vmatprep.subr.mxu1 %v16963_v18 }
0x2642   :  { %6298 = vmatpush2.msra.mxu1 %v16964_v11 }
0x2643   :  { %6299 = vmatprep.subr.mxu1 %v16965_v35 }
0x2644   :  { %6300 = vmatpush2.msra.mxu1 %v16966_v6 }
0x2645   :  { %6301 = vmatprep.subr.mxu1 %v16967_v12 }
0x2646   :  { %6302 = vmatpush2.msra.mxu1 %v16968_v51 }
0x2647   :  { %6303 = vmatprep.subr.mxu1 %v16969_v33 }
0x2648   :  { %6304 = vmatpush2.msra.mxu1 %v16970_v36 }
0x2649   :  { %6305 = vmatprep.subr.mxu1 %v16971_v0 }
0x264a   :  { %6306 = vmatpush2.msra.mxu1 %v16972_v41 }
0x264b   :  { %6307 = vmatprep.subr.mxu1 %v16973_v3 }
0x264c   :  { %6308 = vmatpush2.msra.mxu1 %v16974_v63 }
0x264d   :  { %6309 = vmatprep.subr.mxu1 %v15071_v31 }
0x264e   :  { %6310 = vmatpush2.msra.mxu1 %v15074_v20 }
0x264f   :  { %6311 = vmatprep.subr.mxu1 %v15077_v4 }
0x2650   :  { %6312 = vmatpush2.msra.mxu1 %v15080_v45 }
0x2651   :  { %6313 = vmatprep.subr.mxu1 %v15083_v14 }
0x2652   :  { %6314 = vmatpush2.msra.mxu1 %v15086_v43 }
0x2653   :  { %6316 = vmatmul.mubr.f32.vlgmr.msra.gmra.mxu1 %v15236_v42 }
0x26d3   :  { %v6173_v10 = vpop.f32.mrf.mxu1 }
0x26d4   :  { %v6174_v5 = vadd.f32 %v15127_v28, %v6173_v10 }
0x26d5   :  { %v9312_v61 = vpop.f32.mrf.mxu1 }
0x26d6   :  { %v6177_v13 = vmax.f32 %v6174_v5, 0.0 }
0x26d8   :  { %9346 = vmatmul.mubr.f32.vlgmr.msra.gmra.mxu0 %v6177_v13 }
0x2713   :  { %v6317_v23 = vpop.f32.mrf.mxu1 }
0x2714   :  { %v6318_v4 = vadd.f32 %v6317_v23, %v16774_v1 }
0x2715   :  { %v6319_v31 = vpop.f32.mrf.mxu1 }
0x2716   :  { %v6320_v20 = vadd.f32 %v6319_v31, %v16887_v37  ;;  %v6322_v45 = vmul.f32 0.5, %v6318_v4 }
0x2718   :  { %v6328_v34 = vmul.f32 0.5, %v6320_v20 }
0x271a   :  { %9438 = vtanh.f32 %v6328_v34 }
0x271b   :  { %9440 = vtanh.f32 %v6322_v45 }
0x2727   :  { %v9439_v58 = vpop.eup %9438 }
0x2728   :  { %v9441_v59 = vpop.eup %9440  ;;  %v6330_v32 = vadd.f32 1.0, %v9439_v58 }
0x2729   :  { %v6324_v2 = vadd.f32 1.0, %v9441_v59 }
0x272a   :  { %v6331_v26 = vmul.f32 0.5, %v6330_v32 }
0x272b   :  { %v6325_v37 = vmul.f32 0.5, %v6324_v2 }
0x272c   :  { %v6332_v1 = vmul.f32 %v6331_v26, %v15224_v40 }
0x2798   :  { %v6244_v14 = vpop.f32.mrf.mxu0 }
0x2799   :  { %v6245_v43 = vadd.f32 %v15219_v50, %v6244_v14 }
0x279a   :  { %v9347_v42 = vpop.f32.mrf.mxu0 }
0x279b   :  { %v6248_v55 = vmax.f32 %v6245_v43, 0.0 }
0x279d   :  { %v6249_v28 = vadd.f32 %v6248_v55, %v15436_v38 }
0x279f   :  { %9442 = vtanh.f32 %v6249_v28 }
0x27ac   :  { %v9443_v27 = vpop.eup %9442 }
0x27ad   :  { %v6327_v30 = vmul.f32 %v9443_v27, %v6325_v37 }
0x27af   :  { %v6333_v52 = vadd.f32 %v6332_v1, %v6327_v30 }
0x27b1   :  { %6335 = vst [vmem:[#allocation18 + $0x38] sm:$0xff] %v6333_v52 }
0x27b2   :  { %10348 = shalt.err (!%p10345_p7)
}
0x27b3   :  { %6348 = dma.vmem_to_hbm [thread:$0]  %s6343_s17, 1024, %s15534_s19, [#allocation5], %s10375_s1, %s10375_s1, %s10376_s22  }
0x27b4   :  { %10367 = dma.done.wait [#allocation5], 1024  }
0x27b5   :  { %10368 = vsyncadd [#allocation5], 4294966272 }
0x27b6   :  { %6352 = vsyncpa [#allocation4], 1 }
0x27b7   :  { %6353 = vsyncpa [#allocation7], 1 }
0x27b8   :  { %6354 = vsyncpa [#allocation10], 1 }
0x27b9   :  { %6355 = vsyncpa [#allocation13], 1 }
0x27ba   :  { %6356 = vsyncpa [#allocation16], 1 }
0x27bb   :  { %6357 = vsyncpa [#allocation5], 1 }

</bundles_post_ra>
